<compile_context>
chip_gen: v5e
topology: v5e:2x2
jax: 0.10.0
libtpu: 0.0.40
codegen_flags: <defaults>
</compile_context>

<pallas_src>
import numpy as np
import jax
import jax.numpy as jnp
from jax import lax
from jax.experimental import pallas as pl
from jax.experimental.pallas import tpu as pltpu

_K = 7        # depthwise kernel size
_PH = 3       # conv padding, H axis
_PW = 3       # conv padding, W axis
_LPAD = 8     # left halo of the padded slab (sublane-aligned interior start)
_EPS = 1e-6


def _erf(x):
    # Abramowitz & Stegun 7.1.26 polynomial erf (|err| <= 1.5e-7); only ops that
    # lower cleanly in Mosaic (exp / mul / add / where).
    a1, a2, a3, a4, a5 = (0.254829592, -0.284496736, 1.421413741,
                          -1.453152027, 1.061405429)
    p = 0.3275911
    ax = jnp.abs(x)
    t = 1.0 / (1.0 + p * ax)
    poly = ((((a5 * t + a4) * t + a3) * t + a2) * t + a1) * t
    y = 1.0 - poly * jnp.exp(-ax * ax)
    return jnp.where(x >= 0.0, y, -y)


def _gelu_exact(x):
    return 0.5 * x * (1.0 + _erf(x * 0.7071067811865476))


def _right_pad(W):
    # right halo >= 3, chosen so the padded width is a multiple of 8
    return _PW + ((8 - ((W + _PW) % 8)) % 8)


def _pick_block_b(N, H, Wp, C, slab_budget=8 << 20):
    """Largest divisor of N that keeps grid >= 2 and a modest pad-slab footprint."""
    best = 1
    for b in range(1, N + 1):
        if N % b:
            continue
        if N >= 2 and N // b < 2:      # never collapse the grid to one step
            continue
        if b * (H + 2 * _PH) * Wp * C * 4 > slab_budget:
            continue
        best = b
    return best


def _pick_chunk_h(B, H, W, C, min_rows=128, vreg_budget=48):
    """Row-chunk height: divisor of H; dw-conv working set (acc + 7-row strip)
    bounded by a vreg budget; >=128 matmul rows per chunk when possible."""
    wt = (-(-W // 8)) * (-(-C // 128))     # vregs per activation row
    best = 1
    for d in range(1, H + 1):
        if H % d:
            continue
        if B * (2 * d + 2 * _PH) * wt <= vreg_budget:
            best = d
            if B * d * W >= min_rows:
                break
    return best


def _vmem_limit_bytes(B, H, W, Wp, Cin, C, C4):
    blocks = 2 * (B * H * W * Cin * 2 + B * H * W * C * 4)   # double-buffered I/O
    slab = B * (H + 2 * _PH) * Wp * C * 4
    weights = 2 * ((Cin * C + C * C4 + C4 * C) * 2
                   + (_K * _K * C + 6 * C + C4) * 4)
    est = blocks + slab + weights + (4 << 20)                # temp/spill headroom
    # floor >= every generation's conservative default, ceiling <= v7x physical
    return int(min(64 << 20, max(32 << 20, est)))


def _make_kernel(B, H, W, Wp, Cin, C, C4, RH):
    rows = B * H * W
    f32, bf16 = jnp.float32, jnp.bfloat16
    nchunks = H // RH
    crows = B * RH * W

    def kernel(x_ref, wi_ref, bi_ref, w7_ref, b7_ref, lnw_ref, lnb_ref,
               w1_ref, b1_ref, w2_ref, b2_ref, gamma_ref, out_ref, pad_ref):
        # ---- halo zeroing: only the strips the conv reads (interior is fully
        #      overwritten below); left strip is a full aligned 8-wide store. ----
        pad_ref[:, 0:_PH, :, :] = jnp.zeros((B, _PH, Wp, C), f32)
        pad_ref[:, _PH + H:, :, :] = jnp.zeros((B, _PH, Wp, C), f32)
        pad_ref[:, _PH:_PH + H, 0:_LPAD, :] = jnp.zeros((B, H, _LPAD, C), f32)
        pad_ref[:, _PH:_PH + H, _LPAD + W:, :] = (
            jnp.zeros((B, H, Wp - _LPAD - W, C), f32))

        # ---- 1x1 input conv: (B*H*W, Cin) @ (Cin, C), bf16 MXU, f32 accumulate --
        # TODO(synk): for tiny Cin (<=8) this could be Cin VPU broadcast-FMAs
        # instead of a K=Cin MXU dot; kept as a dot for robust lowering.
        x2 = x_ref[...].reshape(rows, Cin)              # free when W % 8 == 0
        up = jnp.dot(x2, wi_ref[...],
                     preferred_element_type=f32) + bi_ref[...]
        # interior starts at sublane-aligned column _LPAD = 8 -> unmasked stores
        pad_ref[:, _PH:_PH + H, _LPAD:_LPAD + W, :] = up.reshape(B, H, W, C)

        # small per-channel params hoisted out of the chunk loop (a few vregs)
        lnw = lnw_ref[...]
        lnb = lnb_ref[...]
        b1 = b1_ref[...]
        b2 = b2_ref[...]
        gamma = gamma_ref[...]
        b7b = b7_ref[...].reshape(1, 1, 1, C)

        def chunk_body(ci, carry):
            h0 = ci * RH
            # -- depthwise 7x7 for output rows [h0, h0+RH): all 49 taps accumulate
            #    in a vreg-resident chunk accumulator (no acc VMEM round-trips).
            acc = jnp.zeros((B, RH, W, C), f32) + b7b
            for kw in range(_K):
                # one sliced strip load per kw; kh then indexes an untiled major
                # axis of the loaded value (pure vreg selection).
                col = pad_ref[:, pl.ds(h0, RH + 2 * _PH),
                              pl.ds(_LPAD - _PW + kw, W), :]   # (B, RH+6, W, C)
                for kh in range(_K):
                    k = kh * _K + kw
                    tap = w7_ref[k:k + 1, :].reshape(1, 1, 1, C)
                    acc = acc + col[:, kh:kh + RH, :, :] * tap

            # -- LayerNorm over channels (one pass; var clamped at 0) -------------
            v = acc.reshape(crows, C)                    # free when W % 8 == 0
            s1 = jnp.sum(v, axis=-1, keepdims=True)
            s2 = jnp.sum(v * v, axis=-1, keepdims=True)
            mean = s1 * (1.0 / C)
            var = jnp.maximum(s2 * (1.0 / C) - mean * mean, 0.0)
            y = (v - mean) * lax.rsqrt(var + _EPS) * lnw + lnb

            # -- pwconv1 -> exact GELU -> pwconv2 -> layer scale (chunked MLP) ----
            z = jnp.dot(y.astype(bf16), w1_ref[...],
                        preferred_element_type=f32) + b1
            g = _gelu_exact(z)
            z2 = jnp.dot(g.astype(bf16), w2_ref[...],
                         preferred_element_type=f32) + b2
            z2 = z2 * gamma

            # -- residual: re-read `up` from the aligned slab interior, store chunk.
            # TODO(synk): training-mode stochastic drop_path (per-sample Bernoulli /
            # keep_prob scaling) is not implemented; eval mode is identity.
            upc = pad_ref[:, pl.ds(_PH + h0, RH),
                          _LPAD:_LPAD + W, :].reshape(crows, C)
            out_ref[:, pl.ds(h0, RH), :, :] = (
                (upc + z2).reshape(B, RH, W, C).astype(out_ref.dtype))
            return carry

        if nchunks == 1:
            chunk_body(0, 0)
        else:
            lax.fori_loop(0, nchunks, chunk_body, 0)

    return kernel


def block_forward(x_nchw, params):
    N, Cin, H, W = map(int, x_nchw.shape)
    C = int(params['wi'].shape[0])
    C4 = int(params['w1'].shape[0])
    Wp = _LPAD + W + _right_pad(W)
    B = _pick_block_b(N, H, Wp, C)
    RH = _pick_chunk_h(B, H, W, C)

    bf16, f32 = jnp.bfloat16, jnp.float32

    # -------- plain-JAX glue: re-layout parameters (tiny, one-off) --------
    wi = jnp.transpose(params['wi'][:, :, 0, 0]).astype(bf16)            # (Cin, C)
    bi = params['bi'].reshape(1, C).astype(f32)
    w7 = jnp.transpose(params['w7'][:, 0], (1, 2, 0)).reshape(_K * _K, C).astype(f32)
    b7 = params['b7'].reshape(1, C).astype(f32)
    lnw = params['lnw'].reshape(1, C).astype(f32)
    lnb = params['lnb'].reshape(1, C).astype(f32)
    w1 = jnp.transpose(params['w1']).astype(bf16)                        # (C, 4C)
    b1 = params['b1'].reshape(1, C4).astype(f32)
    w2 = jnp.transpose(params['w2']).astype(bf16)                        # (4C, C)
    b2 = params['b2'].reshape(1, C).astype(f32)
    gamma = params['gamma'].reshape(1, C).astype(f32)

    x_nhwc = jnp.transpose(x_nchw, (0, 2, 3, 1)).astype(bf16)            # (N, H, W, Cin)

    kernel = _make_kernel(B, H, W, Wp, Cin, C, C4, RH)

    out_nhwc = pl.pallas_call(
        kernel,
        out_shape=jax.ShapeDtypeStruct((N, H, W, C), f32),
        grid_spec=pltpu.PrefetchScalarGridSpec(
            num_scalar_prefetch=0,
            grid=(N // B,),
            in_specs=[
                pl.BlockSpec((B, H, W, Cin), lambda n: (n, 0, 0, 0)),    # x (bf16)
                pl.BlockSpec((Cin, C), lambda n: (0, 0)),                # 1x1 conv W
                pl.BlockSpec((1, C), lambda n: (0, 0)),                  # 1x1 conv b
                pl.BlockSpec((_K * _K, C), lambda n: (0, 0)),            # dw 7x7 taps
                pl.BlockSpec((1, C), lambda n: (0, 0)),                  # dw 7x7 b
                pl.BlockSpec((1, C), lambda n: (0, 0)),                  # LN weight
                pl.BlockSpec((1, C), lambda n: (0, 0)),                  # LN bias
                pl.BlockSpec((C, C4), lambda n: (0, 0)),                 # pwconv1 W
                pl.BlockSpec((1, C4), lambda n: (0, 0)),                 # pwconv1 b
                pl.BlockSpec((C4, C), lambda n: (0, 0)),                 # pwconv2 W
                pl.BlockSpec((1, C), lambda n: (0, 0)),                  # pwconv2 b
                pl.BlockSpec((1, C), lambda n: (0, 0)),                  # gamma
            ],
            out_specs=pl.BlockSpec((B, H, W, C), lambda n: (n, 0, 0, 0)),
            scratch_shapes=[pltpu.VMEM((B, H + 2 * _PH, Wp, C), f32)],
        ),
        compiler_params=pltpu.CompilerParams(
            dimension_semantics=("parallel",),            # batch blocks independent
            vmem_limit_bytes=_vmem_limit_bytes(B, H, W, Wp, Cin, C, C4)),
    )(x_nhwc, wi, bi, w7, b7, lnw, lnb, w1, b1, w2, b2, gamma)

    # back to NCHW (PyTorch convention)
    return jnp.transpose(out_nhwc, (0, 3, 1, 2))


def block_reference(x_nchw, params):
    """Pure-JAX reference for the PyTorch Block forward (eval mode).

    Matmul operands are cast to bf16 with f32 accumulation, mirroring the
    kernel's TPU-native MXU precision; everything else (depthwise conv,
    LayerNorm, GELU, residual) is f32.
    """
    f32, bf16 = jnp.float32, jnp.bfloat16
    C = params['wi'].shape[0]
    x = jnp.transpose(x_nchw, (0, 2, 3, 1)).astype(bf16)                 # NHWC
    wi = params['wi'][:, :, 0, 0]                                        # (C, Cin)
    up = jnp.einsum('nhwi,oi->nhwo', x, wi.astype(bf16),
                    preferred_element_type=f32) + params['bi']
    dw = lax.conv_general_dilated(
        jnp.transpose(up, (0, 3, 1, 2)), params['w7'], (1, 1), ((3, 3), (3, 3)),
        dimension_numbers=('NCHW', 'OIHW', 'NCHW'), feature_group_count=C,
        precision=lax.Precision.HIGHEST)
    dw = jnp.transpose(dw, (0, 2, 3, 1)) + params['b7']
    mean = jnp.mean(dw, axis=-1, keepdims=True)
    var = jnp.mean((dw - mean) ** 2, axis=-1, keepdims=True)
    y = (dw - mean) / jnp.sqrt(var + 1e-6) * params['lnw'] + params['lnb']
    z = jnp.einsum('nhwc,kc->nhwk', y.astype(bf16), params['w1'].astype(bf16),
                   preferred_element_type=f32) + params['b1']
    g = 0.5 * z * (1.0 + jax.scipy.special.erf(z * 0.7071067811865476))
    z2 = jnp.einsum('nhwk,ck->nhwc', g.astype(bf16), params['w2'].astype(bf16),
                    preferred_element_type=f32) + params['b2']
    z2 = z2 * params['gamma']
    return jnp.transpose(up + z2, (0, 3, 1, 2))   # eval-mode drop_path == identity


if __name__ == "__main__":
    key = jax.random.PRNGKey(0)
    N, Cin, C, size = 2, 4, 8, 16
    C4 = 4 * C
    ks = jax.random.split(key, 12)
    x = jax.random.normal(ks[0], (N, Cin, size, size), jnp.float32)
    params = dict(
        wi=0.3 * jax.random.normal(ks[1], (C, Cin, 1, 1), jnp.float32),   # input 1x1
        bi=0.1 * jax.random.normal(ks[2], (C,), jnp.float32),
        w7=0.1 * jax.random.normal(ks[3], (C, 1, 7, 7), jnp.float32),     # depthwise
        b7=0.1 * jax.random.normal(ks[4], (C,), jnp.float32),
        lnw=1.0 + 0.1 * jax.random.normal(ks[5], (C,), jnp.float32),      # LN (dim,)
        lnb=0.1 * jax.random.normal(ks[6], (C,), jnp.float32),
        w1=0.3 * jax.random.normal(ks[7], (C4, C), jnp.float32),          # pwconv1
        b1=0.1 * jax.random.normal(ks[8], (C4,), jnp.float32),
        w2=0.2 * jax.random.normal(ks[9], (C, C4), jnp.float32),          # pwconv2
        b2=0.1 * jax.random.normal(ks[10], (C,), jnp.float32),
        gamma=0.3 * jax.random.normal(ks[11], (C,), jnp.float32),         # layer scale
    )

    out = jax.block_until_ready(block_forward(x, params))
    ref = jax.block_until_ready(block_reference(x, params))

    # Kernel and reference share the same bf16 matmul operands / f32 accumulation,
    # so remaining differences are f32 summation order plus rare bf16 rounding
    # flips on near-boundary values; 5e-3 gives comfortable margin.
    np.testing.assert_allclose(np.asarray(out), np.asarray(ref), rtol=5e-3, atol=5e-3)
    print("KERNEL_OK")
</pallas_src>

<mosaic_0001>
module attributes {stable_mosaic.version = 11 : i64} {
  func.func @kernel(%arg0: i32, %arg1: memref<1x16x16x4xbf16, #tpu.memory_space<vmem>>, %arg2: memref<4x8xbf16, #tpu.memory_space<vmem>>, %arg3: memref<1x8xf32, #tpu.memory_space<vmem>>, %arg4: memref<49x8xf32, #tpu.memory_space<vmem>>, %arg5: memref<1x8xf32, #tpu.memory_space<vmem>>, %arg6: memref<1x8xf32, #tpu.memory_space<vmem>>, %arg7: memref<1x8xf32, #tpu.memory_space<vmem>>, %arg8: memref<8x32xbf16, #tpu.memory_space<vmem>>, %arg9: memref<1x32xf32, #tpu.memory_space<vmem>>, %arg10: memref<32x8xbf16, #tpu.memory_space<vmem>>, %arg11: memref<1x8xf32, #tpu.memory_space<vmem>>, %arg12: memref<1x8xf32, #tpu.memory_space<vmem>>, %arg13: memref<1x16x16x8xf32, #tpu.memory_space<vmem>>, %arg14: memref<1x22x32x8xf32, #tpu.memory_space<vmem>>) attributes {dimension_semantics = [#tpu.dimension_semantics<parallel>], iteration_bounds = array<i64: 2>, scalar_prefetch = 0 : i64, scratch_operands = 1 : i64, tpu.core_type = #tpu.core_type<tc>, window_params = [{transform_indices = @transform_0, window_bounds = array<i64: 1, 16, 16, 4>}, {pipeline_mode = #tpu.pipeline_mode<synchronous>, transform_indices = @transform_1, window_bounds = array<i64: 4, 8>}, {pipeline_mode = #tpu.pipeline_mode<synchronous>, transform_indices = @transform_2, window_bounds = array<i64: 1, 8>}, {pipeline_mode = #tpu.pipeline_mode<synchronous>, transform_indices = @transform_3, window_bounds = array<i64: 49, 8>}, {pipeline_mode = #tpu.pipeline_mode<synchronous>, transform_indices = @transform_4, window_bounds = array<i64: 1, 8>}, {pipeline_mode = #tpu.pipeline_mode<synchronous>, transform_indices = @transform_5, window_bounds = array<i64: 1, 8>}, {pipeline_mode = #tpu.pipeline_mode<synchronous>, transform_indices = @transform_6, window_bounds = array<i64: 1, 8>}, {pipeline_mode = #tpu.pipeline_mode<synchronous>, transform_indices = @transform_7, window_bounds = array<i64: 8, 32>}, {pipeline_mode = #tpu.pipeline_mode<synchronous>, transform_indices = @transform_8, window_bounds = array<i64: 1, 32>}, {pipeline_mode = #tpu.pipeline_mode<synchronous>, transform_indices = @transform_9, window_bounds = array<i64: 32, 8>}, {pipeline_mode = #tpu.pipeline_mode<synchronous>, transform_indices = @transform_10, window_bounds = array<i64: 1, 8>}, {pipeline_mode = #tpu.pipeline_mode<synchronous>, transform_indices = @transform_11, window_bounds = array<i64: 1, 8>}, {transform_indices = @transform_12, window_bounds = array<i64: 1, 16, 16, 8>}]} {
    %cst = arith.constant 0.000000e+00 : f32
    %0 = vector.broadcast %cst : f32 to vector<1x3x32x8xf32>
    %c0 = arith.constant 0 : index
    %c0_0 = arith.constant 0 : index
    %c0_1 = arith.constant 0 : index
    %c0_2 = arith.constant 0 : index
    %1 = vector.load %arg14[%c0, %c0_0, %c0_1, %c0_2] : memref<1x22x32x8xf32, #tpu.memory_space<vmem>>, vector<1x3x32x8xf32>
    tpu.vector_store %arg14[%c0, %c0_0, %c0_1, %c0_2], %0 {strides = array<i32>} : memref<1x22x32x8xf32, #tpu.memory_space<vmem>>, vector<1x3x32x8xf32>,
    %cst_3 = arith.constant 0.000000e+00 : f32
    %2 = vector.broadcast %cst_3 : f32 to vector<1x3x32x8xf32>
    %c0_4 = arith.constant 0 : index
    %c19 = arith.constant 19 : index
    %c0_5 = arith.constant 0 : index
    %c0_6 = arith.constant 0 : index
    %3 = vector.load %arg14[%c0_4, %c19, %c0_5, %c0_6] : memref<1x22x32x8xf32, #tpu.memory_space<vmem>>, vector<1x3x32x8xf32>
    tpu.vector_store %arg14[%c0_4, %c19, %c0_5, %c0_6], %2 {strides = array<i32>} : memref<1x22x32x8xf32, #tpu.memory_space<vmem>>, vector<1x3x32x8xf32>,
    %cst_7 = arith.constant 0.000000e+00 : f32
    %4 = vector.broadcast %cst_7 : f32 to vector<1x16x8x8xf32>
    %c0_8 = arith.constant 0 : index
    %c3 = arith.constant 3 : index
    %c0_9 = arith.constant 0 : index
    %c0_10 = arith.constant 0 : index
    %5 = vector.load %arg14[%c0_8, %c3, %c0_9, %c0_10] : memref<1x22x32x8xf32, #tpu.memory_space<vmem>>, vector<1x16x8x8xf32>
    tpu.vector_store %arg14[%c0_8, %c3, %c0_9, %c0_10], %4 {strides = array<i32>} : memref<1x22x32x8xf32, #tpu.memory_space<vmem>>, vector<1x16x8x8xf32>,
    %cst_11 = arith.constant 0.000000e+00 : f32
    %6 = vector.broadcast %cst_11 : f32 to vector<1x16x8x8xf32>
    %c0_12 = arith.constant 0 : index
    %c3_13 = arith.constant 3 : index
    %c24 = arith.constant 24 : index
    %c0_14 = arith.constant 0 : index
    %7 = vector.load %arg14[%c0_12, %c3_13, %c24, %c0_14] : memref<1x22x32x8xf32, #tpu.memory_space<vmem>>, vector<1x16x8x8xf32>
    tpu.vector_store %arg14[%c0_12, %c3_13, %c24, %c0_14], %6 {strides = array<i32>} : memref<1x22x32x8xf32, #tpu.memory_space<vmem>>, vector<1x16x8x8xf32>,
    %c0_15 = arith.constant 0 : index
    %c0_16 = arith.constant 0 : index
    %c0_17 = arith.constant 0 : index
    %c0_18 = arith.constant 0 : index
    %8 = vector.load %arg1[%c0_15, %c0_16, %c0_17, %c0_18] : memref<1x16x16x4xbf16, #tpu.memory_space<vmem>>, vector<1x16x16x4xbf16>
    %9 = vector.shape_cast %8 : vector<1x16x16x4xbf16> to vector<256x4xbf16>
    %c0_19 = arith.constant 0 : index
    %c0_20 = arith.constant 0 : index
    %10 = vector.load %arg2[%c0_19, %c0_20] : memref<4x8xbf16, #tpu.memory_space<vmem>>, vector<4x8xbf16>
    %cst_21 = arith.constant dense<0.000000e+00> : vector<256x8xf32>
    %11 = tpu.matmul %9, %10, %cst_21 {dimension_numbers = #tpu.dot_dimension_numbers<[1], [0], [0], [1], [0, 0, 1, 1], [], []>} : vector<256x4xbf16>, vector<4x8xbf16>, vector<256x8xf32> -> vector<256x8xf32>
    %c0_22 = arith.constant 0 : index
    %c0_23 = arith.constant 0 : index
    %12 = vector.load %arg3[%c0_22, %c0_23] : memref<1x8xf32, #tpu.memory_space<vmem>>, vector<1x8xf32>
    %13 = vector.broadcast %12 : vector<1x8xf32> to vector<256x8xf32>
    %14 = arith.addf %11, %13 : vector<256x8xf32>
    %15 = vector.shape_cast %14 : vector<256x8xf32> to vector<1x16x16x8xf32>
    %c0_24 = arith.constant 0 : index
    %c3_25 = arith.constant 3 : index
    %c8 = arith.constant 8 : index
    %c0_26 = arith.constant 0 : index
    %16 = vector.load %arg14[%c0_24, %c3_25, %c8, %c0_26] : memref<1x22x32x8xf32, #tpu.memory_space<vmem>>, vector<1x16x16x8xf32>
    tpu.vector_store %arg14[%c0_24, %c3_25, %c8, %c0_26], %15 {strides = array<i32>} : memref<1x22x32x8xf32, #tpu.memory_space<vmem>>, vector<1x16x16x8xf32>,
    %c0_27 = arith.constant 0 : index
    %c0_28 = arith.constant 0 : index
    %17 = vector.load %arg6[%c0_27, %c0_28] : memref<1x8xf32, #tpu.memory_space<vmem>>, vector<1x8xf32>
    %c0_29 = arith.constant 0 : index
    %c0_30 = arith.constant 0 : index
    %18 = vector.load %arg7[%c0_29, %c0_30] : memref<1x8xf32, #tpu.memory_space<vmem>>, vector<1x8xf32>
    %c0_31 = arith.constant 0 : index
    %c0_32 = arith.constant 0 : index
    %19 = vector.load %arg9[%c0_31, %c0_32] : memref<1x32xf32, #tpu.memory_space<vmem>>, vector<1x32xf32>
    %c0_33 = arith.constant 0 : index
    %c0_34 = arith.constant 0 : index
    %20 = vector.load %arg11[%c0_33, %c0_34] : memref<1x8xf32, #tpu.memory_space<vmem>>, vector<1x8xf32>
    %c0_35 = arith.constant 0 : index
    %c0_36 = arith.constant 0 : index
    %21 = vector.load %arg12[%c0_35, %c0_36] : memref<1x8xf32, #tpu.memory_space<vmem>>, vector<1x8xf32>
    %c0_37 = arith.constant 0 : index
    %c0_38 = arith.constant 0 : index
    %22 = vector.load %arg5[%c0_37, %c0_38] : memref<1x8xf32, #tpu.memory_space<vmem>>, vector<1x8xf32>
    %23 = vector.shape_cast %22 : vector<1x8xf32> to vector<1x1x1x8xf32>
    %c0_i32 = arith.constant 0 : i32
    %c2_i32 = arith.constant 2 : i32
    %24 = arith.addi %c0_i32, %c2_i32 : i32
    %c1_i32 = arith.constant 1 : i32
    scf.for %arg15 = %c0_i32 to %24 step %c1_i32  : i32 {
      %c8_i32 = arith.constant 8 : i32
      %25 = arith.muli %arg15, %c8_i32 : i32
      %cst_40 = arith.constant 0.000000e+00 : f32
      %26 = vector.broadcast %cst_40 : f32 to vector<1x8x16x8xf32>
      %27 = vector.broadcast %23 : vector<1x1x1x8xf32> to vector<1x8x16x8xf32>
      %28 = arith.addf %26, %27 : vector<1x8x16x8xf32>
      %c0_41 = arith.constant 0 : index
      %29 = arith.index_cast %25 : i32 to index
      %c5 = arith.constant 5 : index
      %c0_42 = arith.constant 0 : index
      %30 = vector.load %arg14[%c0_41, %29, %c5, %c0_42] : memref<1x22x32x8xf32, #tpu.memory_space<vmem>>, vector<1x14x16x8xf32>
      %c0_43 = arith.constant 0 : index
      %c0_44 = arith.constant 0 : index
      %31 = vector.load %arg4[%c0_43, %c0_44] : memref<49x8xf32, #tpu.memory_space<vmem>>, vector<1x8xf32>
      %32 = vector.shape_cast %31 : vector<1x8xf32> to vector<1x1x1x8xf32>
      %33 = vector.extract_strided_slice %30 {offsets = [0, 0, 0, 0], sizes = [1, 8, 16, 8], strides = [1, 1, 1, 1]} : vector<1x14x16x8xf32> to vector<1x8x16x8xf32>
      %34 = vector.broadcast %32 : vector<1x1x1x8xf32> to vector<1x8x16x8xf32>
      %35 = arith.mulf %33, %34 : vector<1x8x16x8xf32>
      %36 = arith.addf %28, %35 : vector<1x8x16x8xf32>
      %c7 = arith.constant 7 : index
      %c0_45 = arith.constant 0 : index
      %37 = vector.load %arg4[%c7, %c0_45] : memref<49x8xf32, #tpu.memory_space<vmem>>, vector<1x8xf32>
      %38 = vector.shape_cast %37 : vector<1x8xf32> to vector<1x1x1x8xf32>
      %39 = vector.extract_strided_slice %30 {offsets = [0, 1, 0, 0], sizes = [1, 8, 16, 8], strides = [1, 1, 1, 1]} : vector<1x14x16x8xf32> to vector<1x8x16x8xf32>
      %40 = vector.broadcast %38 : vector<1x1x1x8xf32> to vector<1x8x16x8xf32>
      %41 = arith.mulf %39, %40 : vector<1x8x16x8xf32>
      %42 = arith.addf %36, %41 : vector<1x8x16x8xf32>
      %c14 = arith.constant 14 : index
      %c0_46 = arith.constant 0 : index
      %43 = vector.load %arg4[%c14, %c0_46] : memref<49x8xf32, #tpu.memory_space<vmem>>, vector<1x8xf32>
      %44 = vector.shape_cast %43 : vector<1x8xf32> to vector<1x1x1x8xf32>
      %45 = vector.extract_strided_slice %30 {offsets = [0, 2, 0, 0], sizes = [1, 8, 16, 8], strides = [1, 1, 1, 1]} : vector<1x14x16x8xf32> to vector<1x8x16x8xf32>
      %46 = vector.broadcast %44 : vector<1x1x1x8xf32> to vector<1x8x16x8xf32>
      %47 = arith.mulf %45, %46 : vector<1x8x16x8xf32>
      %48 = arith.addf %42, %47 : vector<1x8x16x8xf32>
      %c21 = arith.constant 21 : index
      %c0_47 = arith.constant 0 : index
      %49 = vector.load %arg4[%c21, %c0_47] : memref<49x8xf32, #tpu.memory_space<vmem>>, vector<1x8xf32>
      %50 = vector.shape_cast %49 : vector<1x8xf32> to vector<1x1x1x8xf32>
      %51 = vector.extract_strided_slice %30 {offsets = [0, 3, 0, 0], sizes = [1, 8, 16, 8], strides = [1, 1, 1, 1]} : vector<1x14x16x8xf32> to vector<1x8x16x8xf32>
      %52 = vector.broadcast %50 : vector<1x1x1x8xf32> to vector<1x8x16x8xf32>
      %53 = arith.mulf %51, %52 : vector<1x8x16x8xf32>
      %54 = arith.addf %48, %53 : vector<1x8x16x8xf32>
      %c28 = arith.constant 28 : index
      %c0_48 = arith.constant 0 : index
      %55 = vector.load %arg4[%c28, %c0_48] : memref<49x8xf32, #tpu.memory_space<vmem>>, vector<1x8xf32>
      %56 = vector.shape_cast %55 : vector<1x8xf32> to vector<1x1x1x8xf32>
      %57 = vector.extract_strided_slice %30 {offsets = [0, 4, 0, 0], sizes = [1, 8, 16, 8], strides = [1, 1, 1, 1]} : vector<1x14x16x8xf32> to vector<1x8x16x8xf32>
      %58 = vector.broadcast %56 : vector<1x1x1x8xf32> to vector<1x8x16x8xf32>
      %59 = arith.mulf %57, %58 : vector<1x8x16x8xf32>
      %60 = arith.addf %54, %59 : vector<1x8x16x8xf32>
      %c35 = arith.constant 35 : index
      %c0_49 = arith.constant 0 : index
      %61 = vector.load %arg4[%c35, %c0_49] : memref<49x8xf32, #tpu.memory_space<vmem>>, vector<1x8xf32>
      %62 = vector.shape_cast %61 : vector<1x8xf32> to vector<1x1x1x8xf32>
      %63 = vector.extract_strided_slice %30 {offsets = [0, 5, 0, 0], sizes = [1, 8, 16, 8], strides = [1, 1, 1, 1]} : vector<1x14x16x8xf32> to vector<1x8x16x8xf32>
      %64 = vector.broadcast %62 : vector<1x1x1x8xf32> to vector<1x8x16x8xf32>
      %65 = arith.mulf %63, %64 : vector<1x8x16x8xf32>
      %66 = arith.addf %60, %65 : vector<1x8x16x8xf32>
      %c42 = arith.constant 42 : index
      %c0_50 = arith.constant 0 : index
      %67 = vector.load %arg4[%c42, %c0_50] : memref<49x8xf32, #tpu.memory_space<vmem>>, vector<1x8xf32>
      %68 = vector.shape_cast %67 : vector<1x8xf32> to vector<1x1x1x8xf32>
      %69 = vector.extract_strided_slice %30 {offsets = [0, 6, 0, 0], sizes = [1, 8, 16, 8], strides = [1, 1, 1, 1]} : vector<1x14x16x8xf32> to vector<1x8x16x8xf32>
      %70 = vector.broadcast %68 : vector<1x1x1x8xf32> to vector<1x8x16x8xf32>
      %71 = arith.mulf %69, %70 : vector<1x8x16x8xf32>
      %72 = arith.addf %66, %71 : vector<1x8x16x8xf32>
      %c0_51 = arith.constant 0 : index
      %73 = arith.index_cast %25 : i32 to index
      %c6 = arith.constant 6 : index
      %c0_52 = arith.constant 0 : index
      %74 = vector.load %arg14[%c0_51, %73, %c6, %c0_52] : memref<1x22x32x8xf32, #tpu.memory_space<vmem>>, vector<1x14x16x8xf32>
      %c1 = arith.constant 1 : index
      %c0_53 = arith.constant 0 : index
      %75 = vector.load %arg4[%c1, %c0_53] : memref<49x8xf32, #tpu.memory_space<vmem>>, vector<1x8xf32>
      %76 = vector.shape_cast %75 : vector<1x8xf32> to vector<1x1x1x8xf32>
      %77 = vector.extract_strided_slice %74 {offsets = [0, 0, 0, 0], sizes = [1, 8, 16, 8], strides = [1, 1, 1, 1]} : vector<1x14x16x8xf32> to vector<1x8x16x8xf32>
      %78 = vector.broadcast %76 : vector<1x1x1x8xf32> to vector<1x8x16x8xf32>
      %79 = arith.mulf %77, %78 : vector<1x8x16x8xf32>
      %80 = arith.addf %72, %79 : vector<1x8x16x8xf32>
      %c8_54 = arith.constant 8 : index
      %c0_55 = arith.constant 0 : index
      %81 = vector.load %arg4[%c8_54, %c0_55] : memref<49x8xf32, #tpu.memory_space<vmem>>, vector<1x8xf32>
      %82 = vector.shape_cast %81 : vector<1x8xf32> to vector<1x1x1x8xf32>
      %83 = vector.extract_strided_slice %74 {offsets = [0, 1, 0, 0], sizes = [1, 8, 16, 8], strides = [1, 1, 1, 1]} : vector<1x14x16x8xf32> to vector<1x8x16x8xf32>
      %84 = vector.broadcast %82 : vector<1x1x1x8xf32> to vector<1x8x16x8xf32>
      %85 = arith.mulf %83, %84 : vector<1x8x16x8xf32>
      %86 = arith.addf %80, %85 : vector<1x8x16x8xf32>
      %c15 = arith.constant 15 : index
      %c0_56 = arith.constant 0 : index
      %87 = vector.load %arg4[%c15, %c0_56] : memref<49x8xf32, #tpu.memory_space<vmem>>, vector<1x8xf32>
      %88 = vector.shape_cast %87 : vector<1x8xf32> to vector<1x1x1x8xf32>
      %89 = vector.extract_strided_slice %74 {offsets = [0, 2, 0, 0], sizes = [1, 8, 16, 8], strides = [1, 1, 1, 1]} : vector<1x14x16x8xf32> to vector<1x8x16x8xf32>
      %90 = vector.broadcast %88 : vector<1x1x1x8xf32> to vector<1x8x16x8xf32>
      %91 = arith.mulf %89, %90 : vector<1x8x16x8xf32>
      %92 = arith.addf %86, %91 : vector<1x8x16x8xf32>
      %c22 = arith.constant 22 : index
      %c0_57 = arith.constant 0 : index
      %93 = vector.load %arg4[%c22, %c0_57] : memref<49x8xf32, #tpu.memory_space<vmem>>, vector<1x8xf32>
      %94 = vector.shape_cast %93 : vector<1x8xf32> to vector<1x1x1x8xf32>
      %95 = vector.extract_strided_slice %74 {offsets = [0, 3, 0, 0], sizes = [1, 8, 16, 8], strides = [1, 1, 1, 1]} : vector<1x14x16x8xf32> to vector<1x8x16x8xf32>
      %96 = vector.broadcast %94 : vector<1x1x1x8xf32> to vector<1x8x16x8xf32>
      %97 = arith.mulf %95, %96 : vector<1x8x16x8xf32>
      %98 = arith.addf %92, %97 : vector<1x8x16x8xf32>
      %c29 = arith.constant 29 : index
      %c0_58 = arith.constant 0 : index
      %99 = vector.load %arg4[%c29, %c0_58] : memref<49x8xf32, #tpu.memory_space<vmem>>, vector<1x8xf32>
      %100 = vector.shape_cast %99 : vector<1x8xf32> to vector<1x1x1x8xf32>
      %101 = vector.extract_strided_slice %74 {offsets = [0, 4, 0, 0], sizes = [1, 8, 16, 8], strides = [1, 1, 1, 1]} : vector<1x14x16x8xf32> to vector<1x8x16x8xf32>
      %102 = vector.broadcast %100 : vector<1x1x1x8xf32> to vector<1x8x16x8xf32>
      %103 = arith.mulf %101, %102 : vector<1x8x16x8xf32>
      %104 = arith.addf %98, %103 : vector<1x8x16x8xf32>
      %c36 = arith.constant 36 : index
      %c0_59 = arith.constant 0 : index
      %105 = vector.load %arg4[%c36, %c0_59] : memref<49x8xf32, #tpu.memory_space<vmem>>, vector<1x8xf32>
      %106 = vector.shape_cast %105 : vector<1x8xf32> to vector<1x1x1x8xf32>
      %107 = vector.extract_strided_slice %74 {offsets = [0, 5, 0, 0], sizes = [1, 8, 16, 8], strides = [1, 1, 1, 1]} : vector<1x14x16x8xf32> to vector<1x8x16x8xf32>
      %108 = vector.broadcast %106 : vector<1x1x1x8xf32> to vector<1x8x16x8xf32>
      %109 = arith.mulf %107, %108 : vector<1x8x16x8xf32>
      %110 = arith.addf %104, %109 : vector<1x8x16x8xf32>
      %c43 = arith.constant 43 : index
      %c0_60 = arith.constant 0 : index
      %111 = vector.load %arg4[%c43, %c0_60] : memref<49x8xf32, #tpu.memory_space<vmem>>, vector<1x8xf32>
      %112 = vector.shape_cast %111 : vector<1x8xf32> to vector<1x1x1x8xf32>
      %113 = vector.extract_strided_slice %74 {offsets = [0, 6, 0, 0], sizes = [1, 8, 16, 8], strides = [1, 1, 1, 1]} : vector<1x14x16x8xf32> to vector<1x8x16x8xf32>
      %114 = vector.broadcast %112 : vector<1x1x1x8xf32> to vector<1x8x16x8xf32>
      %115 = arith.mulf %113, %114 : vector<1x8x16x8xf32>
      %116 = arith.addf %110, %115 : vector<1x8x16x8xf32>
      %c0_61 = arith.constant 0 : index
      %117 = arith.index_cast %25 : i32 to index
      %c7_62 = arith.constant 7 : index
      %c0_63 = arith.constant 0 : index
      %118 = vector.load %arg14[%c0_61, %117, %c7_62, %c0_63] : memref<1x22x32x8xf32, #tpu.memory_space<vmem>>, vector<1x14x16x8xf32>
      %c2 = arith.constant 2 : index
      %c0_64 = arith.constant 0 : index
      %119 = vector.load %arg4[%c2, %c0_64] : memref<49x8xf32, #tpu.memory_space<vmem>>, vector<1x8xf32>
      %120 = vector.shape_cast %119 : vector<1x8xf32> to vector<1x1x1x8xf32>
      %121 = vector.extract_strided_slice %118 {offsets = [0, 0, 0, 0], sizes = [1, 8, 16, 8], strides = [1, 1, 1, 1]} : vector<1x14x16x8xf32> to vector<1x8x16x8xf32>
      %122 = vector.broadcast %120 : vector<1x1x1x8xf32> to vector<1x8x16x8xf32>
      %123 = arith.mulf %121, %122 : vector<1x8x16x8xf32>
      %124 = arith.addf %116, %123 : vector<1x8x16x8xf32>
      %c9 = arith.constant 9 : index
      %c0_65 = arith.constant 0 : index
      %125 = vector.load %arg4[%c9, %c0_65] : memref<49x8xf32, #tpu.memory_space<vmem>>, vector<1x8xf32>
      %126 = vector.shape_cast %125 : vector<1x8xf32> to vector<1x1x1x8xf32>
      %127 = vector.extract_strided_slice %118 {offsets = [0, 1, 0, 0], sizes = [1, 8, 16, 8], strides = [1, 1, 1, 1]} : vector<1x14x16x8xf32> to vector<1x8x16x8xf32>
      %128 = vector.broadcast %126 : vector<1x1x1x8xf32> to vector<1x8x16x8xf32>
      %129 = arith.mulf %127, %128 : vector<1x8x16x8xf32>
      %130 = arith.addf %124, %129 : vector<1x8x16x8xf32>
      %c16 = arith.constant 16 : index
      %c0_66 = arith.constant 0 : index
      %131 = vector.load %arg4[%c16, %c0_66] : memref<49x8xf32, #tpu.memory_space<vmem>>, vector<1x8xf32>
      %132 = vector.shape_cast %131 : vector<1x8xf32> to vector<1x1x1x8xf32>
      %133 = vector.extract_strided_slice %118 {offsets = [0, 2, 0, 0], sizes = [1, 8, 16, 8], strides = [1, 1, 1, 1]} : vector<1x14x16x8xf32> to vector<1x8x16x8xf32>
      %134 = vector.broadcast %132 : vector<1x1x1x8xf32> to vector<1x8x16x8xf32>
      %135 = arith.mulf %133, %134 : vector<1x8x16x8xf32>
      %136 = arith.addf %130, %135 : vector<1x8x16x8xf32>
      %c23 = arith.constant 23 : index
      %c0_67 = arith.constant 0 : index
      %137 = vector.load %arg4[%c23, %c0_67] : memref<49x8xf32, #tpu.memory_space<vmem>>, vector<1x8xf32>
      %138 = vector.shape_cast %137 : vector<1x8xf32> to vector<1x1x1x8xf32>
      %139 = vector.extract_strided_slice %118 {offsets = [0, 3, 0, 0], sizes = [1, 8, 16, 8], strides = [1, 1, 1, 1]} : vector<1x14x16x8xf32> to vector<1x8x16x8xf32>
      %140 = vector.broadcast %138 : vector<1x1x1x8xf32> to vector<1x8x16x8xf32>
      %141 = arith.mulf %139, %140 : vector<1x8x16x8xf32>
      %142 = arith.addf %136, %141 : vector<1x8x16x8xf32>
      %c30 = arith.constant 30 : index
      %c0_68 = arith.constant 0 : index
      %143 = vector.load %arg4[%c30, %c0_68] : memref<49x8xf32, #tpu.memory_space<vmem>>, vector<1x8xf32>
      %144 = vector.shape_cast %143 : vector<1x8xf32> to vector<1x1x1x8xf32>
      %145 = vector.extract_strided_slice %118 {offsets = [0, 4, 0, 0], sizes = [1, 8, 16, 8], strides = [1, 1, 1, 1]} : vector<1x14x16x8xf32> to vector<1x8x16x8xf32>
      %146 = vector.broadcast %144 : vector<1x1x1x8xf32> to vector<1x8x16x8xf32>
      %147 = arith.mulf %145, %146 : vector<1x8x16x8xf32>
      %148 = arith.addf %142, %147 : vector<1x8x16x8xf32>
      %c37 = arith.constant 37 : index
      %c0_69 = arith.constant 0 : index
      %149 = vector.load %arg4[%c37, %c0_69] : memref<49x8xf32, #tpu.memory_space<vmem>>, vector<1x8xf32>
      %150 = vector.shape_cast %149 : vector<1x8xf32> to vector<1x1x1x8xf32>
      %151 = vector.extract_strided_slice %118 {offsets = [0, 5, 0, 0], sizes = [1, 8, 16, 8], strides = [1, 1, 1, 1]} : vector<1x14x16x8xf32> to vector<1x8x16x8xf32>
      %152 = vector.broadcast %150 : vector<1x1x1x8xf32> to vector<1x8x16x8xf32>
      %153 = arith.mulf %151, %152 : vector<1x8x16x8xf32>
      %154 = arith.addf %148, %153 : vector<1x8x16x8xf32>
      %c44 = arith.constant 44 : index
      %c0_70 = arith.constant 0 : index
      %155 = vector.load %arg4[%c44, %c0_70] : memref<49x8xf32, #tpu.memory_space<vmem>>, vector<1x8xf32>
      %156 = vector.shape_cast %155 : vector<1x8xf32> to vector<1x1x1x8xf32>
      %157 = vector.extract_strided_slice %118 {offsets = [0, 6, 0, 0], sizes = [1, 8, 16, 8], strides = [1, 1, 1, 1]} : vector<1x14x16x8xf32> to vector<1x8x16x8xf32>
      %158 = vector.broadcast %156 : vector<1x1x1x8xf32> to vector<1x8x16x8xf32>
      %159 = arith.mulf %157, %158 : vector<1x8x16x8xf32>
      %160 = arith.addf %154, %159 : vector<1x8x16x8xf32>
      %c0_71 = arith.constant 0 : index
      %161 = arith.index_cast %25 : i32 to index
      %c8_72 = arith.constant 8 : index
      %c0_73 = arith.constant 0 : index
      %162 = vector.load %arg14[%c0_71, %161, %c8_72, %c0_73] : memref<1x22x32x8xf32, #tpu.memory_space<vmem>>, vector<1x14x16x8xf32>
      %c3_74 = arith.constant 3 : index
      %c0_75 = arith.constant 0 : index
      %163 = vector.load %arg4[%c3_74, %c0_75] : memref<49x8xf32, #tpu.memory_space<vmem>>, vector<1x8xf32>
      %164 = vector.shape_cast %163 : vector<1x8xf32> to vector<1x1x1x8xf32>
      %165 = vector.extract_strided_slice %162 {offsets = [0, 0, 0, 0], sizes = [1, 8, 16, 8], strides = [1, 1, 1, 1]} : vector<1x14x16x8xf32> to vector<1x8x16x8xf32>
      %166 = vector.broadcast %164 : vector<1x1x1x8xf32> to vector<1x8x16x8xf32>
      %167 = arith.mulf %165, %166 : vector<1x8x16x8xf32>
      %168 = arith.addf %160, %167 : vector<1x8x16x8xf32>
      %c10 = arith.constant 10 : index
      %c0_76 = arith.constant 0 : index
      %169 = vector.load %arg4[%c10, %c0_76] : memref<49x8xf32, #tpu.memory_space<vmem>>, vector<1x8xf32>
      %170 = vector.shape_cast %169 : vector<1x8xf32> to vector<1x1x1x8xf32>
      %171 = vector.extract_strided_slice %162 {offsets = [0, 1, 0, 0], sizes = [1, 8, 16, 8], strides = [1, 1, 1, 1]} : vector<1x14x16x8xf32> to vector<1x8x16x8xf32>
      %172 = vector.broadcast %170 : vector<1x1x1x8xf32> to vector<1x8x16x8xf32>
      %173 = arith.mulf %171, %172 : vector<1x8x16x8xf32>
      %174 = arith.addf %168, %173 : vector<1x8x16x8xf32>
      %c17 = arith.constant 17 : index
      %c0_77 = arith.constant 0 : index
      %175 = vector.load %arg4[%c17, %c0_77] : memref<49x8xf32, #tpu.memory_space<vmem>>, vector<1x8xf32>
      %176 = vector.shape_cast %175 : vector<1x8xf32> to vector<1x1x1x8xf32>
      %177 = vector.extract_strided_slice %162 {offsets = [0, 2, 0, 0], sizes = [1, 8, 16, 8], strides = [1, 1, 1, 1]} : vector<1x14x16x8xf32> to vector<1x8x16x8xf32>
      %178 = vector.broadcast %176 : vector<1x1x1x8xf32> to vector<1x8x16x8xf32>
      %179 = arith.mulf %177, %178 : vector<1x8x16x8xf32>
      %180 = arith.addf %174, %179 : vector<1x8x16x8xf32>
      %c24_78 = arith.constant 24 : index
      %c0_79 = arith.constant 0 : index
      %181 = vector.load %arg4[%c24_78, %c0_79] : memref<49x8xf32, #tpu.memory_space<vmem>>, vector<1x8xf32>
      %182 = vector.shape_cast %181 : vector<1x8xf32> to vector<1x1x1x8xf32>
      %183 = vector.extract_strided_slice %162 {offsets = [0, 3, 0, 0], sizes = [1, 8, 16, 8], strides = [1, 1, 1, 1]} : vector<1x14x16x8xf32> to vector<1x8x16x8xf32>
      %184 = vector.broadcast %182 : vector<1x1x1x8xf32> to vector<1x8x16x8xf32>
      %185 = arith.mulf %183, %184 : vector<1x8x16x8xf32>
      %186 = arith.addf %180, %185 : vector<1x8x16x8xf32>
      %c31 = arith.constant 31 : index
      %c0_80 = arith.constant 0 : index
      %187 = vector.load %arg4[%c31, %c0_80] : memref<49x8xf32, #tpu.memory_space<vmem>>, vector<1x8xf32>
      %188 = vector.shape_cast %187 : vector<1x8xf32> to vector<1x1x1x8xf32>
      %189 = vector.extract_strided_slice %162 {offsets = [0, 4, 0, 0], sizes = [1, 8, 16, 8], strides = [1, 1, 1, 1]} : vector<1x14x16x8xf32> to vector<1x8x16x8xf32>
      %190 = vector.broadcast %188 : vector<1x1x1x8xf32> to vector<1x8x16x8xf32>
      %191 = arith.mulf %189, %190 : vector<1x8x16x8xf32>
      %192 = arith.addf %186, %191 : vector<1x8x16x8xf32>
      %c38 = arith.constant 38 : index
      %c0_81 = arith.constant 0 : index
      %193 = vector.load %arg4[%c38, %c0_81] : memref<49x8xf32, #tpu.memory_space<vmem>>, vector<1x8xf32>
      %194 = vector.shape_cast %193 : vector<1x8xf32> to vector<1x1x1x8xf32>
      %195 = vector.extract_strided_slice %162 {offsets = [0, 5, 0, 0], sizes = [1, 8, 16, 8], strides = [1, 1, 1, 1]} : vector<1x14x16x8xf32> to vector<1x8x16x8xf32>
      %196 = vector.broadcast %194 : vector<1x1x1x8xf32> to vector<1x8x16x8xf32>
      %197 = arith.mulf %195, %196 : vector<1x8x16x8xf32>
      %198 = arith.addf %192, %197 : vector<1x8x16x8xf32>
      %c45 = arith.constant 45 : index
      %c0_82 = arith.constant 0 : index
      %199 = vector.load %arg4[%c45, %c0_82] : memref<49x8xf32, #tpu.memory_space<vmem>>, vector<1x8xf32>
      %200 = vector.shape_cast %199 : vector<1x8xf32> to vector<1x1x1x8xf32>
      %201 = vector.extract_strided_slice %162 {offsets = [0, 6, 0, 0], sizes = [1, 8, 16, 8], strides = [1, 1, 1, 1]} : vector<1x14x16x8xf32> to vector<1x8x16x8xf32>
      %202 = vector.broadcast %200 : vector<1x1x1x8xf32> to vector<1x8x16x8xf32>
      %203 = arith.mulf %201, %202 : vector<1x8x16x8xf32>
      %204 = arith.addf %198, %203 : vector<1x8x16x8xf32>
      %c0_83 = arith.constant 0 : index
      %205 = arith.index_cast %25 : i32 to index
      %c9_84 = arith.constant 9 : index
      %c0_85 = arith.constant 0 : index
      %206 = vector.load %arg14[%c0_83, %205, %c9_84, %c0_85] : memref<1x22x32x8xf32, #tpu.memory_space<vmem>>, vector<1x14x16x8xf32>
      %c4 = arith.constant 4 : index
      %c0_86 = arith.constant 0 : index
      %207 = vector.load %arg4[%c4, %c0_86] : memref<49x8xf32, #tpu.memory_space<vmem>>, vector<1x8xf32>
      %208 = vector.shape_cast %207 : vector<1x8xf32> to vector<1x1x1x8xf32>
      %209 = vector.extract_strided_slice %206 {offsets = [0, 0, 0, 0], sizes = [1, 8, 16, 8], strides = [1, 1, 1, 1]} : vector<1x14x16x8xf32> to vector<1x8x16x8xf32>
      %210 = vector.broadcast %208 : vector<1x1x1x8xf32> to vector<1x8x16x8xf32>
      %211 = arith.mulf %209, %210 : vector<1x8x16x8xf32>
      %212 = arith.addf %204, %211 : vector<1x8x16x8xf32>
      %c11 = arith.constant 11 : index
      %c0_87 = arith.constant 0 : index
      %213 = vector.load %arg4[%c11, %c0_87] : memref<49x8xf32, #tpu.memory_space<vmem>>, vector<1x8xf32>
      %214 = vector.shape_cast %213 : vector<1x8xf32> to vector<1x1x1x8xf32>
      %215 = vector.extract_strided_slice %206 {offsets = [0, 1, 0, 0], sizes = [1, 8, 16, 8], strides = [1, 1, 1, 1]} : vector<1x14x16x8xf32> to vector<1x8x16x8xf32>
      %216 = vector.broadcast %214 : vector<1x1x1x8xf32> to vector<1x8x16x8xf32>
      %217 = arith.mulf %215, %216 : vector<1x8x16x8xf32>
      %218 = arith.addf %212, %217 : vector<1x8x16x8xf32>
      %c18 = arith.constant 18 : index
      %c0_88 = arith.constant 0 : index
      %219 = vector.load %arg4[%c18, %c0_88] : memref<49x8xf32, #tpu.memory_space<vmem>>, vector<1x8xf32>
      %220 = vector.shape_cast %219 : vector<1x8xf32> to vector<1x1x1x8xf32>
      %221 = vector.extract_strided_slice %206 {offsets = [0, 2, 0, 0], sizes = [1, 8, 16, 8], strides = [1, 1, 1, 1]} : vector<1x14x16x8xf32> to vector<1x8x16x8xf32>
      %222 = vector.broadcast %220 : vector<1x1x1x8xf32> to vector<1x8x16x8xf32>
      %223 = arith.mulf %221, %222 : vector<1x8x16x8xf32>
      %224 = arith.addf %218, %223 : vector<1x8x16x8xf32>
      %c25 = arith.constant 25 : index
      %c0_89 = arith.constant 0 : index
      %225 = vector.load %arg4[%c25, %c0_89] : memref<49x8xf32, #tpu.memory_space<vmem>>, vector<1x8xf32>
      %226 = vector.shape_cast %225 : vector<1x8xf32> to vector<1x1x1x8xf32>
      %227 = vector.extract_strided_slice %206 {offsets = [0, 3, 0, 0], sizes = [1, 8, 16, 8], strides = [1, 1, 1, 1]} : vector<1x14x16x8xf32> to vector<1x8x16x8xf32>
      %228 = vector.broadcast %226 : vector<1x1x1x8xf32> to vector<1x8x16x8xf32>
      %229 = arith.mulf %227, %228 : vector<1x8x16x8xf32>
      %230 = arith.addf %224, %229 : vector<1x8x16x8xf32>
      %c32 = arith.constant 32 : index
      %c0_90 = arith.constant 0 : index
      %231 = vector.load %arg4[%c32, %c0_90] : memref<49x8xf32, #tpu.memory_space<vmem>>, vector<1x8xf32>
      %232 = vector.shape_cast %231 : vector<1x8xf32> to vector<1x1x1x8xf32>
      %233 = vector.extract_strided_slice %206 {offsets = [0, 4, 0, 0], sizes = [1, 8, 16, 8], strides = [1, 1, 1, 1]} : vector<1x14x16x8xf32> to vector<1x8x16x8xf32>
      %234 = vector.broadcast %232 : vector<1x1x1x8xf32> to vector<1x8x16x8xf32>
      %235 = arith.mulf %233, %234 : vector<1x8x16x8xf32>
      %236 = arith.addf %230, %235 : vector<1x8x16x8xf32>
      %c39 = arith.constant 39 : index
      %c0_91 = arith.constant 0 : index
      %237 = vector.load %arg4[%c39, %c0_91] : memref<49x8xf32, #tpu.memory_space<vmem>>, vector<1x8xf32>
      %238 = vector.shape_cast %237 : vector<1x8xf32> to vector<1x1x1x8xf32>
      %239 = vector.extract_strided_slice %206 {offsets = [0, 5, 0, 0], sizes = [1, 8, 16, 8], strides = [1, 1, 1, 1]} : vector<1x14x16x8xf32> to vector<1x8x16x8xf32>
      %240 = vector.broadcast %238 : vector<1x1x1x8xf32> to vector<1x8x16x8xf32>
      %241 = arith.mulf %239, %240 : vector<1x8x16x8xf32>
      %242 = arith.addf %236, %241 : vector<1x8x16x8xf32>
      %c46 = arith.constant 46 : index
      %c0_92 = arith.constant 0 : index
      %243 = vector.load %arg4[%c46, %c0_92] : memref<49x8xf32, #tpu.memory_space<vmem>>, vector<1x8xf32>
      %244 = vector.shape_cast %243 : vector<1x8xf32> to vector<1x1x1x8xf32>
      %245 = vector.extract_strided_slice %206 {offsets = [0, 6, 0, 0], sizes = [1, 8, 16, 8], strides = [1, 1, 1, 1]} : vector<1x14x16x8xf32> to vector<1x8x16x8xf32>
      %246 = vector.broadcast %244 : vector<1x1x1x8xf32> to vector<1x8x16x8xf32>
      %247 = arith.mulf %245, %246 : vector<1x8x16x8xf32>
      %248 = arith.addf %242, %247 : vector<1x8x16x8xf32>
      %c0_93 = arith.constant 0 : index
      %249 = arith.index_cast %25 : i32 to index
      %c10_94 = arith.constant 10 : index
      %c0_95 = arith.constant 0 : index
      %250 = vector.load %arg14[%c0_93, %249, %c10_94, %c0_95] : memref<1x22x32x8xf32, #tpu.memory_space<vmem>>, vector<1x14x16x8xf32>
      %c5_96 = arith.constant 5 : index
      %c0_97 = arith.constant 0 : index
      %251 = vector.load %arg4[%c5_96, %c0_97] : memref<49x8xf32, #tpu.memory_space<vmem>>, vector<1x8xf32>
      %252 = vector.shape_cast %251 : vector<1x8xf32> to vector<1x1x1x8xf32>
      %253 = vector.extract_strided_slice %250 {offsets = [0, 0, 0, 0], sizes = [1, 8, 16, 8], strides = [1, 1, 1, 1]} : vector<1x14x16x8xf32> to vector<1x8x16x8xf32>
      %254 = vector.broadcast %252 : vector<1x1x1x8xf32> to vector<1x8x16x8xf32>
      %255 = arith.mulf %253, %254 : vector<1x8x16x8xf32>
      %256 = arith.addf %248, %255 : vector<1x8x16x8xf32>
      %c12 = arith.constant 12 : index
      %c0_98 = arith.constant 0 : index
      %257 = vector.load %arg4[%c12, %c0_98] : memref<49x8xf32, #tpu.memory_space<vmem>>, vector<1x8xf32>
      %258 = vector.shape_cast %257 : vector<1x8xf32> to vector<1x1x1x8xf32>
      %259 = vector.extract_strided_slice %250 {offsets = [0, 1, 0, 0], sizes = [1, 8, 16, 8], strides = [1, 1, 1, 1]} : vector<1x14x16x8xf32> to vector<1x8x16x8xf32>
      %260 = vector.broadcast %258 : vector<1x1x1x8xf32> to vector<1x8x16x8xf32>
      %261 = arith.mulf %259, %260 : vector<1x8x16x8xf32>
      %262 = arith.addf %256, %261 : vector<1x8x16x8xf32>
      %c19_99 = arith.constant 19 : index
      %c0_100 = arith.constant 0 : index
      %263 = vector.load %arg4[%c19_99, %c0_100] : memref<49x8xf32, #tpu.memory_space<vmem>>, vector<1x8xf32>
      %264 = vector.shape_cast %263 : vector<1x8xf32> to vector<1x1x1x8xf32>
      %265 = vector.extract_strided_slice %250 {offsets = [0, 2, 0, 0], sizes = [1, 8, 16, 8], strides = [1, 1, 1, 1]} : vector<1x14x16x8xf32> to vector<1x8x16x8xf32>
      %266 = vector.broadcast %264 : vector<1x1x1x8xf32> to vector<1x8x16x8xf32>
      %267 = arith.mulf %265, %266 : vector<1x8x16x8xf32>
      %268 = arith.addf %262, %267 : vector<1x8x16x8xf32>
      %c26 = arith.constant 26 : index
      %c0_101 = arith.constant 0 : index
      %269 = vector.load %arg4[%c26, %c0_101] : memref<49x8xf32, #tpu.memory_space<vmem>>, vector<1x8xf32>
      %270 = vector.shape_cast %269 : vector<1x8xf32> to vector<1x1x1x8xf32>
      %271 = vector.extract_strided_slice %250 {offsets = [0, 3, 0, 0], sizes = [1, 8, 16, 8], strides = [1, 1, 1, 1]} : vector<1x14x16x8xf32> to vector<1x8x16x8xf32>
      %272 = vector.broadcast %270 : vector<1x1x1x8xf32> to vector<1x8x16x8xf32>
      %273 = arith.mulf %271, %272 : vector<1x8x16x8xf32>
      %274 = arith.addf %268, %273 : vector<1x8x16x8xf32>
      %c33 = arith.constant 33 : index
      %c0_102 = arith.constant 0 : index
      %275 = vector.load %arg4[%c33, %c0_102] : memref<49x8xf32, #tpu.memory_space<vmem>>, vector<1x8xf32>
      %276 = vector.shape_cast %275 : vector<1x8xf32> to vector<1x1x1x8xf32>
      %277 = vector.extract_strided_slice %250 {offsets = [0, 4, 0, 0], sizes = [1, 8, 16, 8], strides = [1, 1, 1, 1]} : vector<1x14x16x8xf32> to vector<1x8x16x8xf32>
      %278 = vector.broadcast %276 : vector<1x1x1x8xf32> to vector<1x8x16x8xf32>
      %279 = arith.mulf %277, %278 : vector<1x8x16x8xf32>
      %280 = arith.addf %274, %279 : vector<1x8x16x8xf32>
      %c40 = arith.constant 40 : index
      %c0_103 = arith.constant 0 : index
      %281 = vector.load %arg4[%c40, %c0_103] : memref<49x8xf32, #tpu.memory_space<vmem>>, vector<1x8xf32>
      %282 = vector.shape_cast %281 : vector<1x8xf32> to vector<1x1x1x8xf32>
      %283 = vector.extract_strided_slice %250 {offsets = [0, 5, 0, 0], sizes = [1, 8, 16, 8], strides = [1, 1, 1, 1]} : vector<1x14x16x8xf32> to vector<1x8x16x8xf32>
      %284 = vector.broadcast %282 : vector<1x1x1x8xf32> to vector<1x8x16x8xf32>
      %285 = arith.mulf %283, %284 : vector<1x8x16x8xf32>
      %286 = arith.addf %280, %285 : vector<1x8x16x8xf32>
      %c47 = arith.constant 47 : index
      %c0_104 = arith.constant 0 : index
      %287 = vector.load %arg4[%c47, %c0_104] : memref<49x8xf32, #tpu.memory_space<vmem>>, vector<1x8xf32>
      %288 = vector.shape_cast %287 : vector<1x8xf32> to vector<1x1x1x8xf32>
      %289 = vector.extract_strided_slice %250 {offsets = [0, 6, 0, 0], sizes = [1, 8, 16, 8], strides = [1, 1, 1, 1]} : vector<1x14x16x8xf32> to vector<1x8x16x8xf32>
      %290 = vector.broadcast %288 : vector<1x1x1x8xf32> to vector<1x8x16x8xf32>
      %291 = arith.mulf %289, %290 : vector<1x8x16x8xf32>
      %292 = arith.addf %286, %291 : vector<1x8x16x8xf32>
      %c0_105 = arith.constant 0 : index
      %293 = arith.index_cast %25 : i32 to index
      %c11_106 = arith.constant 11 : index
      %c0_107 = arith.constant 0 : index
      %294 = vector.load %arg14[%c0_105, %293, %c11_106, %c0_107] : memref<1x22x32x8xf32, #tpu.memory_space<vmem>>, vector<1x14x16x8xf32>
      %c6_108 = arith.constant 6 : index
      %c0_109 = arith.constant 0 : index
      %295 = vector.load %arg4[%c6_108, %c0_109] : memref<49x8xf32, #tpu.memory_space<vmem>>, vector<1x8xf32>
      %296 = vector.shape_cast %295 : vector<1x8xf32> to vector<1x1x1x8xf32>
      %297 = vector.extract_strided_slice %294 {offsets = [0, 0, 0, 0], sizes = [1, 8, 16, 8], strides = [1, 1, 1, 1]} : vector<1x14x16x8xf32> to vector<1x8x16x8xf32>
      %298 = vector.broadcast %296 : vector<1x1x1x8xf32> to vector<1x8x16x8xf32>
      %299 = arith.mulf %297, %298 : vector<1x8x16x8xf32>
      %300 = arith.addf %292, %299 : vector<1x8x16x8xf32>
      %c13 = arith.constant 13 : index
      %c0_110 = arith.constant 0 : index
      %301 = vector.load %arg4[%c13, %c0_110] : memref<49x8xf32, #tpu.memory_space<vmem>>, vector<1x8xf32>
      %302 = vector.shape_cast %301 : vector<1x8xf32> to vector<1x1x1x8xf32>
      %303 = vector.extract_strided_slice %294 {offsets = [0, 1, 0, 0], sizes = [1, 8, 16, 8], strides = [1, 1, 1, 1]} : vector<1x14x16x8xf32> to vector<1x8x16x8xf32>
      %304 = vector.broadcast %302 : vector<1x1x1x8xf32> to vector<1x8x16x8xf32>
      %305 = arith.mulf %303, %304 : vector<1x8x16x8xf32>
      %306 = arith.addf %300, %305 : vector<1x8x16x8xf32>
      %c20 = arith.constant 20 : index
      %c0_111 = arith.constant 0 : index
      %307 = vector.load %arg4[%c20, %c0_111] : memref<49x8xf32, #tpu.memory_space<vmem>>, vector<1x8xf32>
      %308 = vector.shape_cast %307 : vector<1x8xf32> to vector<1x1x1x8xf32>
      %309 = vector.extract_strided_slice %294 {offsets = [0, 2, 0, 0], sizes = [1, 8, 16, 8], strides = [1, 1, 1, 1]} : vector<1x14x16x8xf32> to vector<1x8x16x8xf32>
      %310 = vector.broadcast %308 : vector<1x1x1x8xf32> to vector<1x8x16x8xf32>
      %311 = arith.mulf %309, %310 : vector<1x8x16x8xf32>
      %312 = arith.addf %306, %311 : vector<1x8x16x8xf32>
      %c27 = arith.constant 27 : index
      %c0_112 = arith.constant 0 : index
      %313 = vector.load %arg4[%c27, %c0_112] : memref<49x8xf32, #tpu.memory_space<vmem>>, vector<1x8xf32>
      %314 = vector.shape_cast %313 : vector<1x8xf32> to vector<1x1x1x8xf32>
      %315 = vector.extract_strided_slice %294 {offsets = [0, 3, 0, 0], sizes = [1, 8, 16, 8], strides = [1, 1, 1, 1]} : vector<1x14x16x8xf32> to vector<1x8x16x8xf32>
      %316 = vector.broadcast %314 : vector<1x1x1x8xf32> to vector<1x8x16x8xf32>
      %317 = arith.mulf %315, %316 : vector<1x8x16x8xf32>
      %318 = arith.addf %312, %317 : vector<1x8x16x8xf32>
      %c34 = arith.constant 34 : index
      %c0_113 = arith.constant 0 : index
      %319 = vector.load %arg4[%c34, %c0_113] : memref<49x8xf32, #tpu.memory_space<vmem>>, vector<1x8xf32>
      %320 = vector.shape_cast %319 : vector<1x8xf32> to vector<1x1x1x8xf32>
      %321 = vector.extract_strided_slice %294 {offsets = [0, 4, 0, 0], sizes = [1, 8, 16, 8], strides = [1, 1, 1, 1]} : vector<1x14x16x8xf32> to vector<1x8x16x8xf32>
      %322 = vector.broadcast %320 : vector<1x1x1x8xf32> to vector<1x8x16x8xf32>
      %323 = arith.mulf %321, %322 : vector<1x8x16x8xf32>
      %324 = arith.addf %318, %323 : vector<1x8x16x8xf32>
      %c41 = arith.constant 41 : index
      %c0_114 = arith.constant 0 : index
      %325 = vector.load %arg4[%c41, %c0_114] : memref<49x8xf32, #tpu.memory_space<vmem>>, vector<1x8xf32>
      %326 = vector.shape_cast %325 : vector<1x8xf32> to vector<1x1x1x8xf32>
      %327 = vector.extract_strided_slice %294 {offsets = [0, 5, 0, 0], sizes = [1, 8, 16, 8], strides = [1, 1, 1, 1]} : vector<1x14x16x8xf32> to vector<1x8x16x8xf32>
      %328 = vector.broadcast %326 : vector<1x1x1x8xf32> to vector<1x8x16x8xf32>
      %329 = arith.mulf %327, %328 : vector<1x8x16x8xf32>
      %330 = arith.addf %324, %329 : vector<1x8x16x8xf32>
      %c48 = arith.constant 48 : index
      %c0_115 = arith.constant 0 : index
      %331 = vector.load %arg4[%c48, %c0_115] : memref<49x8xf32, #tpu.memory_space<vmem>>, vector<1x8xf32>
      %332 = vector.shape_cast %331 : vector<1x8xf32> to vector<1x1x1x8xf32>
      %333 = vector.extract_strided_slice %294 {offsets = [0, 6, 0, 0], sizes = [1, 8, 16, 8], strides = [1, 1, 1, 1]} : vector<1x14x16x8xf32> to vector<1x8x16x8xf32>
      %334 = vector.broadcast %332 : vector<1x1x1x8xf32> to vector<1x8x16x8xf32>
      %335 = arith.mulf %333, %334 : vector<1x8x16x8xf32>
      %336 = arith.addf %330, %335 : vector<1x8x16x8xf32>
      %337 = vector.shape_cast %336 : vector<1x8x16x8xf32> to vector<128x8xf32>
      %cst_116 = arith.constant dense<0.000000e+00> : vector<128xf32>
      %338 = vector.multi_reduction <add>, %337, %cst_116 [1] : vector<128x8xf32> to vector<128xf32>
      %339 = vector.shape_cast %338 : vector<128xf32> to vector<128x1xf32>
      %340 = arith.mulf %337, %337 : vector<128x8xf32>
      %cst_117 = arith.constant dense<0.000000e+00> : vector<128xf32>
      %341 = vector.multi_reduction <add>, %340, %cst_117 [1] : vector<128x8xf32> to vector<128xf32>
      %342 = vector.shape_cast %341 : vector<128xf32> to vector<128x1xf32>
      %cst_118 = arith.constant 1.250000e-01 : f32
      %343 = vector.broadcast %cst_118 : f32 to vector<128x1xf32>
      %344 = arith.mulf %339, %343 : vector<128x1xf32>
      %cst_119 = arith.constant 1.250000e-01 : f32
      %345 = vector.broadcast %cst_119 : f32 to vector<128x1xf32>
      %346 = arith.mulf %342, %345 : vector<128x1xf32>
      %347 = arith.mulf %344, %344 : vector<128x1xf32>
      %348 = arith.subf %346, %347 : vector<128x1xf32>
      %cst_120 = arith.constant 0.000000e+00 : f32
      %349 = vector.broadcast %cst_120 : f32 to vector<128x1xf32>
      %350 = arith.maximumf %348, %349 : vector<128x1xf32>
      %351 = vector.broadcast %344 : vector<128x1xf32> to vector<128x8xf32>
      %352 = arith.subf %337, %351 : vector<128x8xf32>
      %cst_121 = arith.constant 9.99999997E-7 : f32
      %353 = vector.broadcast %cst_121 : f32 to vector<128x1xf32>
      %354 = arith.addf %350, %353 : vector<128x1xf32>
      %355 = math.rsqrt %354 : vector<128x1xf32>
      %356 = vector.broadcast %355 : vector<128x1xf32> to vector<128x8xf32>
      %357 = arith.mulf %352, %356 : vector<128x8xf32>
      %358 = vector.broadcast %17 : vector<1x8xf32> to vector<128x8xf32>
      %359 = arith.mulf %357, %358 : vector<128x8xf32>
      %360 = vector.broadcast %18 : vector<1x8xf32> to vector<128x8xf32>
      %361 = arith.addf %359, %360 : vector<128x8xf32>
      %362 = arith.truncf %361 : vector<128x8xf32> to vector<128x8xbf16>
      %c0_122 = arith.constant 0 : index
      %c0_123 = arith.constant 0 : index
      %363 = vector.load %arg8[%c0_122, %c0_123] : memref<8x32xbf16, #tpu.memory_space<vmem>>, vector<8x32xbf16>
      %cst_124 = arith.constant dense<0.000000e+00> : vector<128x32xf32>
      %364 = tpu.matmul %362, %363, %cst_124 {dimension_numbers = #tpu.dot_dimension_numbers<[1], [0], [0], [1], [0, 0, 1, 1], [], []>} : vector<128x8xbf16>, vector<8x32xbf16>, vector<128x32xf32> -> vector<128x32xf32>
      %365 = vector.broadcast %19 : vector<1x32xf32> to vector<128x32xf32>
      %366 = arith.addf %364, %365 : vector<128x32xf32>
      %cst_125 = arith.constant 5.000000e-01 : f32
      %367 = vector.broadcast %cst_125 : f32 to vector<128x32xf32>
      %368 = arith.mulf %367, %366 : vector<128x32xf32>
      %cst_126 = arith.constant 0.707106769 : f32
      %369 = vector.broadcast %cst_126 : f32 to vector<128x32xf32>
      %370 = arith.mulf %366, %369 : vector<128x32xf32>
      %371 = math.absf %370 : vector<128x32xf32>
      %cst_127 = arith.constant 0.327591091 : f32
      %372 = vector.broadcast %cst_127 : f32 to vector<128x32xf32>
      %373 = arith.mulf %372, %371 : vector<128x32xf32>
      %cst_128 = arith.constant 1.000000e+00 : f32
      %374 = vector.broadcast %cst_128 : f32 to vector<128x32xf32>
      %375 = arith.addf %374, %373 : vector<128x32xf32>
      %cst_129 = arith.constant 1.000000e+00 : f32
      %376 = vector.broadcast %cst_129 : f32 to vector<128x32xf32>
      %377 = arith.divf %376, %375 : vector<128x32xf32>
      %cst_130 = arith.constant 1.06140542 : f32
      %378 = vector.broadcast %cst_130 : f32 to vector<128x32xf32>
      %379 = arith.mulf %378, %377 : vector<128x32xf32>
      %cst_131 = arith.constant -1.45315206 : f32
      %380 = vector.broadcast %cst_131 : f32 to vector<128x32xf32>
      %381 = arith.addf %379, %380 : vector<128x32xf32>
      %382 = arith.mulf %381, %377 : vector<128x32xf32>
      %cst_132 = arith.constant 1.42141378 : f32
      %383 = vector.broadcast %cst_132 : f32 to vector<128x32xf32>
      %384 = arith.addf %382, %383 : vector<128x32xf32>
      %385 = arith.mulf %384, %377 : vector<128x32xf32>
      %cst_133 = arith.constant -0.284496725 : f32
      %386 = vector.broadcast %cst_133 : f32 to vector<128x32xf32>
      %387 = arith.addf %385, %386 : vector<128x32xf32>
      %388 = arith.mulf %387, %377 : vector<128x32xf32>
      %cst_134 = arith.constant 0.254829586 : f32
      %389 = vector.broadcast %cst_134 : f32 to vector<128x32xf32>
      %390 = arith.addf %388, %389 : vector<128x32xf32>
      %391 = arith.mulf %390, %377 : vector<128x32xf32>
      %cst_135 = arith.constant 0.000000e+00 : f32
      %392 = vector.broadcast %cst_135 : f32 to vector<128x32xf32>
      %393 = arith.subf %392, %371 : vector<128x32xf32>
      %394 = arith.mulf %393, %371 : vector<128x32xf32>
      %395 = math.exp %394 : vector<128x32xf32>
      %396 = arith.mulf %391, %395 : vector<128x32xf32>
      %cst_136 = arith.constant 1.000000e+00 : f32
      %397 = vector.broadcast %cst_136 : f32 to vector<128x32xf32>
      %398 = arith.subf %397, %396 : vector<128x32xf32>
      %cst_137 = arith.constant 0.000000e+00 : f32
      %399 = vector.broadcast %cst_137 : f32 to vector<128x32xf32>
      %400 = arith.cmpf oge, %370, %399 : vector<128x32xf32>
      %cst_138 = arith.constant 0.000000e+00 : f32
      %401 = vector.broadcast %cst_138 : f32 to vector<128x32xf32>
      %402 = arith.subf %401, %398 : vector<128x32xf32>
      %403 = arith.select %400, %398, %402 : vector<128x32xi1>, vector<128x32xf32>
      %cst_139 = arith.constant 1.000000e+00 : f32
      %404 = vector.broadcast %cst_139 : f32 to vector<128x32xf32>
      %405 = arith.addf %404, %403 : vector<128x32xf32>
      %406 = arith.mulf %368, %405 : vector<128x32xf32>
      %407 = arith.truncf %406 : vector<128x32xf32> to vector<128x32xbf16>
      %c0_140 = arith.constant 0 : index
      %c0_141 = arith.constant 0 : index
      %408 = vector.load %arg10[%c0_140, %c0_141] : memref<32x8xbf16, #tpu.memory_space<vmem>>, vector<32x8xbf16>
      %cst_142 = arith.constant dense<0.000000e+00> : vector<128x8xf32>
      %409 = tpu.matmul %407, %408, %cst_142 {dimension_numbers = #tpu.dot_dimension_numbers<[1], [0], [0], [1], [0, 0, 1, 1], [], []>} : vector<128x32xbf16>, vector<32x8xbf16>, vector<128x8xf32> -> vector<128x8xf32>
      %410 = vector.broadcast %20 : vector<1x8xf32> to vector<128x8xf32>
      %411 = arith.addf %409, %410 : vector<128x8xf32>
      %412 = vector.broadcast %21 : vector<1x8xf32> to vector<128x8xf32>
      %413 = arith.mulf %411, %412 : vector<128x8xf32>
      %c3_i32 = arith.constant 3 : i32
      %414 = arith.addi %c3_i32, %25 : i32
      %c0_143 = arith.constant 0 : index
      %415 = arith.index_cast %414 : i32 to index
      %c8_144 = arith.constant 8 : index
      %c0_145 = arith.constant 0 : index
      %416 = vector.load %arg14[%c0_143, %415, %c8_144, %c0_145] : memref<1x22x32x8xf32, #tpu.memory_space<vmem>>, vector<1x8x16x8xf32>
      %417 = vector.shape_cast %416 : vector<1x8x16x8xf32> to vector<128x8xf32>
      %418 = arith.addf %417, %413 : vector<128x8xf32>
      %419 = vector.shape_cast %418 : vector<128x8xf32> to vector<1x8x16x8xf32>
      %c0_146 = arith.constant 0 : index
      %420 = arith.index_cast %25 : i32 to index
      %c0_147 = arith.constant 0 : index
      %c0_148 = arith.constant 0 : index
      %421 = vector.load %arg13[%c0_146, %420, %c0_147, %c0_148] : memref<1x16x16x8xf32, #tpu.memory_space<vmem>>, vector<1x8x16x8xf32>
      tpu.vector_store %arg13[%c0_146, %420, %c0_147, %c0_148], %419 {strides = array<i32>} : memref<1x16x16x8xf32, #tpu.memory_space<vmem>>, vector<1x8x16x8xf32>,
    }
    %c2_i32_39 = arith.constant 2 : i32
    return
  }
  func.func @transform_0(%arg0: i32) -> (i32, i32, i32, i32) {
    %c0_i32 = arith.constant 0 : i32
    %c0_i32_0 = arith.constant 0 : i32
    %c0_i32_1 = arith.constant 0 : i32
    %c0_i32_2 = arith.constant 0 : i32
    return %arg0, %c0_i32, %c0_i32_0, %c0_i32_1 : i32, i32, i32, i32
  }
  func.func @transform_1(%arg0: i32) -> (i32, i32) {
    %c0_i32 = arith.constant 0 : i32
    %c0_i32_0 = arith.constant 0 : i32
    %c0_i32_1 = arith.constant 0 : i32
    return %c0_i32, %c0_i32_0 : i32, i32
  }
  func.func @transform_2(%arg0: i32) -> (i32, i32) {
    %c0_i32 = arith.constant 0 : i32
    %c0_i32_0 = arith.constant 0 : i32
    %c0_i32_1 = arith.constant 0 : i32
    return %c0_i32, %c0_i32_0 : i32, i32
  }
  func.func @transform_3(%arg0: i32) -> (i32, i32) {
    %c0_i32 = arith.constant 0 : i32
    %c0_i32_0 = arith.constant 0 : i32
    %c0_i32_1 = arith.constant 0 : i32
    return %c0_i32, %c0_i32_0 : i32, i32
  }
  func.func @transform_4(%arg0: i32) -> (i32, i32) {
    %c0_i32 = arith.constant 0 : i32
    %c0_i32_0 = arith.constant 0 : i32
    %c0_i32_1 = arith.constant 0 : i32
    return %c0_i32, %c0_i32_0 : i32, i32
  }
  func.func @transform_5(%arg0: i32) -> (i32, i32) {
    %c0_i32 = arith.constant 0 : i32
    %c0_i32_0 = arith.constant 0 : i32
    %c0_i32_1 = arith.constant 0 : i32
    return %c0_i32, %c0_i32_0 : i32, i32
  }
  func.func @transform_6(%arg0: i32) -> (i32, i32) {
    %c0_i32 = arith.constant 0 : i32
    %c0_i32_0 = arith.constant 0 : i32
    %c0_i32_1 = arith.constant 0 : i32
    return %c0_i32, %c0_i32_0 : i32, i32
  }
  func.func @transform_7(%arg0: i32) -> (i32, i32) {
    %c0_i32 = arith.constant 0 : i32
    %c0_i32_0 = arith.constant 0 : i32
    %c0_i32_1 = arith.constant 0 : i32
    return %c0_i32, %c0_i32_0 : i32, i32
  }
  func.func @transform_8(%arg0: i32) -> (i32, i32) {
    %c0_i32 = arith.constant 0 : i32
    %c0_i32_0 = arith.constant 0 : i32
    %c0_i32_1 = arith.constant 0 : i32
    return %c0_i32, %c0_i32_0 : i32, i32
  }
  func.func @transform_9(%arg0: i32) -> (i32, i32) {
    %c0_i32 = arith.constant 0 : i32
    %c0_i32_0 = arith.constant 0 : i32
    %c0_i32_1 = arith.constant 0 : i32
    return %c0_i32, %c0_i32_0 : i32, i32
  }
  func.func @transform_10(%arg0: i32) -> (i32, i32) {
    %c0_i32 = arith.constant 0 : i32
    %c0_i32_0 = arith.constant 0 : i32
    %c0_i32_1 = arith.constant 0 : i32
    return %c0_i32, %c0_i32_0 : i32, i32
  }
  func.func @transform_11(%arg0: i32) -> (i32, i32) {
    %c0_i32 = arith.constant 0 : i32
    %c0_i32_0 = arith.constant 0 : i32
    %c0_i32_1 = arith.constant 0 : i32
    return %c0_i32, %c0_i32_0 : i32, i32
  }
  func.func @transform_12(%arg0: i32) -> (i32, i32, i32, i32) {
    %c0_i32 = arith.constant 0 : i32
    %c0_i32_0 = arith.constant 0 : i32
    %c0_i32_1 = arith.constant 0 : i32
    %c0_i32_2 = arith.constant 0 : i32
    return %arg0, %c0_i32, %c0_i32_0, %c0_i32_1 : i32, i32, i32, i32
  }
}

</mosaic_0001>

<bundles_post_ra>
// kernel: tpu_custom_call.1
= control target key start
LH: loop header
LB: loop body
LE: loop exit
PB: predicated region body
PF: predicated region fallthrough
CT: control target
= control target key end

     0   :  { %s4735_s21 = smov 0   ;;  %s9474_s0 = inlined_call_operand.vmem [shape: bf16[2,16,16,4], index: 0, kind: input, shape index: {}]   ;;  %s9475_s1 = inlined_call_operand.vmem [shape: bf16[4,8], index: 1, kind: input, shape index: {}]   ;;  %s9476_s2 = inlined_call_operand.vmem [shape: f32[1,8], index: 2, kind: input, shape index: {}]   ;;  %s9477_s3 = inlined_call_operand.vmem [shape: f32[49,8], index: 3, kind: input, shape index: {}]   ;;  %s9478_s4 = inlined_call_operand.vmem [shape: f32[1,8], index: 4, kind: input, shape index: {}]   ;;  %s9479_s5 = inlined_call_operand.vmem [shape: f32[1,8], index: 5, kind: input, shape index: {}]   ;;  %s9480_s6 = inlined_call_operand.vmem [shape: f32[1,8], index: 6, kind: input, shape index: {}]   ;;  %s9481_s7 = inlined_call_operand.vmem [shape: bf16[8,32], index: 7, kind: input, shape index: {}]   ;;  %s9482_s8 = inlined_call_operand.vmem [shape: f32[1,32], index: 8, kind: input, shape index: {}]   ;;  %s9483_s9 = inlined_call_operand.vmem [shape: bf16[32,8], index: 9, kind: input, shape index: {}]   ;;  %s9484_s10 = inlined_call_operand.vmem [shape: f32[1,8], index: 10, kind: input, shape index: {}]   ;;  %s9485_s11 = inlined_call_operand.vmem [shape: f32[1,8], index: 11, kind: input, shape index: {}]   ;;  %s9486_s12 = inlined_call_operand.vmem [shape: f32[2,16,16,8], index: 12, kind: output, shape index: {}]  }
   0x1 LB: > { %s4054_s22 = sadd.s32 4294967295, %s4663_s21   ;;  %p4058_p0 = scmp.ge.s32.totalorder %s4663_s21, 1  ;;  %s4663_s21 = sphi %s4735_s21, %s22_s21  }
   0x2   : > { %p362_p1 = scmp.lt.s32.totalorder %s4663_s21, 3 }
   0x4   : > { %p363_p2 = pnand %p4058_p0, %p362_p1 }
   0x5   : > { %p404_p3 = scmp.lt.s32.totalorder (!%p363_p2), %s4054_s22, 1  ;;  %s4999_s30 = smov (!%p363_p2), 0  }
   0x6   : > { %366 = sbr.rel (%p363_p2) target bundleno = 1253 (0x4e5), region = 68 }
   0xb   : > { %v506_v0 = vld [vmem:[%s9475_s1] sm:$0x3]  ;;  %vm640_vm0 = vcmask 1041408   ;;  %s10933_s22 = smov (!%p404_p3, %s4054_s22), 1  ;;  %vm591_vm1 = vcmask 31744   ;;  %vm415_vm2 = vcmask 64512  }
   0xc   : > { %v642_v1 = vsel %vm640_vm0, %v506_v0, 0  ;;  %s4190_s25 = sshll.u32 %s10933_s22, 7  ;;  %s4191_s26 = sshll.u32 %s10933_s22, 8  ;;  %v4669_v10 = vmov 0.0   ;;  %v4903_v19 = vld [vmem:[%s9476_s2] ss:$0 sm:$0xff] }
   0xd   : > { %651 = vmatpush.bf16.msra.mxu0 %v642_v1  ;;  %4213 = vmatpush.bf16.msra.mxu1 %v642_v1  ;;  %s4749_s29 = scalar_lea.vmem %s9474_s0, %s4190_s25  ;;  %s4754_s14 = scalar_lea.vmem %s9486_s12, %s4191_s26  ;;  %416 = vst.msk [vmem:[#allocation2] sm:$0xff] %vm415_vm2, %v4669_v10  ;;  %v4942_v56 = vld [vmem:[%s9479_s5] sm:$0x1] }
   0xe   : > { %4214 = vmatpush.bf16.msra.mxu2 %v642_v1  ;;  %4215 = vmatpush.bf16.msra.mxu3 %v642_v1  ;;  %v4192_v2 = vld [vmem:[%s4749_s29] sm:$0xff]  ;;  %v4193_v6 = vld [vmem:[%s4749_s29 + $0x8] sm:$0xff]  ;;  %417 = vst.msk [vmem:[#allocation2 + $0x8] sm:$0xff] %vm415_vm2, %v4669_v10  ;;  %v4194_v11 = vld [vmem:[%s4749_s29 + $0x10] sm:$0xff] }
   0xf   : > { %v4196_v3 = vld [vmem:[%s4749_s29 + $0x20] sm:$0xff]  ;;  %v4197_v7 = vld [vmem:[%s4749_s29 + $0x28] sm:$0xff]  ;;  %418 = vst.msk [vmem:[#allocation2 + $0x10] sm:$0xff] %vm415_vm2, %v4669_v10  ;;  %v4198_v12 = vld [vmem:[%s4749_s29 + $0x30] sm:$0xff] }
  0x10   : > { %v4200_v4 = vld [vmem:[%s4749_s29 + $0x40] sm:$0xff]  ;;  %4127 = vmatmul.msk.bf16.vlgmr.msra.gmra.mxu0 %vm591_vm1, %v4192_v2  ;;  %4131 = vmatmul.msk.bf16.vlgmr.msra.gmra.mxu1 %vm591_vm1, %v4196_v3  ;;  %v4201_v8 = vld [vmem:[%s4749_s29 + $0x48] sm:$0xff]  ;;  %419 = vst.msk [vmem:[#allocation2 + $0x18] sm:$0xff] %vm415_vm2, %v4669_v10  ;;  %v4202_v13 = vld [vmem:[%s4749_s29 + $0x50] sm:$0xff] }
  0x11   : > { %v4204_v5 = vld [vmem:[%s4749_s29 + $0x60] sm:$0xff]  ;;  %4135 = vmatmul.msk.bf16.vlgmr.msra.gmra.mxu2 %vm591_vm1, %v4200_v4  ;;  %v4205_v9 = vld [vmem:[%s4749_s29 + $0x68] sm:$0xff]  ;;  %420 = vst.msk [vmem:[#allocation2 + $0x20] sm:$0xff] %vm415_vm2, %v4669_v10  ;;  %v4206_v14 = vld [vmem:[%s4749_s29 + $0x70] sm:$0xff] }
  0x12   : > { %4139 = vmatmul.msk.bf16.vlgmr.msra.gmra.mxu3 %vm591_vm1, %v4204_v5  ;;  %421 = vst.msk [vmem:[#allocation2 + $0x28] sm:$0xff] %vm415_vm2, %v4669_v10  ;;  %v4195_v15 = vld [vmem:[%s4749_s29 + $0x18] sm:$0xff]  ;;  %v4947_v57 = vld [vmem:[%s9480_s6] sm:$0x1] }
  0x13   : > { %422 = vst.msk [vmem:[#allocation2 + $0x30] sm:$0xff] %vm415_vm2, %v4669_v10  ;;  %v4199_v16 = vld [vmem:[%s4749_s29 + $0x38] sm:$0xff]  ;;  %v4953_v58 = vld [vmem:[%s9482_s8] sm:$0x1] }
  0x14   : > { %423 = vst.msk [vmem:[#allocation2 + $0x38] sm:$0xff] %vm415_vm2, %v4669_v10  ;;  %v4203_v17 = vld [vmem:[%s4749_s29 + $0x58] sm:$0xff]  ;;  %v4958_v59 = vld [vmem:[%s9484_s10] sm:$0x1] }
  0x15   : > { %424 = vst.msk [vmem:[#allocation2 + $0x40] sm:$0xff] %vm415_vm2, %v4669_v10  ;;  %v4207_v18 = vld [vmem:[%s4749_s29 + $0x78] sm:$0xff]  ;;  %v4964_v60 = vld [vmem:[%s9485_s11] sm:$0x1] }
  0x16   : > { %425 = vst.msk [vmem:[#allocation2 + $0x48] sm:$0xff] %vm415_vm2, %v4669_v10  ;;  %v4969_v61 = vld [vmem:[%s9478_s4] sm:$0x1] }
  0x17   : > { %426 = vst.msk [vmem:[#allocation2 + $0x50] sm:$0xff] %vm415_vm2, %v4669_v10 }
  0x18   : > { %427 = vst.msk [vmem:[#allocation2 + $0x58] sm:$0xff] %vm415_vm2, %v4669_v10 }
  0x19   : > { %429 = vst.msk [vmem:[#allocation2 + $0x260] sm:$0xff] %vm415_vm2, %v4669_v10 }
  0x1a   : > { %430 = vst.msk [vmem:[#allocation2 + $0x268] sm:$0xff] %vm415_vm2, %v4669_v10 }
  0x1b   : > { %431 = vst.msk [vmem:[#allocation2 + $0x270] sm:$0xff] %vm415_vm2, %v4669_v10 }
  0x1c   : > { %432 = vst.msk [vmem:[#allocation2 + $0x278] sm:$0xff] %vm415_vm2, %v4669_v10 }
  0x1d   : > { %433 = vst.msk [vmem:[#allocation2 + $0x280] sm:$0xff] %vm415_vm2, %v4669_v10 }
  0x1e   : > { %434 = vst.msk [vmem:[#allocation2 + $0x288] sm:$0xff] %vm415_vm2, %v4669_v10 }
  0x1f   : > { %435 = vst.msk [vmem:[#allocation2 + $0x290] sm:$0xff] %vm415_vm2, %v4669_v10 }
  0x20   : > { %4128 = vmatmul.msk.bf16.gmra.mxu0 %vm591_vm1, %v4193_v6  ;;  %4132 = vmatmul.msk.bf16.gmra.mxu1 %vm591_vm1, %v4197_v7  ;;  %436 = vst.msk [vmem:[#allocation2 + $0x298] sm:$0xff] %vm415_vm2, %v4669_v10 }
  0x21   : > { %4136 = vmatmul.msk.bf16.gmra.mxu2 %vm591_vm1, %v4201_v8  ;;  %437 = vst.msk [vmem:[#allocation2 + $0x2a0] sm:$0xff] %vm415_vm2, %v4669_v10 }
  0x22   : > { %4140 = vmatmul.msk.bf16.gmra.mxu3 %vm591_vm1, %v4205_v9  ;;  %438 = vst.msk [vmem:[#allocation2 + $0x2a8] sm:$0xff] %vm415_vm2, %v4669_v10 }
  0x23   : > { %439 = vst.msk [vmem:[#allocation2 + $0x2b0] sm:$0xff] %vm415_vm2, %v4669_v10 }
  0x24   : > { %440 = vst.msk [vmem:[#allocation2 + $0x2b8] sm:$0xff] %vm415_vm2, %v4669_v10 }
  0x25   : > { %442 = vst.msk [vmem:[#allocation2 + $0x60] sm:$0xff] %vm415_vm2, %v4669_v10 }
  0x26   : > { %443 = vst.msk [vmem:[#allocation2 + $0x80] sm:$0xff] %vm415_vm2, %v4669_v10 }
  0x27   : > { %444 = vst.msk [vmem:[#allocation2 + $0xa0] sm:$0xff] %vm415_vm2, %v4669_v10 }
  0x28   : > { %445 = vst.msk [vmem:[#allocation2 + $0xc0] sm:$0xff] %vm415_vm2, %v4669_v10 }
  0x29   : > { %446 = vst.msk [vmem:[#allocation2 + $0xe0] sm:$0xff] %vm415_vm2, %v4669_v10 }
  0x2a   : > { %447 = vst.msk [vmem:[#allocation2 + $0x100] sm:$0xff] %vm415_vm2, %v4669_v10 }
  0x2b   : > { %448 = vst.msk [vmem:[#allocation2 + $0x120] sm:$0xff] %vm415_vm2, %v4669_v10 }
  0x2c   : > { %449 = vst.msk [vmem:[#allocation2 + $0x140] sm:$0xff] %vm415_vm2, %v4669_v10 }
  0x2d   : > { %450 = vst.msk [vmem:[#allocation2 + $0x160] sm:$0xff] %vm415_vm2, %v4669_v10 }
  0x2e   : > { %451 = vst.msk [vmem:[#allocation2 + $0x180] sm:$0xff] %vm415_vm2, %v4669_v10 }
  0x2f   : > { %452 = vst.msk [vmem:[#allocation2 + $0x1a0] sm:$0xff] %vm415_vm2, %v4669_v10 }
  0x30   : > { %4129 = vmatmul.msk.bf16.gmra.mxu0 %vm591_vm1, %v4194_v11  ;;  %4133 = vmatmul.msk.bf16.gmra.mxu1 %vm591_vm1, %v4198_v12  ;;  %453 = vst.msk [vmem:[#allocation2 + $0x1c0] sm:$0xff] %vm415_vm2, %v4669_v10 }
  0x31   : > { %4137 = vmatmul.msk.bf16.gmra.mxu2 %vm591_vm1, %v4202_v13  ;;  %454 = vst.msk [vmem:[#allocation2 + $0x1e0] sm:$0xff] %vm415_vm2, %v4669_v10 }
  0x32   : > { %4141 = vmatmul.msk.bf16.gmra.mxu3 %vm591_vm1, %v4206_v14  ;;  %455 = vst.msk [vmem:[#allocation2 + $0x200] sm:$0xff] %vm415_vm2, %v4669_v10 }
  0x33   : > { %456 = vst.msk [vmem:[#allocation2 + $0x220] sm:$0xff] %vm415_vm2, %v4669_v10 }
  0x34   : > { %457 = vst.msk [vmem:[#allocation2 + $0x240] sm:$0xff] %vm415_vm2, %v4669_v10 }
  0x35   : > { %458 = vst.msk [vmem:[#allocation2 + $0x78] sm:$0xff] %vm415_vm2, %v4669_v10 }
  0x36   : > { %459 = vst.msk [vmem:[#allocation2 + $0x98] sm:$0xff] %vm415_vm2, %v4669_v10 }
  0x37   : > { %460 = vst.msk [vmem:[#allocation2 + $0xb8] sm:$0xff] %vm415_vm2, %v4669_v10 }
  0x38   : > { %461 = vst.msk [vmem:[#allocation2 + $0xd8] sm:$0xff] %vm415_vm2, %v4669_v10 }
  0x39   : > { %462 = vst.msk [vmem:[#allocation2 + $0xf8] sm:$0xff] %vm415_vm2, %v4669_v10 }
  0x3a   : > { %463 = vst.msk [vmem:[#allocation2 + $0x118] sm:$0xff] %vm415_vm2, %v4669_v10 }
  0x3b   : > { %464 = vst.msk [vmem:[#allocation2 + $0x138] sm:$0xff] %vm415_vm2, %v4669_v10 }
  0x3c   : > { %465 = vst.msk [vmem:[#allocation2 + $0x158] sm:$0xff] %vm415_vm2, %v4669_v10 }
  0x3d   : > { %466 = vst.msk [vmem:[#allocation2 + $0x178] sm:$0xff] %vm415_vm2, %v4669_v10 }
  0x3e   : > { %467 = vst.msk [vmem:[#allocation2 + $0x198] sm:$0xff] %vm415_vm2, %v4669_v10 }
  0x3f   : > { %468 = vst.msk [vmem:[#allocation2 + $0x1b8] sm:$0xff] %vm415_vm2, %v4669_v10 }
  0x40   : > { %4130 = vmatmul.msk.bf16.gmra.mxu0 %vm591_vm1, %v4195_v15  ;;  %4134 = vmatmul.msk.bf16.gmra.mxu1 %vm591_vm1, %v4199_v16  ;;  %469 = vst.msk [vmem:[#allocation2 + $0x1d8] sm:$0xff] %vm415_vm2, %v4669_v10 }
  0x41   : > { %4138 = vmatmul.msk.bf16.gmra.mxu2 %vm591_vm1, %v4203_v17  ;;  %470 = vst.msk [vmem:[#allocation2 + $0x1f8] sm:$0xff] %vm415_vm2, %v4669_v10 }
  0x42   : > { %4142 = vmatmul.msk.bf16.gmra.mxu3 %vm591_vm1, %v4207_v18  ;;  %471 = vst.msk [vmem:[#allocation2 + $0x218] sm:$0xff] %vm415_vm2, %v4669_v10 }
  0x43   : > { %472 = vst.msk [vmem:[#allocation2 + $0x238] sm:$0xff] %vm415_vm2, %v4669_v10 }
  0x44   : > { %473 = vst.msk [vmem:[#allocation2 + $0x258] sm:$0xff] %vm415_vm2, %v4669_v10 }
  0x45   : > { %10057 = vst [vmem:[#allocation3_spill] sm:$0xff] %v4942_v56 }
  0x46   : > { %10058 = vst [vmem:[#allocation4_spill] sm:$0xff] %v4947_v57 }
  0x47   : > { %10059 = vst [vmem:[#allocation5_spill] sm:$0xff] %v4953_v58 }
  0x48   : > { %10060 = vst [vmem:[#allocation6_spill] sm:$0xff] %v4958_v59 }
  0x49   : > { %10061 = vst [vmem:[#allocation7_spill] sm:$0xff] %v4964_v60 }
  0x4a   : > { %10062 = vst [vmem:[#allocation8_spill] sm:$0xff] %v4969_v61 }
  0x8d   : > { %v653_v20 = vpop.f32.mrf.mxu0  ;;  %v673_v21 = vpop.f32.mrf.mxu1 }
  0x8e   : > { %v654_v22 = vadd.f32 %v4903_v19, %v653_v20  ;;  %v674_v23 = vadd.f32 %v4903_v19, %v673_v21 }
  0x90   : > { %733 = vst.msk [vmem:[#allocation2 + $0x68] sm:$0xff] %vm415_vm2, %v654_v22 }
  0x91   : > { %741 = vst.msk [vmem:[#allocation2 + $0xe8] sm:$0xff] %vm415_vm2, %v674_v23 }
  0x94   : > { %v693_v24 = vpop.f32.mrf.mxu2 }
  0x95   : > { %v713_v25 = vpop.f32.mrf.mxu3  ;;  %v694_v26 = vadd.f32 %v4903_v19, %v693_v24  ;;  %v655_v28 = vpop.f32.mrf.mxu0 }
  0x96   : > { %v714_v27 = vadd.f32 %v4903_v19, %v713_v25  ;;  %v675_v29 = vpop.f32.mrf.mxu1  ;;  %v656_v30 = vadd.f32 %v4903_v19, %v655_v28 }
  0x97   : > { %v676_v31 = vadd.f32 %v4903_v19, %v675_v29  ;;  %749 = vst.msk [vmem:[#allocation2 + $0x168] sm:$0xff] %vm415_vm2, %v694_v26 }
  0x98   : > { %757 = vst.msk [vmem:[#allocation2 + $0x1e8] sm:$0xff] %vm415_vm2, %v714_v27 }
  0x99   : > { %734 = vst.msk [vmem:[#allocation2 + $0x70] sm:$0xff] %vm415_vm2, %v656_v30 }
  0x9a   : > { %742 = vst.msk [vmem:[#allocation2 + $0xf0] sm:$0xff] %vm415_vm2, %v676_v31 }
  0x9c   : > { %v695_v32 = vpop.f32.mrf.mxu2 }
  0x9d   : > { %v715_v33 = vpop.f32.mrf.mxu3  ;;  %v696_v34 = vadd.f32 %v4903_v19, %v695_v32  ;;  %v658_v36 = vpop.f32.mrf.mxu0 }
  0x9e   : > { %v716_v35 = vadd.f32 %v4903_v19, %v715_v33  ;;  %v678_v37 = vpop.f32.mrf.mxu1  ;;  %v659_v38 = vadd.f32 %v4903_v19, %v658_v36 }
  0x9f   : > { %v679_v39 = vadd.f32 %v4903_v19, %v678_v37  ;;  %750 = vst.msk [vmem:[#allocation2 + $0x170] sm:$0xff] %vm415_vm2, %v696_v34 }
  0xa0   : > { %758 = vst.msk [vmem:[#allocation2 + $0x1f0] sm:$0xff] %vm415_vm2, %v716_v35 }
  0xa1   : > { %735 = vst.msk [vmem:[#allocation2 + $0x88] sm:$0xff] %vm415_vm2, %v659_v38 }
  0xa2   : > { %743 = vst.msk [vmem:[#allocation2 + $0x108] sm:$0xff] %vm415_vm2, %v679_v39 }
  0xa4   : > { %v698_v40 = vpop.f32.mrf.mxu2 }
  0xa5   : > { %v718_v41 = vpop.f32.mrf.mxu3  ;;  %v699_v42 = vadd.f32 %v4903_v19, %v698_v40  ;;  %v660_v44 = vpop.f32.mrf.mxu0 }
  0xa6   : > { %v719_v43 = vadd.f32 %v4903_v19, %v718_v41  ;;  %v680_v45 = vpop.f32.mrf.mxu1  ;;  %v661_v46 = vadd.f32 %v4903_v19, %v660_v44 }
  0xa7   : > { %v681_v47 = vadd.f32 %v4903_v19, %v680_v45  ;;  %751 = vst.msk [vmem:[#allocation2 + $0x188] sm:$0xff] %vm415_vm2, %v699_v42 }
  0xa8   : > { %759 = vst.msk [vmem:[#allocation2 + $0x208] sm:$0xff] %vm415_vm2, %v719_v43 }
  0xa9   : > { %736 = vst.msk [vmem:[#allocation2 + $0x90] sm:$0xff] %vm415_vm2, %v661_v46 }
  0xaa   : > { %744 = vst.msk [vmem:[#allocation2 + $0x110] sm:$0xff] %vm415_vm2, %v681_v47 }
  0xac   : > { %v700_v48 = vpop.f32.mrf.mxu2 }
  0xad   : > { %v720_v49 = vpop.f32.mrf.mxu3  ;;  %v701_v50 = vadd.f32 %v4903_v19, %v700_v48  ;;  %v663_v52 = vpop.f32.mrf.mxu0 }
  0xae   : > { %v721_v51 = vadd.f32 %v4903_v19, %v720_v49  ;;  %v683_v53 = vpop.f32.mrf.mxu1  ;;  %v664_v54 = vadd.f32 %v4903_v19, %v663_v52 }
  0xaf   : > { %v684_v55 = vadd.f32 %v4903_v19, %v683_v53  ;;  %752 = vst.msk [vmem:[#allocation2 + $0x190] sm:$0xff] %vm415_vm2, %v701_v50 }
  0xb0   : > { %760 = vst.msk [vmem:[#allocation2 + $0x210] sm:$0xff] %vm415_vm2, %v721_v51 }
  0xb1   : > { %737 = vst.msk [vmem:[#allocation2 + $0xa8] sm:$0xff] %vm415_vm2, %v664_v54 }
  0xb2   : > { %745 = vst.msk [vmem:[#allocation2 + $0x128] sm:$0xff] %vm415_vm2, %v684_v55 }
  0xb4   : > { %v703_v62 = vpop.f32.mrf.mxu2 }
  0xb5   : > { %v723_v63 = vpop.f32.mrf.mxu3  ;;  %v704_v0 = vadd.f32 %v4903_v19, %v703_v62  ;;  %v665_v2 = vpop.f32.mrf.mxu0 }
  0xb6   : > { %v724_v1 = vadd.f32 %v4903_v19, %v723_v63  ;;  %v685_v3 = vpop.f32.mrf.mxu1  ;;  %v666_v4 = vadd.f32 %v4903_v19, %v665_v2 }
  0xb7   : > { %v686_v5 = vadd.f32 %v4903_v19, %v685_v3  ;;  %753 = vst.msk [vmem:[#allocation2 + $0x1a8] sm:$0xff] %vm415_vm2, %v704_v0 }
  0xb8   : > { %761 = vst.msk [vmem:[#allocation2 + $0x228] sm:$0xff] %vm415_vm2, %v724_v1 }
  0xb9   : > { %738 = vst.msk [vmem:[#allocation2 + $0xb0] sm:$0xff] %vm415_vm2, %v666_v4 }
  0xba   : > { %746 = vst.msk [vmem:[#allocation2 + $0x130] sm:$0xff] %vm415_vm2, %v686_v5 }
  0xbc   : > { %v705_v6 = vpop.f32.mrf.mxu2 }
  0xbd   : > { %v725_v7 = vpop.f32.mrf.mxu3  ;;  %v706_v8 = vadd.f32 %v4903_v19, %v705_v6  ;;  %v668_v10 = vpop.f32.mrf.mxu0 }
  0xbe   : > { %v726_v9 = vadd.f32 %v4903_v19, %v725_v7  ;;  %v688_v11 = vpop.f32.mrf.mxu1  ;;  %v669_v12 = vadd.f32 %v4903_v19, %v668_v10 }
  0xbf   : > { %v689_v13 = vadd.f32 %v4903_v19, %v688_v11  ;;  %754 = vst.msk [vmem:[#allocation2 + $0x1b0] sm:$0xff] %vm415_vm2, %v706_v8 }
  0xc0   : > { %762 = vst.msk [vmem:[#allocation2 + $0x230] sm:$0xff] %vm415_vm2, %v726_v9 }
  0xc1   : > { %739 = vst.msk [vmem:[#allocation2 + $0xc8] sm:$0xff] %vm415_vm2, %v669_v12 }
  0xc2   : > { %747 = vst.msk [vmem:[#allocation2 + $0x148] sm:$0xff] %vm415_vm2, %v689_v13 }
  0xc4   : > { %v708_v14 = vpop.f32.mrf.mxu2 }
  0xc5   : > { %v728_v15 = vpop.f32.mrf.mxu3  ;;  %v709_v16 = vadd.f32 %v4903_v19, %v708_v14  ;;  %v670_v18 = vpop.f32.mrf.mxu0 }
  0xc6   : > { %v729_v17 = vadd.f32 %v4903_v19, %v728_v15  ;;  %v690_v20 = vpop.f32.mrf.mxu1  ;;  %v671_v21 = vadd.f32 %v4903_v19, %v670_v18 }
  0xc7   : > { %v691_v22 = vadd.f32 %v4903_v19, %v690_v20  ;;  %755 = vst.msk [vmem:[#allocation2 + $0x1c8] sm:$0xff] %vm415_vm2, %v709_v16 }
  0xc8   : > { %763 = vst.msk [vmem:[#allocation2 + $0x248] sm:$0xff] %vm415_vm2, %v729_v17 }
  0xc9   : > { %740 = vst.msk [vmem:[#allocation2 + $0xd0] sm:$0xff] %vm415_vm2, %v671_v21 }
  0xca   : > { %748 = vst.msk [vmem:[#allocation2 + $0x150] sm:$0xff] %vm415_vm2, %v691_v22 }
  0xcc   : > { %v710_v23 = vpop.f32.mrf.mxu2 }
  0xcd   : > { %v730_v24 = vpop.f32.mrf.mxu3  ;;  %v711_v25 = vadd.f32 %v4903_v19, %v710_v23 }
  0xce   : > { %v731_v26 = vadd.f32 %v4903_v19, %v730_v24 }
  0xcf   : > { %756 = vst.msk [vmem:[#allocation2 + $0x1d0] sm:$0xff] %vm415_vm2, %v711_v25 }
  0xd0   : > { %764 = vst.msk [vmem:[#allocation2 + $0x250] sm:$0xff] %vm415_vm2, %v731_v26 }
  0xd1 LB: >> { %v5007_v27 = vld [vmem:[%s9477_s3] ss:$0 sm:$0xff]  ;;  %v5012_v19 = vld [vmem:[%s9477_s3 + $0x7] ss:$0 sm:$0xff]  ;;  %s4208_s18 = sshll.u32 %s4667_s30, 8  ;;  %v10063_v61 = vld [vmem:[#allocation8_spill] sm:$0xff]  ;;  %s4667_s30 = sphi %s4999_s30, %s776_s30  }
  0xd2   : >> { %v5016_v28 = vperm.slane %v10063_v61, 0  ;;  %v5021_v29 = vld [vmem:[%s9477_s3 + $0xe] ss:$0 sm:$0xff]  ;;  %s5023_s22 = scalar_lea.vmem [#allocation2], %s4208_s18  ;;  %v5035_v35 = vld [vmem:[%s9477_s3 + $0x15] ss:$0 sm:$0xff] }
  0xd3   : >> { %10065 = vst [vmem:[#allocation10_spill] sm:$0xff] %v5035_v35  ;;  %v5046_v39 = vld [vmem:[%s9477_s3 + $0x1c] ss:$0 sm:$0xff]  ;;  %v5056_v43 = vld [vmem:[%s9477_s3 + $0x23] ss:$0 sm:$0xff]  ;;  %vm3120_vm4 = vcmask 1043456  }
  0xd4   : >> { %10064 = vst [vmem:[#allocation9_spill] sm:$0xff] %v5016_v28  ;;  %v5066_v47 = vld [vmem:[%s9477_s3 + $0x2a] ss:$0 sm:$0xff]  ;;  %v5076_v51 = vld [vmem:[%s9477_s3 + $0x1] ss:$0 sm:$0xff]  ;;  %s4212_s23 = sshll.u32 %s4667_s30, 7 }
  0xd5   : >> { %10066 = vst [vmem:[#allocation11_spill] sm:$0xff] %v5046_v39  ;;  %v5084_v55 = vld [vmem:[%s9477_s3 + $0x8] ss:$0 sm:$0xff]  ;;  %v5094_v2 = vld [vmem:[%s9477_s3 + $0xf] ss:$0 sm:$0xff]  ;;  %s9389_s24 = scalar_lea.vmem %s4754_s14, %s4212_s23  ;;  %s776_s30 = sadd.s32 1, %s4667_s30  }
  0xd6   : >> { %10067 = vst [vmem:[#allocation12_spill] sm:$0xff] %v5056_v43  ;;  %v5104_v6 = vld [vmem:[%s9477_s3 + $0x16] ss:$0 sm:$0xff]  ;;  %v5117_v12 = vld [vmem:[%s9477_s3 + $0x1d] ss:$0 sm:$0xff]  ;;  %p773_p4 = scmp.ge.s32.totalorder %s776_s30, 2  }
  0xd7   : >> { %v784_v30 = vld [vmem:[%s5023_s22 + $0x5] sm:$0xff]  ;;  %10069 = vst [vmem:[#allocation14_spill] sm:$0xff] %v5066_v47  ;;  %v5127_v16 = vld [vmem:[%s9477_s3 + $0x24] ss:$0 sm:$0xff]  ;;  %v5270_v60 = vld [vmem:[%s9477_s3 + $0x11] ss:$0 sm:$0xff] }
  0xd8   : >> { %v786_v31 = vld [vmem:[%s5023_s22 + $0x25] sm:$0xff]  ;;  %v814_v33 = vmul.f32 %v5007_v27, %v784_v30  ;;  %10071 = vst [vmem:[#allocation16_spill] sm:$0xff] %v5084_v55  ;;  %v5149_v30 = vld [vmem:[%s9477_s3 + $0x2] ss:$0 sm:$0xff] }
  0xd9   : >> { %v5028_v32 = vld [vmem:[%s5023_s22 + $0x45] sm:$0xff]  ;;  %v848_v34 = vmul.f32 %v5012_v19, %v786_v31  ;;  %v816_v62 = vmul.f32 %v5007_v27, %v786_v31  ;;  %10072 = vst [vmem:[#allocation17_spill] sm:$0xff] %v5094_v2 }
  0xda   : >> { %v5038_v36 = vld [vmem:[%s5023_s22 + $0x65] sm:$0xff]  ;;  %v830_v37 = vadd.f32 %v814_v33, %v5016_v28  ;;  %v882_v38 = vmul.f32 %v5021_v29, %v5028_v32  ;;  %10073 = vst [vmem:[#allocation18_spill] sm:$0xff] %v5104_v6  ;;  %v850_v8 = vmul.f32 %v5012_v19, %v5028_v32 }
  0xdb   : >> { %v5049_v40 = vld [vmem:[%s5023_s22 + $0x85] sm:$0xff]  ;;  %v916_v42 = vmul.f32 %v5035_v35, %v5038_v36  ;;  %v832_v7 = vadd.f32 %v816_v62, %v5016_v28  ;;  %10075 = vst [vmem:[#allocation20_spill] sm:$0xff] %v5117_v12  ;;  %v884_v18 = vmul.f32 %v5021_v29, %v5038_v36 }
  0xdc   : >> { %v864_v41 = vadd.f32 %v848_v34, %v830_v37  ;;  %v5059_v44 = vld [vmem:[%s5023_s22 + $0xa5] sm:$0xff]  ;;  %v950_v46 = vmul.f32 %v5046_v39, %v5049_v40  ;;  %10077 = vst [vmem:[#allocation22_spill] sm:$0xff] %v5127_v16  ;;  %v918_v33 = vmul.f32 %v5035_v35, %v5049_v40 }
  0xdd   : >> { %10068 = vst [vmem:[#allocation13_spill] sm:$0xff] %v5059_v44  ;;  %v5069_v48 = vld [vmem:[%s5023_s22 + $0xc5] sm:$0xff]  ;;  %v984_v50 = vmul.f32 %v5056_v43, %v5059_v44  ;;  %v866_v17 = vadd.f32 %v850_v8, %v832_v7  ;;  %v5190_v8 = vld [vmem:[%s9477_s3 + $0x1e] ss:$0 sm:$0xff] }
  0xde   : >> { %v898_v45 = vadd.f32 %v882_v38, %v864_v41  ;;  %10070 = vst [vmem:[#allocation15_spill] sm:$0xff] %v5069_v48  ;;  %v1050_v52 = vld [vmem:[%s5023_s22 + $0x6] sm:$0xff]  ;;  %v1018_v54 = vmul.f32 %v5066_v47, %v5069_v48 }
  0xdf   : >> { %v5088_v63 = vld [vmem:[%s5023_s22 + $0x26] sm:$0xff]  ;;  %v1080_v1 = vmul.f32 %v5076_v51, %v1050_v52  ;;  %10081 = vst [vmem:[#allocation26_spill] sm:$0xff] %v5149_v30  ;;  %v900_v31 = vadd.f32 %v884_v18, %v866_v17  ;;  %v952_v52 = vmul.f32 %v5046_v39, %v5059_v44  ;;  %v5202_v18 = vld [vmem:[%s9477_s3 + $0x25] ss:$0 sm:$0xff] }
  0xe0   : >> { %v932_v49 = vadd.f32 %v916_v42, %v898_v45  ;;  %v5097_v3 = vld [vmem:[%s5023_s22 + $0x46] sm:$0xff]  ;;  %v1114_v5 = vmul.f32 %v5084_v55, %v5088_v63  ;;  %10087 = vst [vmem:[#allocation32_spill] sm:$0xff] %v5190_v8 }
  0xe1   : >> { %v5110_v9 = vld [vmem:[%s5023_s22 + $0x66] sm:$0xff]  ;;  %v1148_v11 = vmul.f32 %v5094_v2, %v5097_v3  ;;  %10095 = vst [vmem:[#allocation40_spill] sm:$0xff] %v5270_v60 }
  0xe2   : >> { %v966_v53 = vadd.f32 %v950_v46, %v932_v49  ;;  %10074 = vst [vmem:[#allocation19_spill] sm:$0xff] %v5110_v9  ;;  %v5120_v13 = vld [vmem:[%s5023_s22 + $0x86] sm:$0xff]  ;;  %v1182_v15 = vmul.f32 %v5104_v6, %v5110_v9  ;;  %v5166_v49 = vld [vmem:[%s9477_s3 + $0x10] ss:$0 sm:$0xff] }
  0xe3   : >> { %10076 = vst [vmem:[#allocation21_spill] sm:$0xff] %v5120_v13  ;;  %v5132_v20 = vld [vmem:[%s5023_s22 + $0xa6] sm:$0xff]  ;;  %v1216_v22 = vmul.f32 %v5117_v12, %v5120_v13 }
  0xe4   : >> { %v1000_v0 = vadd.f32 %v984_v50, %v966_v53  ;;  %10078 = vst [vmem:[#allocation23_spill] sm:$0xff] %v5132_v20  ;;  %v5139_v23 = vld [vmem:[%s9477_s3 + $0x2b] ss:$0 sm:$0xff]  ;;  %v1250_v26 = vmul.f32 %v5127_v16, %v5132_v20  ;;  %v5159_v41 = vld [vmem:[%s9477_s3 + $0x9] ss:$0 sm:$0xff]  ;;  %v934_v50 = vadd.f32 %v918_v33, %v900_v31  ;;  %v5216_v33 = vmul.f32 %v5007_v27, %v5028_v32 }
  0xe5   : >> { %10079 = vst [vmem:[#allocation24_spill] sm:$0xff] %v5139_v23  ;;  %v5142_v24 = vld [vmem:[%s5023_s22 + $0xc6] sm:$0xff]  ;;  %v1218_v57 = vmul.f32 %v5117_v12, %v5132_v20 }
  0xe6   : >> { %v1034_v4 = vadd.f32 %v1018_v54, %v1000_v0  ;;  %10080 = vst [vmem:[#allocation25_spill] sm:$0xff] %v5142_v24  ;;  %v1316_v34 = vld [vmem:[%s5023_s22 + $0x7] sm:$0xff]  ;;  %v1284_v38 = vmul.f32 %v5139_v23, %v5142_v24  ;;  %v5289_v56 = vmul.f32 %v5127_v16, %v5142_v24 }
  0xe7   : >> { %10082 = vst [vmem:[#allocation27_spill] sm:$0xff] %v5159_v41  ;;  %v1318_v42 = vld [vmem:[%s5023_s22 + $0x27] sm:$0xff]  ;;  %v1346_v46 = vmul.f32 %v5149_v30, %v1316_v34 }
  0xe8   : >> { %v1096_v10 = vadd.f32 %v1080_v1, %v1034_v4  ;;  %10083 = vst [vmem:[#allocation28_spill] sm:$0xff] %v5166_v49  ;;  %v5171_v53 = vld [vmem:[%s5023_s22 + $0x47] sm:$0xff]  ;;  %v1380_v0 = vmul.f32 %v5159_v41, %v1318_v42  ;;  %v5180_v1 = vld [vmem:[%s9477_s3 + $0x17] ss:$0 sm:$0xff]  ;;  %v5304_v24 = vmul.f32 %v5149_v30, %v1318_v42 }
  0xe9   : >> { %v5174_v62 = vld [vmem:[%s5023_s22 + $0x67] sm:$0xff]  ;;  %10085 = vst [vmem:[#allocation30_spill] sm:$0xff] %v5180_v1  ;;  %v1414_v7 = vmul.f32 %v5166_v49, %v5171_v53  ;;  %v5339_v12 = vmul.f32 %v5159_v41, %v5171_v53 }
  0xea   : >> { %v1130_v14 = vadd.f32 %v1114_v5, %v1096_v10  ;;  %10084 = vst [vmem:[#allocation29_spill] sm:$0xff] %v5174_v62  ;;  %v5183_v4 = vld [vmem:[%s5023_s22 + $0x87] sm:$0xff]  ;;  %v968_v10 = vadd.f32 %v952_v52, %v934_v50  ;;  %v1448_v17 = vmul.f32 %v5180_v1, %v5174_v62  ;;  %v5230_v50 = vld [vmem:[%s9477_s3 + $0x3] ss:$0 sm:$0xff]  ;;  %v1082_v52 = vmul.f32 %v5076_v51, %v5088_v63 }
  0xeb   : >> { %10086 = vst [vmem:[#allocation31_spill] sm:$0xff] %v5183_v4  ;;  %v5219_v34 = vld [vmem:[%s5023_s22 + $0xe5] sm:$0xff]  ;;  %v5253_v63 = vld [vmem:[%s5023_s22 + $0x2d] sm:$0xff] }
  0xec   : >> { %v1164_v21 = vadd.f32 %v1148_v11, %v1130_v14  ;;  %v986_v11 = vmul.f32 %v5056_v43, %v5069_v48  ;;  %v5195_v14 = vld [vmem:[%s5023_s22 + $0xa7] sm:$0xff]  ;;  %10090 = vst [vmem:[#allocation35_spill] sm:$0xff] %v5219_v34  ;;  %v1020_v32 = vmul.f32 %v5066_v47, %v5219_v34 }
  0xed   : >> { %10088 = vst [vmem:[#allocation33_spill] sm:$0xff] %v5195_v14  ;;  %v5262_v61 = vld [vmem:[%s5023_s22 + $0x48] sm:$0xff] }
  0xee   : >> { %v1198_v25 = vadd.f32 %v1182_v15, %v1164_v21  ;;  %v5205_v21 = vld [vmem:[%s5023_s22 + $0xc7] sm:$0xff]  ;;  %v1002_v31 = vadd.f32 %v986_v11, %v968_v10  ;;  %v1184_v10 = vmul.f32 %v5104_v6, %v5120_v13 }
  0xef   : >> { %10089 = vst [vmem:[#allocation34_spill] sm:$0xff] %v5205_v21  ;;  %v785_v11 = vld [vmem:[%s5023_s22 + $0xd] sm:$0xff] }
  0xf0   : >> { %v1232_v37 = vadd.f32 %v1216_v22, %v1198_v25  ;;  %v1482_v25 = vmul.f32 %v5190_v8, %v5183_v4  ;;  %v1036_v59 = vadd.f32 %v1020_v32, %v1002_v31  ;;  %v5273_v58 = vld [vmem:[%s5023_s22 + $0x88] sm:$0xff]  ;;  %v815_v31 = vmul.f32 %v5007_v27, %v785_v11 }
  0xf1   : >> { %10096 = vst [vmem:[#allocation41_spill] sm:$0xff] %v5273_v58  ;;  %v849_v32 = vmul.f32 %v5012_v19, %v5253_v63  ;;  %v5295_v13 = vld [vmem:[%s5023_s22 + $0xa8] sm:$0xff] }
  0xf2   : >> { %v1266_v45 = vadd.f32 %v1250_v26, %v1232_v37  ;;  %v5212_v26 = vld [vmem:[%s9477_s3 + $0x2c] ss:$0 sm:$0xff]  ;;  %10099 = vst [vmem:[#allocation44_spill] sm:$0xff] %v5295_v13  ;;  %v1098_v20 = vadd.f32 %v1082_v52, %v1036_v59  ;;  %v5307_v11 = vld [vmem:[%s5023_s22 + $0x4d] sm:$0xff]  ;;  %v831_v42 = vadd.f32 %v815_v31, %v5016_v28 }
  0xf3   : >> { %10101 = vst [vmem:[#allocation46_spill] sm:$0xff] %v5307_v11  ;;  %v5310_v34 = vld [vmem:[%s5023_s22 + $0xc8] sm:$0xff] }
  0xf4   : >> { %v1300_v54 = vadd.f32 %v1284_v38, %v1266_v45  ;;  %v1516_v38 = vmul.f32 %v5202_v18, %v5195_v14  ;;  %v1582_v45 = vld [vmem:[%s5023_s22 + $0x8] sm:$0xff]  ;;  %10102 = vst [vmem:[#allocation47_spill] sm:$0xff] %v5310_v34 }
  0xf5   : >> { %v5321_v59 = vld [vmem:[%s9477_s3 + $0x2d] ss:$0 sm:$0xff] }
  0xf6   : >> { %v1362_v5 = vadd.f32 %v1346_v46, %v1300_v54  ;;  %v5225_v46 = vld [vmem:[%s5023_s22 + $0x28] sm:$0xff]  ;;  %v5238_v54 = vmul.f32 %v5076_v51, %v5097_v3  ;;  %10104 = vst [vmem:[#allocation49_spill] sm:$0xff] %v5321_v59 }
  0xf7   : >> { %v5324_v52 = vld [vmem:[%s5023_s22 + $0x6d] sm:$0xff] }
  0xf8   : >> { %v1396_v15 = vadd.f32 %v1380_v0, %v1362_v5  ;;  %10091 = vst [vmem:[#allocation36_spill] sm:$0xff] %v5238_v54  ;;  %v5243_v0 = vld [vmem:[%s9477_s3 + $0xa] ss:$0 sm:$0xff]  ;;  %v1116_v5 = vmul.f32 %v5084_v55, %v5097_v3  ;;  %v5301_v54 = vld [vmem:[%s9477_s3 + $0x26] ss:$0 sm:$0xff]  ;;  %v5342_v31 = vld [vmem:[%s5023_s22 + $0x8d] sm:$0xff]  ;;  %v917_v41 = vmul.f32 %v5035_v35, %v5324_v52 }
  0xf9   : >> { %10092 = vst [vmem:[#allocation37_spill] sm:$0xff] %v5243_v0  ;;  %v5265_v3 = vld [vmem:[%s5023_s22 + $0x68] sm:$0xff] }
  0xfa   : >> { %v1430_v22 = vadd.f32 %v1414_v7, %v1396_v15  ;;  %v1150_v7 = vmul.f32 %v5094_v2, %v5110_v9  ;;  %v5257_v15 = vmul.f32 %v5149_v30, %v5171_v53  ;;  %10094 = vst [vmem:[#allocation39_spill] sm:$0xff] %v5265_v3  ;;  %v1612_v9 = vmul.f32 %v5230_v50, %v1582_v45  ;;  %v1848_v44 = vld [vmem:[%s5023_s22 + $0x9] sm:$0xff]  ;;  %v5335_v30 = vld [vmem:[%s9477_s3 + $0x4] ss:$0 sm:$0xff]  ;;  %v5359_v53 = vld [vmem:[%s9477_s3 + $0x12] ss:$0 sm:$0xff] }
  0xfb   : >> { %10100 = vst [vmem:[#allocation45_spill] sm:$0xff] %v5301_v54  ;;  %v1646_v45 = vmul.f32 %v5243_v0, %v5225_v46  ;;  %v1132_v16 = vadd.f32 %v1116_v5, %v1098_v20  ;;  %v5349_v6 = vld [vmem:[%s5023_s22 + $0x29] sm:$0xff]  ;;  %v865_v5 = vadd.f32 %v849_v32, %v831_v42  ;;  %v5375_v32 = vmul.f32 %v5166_v49, %v5174_v62 }
  0xfc   : >> { %v1464_v37 = vadd.f32 %v1448_v17, %v1430_v22  ;;  %10093 = vst [vmem:[#allocation38_spill] sm:$0xff] %v5257_v15  ;;  %v1550_v22 = vmul.f32 %v5212_v26, %v5205_v21  ;;  %v5354_v20 = vld [vmem:[%s9477_s3 + $0xb] ss:$0 sm:$0xff]  ;;  %v5378_v42 = vld [vmem:[%s5023_s22 + $0xad] sm:$0xff]  ;;  %v5397_v49 = vmul.f32 %v5335_v30, %v1848_v44 }
  0xfd   : >> { %10105 = vst [vmem:[#allocation50_spill] sm:$0xff] %v5324_v52  ;;  %v5388_v35 = vld [vmem:[%s5023_s22 + $0xe6] sm:$0xff]  ;;  %v5392_v52 = vmul.f32 %v5180_v1, %v5183_v4  ;;  %v5406_v4 = vmul.f32 %v5190_v8, %v5195_v14  ;;  %v5416_v44 = vmul.f32 %v5354_v20, %v5349_v6 }
  0xfe   : >> { %v1498_v17 = vadd.f32 %v1482_v25, %v1464_v37  ;;  %v5278_v25 = vld [vmem:[%s9477_s3 + $0x18] ss:$0 sm:$0xff]  ;;  %v5283_v37 = vld [vmem:[%s9477_s3 + $0x1f] ss:$0 sm:$0xff]  ;;  %10106 = vst [vmem:[#allocation51_spill] sm:$0xff] %v5335_v30  ;;  %v5430_v8 = vld [vmem:[%s5023_s22 + $0xa9] sm:$0xff] }
  0xff   : >> { %10097 = vst [vmem:[#allocation42_spill] sm:$0xff] %v5278_v25 }
 0x100   : >> { %10098 = vst [vmem:[#allocation43_spill] sm:$0xff] %v5283_v37  ;;  %v1532_v15 = vadd.f32 %v1516_v38, %v1498_v17  ;;  %v5314_v38 = vmul.f32 %v5230_v50, %v5262_v61  ;;  %v883_v17 = vmul.f32 %v5021_v29, %v5307_v11 }
 0x101   : >> { %10107 = vst [vmem:[#allocation52_spill] sm:$0xff] %v5342_v31 }
 0x102   : >> { %10103 = vst [vmem:[#allocation48_spill] sm:$0xff] %v5314_v38  ;;  %v1566_v48 = vadd.f32 %v1550_v22, %v1532_v15  ;;  %v1680_v38 = vmul.f32 %v5270_v60, %v5262_v61  ;;  %v1714_v15 = vmul.f32 %v5278_v25, %v5265_v3  ;;  %v1748_v22 = vmul.f32 %v5283_v37, %v5273_v58  ;;  %v5366_v58 = vld [vmem:[%s5023_s22 + $0x49] sm:$0xff]  ;;  %v5371_v60 = vld [vmem:[%s9477_s3 + $0x19] ss:$0 sm:$0xff] }
 0x103   : >> { %10108 = vst [vmem:[#allocation53_spill] sm:$0xff] %v5354_v20  ;;  %v1782_v37 = vmul.f32 %v5301_v54, %v5295_v13  ;;  %v1166_v3 = vadd.f32 %v1150_v7, %v1132_v16  ;;  %v899_v16 = vadd.f32 %v883_v17, %v865_v5  ;;  %v951_v7 = vmul.f32 %v5046_v39, %v5342_v31  ;;  %v5409_v17 = vld [vmem:[%s5023_s22 + $0xcd] sm:$0xff] }
 0x104   : >> { %10109 = vst [vmem:[#allocation54_spill] sm:$0xff] %v5359_v53  ;;  %v1628_v25 = vadd.f32 %v1612_v9, %v1566_v48  ;;  %v5382_v48 = vmul.f32 %v5321_v59, %v5310_v34  ;;  %v5385_v9 = vld [vmem:[%s5023_s22 + $0x69] sm:$0xff]  ;;  %v5402_v59 = vld [vmem:[%s9477_s3 + $0x20] ss:$0 sm:$0xff] }
 0x105   : >> { %10110 = vst [vmem:[#allocation55_spill] sm:$0xff] %v5366_v58  ;;  %v1200_v54 = vadd.f32 %v1184_v10, %v1166_v3  ;;  %v5412_v5 = vld [vmem:[%s5023_s22 + $0x89] sm:$0xff]  ;;  %v5425_v10 = vld [vmem:[%s9477_s3 + $0x27] ss:$0 sm:$0xff]  ;;  %v933_v3 = vadd.f32 %v917_v41, %v899_v16  ;;  %v5434_v1 = vmul.f32 %v5371_v60, %v5385_v9  ;;  %v1286_v41 = vmul.f32 %v5139_v23, %v5388_v35 }
 0x106   : >> { %10111 = vst [vmem:[#allocation56_spill] sm:$0xff] %v5371_v60  ;;  %v1662_v62 = vadd.f32 %v1646_v45, %v1628_v25  ;;  %v5420_v25 = vmul.f32 %v5359_v53, %v5366_v58  ;;  %v985_v45 = vmul.f32 %v5056_v43, %v5378_v42  ;;  %v5439_v53 = vld [vmem:[%s9477_s3 + $0x2e] ss:$0 sm:$0xff]  ;;  %v834_v60 = vadd.f32 %v5216_v33, %v5016_v28 }
 0x107   : >> { %10112 = vst [vmem:[#allocation57_spill] sm:$0xff] %v5378_v42  ;;  %v1234_v20 = vadd.f32 %v1218_v57, %v1200_v54  ;;  %v1051_v16 = vld [vmem:[%s5023_s22 + $0xe] sm:$0xff]  ;;  %v5455_v57 = vmul.f32 %v5402_v59, %v5412_v5  ;;  %v5467_v33 = vmul.f32 %v5425_v10, %v5430_v8 }
 0x108   : >> { %10113 = vst [vmem:[#allocation58_spill] sm:$0xff] %v5385_v9  ;;  %v1696_v14 = vadd.f32 %v1680_v38, %v1662_v62  ;;  %v5445_v58 = vld [vmem:[%s5023_s22 + $0xc9] sm:$0xff]  ;;  %v967_v62 = vadd.f32 %v951_v7, %v933_v3  ;;  %v1019_v38 = vmul.f32 %v5066_v47, %v5409_v17  ;;  %v852_v9 = vmul.f32 %v5012_v19, %v5038_v36 }
 0x109   : >> { %10114 = vst [vmem:[#allocation59_spill] sm:$0xff] %v5388_v35  ;;  %v1268_v54 = vadd.f32 %v5289_v56, %v1234_v20  ;;  %v5460_v7 = vmul.f32 %v5202_v18, %v5205_v21  ;;  %v5463_v3 = vld [vmem:[%s5023_s22 + $0x2e] sm:$0xff]  ;;  %v817_v35 = vmul.f32 %v5007_v27, %v5253_v63  ;;  %v5477_v56 = vmul.f32 %v5439_v53, %v5445_v58  ;;  %v5482_v20 = vld [vmem:[%s9477_s3 + $0x5] ss:$0 sm:$0xff] }
 0x10a   : >> { %10115 = vst [vmem:[#allocation60_spill] sm:$0xff] %v5402_v59  ;;  %v1730_v43 = vadd.f32 %v1714_v15, %v1696_v14  ;;  %v5470_v36 = vld [vmem:[%s5023_s22 + $0xe7] sm:$0xff]  ;;  %v1001_v14 = vadd.f32 %v985_v45, %v967_v62  ;;  %v1081_v15 = vmul.f32 %v5076_v51, %v1051_v16  ;;  %v5486_v45 = vmul.f32 %v5230_v50, %v5225_v46  ;;  %v5504_v46 = vld [vmem:[%s9477_s3 + $0x13] ss:$0 sm:$0xff] }
 0x10b   : >> { %10116 = vst [vmem:[#allocation61_spill] sm:$0xff] %v5409_v17  ;;  %v1302_v21 = vadd.f32 %v1286_v41, %v1268_v54  ;;  %v5489_v16 = vld [vmem:[%s5023_s22 + $0x4e] sm:$0xff]  ;;  %v1115_v63 = vmul.f32 %v5084_v55, %v5463_v3  ;;  %v886_v62 = vmul.f32 %v5021_v29, %v5049_v40  ;;  %v5499_v41 = vld [vmem:[%s9477_s3 + $0xc] ss:$0 sm:$0xff]  ;;  %v5513_v40 = vmul.f32 %v5243_v0, %v5262_v61 }
 0x10c   : >> { %10117 = vst [vmem:[#allocation62_spill] sm:$0xff] %v5412_v5  ;;  %v1764_v59 = vadd.f32 %v1748_v22, %v1730_v43  ;;  %v2114_v27 = vld [vmem:[%s5023_s22 + $0xa] sm:$0xff]  ;;  %v1035_v43 = vadd.f32 %v1019_v38, %v1001_v14  ;;  %v868_v22 = vadd.f32 %v852_v9, %v834_v60  ;;  %v5509_v60 = vmul.f32 %v5212_v26, %v5470_v36 }
 0x10d   : >> { %10118 = vst [vmem:[#allocation63_spill] sm:$0xff] %v5425_v10  ;;  %v1364_v38 = vadd.f32 %v5304_v24, %v1302_v21  ;;  %v5522_v9 = vld [vmem:[%s5023_s22 + $0x4a] sm:$0xff]  ;;  %v1149_v14 = vmul.f32 %v5094_v2, %v5489_v16  ;;  %v833_v24 = vadd.f32 %v817_v35, %v5016_v28  ;;  %v851_v21 = vmul.f32 %v5012_v19, %v5307_v11  ;;  %v5536_v10 = vld [vmem:[%s9477_s3 + $0x1a] ss:$0 sm:$0xff] }
 0x10e   : >> { %10119 = vst [vmem:[#allocation64_spill] sm:$0xff] %v5430_v8  ;;  %v1097_v54 = vadd.f32 %v1081_v15, %v1035_v43  ;;  %v5531_v61 = vmul.f32 %v5482_v20, %v2114_v27  ;;  %v10131_v43 = vld [vmem:[#allocation39_spill] sm:$0xff]  ;;  %v10132_v35 = vld [vmem:[#allocation40_spill] sm:$0xff]  ;;  %v10136_v27 = vld [vmem:[#allocation42_spill] sm:$0xff]  ;;  %v5555_v0 = vadd.f32 %v886_v62, %v868_v22 }
 0x10f   : >> { %10120 = vst [vmem:[#allocation65_spill] sm:$0xff] %v5439_v53  ;;  %v1798_v53 = vadd.f32 %v1782_v37, %v1764_v59  ;;  %v5516_v37 = vld [vmem:[%s5023_s22 + $0x6e] sm:$0xff]  ;;  %v1398_v15 = vadd.f32 %v5339_v12, %v1364_v38  ;;  %v5541_v28 = vmul.f32 %v10132_v35, %v10131_v43  ;;  %v5564_v43 = vmul.f32 %v5504_v46, %v5522_v9 }
 0x110   : >> { %10121 = vst [vmem:[#allocation66_spill] sm:$0xff] %v5445_v58  ;;  %v5519_v59 = vld [vmem:[%s5023_s22 + $0x2a] sm:$0xff]  ;;  %v10137_v58 = vld [vmem:[#allocation18_spill] sm:$0xff] }
 0x111   : >> { %10122 = vst [vmem:[#allocation67_spill] sm:$0xff] %v5470_v36  ;;  %v1832_v36 = vadd.f32 %v5382_v48, %v1798_v53  ;;  %v5544_v19 = vld [vmem:[%s5023_s22 + $0x8e] sm:$0xff]  ;;  %v1183_v8 = vmul.f32 %v10137_v58, %v5516_v37  ;;  %v5560_v38 = vmul.f32 %v5499_v41, %v5519_v59  ;;  %v1432_v22 = vadd.f32 %v5375_v32, %v1398_v15  ;;  %v5595_v15 = vld [vmem:[%s9477_s3 + $0x28] ss:$0 sm:$0xff] }
 0x112   : >> { %10123 = vst [vmem:[#allocation68_spill] sm:$0xff] %v5482_v20  ;;  %v5547_v53 = vld [vmem:[%s5023_s22 + $0x6a] sm:$0xff]  ;;  %v1131_v20 = vadd.f32 %v1115_v63, %v1097_v54  ;;  %v5569_v63 = vld [vmem:[%s9477_s3 + $0x21] ss:$0 sm:$0xff] }
 0x113   : >> { %10124 = vst [vmem:[#allocation69_spill] sm:$0xff] %v5489_v16  ;;  %v10135_v48 = vld [vmem:[#allocation41_spill] sm:$0xff]  ;;  %v1894_v12 = vadd.f32 %v5397_v49, %v1832_v36  ;;  %v5579_v36 = vld [vmem:[%s5023_s22 + $0xe8] sm:$0xff]  ;;  %v10143_v54 = vld [vmem:[#allocation43_spill] sm:$0xff]  ;;  %v5590_v32 = vmul.f32 %v5536_v10, %v5547_v53 }
 0x114   : >> { %10125 = vst [vmem:[#allocation70_spill] sm:$0xff] %v5499_v41  ;;  %v5551_v11 = vmul.f32 %v10136_v27, %v10135_v48  ;;  %v5573_v62 = vld [vmem:[%s5023_s22 + $0xae] sm:$0xff]  ;;  %v5583_v48 = vmul.f32 %v10143_v54, %v5295_v13  ;;  %v1466_v13 = vadd.f32 %v5392_v52, %v1432_v22 }
 0x115   : >> { %10126 = vst [vmem:[#allocation71_spill] sm:$0xff] %v5504_v46  ;;  %v5576_v49 = vld [vmem:[%s5023_s22 + $0x8a] sm:$0xff] }
 0x116   : >> { %10127 = vst [vmem:[#allocation72_spill] sm:$0xff] %v5516_v37  ;;  %v10144_v46 = vld [vmem:[#allocation20_spill] sm:$0xff]  ;;  %v5617_v22 = vmul.f32 %v5569_v63, %v5576_v49 }
 0x117   : >> { %10128 = vst [vmem:[#allocation73_spill] sm:$0xff] %v5519_v59  ;;  %v1217_v41 = vmul.f32 %v10144_v46, %v5544_v19  ;;  %v1928_v59 = vadd.f32 %v5416_v44, %v1894_v12  ;;  %v5606_v44 = vld [vmem:[%s5023_s22 + $0xaa] sm:$0xff]  ;;  %v10150_v12 = vld [vmem:[#allocation22_spill] sm:$0xff] }
 0x118   : >> { %10129 = vst [vmem:[#allocation74_spill] sm:$0xff] %v5522_v9  ;;  %v867_v9 = vadd.f32 %v851_v21, %v833_v24  ;;  %v5603_v24 = vld [vmem:[%s5023_s22 + $0xce] sm:$0xff] }
 0x119   : >> { %10130 = vst [vmem:[#allocation75_spill] sm:$0xff] %v5536_v10  ;;  %v1251_v10 = vmul.f32 %v10150_v12, %v5573_v62  ;;  %v1962_v52 = vadd.f32 %v5420_v25, %v1928_v59  ;;  %v1317_v25 = vld [vmem:[%s5023_s22 + $0xf] sm:$0xff] }
 0x11a   : >> { %10133 = vst [vmem:[#allocation76_spill] sm:$0xff] %v5544_v19  ;;  %v5631_v59 = vld [vmem:[%s5023_s22 + $0xca] sm:$0xff] }
 0x11b   : >> { %10134 = vst [vmem:[#allocation77_spill] sm:$0xff] %v5547_v53  ;;  %v10151_v53 = vld [vmem:[#allocation50_spill] sm:$0xff] }
 0x11c   : >> { %10138 = vst [vmem:[#allocation78_spill] sm:$0xff] %v5555_v0  ;;  %v1165_v0 = vadd.f32 %v1149_v14, %v1131_v20  ;;  %v10147_v20 = vld [vmem:[#allocation45_spill] sm:$0xff]  ;;  %v885_v54 = vmul.f32 %v5021_v29, %v10151_v53  ;;  %v1285_v53 = vmul.f32 %v5139_v23, %v5603_v24 }
 0x11d   : >> { %10139 = vst [vmem:[#allocation79_spill] sm:$0xff] %v5569_v63  ;;  %v5600_v14 = vmul.f32 %v10147_v20, %v5310_v34  ;;  %v10154_v29 = vld [vmem:[#allocation49_spill] sm:$0xff]  ;;  %v953_v63 = vmul.f32 %v5046_v39, %v5378_v42  ;;  %v10160_v42 = vld [vmem:[#allocation26_spill] sm:$0xff] }
 0x11e   : >> { %10140 = vst [vmem:[#allocation80_spill] sm:$0xff] %v5573_v62  ;;  %v1199_v21 = vadd.f32 %v1183_v8, %v1165_v0  ;;  %v5622_v8 = vld [vmem:[%s9477_s3 + $0x2f] ss:$0 sm:$0xff]  ;;  %v1500_v0 = vadd.f32 %v5406_v4, %v1466_v13  ;;  %v5627_v34 = vmul.f32 %v10154_v29, %v5579_v36  ;;  %v5640_v13 = vmul.f32 %v5595_v15, %v5606_v44  ;;  %v5645_v4 = vld [vmem:[%s9477_s3 + $0x6] ss:$0 sm:$0xff] }
 0x11f   : >> { %10141 = vst [vmem:[#allocation81_spill] sm:$0xff] %v5576_v49  ;;  %v1996_v49 = vadd.f32 %v5434_v1, %v1962_v52  ;;  %v5656_v1 = vld [vmem:[%s5023_s22 + $0xed] sm:$0xff]  ;;  %v1347_v39 = vmul.f32 %v10160_v42, %v1317_v25 }
 0x120   : >> { %10142 = vst [vmem:[#allocation82_spill] sm:$0xff] %v5579_v36  ;;  %v5660_v36 = vld [vmem:[%s5023_s22 + $0x4f] sm:$0xff] }
 0x121   : >> { %10145 = vst [vmem:[#allocation83_spill] sm:$0xff] %v5590_v32  ;;  %v10152_v32 = vld [vmem:[#allocation10_spill] sm:$0xff]  ;;  %v5676_v25 = vld [vmem:[%s5023_s22 + $0x6f] sm:$0xff] }
 0x122   : >> { %10146 = vst [vmem:[#allocation84_spill] sm:$0xff] %v5595_v15  ;;  %v919_v46 = vmul.f32 %v10152_v32, %v5342_v31  ;;  %v1233_v31 = vadd.f32 %v1217_v41, %v1199_v21  ;;  %v901_v32 = vadd.f32 %v885_v54, %v867_v9  ;;  %v1534_v41 = vadd.f32 %v5460_v7, %v1500_v0  ;;  %v5653_v54 = vld [vmem:[%s5023_s22 + $0x2f] sm:$0xff] }
 0x123   : >> { %10148 = vst [vmem:[#allocation85_spill] sm:$0xff] %v5603_v24  ;;  %v5650_v9 = vmul.f32 %v5335_v30, %v5349_v6  ;;  %v2380_v21 = vld [vmem:[%s5023_s22 + $0xb] sm:$0xff]  ;;  %v2030_v7 = vadd.f32 %v5455_v57, %v1996_v49  ;;  %v5668_v6 = vmul.f32 %v5622_v8, %v5631_v59  ;;  %v10162_v30 = vld [vmem:[#allocation55_spill] sm:$0xff]  ;;  %v1021_v49 = vmul.f32 %v5066_v47, %v5656_v1 }
 0x124   : >> { %10149 = vst [vmem:[#allocation86_spill] sm:$0xff] %v5606_v44  ;;  %v1267_v52 = vadd.f32 %v1251_v10, %v1233_v31  ;;  %v935_v15 = vadd.f32 %v919_v46, %v901_v32  ;;  %v10161_v44 = vld [vmem:[#allocation12_spill] sm:$0xff]  ;;  %v1568_v0 = vadd.f32 %v5509_v60, %v1534_v41  ;;  %v10163_v31 = vld [vmem:[#allocation53_spill] sm:$0xff]  ;;  %v10166_v32 = vld [vmem:[#allocation27_spill] sm:$0xff]  ;;  %v5687_v60 = vmul.f32 %v5645_v4, %v2380_v21 }
 0x125   : >> { %10153 = vst [vmem:[#allocation87_spill] sm:$0xff] %v5622_v8  ;;  %v987_v29 = vmul.f32 %v10161_v44, %v5409_v17  ;;  %v5673_v10 = vmul.f32 %v10163_v31, %v10162_v30  ;;  %v5679_v46 = vld [vmem:[%s5023_s22 + $0x8f] sm:$0xff]  ;;  %v1381_v17 = vmul.f32 %v10166_v32, %v5653_v54  ;;  %v2064_v44 = vadd.f32 %v5467_v33, %v2030_v7  ;;  %v10168_v30 = vld [vmem:[#allocation58_spill] sm:$0xff]  ;;  %v5708_v7 = vld [vmem:[%s9477_s3 + $0xd] ss:$0 sm:$0xff] }
 0x126   : >> { %10155 = vst [vmem:[#allocation88_spill] sm:$0xff] %v5631_v59  ;;  %v969_v57 = vadd.f32 %v953_v63, %v935_v15  ;;  %v10167_v41 = vld [vmem:[#allocation28_spill] sm:$0xff]  ;;  %v10169_v8 = vld [vmem:[#allocation54_spill] sm:$0xff]  ;;  %v1083_v21 = vmul.f32 %v5076_v51, %v5463_v3  ;;  %v5722_v51 = vld [vmem:[%s9477_s3 + $0x14] ss:$0 sm:$0xff] }
 0x127   : >> { %10156 = vst [vmem:[#allocation89_spill] sm:$0xff] %v5645_v4  ;;  %v5694_v59 = vmul.f32 %v10169_v8, %v10168_v30  ;;  %v5697_v63 = vld [vmem:[%s5023_s22 + $0xaf] sm:$0xff]  ;;  %v10173_v30 = vld [vmem:[#allocation30_spill] sm:$0xff] }
 0x128   : >> { %10157 = vst [vmem:[#allocation90_spill] sm:$0xff] %v5650_v9  ;;  %v1301_v9 = vadd.f32 %v1285_v53, %v1267_v52  ;;  %v1630_v53 = vadd.f32 %v5486_v45, %v1568_v0  ;;  %v1415_v52 = vmul.f32 %v10167_v41, %v5660_v36  ;;  %v5700_v15 = vld [vmem:[%s5023_s22 + $0xcf] sm:$0xff]  ;;  %v1003_v33 = vadd.f32 %v987_v29, %v969_v57 }
 0x129   : >> { %10158 = vst [vmem:[#allocation91_spill] sm:$0xff] %v5656_v1  ;;  %v2098_v45 = vadd.f32 %v5477_v56, %v2064_v44  ;;  %v1449_v47 = vmul.f32 %v10173_v30, %v5676_v25  ;;  %v10174_v4 = vld [vmem:[#allocation32_spill] sm:$0xff]  ;;  %v1583_v29 = vld [vmem:[%s5023_s22 + $0x10] sm:$0xff]  ;;  %v1517_v41 = vmul.f32 %v5202_v18, %v5697_v63 }
 0x12a   : >> { %10159 = vst [vmem:[#allocation92_spill] sm:$0xff] %v5660_v36  ;;  %v1363_v1 = vadd.f32 %v1347_v39, %v1301_v9  ;;  %v1664_v0 = vadd.f32 %v5513_v40, %v1630_v53  ;;  %v1483_v39 = vmul.f32 %v10174_v4, %v5679_v46  ;;  %v5717_v9 = vld [vmem:[%s5023_s22 + $0x2b] sm:$0xff]  ;;  %v1037_v57 = vadd.f32 %v1021_v49, %v1003_v33 }
 0x12b   : >> { %10164 = vst [vmem:[#allocation26_spill] sm:$0xff] %v5676_v25  ;;  %v10176_v3 = vld [vmem:[#allocation56_spill] sm:$0xff]  ;;  %v5729_v44 = vld [vmem:[%s5023_s22 + $0x30] sm:$0xff]  ;;  %v1117_v53 = vmul.f32 %v5084_v55, %v5489_v16  ;;  %v2160_v4 = vadd.f32 %v5531_v61, %v2098_v45  ;;  %v1613_v49 = vmul.f32 %v5230_v50, %v1583_v29  ;;  %v1151_v61 = vmul.f32 %v5094_v2, %v5516_v37 }
 0x12c   : >> { %10165 = vst [vmem:[#allocation93_spill] sm:$0xff] %v5679_v46  ;;  %v5726_v56 = vmul.f32 %v10176_v3, %v5412_v5  ;;  %v1397_v40 = vadd.f32 %v1381_v17, %v1363_v1  ;;  %v5735_v30 = vld [vmem:[%s5023_s22 + $0x4b] sm:$0xff]  ;;  %v1698_v46 = vadd.f32 %v5541_v28, %v1664_v0  ;;  %v1551_v17 = vmul.f32 %v5212_v26, %v5700_v15 }
 0x12d   : >> { %10170 = vst [vmem:[#allocation94_spill] sm:$0xff] %v5697_v63  ;;  %v5743_v5 = vld [vmem:[%s5023_s22 + $0x50] sm:$0xff]  ;;  %v1099_v33 = vadd.f32 %v1083_v21, %v1037_v57  ;;  %v2194_v45 = vadd.f32 %v5560_v38, %v2160_v4  ;;  %v5751_v28 = vmul.f32 %v5708_v7, %v5717_v9  ;;  %v5769_v38 = vmul.f32 %v5722_v51, %v5735_v30  ;;  %v10184_v55 = vld [vmem:[#allocation64_spill] sm:$0xff] }
 0x12e   : >> { %10171 = vst [vmem:[#allocation95_spill] sm:$0xff] %v5700_v15  ;;  %v1431_v1 = vadd.f32 %v1415_v52, %v1397_v40  ;;  %v5756_v52 = vld [vmem:[%s9477_s3 + $0x1b] ss:$0 sm:$0xff]  ;;  %v1732_v0 = vadd.f32 %v5551_v11, %v1698_v46  ;;  %v5760_v21 = vld [vmem:[%s5023_s22 + $0x70] sm:$0xff]  ;;  %v1185_v16 = vmul.f32 %v10137_v58, %v5544_v19  ;;  %v5777_v11 = vld [vmem:[%s9477_s3 + $0x22] ss:$0 sm:$0xff] }
 0x12f   : >> { %10172 = vst [vmem:[#allocation96_spill] sm:$0xff] %v5708_v7  ;;  %v10181_v29 = vld [vmem:[#allocation37_spill] sm:$0xff]  ;;  %v1133_v37 = vadd.f32 %v1117_v53, %v1099_v33  ;;  %v2228_v2 = vadd.f32 %v5564_v43, %v2194_v45  ;;  %v1681_v53 = vmul.f32 %v10132_v35, %v5743_v5  ;;  %v10190_v19 = vld [vmem:[#allocation83_spill] sm:$0xff]  ;;  %v5807_v35 = vld [vmem:[%s9477_s3 + $0x29] ss:$0 sm:$0xff] }
 0x130   : >> { %10175 = vst [vmem:[#allocation97_spill] sm:$0xff] %v5722_v51  ;;  %v1647_v40 = vmul.f32 %v10181_v29, %v5729_v44  ;;  %v5765_v57 = vld [vmem:[%s5023_s22 + $0x6b] sm:$0xff]  ;;  %v1465_v4 = vadd.f32 %v1449_v47, %v1431_v1  ;;  %v1766_v46 = vadd.f32 %v5583_v48, %v1732_v0  ;;  %v1715_v48 = vmul.f32 %v10136_v27, %v5760_v21 }
 0x131   : >> { %10177 = vst [vmem:[#allocation98_spill] sm:$0xff] %v5735_v30  ;;  %v10185_v29 = vld [vmem:[#allocation60_spill] sm:$0xff]  ;;  %v5785_v47 = vld [vmem:[%s5023_s22 + $0x90] sm:$0xff]  ;;  %v1167_v45 = vadd.f32 %v1151_v61, %v1133_v37  ;;  %v2262_v58 = vadd.f32 %v10190_v19, %v2228_v2  ;;  %v5802_v7 = vmul.f32 %v5756_v52, %v5765_v57  ;;  %v10193_v37 = vld [vmem:[#allocation66_spill] sm:$0xff] }
 0x132   : >> { %10178 = vst [vmem:[#allocation99_spill] sm:$0xff] %v5743_v5  ;;  %v5782_v51 = vmul.f32 %v10185_v29, %v10184_v55  ;;  %v5790_v43 = vld [vmem:[%s5023_s22 + $0x8b] sm:$0xff]  ;;  %v1499_v1 = vadd.f32 %v1483_v39, %v1465_v4  ;;  %v1800_v39 = vadd.f32 %v5600_v14, %v1766_v46  ;;  %v10194_v61 = vld [vmem:[#allocation63_spill] sm:$0xff]  ;;  %v1253_v14 = vmul.f32 %v10150_v12, %v5603_v24 }
 0x133   : >> { %10179 = vst [vmem:[#allocation100_spill] sm:$0xff] %v5756_v52  ;;  %v5793_v33 = vld [vmem:[%s5023_s22 + $0xb0] sm:$0xff]  ;;  %v10189_v0 = vld [vmem:[#allocation20_spill] sm:$0xff]  ;;  %v5815_v27 = vmul.f32 %v10194_v61, %v10193_v37  ;;  %v10198_v52 = vld [vmem:[#allocation43_spill] sm:$0xff]  ;;  %v2296_v46 = vadd.f32 %v5617_v22, %v2262_v58  ;;  %v5833_v37 = vmul.f32 %v5777_v11, %v5790_v43 }
 0x134   : >> { %10180 = vst [vmem:[#allocation101_spill] sm:$0xff] %v5760_v21  ;;  %v1219_v55 = vmul.f32 %v10189_v0, %v5573_v62  ;;  %v5811_v4 = vld [vmem:[%s5023_s22 + $0xe9] sm:$0xff]  ;;  %v1533_v62 = vadd.f32 %v1517_v41, %v1499_v1  ;;  %v1201_v21 = vadd.f32 %v1185_v16, %v1167_v45  ;;  %v1834_v1 = vadd.f32 %v5627_v34, %v1800_v39  ;;  %v1849_v12 = vld [vmem:[%s5023_s22 + $0x11] sm:$0xff] }
 0x135   : >> { %10182 = vst [vmem:[#allocation102_spill] sm:$0xff] %v5765_v57  ;;  %v5818_v2 = vld [vmem:[%s5023_s22 + $0xee] sm:$0xff]  ;;  %v1749_v57 = vmul.f32 %v10198_v52, %v5785_v47  ;;  %v1783_v16 = vmul.f32 %v10147_v20, %v5793_v33  ;;  %v2330_v52 = vadd.f32 %v5640_v13, %v2296_v46  ;;  %v10202_v39 = vld [vmem:[#allocation90_spill] sm:$0xff]  ;;  %v1349_v13 = vmul.f32 %v10160_v42, %v5653_v54 }
 0x136   : >> { %10183 = vst [vmem:[#allocation103_spill] sm:$0xff] %v5777_v11  ;;  %v5821_v19 = vld [vmem:[%s5023_s22 + $0xab] sm:$0xff]  ;;  %v1567_v22 = vadd.f32 %v1551_v17, %v1533_v62  ;;  %v1235_v11 = vadd.f32 %v1219_v55, %v1201_v21  ;;  %v1896_v20 = vadd.f32 %v10202_v39, %v1834_v1  ;;  %v1383_v54 = vmul.f32 %v10166_v32, %v5660_v36 }
 0x137   : >> { %10186 = vst [vmem:[#allocation104_spill] sm:$0xff] %v5785_v47  ;;  %v5824_v0 = vld [vmem:[%s5023_s22 + $0xd0] sm:$0xff]  ;;  %v5854_v34 = vmul.f32 %v5807_v35, %v5821_v19  ;;  %v10205_v62 = vld [vmem:[#allocation68_spill] sm:$0xff]  ;;  %v2364_v46 = vadd.f32 %v5668_v6, %v2330_v52  ;;  %v10212_v52 = vld [vmem:[#allocation71_spill] sm:$0xff] }
 0x138   : >> { %10187 = vst [vmem:[#allocation105_spill] sm:$0xff] %v5790_v43  ;;  %v5838_v41 = vld [vmem:[%s9477_s3 + $0x30] ss:$0 sm:$0xff]  ;;  %v1287_v43 = vmul.f32 %v5139_v23, %v5818_v2  ;;  %v1629_v55 = vadd.f32 %v1613_v49, %v1567_v22  ;;  %v5864_v21 = vld [vmem:[%s5023_s22 + $0x31] sm:$0xff]  ;;  %v1930_v39 = vadd.f32 %v5673_v10, %v1896_v20 }
 0x139   : >> { %10188 = vst [vmem:[#allocation106_spill] sm:$0xff] %v5793_v33  ;;  %v5844_v45 = vld [vmem:[%s5023_s22 + $0xcb] sm:$0xff]  ;;  %v10208_v49 = vld [vmem:[#allocation74_spill] sm:$0xff]  ;;  %v2426_v6 = vadd.f32 %v5687_v60, %v2364_v46 }
 0x13a   : >> { %10191 = vst [vmem:[#allocation83_spill] sm:$0xff] %v5807_v35  ;;  %v10201_v24 = vld [vmem:[#allocation65_spill] sm:$0xff]  ;;  %v5871_v1 = vmul.f32 %v5838_v41, %v5844_v45  ;;  %v10209_v22 = vld [vmem:[#allocation70_spill] sm:$0xff]  ;;  %v1964_v20 = vadd.f32 %v5694_v59, %v1930_v39  ;;  %v10214_v60 = vld [vmem:[#allocation28_spill] sm:$0xff] }
 0x13b   : >> { %10192 = vst [vmem:[#allocation107_spill] sm:$0xff] %v5811_v4  ;;  %v2084_v58 = vmul.f32 %v10201_v24, %v5811_v4  ;;  %v10203_v33 = vld [vmem:[#allocation49_spill] sm:$0xff]  ;;  %v1417_v46 = vmul.f32 %v10214_v60, %v5676_v25  ;;  %v2460_v59 = vadd.f32 %v5751_v28, %v2426_v6 }
 0x13c   : >> { %10195 = vst [vmem:[#allocation108_spill] sm:$0xff] %v5818_v2  ;;  %v1817_v47 = vmul.f32 %v10203_v33, %v5824_v0  ;;  %v10204_v4 = vld [vmem:[#allocation73_spill] sm:$0xff]  ;;  %v1269_v2 = vadd.f32 %v1253_v14, %v1235_v11  ;;  %v2180_v33 = vmul.f32 %v10209_v22, %v10208_v49  ;;  %v1663_v11 = vadd.f32 %v1647_v40, %v1629_v55  ;;  %v10216_v49 = vld [vmem:[#allocation75_spill] sm:$0xff] }
 0x13d   : >> { %10196 = vst [vmem:[#allocation109_spill] sm:$0xff] %v5821_v19  ;;  %v5861_v17 = vmul.f32 %v10205_v62, %v10204_v4  ;;  %v5875_v23 = vld [vmem:[%s5023_s22 + $0x51] sm:$0xff]  ;;  %v10207_v4 = vld [vmem:[#allocation51_spill] sm:$0xff]  ;;  %v1998_v39 = vadd.f32 %v5726_v56, %v1964_v20 }
 0x13e   : >> { %10197 = vst [vmem:[#allocation110_spill] sm:$0xff] %v5824_v0  ;;  %v1879_v35 = vmul.f32 %v10207_v4, %v1849_v12  ;;  %v5881_v14 = vld [vmem:[%s5023_s22 + $0x71] sm:$0xff]  ;;  %v1303_v42 = vadd.f32 %v1287_v43, %v1269_v2  ;;  %v1913_v12 = vmul.f32 %v10163_v31, %v5864_v21  ;;  %v1697_v40 = vadd.f32 %v1681_v53, %v1663_v11  ;;  %v10223_v31 = vld [vmem:[#allocation88_spill] sm:$0xff] }
 0x13f   : >> { %10199 = vst [vmem:[#allocation111_spill] sm:$0xff] %v5838_v41  ;;  %v10211_v10 = vld [vmem:[#allocation77_spill] sm:$0xff]  ;;  %v5898_v43 = vmul.f32 %v10169_v8, %v5875_v23  ;;  %v5911_v53 = vmul.f32 %v10176_v3, %v5881_v14  ;;  %v10219_v8 = vld [vmem:[#allocation86_spill] sm:$0xff]  ;;  %v2032_v60 = vadd.f32 %v5782_v51, %v1998_v39  ;;  %v10227_v39 = vld [vmem:[#allocation87_spill] sm:$0xff] }
 0x140   : >> { %10200 = vst [vmem:[#allocation112_spill] sm:$0xff] %v5844_v45  ;;  %v5889_v41 = vmul.f32 %v10212_v52, %v10211_v10  ;;  %v5894_v55 = vld [vmem:[%s5023_s22 + $0x91] sm:$0xff]  ;;  %v1365_v2 = vadd.f32 %v1349_v13, %v1303_v42  ;;  %v10220_v13 = vld [vmem:[#allocation79_spill] sm:$0xff]  ;;  %v1731_v25 = vadd.f32 %v1715_v48, %v1697_v40 }
 0x141   : >> { %10206 = vst [vmem:[#allocation65_spill] sm:$0xff] %v5875_v23  ;;  %v10215_v10 = vld [vmem:[#allocation81_spill] sm:$0xff]  ;;  %v5918_v42 = vmul.f32 %v10220_v13, %v10219_v8  ;;  %v10222_v56 = vld [vmem:[#allocation30_spill] sm:$0xff]  ;;  %v10224_v23 = vld [vmem:[#allocation84_spill] sm:$0xff]  ;;  %v5933_v8 = vmul.f32 %v10185_v29, %v5894_v55 }
 0x142   : >> { %10210 = vst [vmem:[#allocation90_spill] sm:$0xff] %v5881_v14  ;;  %v2248_v36 = vmul.f32 %v10216_v49, %v10215_v10  ;;  %v5907_v32 = vld [vmem:[%s5023_s22 + $0xb1] sm:$0xff]  ;;  %v1399_v28 = vadd.f32 %v1383_v54, %v1365_v2  ;;  %v2494_v10 = vadd.f32 %v5769_v38, %v2460_v59  ;;  %v5926_v3 = vmul.f32 %v10224_v23, %v10223_v31  ;;  %v10226_v38 = vld [vmem:[#allocation32_spill] sm:$0xff]  ;;  %v10233_v29 = vld [vmem:[#allocation11_spill] sm:$0xff] }
 0x143   : >> { %10213 = vst [vmem:[#allocation73_spill] sm:$0xff] %v5894_v55  ;;  %v5914_v11 = vld [vmem:[%s5023_s22 + $0xea] sm:$0xff]  ;;  %v1765_v48 = vadd.f32 %v1749_v57, %v1731_v25  ;;  %v5937_v54 = vmul.f32 %v10194_v61, %v5907_v32  ;;  %v1485_v51 = vmul.f32 %v10226_v38, %v5697_v63  ;;  %v2066_v59 = vadd.f32 %v5815_v27, %v2032_v60  ;;  %v10230_v57 = vld [vmem:[#allocation10_spill] sm:$0xff]  ;;  %v10232_v38 = vld [vmem:[#allocation15_spill] sm:$0xff] }
 0x144   : >> { %10217 = vst [vmem:[#allocation68_spill] sm:$0xff] %v5907_v32  ;;  %v10221_v6 = vld [vmem:[#allocation93_spill] sm:$0xff]  ;;  %v1433_v40 = vadd.f32 %v1417_v46, %v1399_v28  ;;  %v2528_v2 = vadd.f32 %v5802_v7, %v2494_v10  ;;  %v5945_v31 = vmul.f32 %v10227_v39, %v5914_v11  ;;  %v1519_v7 = vmul.f32 %v5202_v18, %v5700_v15 }
 0x145   : >> { %10218 = vst [vmem:[#allocation51_spill] sm:$0xff] %v5914_v11  ;;  %v1451_v20 = vmul.f32 %v10222_v56, %v10221_v6  ;;  %v5929_v14 = vld [vmem:[%s5023_s22 + $0xd1] sm:$0xff]  ;;  %v1799_v61 = vadd.f32 %v1783_v16, %v1765_v48  ;;  %v2100_v10 = vadd.f32 %v2084_v58, %v2066_v59  ;;  %v954_v32 = vmul.f32 %v10233_v29, %v10232_v38 }
 0x146   : >> { %10225 = vst [vmem:[#allocation70_spill] sm:$0xff] %v5929_v14  ;;  %v5948_v6 = vld [vmem:[%s5023_s22 + $0xef] sm:$0xff]  ;;  %v5954_v46 = vmul.f32 %v10201_v24, %v5929_v14  ;;  %v2562_v27 = vadd.f32 %v5833_v37, %v2528_v2  ;;  %v10231_v11 = vld [vmem:[#allocation78_spill] sm:$0xff] }
 0x147   : >> { %10228 = vst [vmem:[#allocation71_spill] sm:$0xff] %v5948_v6  ;;  %v10229_v25 = vld [vmem:[#allocation13_spill] sm:$0xff]  ;;  %v1467_v28 = vadd.f32 %v1451_v20, %v1433_v40  ;;  %v1833_v48 = vadd.f32 %v1817_v47, %v1799_v61  ;;  %v1553_v20 = vmul.f32 %v5212_v26, %v5948_v6  ;;  %v5970_v40 = vld [vmem:[%s5023_s22 + $0x105] sm:$0xff]  ;;  %v2162_v58 = vadd.f32 %v5861_v17, %v2100_v10 }
 0x148   : >> { %v920_v56 = vmul.f32 %v10230_v57, %v10229_v25  ;;  %v2115_v60 = vld [vmem:[%s5023_s22 + $0x12] sm:$0xff]  ;;  %10235 = vst [vmem:[#allocation75_spill] sm:$0xff] %v5970_v40  ;;  %v2596_v37 = vadd.f32 %v5854_v34, %v2562_v27  ;;  %v10237_v2 = vld [vmem:[#allocation12_spill] sm:$0xff]  ;;  %v1615_v47 = vmul.f32 %v5230_v50, %v5729_v44 }
 0x149   : >> { %v10234_v25 = vld [vmem:[#allocation89_spill] sm:$0xff]  ;;  %v1501_v57 = vadd.f32 %v1485_v51, %v1467_v28  ;;  %v1895_v38 = vadd.f32 %v1879_v35, %v1833_v48  ;;  %v5977_v59 = vmul.f32 %v10205_v62, %v2115_v60  ;;  %v2196_v51 = vadd.f32 %v2180_v33, %v2162_v58  ;;  %v10240_v17 = vld [vmem:[#allocation96_spill] sm:$0xff] }
 0x14a   : >> { %v936_v63 = vadd.f32 %v920_v56, %v10231_v11  ;;  %v5965_v16 = vmul.f32 %v10234_v25, %v5717_v9  ;;  %v10236_v56 = vld [vmem:[#allocation35_spill] sm:$0xff]  ;;  %v5982_v61 = vadd.f32 %v5871_v1, %v2596_v37  ;;  %v5985_v28 = vld [vmem:[%s5023_s22 + $0x32] sm:$0xff]  ;;  %v2446_v35 = vmul.f32 %v10240_v17, %v5735_v30  ;;  %v10243_v37 = vld [vmem:[#allocation40_spill] sm:$0xff] }
 0x14b   : >> { %v988_v29 = vmul.f32 %v10237_v2, %v10236_v56  ;;  %v1535_v9 = vadd.f32 %v1519_v7, %v1501_v57  ;;  %v1929_v27 = vadd.f32 %v1913_v12, %v1895_v38  ;;  %v10241_v7 = vld [vmem:[#allocation37_spill] sm:$0xff]  ;;  %v2230_v44 = vadd.f32 %v5889_v41, %v2196_v51  ;;  %v10245_v41 = vld [vmem:[#allocation36_spill] sm:$0xff]  ;;  %v10246_v38 = vld [vmem:[#allocation19_spill] sm:$0xff] }
 0x14c   : >> { %v970_v11 = vadd.f32 %v954_v32, %v936_v63  ;;  %10238 = vst [vmem:[#allocation79_spill] sm:$0xff] %v5982_v61  ;;  %v10239_v32 = vld [vmem:[#allocation14_spill] sm:$0xff]  ;;  %v1649_v60 = vmul.f32 %v10241_v7, %v5743_v5  ;;  %v2646_v50 = vsel %vm415_vm2, %v5982_v61, 0.0  ;;  %v2694_v33 = vmul.f32 %v5982_v61, %v5982_v61  ;;  %v10267_v30 = vld [vmem:[#allocation103_spill] sm:$0xff] }
 0x14d   : >> { %v1022_v63 = vmul.f32 %v10239_v32, %v5970_v40  ;;  %v1569_v10 = vadd.f32 %v1553_v20, %v1535_v9  ;;  %2647 = vadd.xlane.f32.xlu0 %v2646_v50  ;;  %v1963_v48 = vadd.f32 %v5898_v43, %v1929_v27  ;;  %v2179_v12 = vmul.f32 %v10209_v22, %v5985_v28  ;;  %v10242_v20 = vld [vmem:[#allocation101_spill] sm:$0xff]  ;;  %v10247_v9 = vld [vmem:[#allocation16_spill] sm:$0xff]  ;;  %v10256_v61 = vld [vmem:[#allocation18_spill] sm:$0xff] }
 0x14e   : >> { %v1004_v34 = vadd.f32 %v988_v29, %v970_v11  ;;  %v1683_v58 = vmul.f32 %v10243_v37, %v10242_v20  ;;  %v2264_v11 = vadd.f32 %v2248_v36, %v2230_v44  ;;  %v2710_v56 = vsel %vm415_vm2, %v2694_v33, 0.0  ;;  %v6005_v2 = vld [vmem:[%s5023_s22 + $0x52] sm:$0xff]  ;;  %v10250_v27 = vld [vmem:[#allocation104_spill] sm:$0xff] }
 0x14f   : >> { %v1631_v57 = vadd.f32 %v1615_v47, %v1569_v10  ;;  %10244 = vst [vmem:[#allocation13_spill] sm:$0xff] %v6005_v2  ;;  %v1118_v51 = vmul.f32 %v10247_v9, %v10246_v38  ;;  %v10249_v32 = vld [vmem:[#allocation97_spill] sm:$0xff]  ;;  %2711 = vadd.xlane.f32.xlu1 %v2710_v56  ;;  %v1997_v47 = vadd.f32 %v5911_v53, %v1963_v48  ;;  %v10251_v36 = vld [vmem:[#allocation42_spill] sm:$0xff]  ;;  %v10255_v9 = vld [vmem:[#allocation23_spill] sm:$0xff] }
 0x150   : >> { %v1038_v1 = vadd.f32 %v1022_v63, %v1004_v34  ;;  %v10248_v34 = vld [vmem:[#allocation102_spill] sm:$0xff]  ;;  %v1717_v10 = vmul.f32 %v10251_v36, %v10250_v27  ;;  %v2298_v50 = vadd.f32 %v5918_v42, %v2264_v11  ;;  %v2213_v53 = vmul.f32 %v10212_v52, %v6005_v2  ;;  %v6045_v20 = vld [vmem:[%s5023_s22 + $0x106] sm:$0xff] }
 0x151   : >> { %v2480_v43 = vmul.f32 %v10249_v32, %v10248_v34  ;;  %v1665_v63 = vadd.f32 %v1649_v60, %v1631_v57  ;;  %v6017_v44 = vld [vmem:[%s5023_s22 + $0x72] sm:$0xff]  ;;  %v1186_v34 = vmul.f32 %v10256_v61, %v10255_v9  ;;  %v2031_v56 = vadd.f32 %v5933_v8, %v1997_v47  ;;  %v10258_v57 = vld [vmem:[#allocation43_spill] sm:$0xff]  ;;  %v10264_v9 = vld [vmem:[#allocation20_spill] sm:$0xff]  ;;  %10266 = vst [vmem:[#allocation11_spill] sm:$0xff] %v6045_v20 }
 0x152   : >> { %v1100_v29 = vadd.f32 %v10245_v41, %v1038_v1  ;;  %10252 = vst [vmem:[#allocation10_spill] sm:$0xff] %v6017_v44  ;;  %v10253_v1 = vld [vmem:[#allocation21_spill] sm:$0xff]  ;;  %v10257_v48 = vld [vmem:[#allocation106_spill] sm:$0xff]  ;;  %v2332_v11 = vadd.f32 %v5926_v3, %v2298_v50  ;;  %v2548_v5 = vmul.f32 %v10267_v30, %v5821_v19 }
 0x153   : >> { %v10254_v41 = vld [vmem:[#allocation17_spill] sm:$0xff]  ;;  %v1699_v60 = vadd.f32 %v1683_v58, %v1665_v63  ;;  %v1751_v42 = vmul.f32 %v10258_v57, %v10257_v48  ;;  %v2065_v58 = vadd.f32 %v5937_v54, %v2031_v56  ;;  %v2247_v63 = vmul.f32 %v10216_v49, %v6017_v44 }
 0x154   : >> { %v1134_v33 = vadd.f32 %v1118_v51, %v1100_v29  ;;  %v1152_v38 = vmul.f32 %v10254_v41, %v10253_v1  ;;  %v10259_v29 = vld [vmem:[#allocation105_spill] sm:$0xff]  ;;  %v10260_v51 = vld [vmem:[#allocation100_spill] sm:$0xff] }
 0x155   : >> { %v2514_v1 = vmul.f32 %v10260_v51, %v10259_v29  ;;  %v6032_v41 = vld [vmem:[%s5023_s22 + $0x92] sm:$0xff]  ;;  %v1733_v48 = vadd.f32 %v1717_v10, %v1699_v60  ;;  %v2366_v29 = vadd.f32 %v5945_v31, %v2332_v11  ;;  %v2099_v10 = vadd.f32 %v5954_v46, %v2065_v58 }
 0x156   : >> { %10261 = vst [vmem:[#allocation78_spill] sm:$0xff] %v6032_v41  ;;  %v6035_v61 = vld [vmem:[%s5023_s22 + $0xf0] sm:$0xff]  ;;  %v1168_v8 = vadd.f32 %v1152_v38, %v1134_v33 }
 0x157   : >> { %10262 = vst [vmem:[#allocation15_spill] sm:$0xff] %v6035_v61  ;;  %v10263_v47 = vld [vmem:[#allocation25_spill] sm:$0xff]  ;;  %v1767_v31 = vadd.f32 %v1751_v42, %v1733_v48  ;;  %v2428_v6 = vadd.f32 %v5965_v16, %v2366_v29  ;;  %v2161_v58 = vadd.f32 %v5977_v59, %v2099_v10  ;;  %v1881_v48 = vmul.f32 %v10207_v4, %v5864_v21  ;;  %v10276_v16 = vld [vmem:[#allocation111_spill] sm:$0xff] }
 0x158   : >> { %v1220_v27 = vmul.f32 %v10264_v9, %v10263_v47  ;;  %v10265_v3 = vld [vmem:[#allocation45_spill] sm:$0xff]  ;;  %v1202_v38 = vadd.f32 %v1186_v34, %v1168_v8  ;;  %v10269_v47 = vld [vmem:[#allocation59_spill] sm:$0xff]  ;;  %v10270_v9 = vld [vmem:[#allocation22_spill] sm:$0xff] }
 0x159   : >> { %v1785_v50 = vmul.f32 %v10265_v3, %v5824_v0  ;;  %v6051_v33 = vld [vmem:[%s5023_s22 + $0xb2] sm:$0xff]  ;;  %v1254_v54 = vmul.f32 %v10270_v9, %v10269_v47  ;;  %v2281_v0 = vmul.f32 %v10220_v13, %v6032_v41  ;;  %v10274_v34 = vld [vmem:[#allocation83_spill] sm:$0xff]  ;;  %v10275_v9 = vld [vmem:[#allocation24_spill] sm:$0xff]  ;;  %v2462_v42 = vadd.f32 %v2446_v35, %v2428_v6 }
 0x15a   : >> { %10268 = vst [vmem:[#allocation89_spill] sm:$0xff] %v6051_v33  ;;  %v6056_v56 = vld [vmem:[%s5023_s22 + $0xeb] sm:$0xff]  ;;  %v2582_v8 = vmul.f32 %v10274_v34, %v5844_v45  ;;  %v1236_v47 = vadd.f32 %v1220_v27, %v1202_v38  ;;  %v1288_v46 = vmul.f32 %v10275_v9, %v6045_v20  ;;  %v2315_v15 = vmul.f32 %v10224_v23, %v6051_v33  ;;  %v2381_v38 = vld [vmem:[%s5023_s22 + $0x13] sm:$0xff] }
 0x15b   : >> { %10271 = vst [vmem:[#allocation35_spill] sm:$0xff] %v6056_v56  ;;  %v6060_v60 = vld [vmem:[%s5023_s22 + $0xd2] sm:$0xff]  ;;  %v1801_v40 = vadd.f32 %v1785_v50, %v1767_v31  ;;  %v2616_v29 = vmul.f32 %v10276_v16, %v6056_v56  ;;  %v2195_v9 = vadd.f32 %v2179_v12, %v2161_v58  ;;  %v2496_v3 = vadd.f32 %v2480_v43, %v2462_v42  ;;  %v10281_v6 = vld [vmem:[#allocation56_spill] sm:$0xff]  ;;  %v10287_v43 = vld [vmem:[#allocation63_spill] sm:$0xff] }
 0x15c   : >> { %10272 = vst [vmem:[#allocation12_spill] sm:$0xff] %v6060_v60  ;;  %v10273_v11 = vld [vmem:[#allocation49_spill] sm:$0xff]  ;;  %v2349_v27 = vmul.f32 %v10227_v39, %v6060_v60  ;;  %v1270_v45 = vadd.f32 %v1254_v54, %v1236_v47  ;;  %v10280_v50 = vld [vmem:[#allocation54_spill] sm:$0xff]  ;;  %v1983_v35 = vmul.f32 %v10281_v6, %v5894_v55  ;;  %v10283_v39 = vld [vmem:[#allocation27_spill] sm:$0xff]  ;;  %v2051_v42 = vmul.f32 %v10287_v43, %v5929_v14 }
 0x15d   : >> { %v1819_v19 = vmul.f32 %v10273_v11, %v6035_v61  ;;  %v10277_v59 = vld [vmem:[#allocation65_spill] sm:$0xff]  ;;  %v10279_v11 = vld [vmem:[#allocation90_spill] sm:$0xff]  ;;  %v2229_v54 = vadd.f32 %v2213_v53, %v2195_v9  ;;  %v10284_v12 = vld [vmem:[#allocation68_spill] sm:$0xff] }
 0x15e   : >> { %v10278_v10 = vld [vmem:[#allocation53_spill] sm:$0xff]  ;;  %v1949_v31 = vmul.f32 %v10280_v50, %v10279_v11  ;;  %v1304_v56 = vadd.f32 %v1288_v46, %v1270_v45  ;;  %v10285_v47 = vld [vmem:[#allocation60_spill] sm:$0xff]  ;;  %v10288_v50 = vld [vmem:[#allocation38_spill] sm:$0xff] }
 0x15f   : >> { %v1835_v61 = vadd.f32 %v1819_v19, %v1801_v40  ;;  %v1915_v20 = vmul.f32 %v10278_v10, %v10277_v59  ;;  %v6086_v21 = vld [vmem:[%s5023_s22 + $0x33] sm:$0xff]  ;;  %v2411_v19 = vmul.f32 %v10234_v25, %v2381_v38  ;;  %v2017_v58 = vmul.f32 %v10285_v47, %v10284_v12  ;;  %v10289_v45 = vld [vmem:[#allocation31_spill] sm:$0xff]  ;;  %v10290_v46 = vld [vmem:[#allocation28_spill] sm:$0xff] }
 0x160   : >> { %v10282_v57 = vld [vmem:[#allocation29_spill] sm:$0xff]  ;;  %v2530_v59 = vadd.f32 %v2514_v1, %v2496_v3  ;;  %v1366_v55 = vadd.f32 %v10288_v50, %v1304_v56  ;;  %v1418_v6 = vmul.f32 %v10290_v46, %v10289_v45  ;;  %v2445_v53 = vmul.f32 %v10240_v17, %v6086_v21  ;;  %v10291_v1 = vld [vmem:[#allocation46_spill] sm:$0xff]  ;;  %v6132_v12 = vld [vmem:[%s9477_s3 + $0xe] ss:$0 sm:$0xff] }
 0x161   : >> { %v1384_v23 = vmul.f32 %v10283_v39, %v10282_v57  ;;  %v1897_v40 = vadd.f32 %v1881_v48, %v1835_v61  ;;  %v6096_v11 = vld [vmem:[%s5023_s22 + $0xf1] sm:$0xff]  ;;  %v2263_v39 = vadd.f32 %v2247_v63, %v2229_v54  ;;  %v6108_v61 = vld [vmem:[%s9477_s3] ss:$0 sm:$0xff]  ;;  %10300 = vst [vmem:[#allocation40_spill] sm:$0xff] %v6132_v12  ;;  %v10301_v43 = vld [vmem:[#allocation52_spill] sm:$0xff] }
 0x162   : >> { %10286 = vst [vmem:[#allocation14_spill] sm:$0xff] %v6096_v11  ;;  %v819_v3 = vmul.f32 %v6108_v61, %v10291_v1  ;;  %v2564_v48 = vadd.f32 %v2548_v5, %v2530_v59  ;;  %v6113_v38 = vld [vmem:[%s5023_s22 + $0x53] sm:$0xff]  ;;  %v2085_v5 = vmul.f32 %v10201_v24, %v6096_v11 }
 0x163   : >> { %v1931_v57 = vadd.f32 %v1915_v20, %v1897_v40  ;;  %10292 = vst [vmem:[#allocation96_spill] sm:$0xff] %v6113_v38  ;;  %v1400_v56 = vadd.f32 %v1384_v23, %v1366_v55  ;;  %v10293_v9 = vld [vmem:[#allocation33_spill] sm:$0xff]  ;;  %v10294_v50 = vld [vmem:[#allocation30_spill] sm:$0xff]  ;;  %v6120_v20 = vld [vmem:[%s9477_s3 + $0x7] ss:$0 sm:$0xff]  ;;  %v2297_v45 = vadd.f32 %v2281_v0, %v2263_v39  ;;  %v887_v0 = vmul.f32 %v6132_v12, %v10301_v43 }
 0x164   : >> { %v1452_v63 = vmul.f32 %v10294_v50, %v10293_v9  ;;  %10295 = vst [vmem:[#allocation37_spill] sm:$0xff] %v6120_v20  ;;  %v10296_v54 = vld [vmem:[#allocation50_spill] sm:$0xff]  ;;  %v10297_v59 = vld [vmem:[#allocation9_spill] sm:$0xff]  ;;  %v2598_v23 = vadd.f32 %v2582_v8, %v2564_v48  ;;  %v10299_v9 = vld [vmem:[#allocation32_spill] sm:$0xff]  ;;  %v2479_v24 = vmul.f32 %v10249_v32, %v6113_v38 }
 0x165   : >> { %v853_v40 = vmul.f32 %v6120_v20, %v10296_v54  ;;  %v1965_v46 = vadd.f32 %v1949_v31, %v1931_v57  ;;  %v835_v1 = vadd.f32 %v819_v3, %v10297_v59  ;;  %v1434_v55 = vadd.f32 %v1418_v6, %v1400_v56  ;;  %v10298_v14 = vld [vmem:[#allocation34_spill] sm:$0xff]  ;;  %v6139_v57 = vld [vmem:[%s5023_s22 + $0x107] sm:$0xff]  ;;  %v6148_v43 = vld [vmem:[%s9477_s3 + $0x15] ss:$0 sm:$0xff] }
 0x166   : >> { %v1486_v50 = vmul.f32 %v10299_v9, %v10298_v14  ;;  %v2331_v31 = vadd.f32 %v2315_v15, %v2297_v45  ;;  %10302 = vst [vmem:[#allocation36_spill] sm:$0xff] %v6139_v57  ;;  %v6141_v6 = vadd.f32 %v2616_v29, %v2598_v23  ;;  %v10304_v3 = vld [vmem:[#allocation67_spill] sm:$0xff]  ;;  %v10306_v15 = vld [vmem:[#allocation57_spill] sm:$0xff]  ;;  %v6158_v29 = vld [vmem:[%s9477_s3 + $0x1c] ss:$0 sm:$0xff] }
 0x167   : >> { %v1999_v39 = vadd.f32 %v1983_v35, %v1965_v46  ;;  %v869_v8 = vadd.f32 %v853_v40, %v835_v1  ;;  %v1468_v14 = vadd.f32 %v1452_v63, %v1434_v55  ;;  %v1520_v48 = vmul.f32 %v5202_v18, %v10304_v3  ;;  %10305 = vst [vmem:[#allocation16_spill] sm:$0xff] %v6148_v43  ;;  %v6153_v54 = vld [vmem:[%s5023_s22 + $0x73] sm:$0xff] }
 0x168   : >> { %10303 = vst [vmem:[#allocation19_spill] sm:$0xff] %v6141_v6  ;;  %v921_v56 = vmul.f32 %v6148_v43, %v10306_v15  ;;  %v2365_v35 = vadd.f32 %v2349_v27, %v2331_v31  ;;  %v10309_v63 = vld [vmem:[#allocation61_spill] sm:$0xff]  ;;  %v2652_v46 = vsel %vm415_vm2, %v6141_v6, 0.0  ;;  %v2147_v1 = vmul.f32 %v10205_v62, %v5985_v28 }
 0x169   : >> { %10307 = vst [vmem:[#allocation97_spill] sm:$0xff] %v6153_v54  ;;  %v2033_v40 = vadd.f32 %v2017_v58, %v1999_v39  ;;  %v903_v45 = vadd.f32 %v887_v0, %v869_v8  ;;  %v955_v18 = vmul.f32 %v6158_v29, %v10309_v63  ;;  %v1502_v27 = vadd.f32 %v1486_v50, %v1468_v14  ;;  %v6169_v23 = vld [vmem:[%s5023_s22 + $0x10d] sm:$0xff]  ;;  %v6177_v39 = vld [vmem:[%s9477_s3 + $0x23] ss:$0 sm:$0xff] }
 0x16a   : >> { %10308 = vst [vmem:[#allocation42_spill] sm:$0xff] %v6158_v29  ;;  %v1554_v58 = vmul.f32 %v5212_v26, %v6139_v57  ;;  %2653 = vadd.xlane.f32.xlu2 %v2652_v46  ;;  %v6172_v55 = vld [vmem:[%s5023_s22 + $0x93] sm:$0xff]  ;;  %v2427_v9 = vadd.f32 %v2411_v19, %v2365_v35  ;;  %v10312_v8 = vld [vmem:[#allocation91_spill] sm:$0xff]  ;;  %v2513_v14 = vmul.f32 %v10260_v51, %v6153_v54 }
 0x16b   : >> { %10310 = vst [vmem:[#allocation21_spill] sm:$0xff] %v6172_v55  ;;  %v2067_v0 = vadd.f32 %v2051_v42, %v2033_v40  ;;  %v937_v31 = vadd.f32 %v921_v56, %v903_v45  ;;  %v989_v28 = vmul.f32 %v6177_v39, %v10312_v8  ;;  %v10313_v50 = vld [vmem:[#allocation55_spill] sm:$0xff]  ;;  %v2181_v19 = vmul.f32 %v10209_v22, %v6005_v2  ;;  %v6190_v3 = vld [vmem:[%s5023_s22 + $0xb3] sm:$0xff]  ;;  %v6195_v40 = vld [vmem:[%s9477_s3 + $0x2a] ss:$0 sm:$0xff] }
 0x16c   : >> { %10311 = vst [vmem:[#allocation17_spill] sm:$0xff] %v6177_v39  ;;  %v6183_v26 = vmul.f32 %v10207_v4, %v10313_v50  ;;  %v1536_v42 = vadd.f32 %v1520_v48, %v1502_v27  ;;  %v2461_v15 = vadd.f32 %v2445_v53, %v2427_v9  ;;  %v1023_v4 = vmul.f32 %v6195_v40, %v6169_v23  ;;  %v10316_v46 = vld [vmem:[#allocation39_spill] sm:$0xff] }
 0x16d   : >> { %10314 = vst [vmem:[#allocation23_spill] sm:$0xff] %v6190_v3  ;;  %v2101_v56 = vadd.f32 %v2085_v5, %v2067_v0  ;;  %v971_v35 = vadd.f32 %v955_v18, %v937_v31  ;;  %v2547_v45 = vmul.f32 %v10267_v30, %v6172_v55  ;;  %v2215_v48 = vmul.f32 %v10212_v52, %v6017_v44  ;;  %v6206_v5 = vld [vmem:[%s5023_s22 + $0xd3] sm:$0xff]  ;;  %v6211_v0 = vld [vmem:[%s9477_s3 + $0x1] ss:$0 sm:$0xff] }
 0x16e   : >> { %10315 = vst [vmem:[#allocation18_spill] sm:$0xff] %v6195_v40  ;;  %v1570_v63 = vadd.f32 %v1554_v58, %v1536_v42  ;;  %v1650_v53 = vmul.f32 %v10241_v7, %v10316_v46  ;;  %v2495_v18 = vadd.f32 %v2479_v24, %v2461_v15  ;;  %v10318_v31 = vld [vmem:[#allocation69_spill] sm:$0xff]  ;;  %v2581_v44 = vmul.f32 %v10274_v34, %v6190_v3  ;;  %v10319_v7 = vld [vmem:[#allocation48_spill] sm:$0xff]  ;;  %v10327_v57 = vld [vmem:[#allocation47_spill] sm:$0xff] }
 0x16f   : >> { %10317 = vst [vmem:[#allocation100_spill] sm:$0xff] %v6206_v5  ;;  %v2163_v27 = vadd.f32 %v2147_v1, %v2101_v56  ;;  %v1005_v9 = vadd.f32 %v989_v28, %v971_v35  ;;  %v1085_v50 = vmul.f32 %v6211_v0, %v10318_v31  ;;  %v2249_v58 = vmul.f32 %v10216_v49, %v6032_v41  ;;  %v10320_v46 = vld [vmem:[#allocation41_spill] sm:$0xff]  ;;  %v6228_v35 = vld [vmem:[%s9477_s3 + $0x8] ss:$0 sm:$0xff] }
 0x170   : >> { %v1632_v42 = vadd.f32 %v10319_v7, %v1570_v63  ;;  %v1684_v24 = vmul.f32 %v10243_v37, %v10320_v46  ;;  %v2529_v1 = vadd.f32 %v2513_v14, %v2495_v18  ;;  %v6223_v28 = vld [vmem:[%s5023_s22 + $0xf2] sm:$0xff]  ;;  %v10322_v31 = vld [vmem:[#allocation72_spill] sm:$0xff]  ;;  %v2615_v63 = vmul.f32 %v10276_v16, %v6206_v5 }
 0x171   : >> { %10321 = vst [vmem:[#allocation25_spill] sm:$0xff] %v6223_v28  ;;  %v2197_v15 = vadd.f32 %v2181_v19, %v2163_v27  ;;  %v1039_v56 = vadd.f32 %v1023_v4, %v1005_v9  ;;  %v1119_v2 = vmul.f32 %v6228_v35, %v10322_v31  ;;  %v2283_v37 = vmul.f32 %v10220_v13, %v6051_v33  ;;  %v10323_v18 = vld [vmem:[#allocation44_spill] sm:$0xff]  ;;  %v10326_v33 = vld [vmem:[#allocation87_spill] sm:$0xff] }
 0x172   : >> { %v1666_v14 = vadd.f32 %v1650_v53, %v1632_v42  ;;  %v1718_v19 = vmul.f32 %v10251_v36, %v10323_v18  ;;  %v2563_v4 = vadd.f32 %v2547_v45, %v2529_v1  ;;  %v6241_v7 = vld [vmem:[%s9477_s3 + $0xf] ss:$0 sm:$0xff]  ;;  %v2351_v53 = vmul.f32 %v10326_v33, %v6223_v28  ;;  %v10328_v36 = vld [vmem:[#allocation43_spill] sm:$0xff] }
 0x173   : >> { %v2231_v27 = vadd.f32 %v2215_v48, %v2197_v15  ;;  %v1101_v9 = vadd.f32 %v1085_v50, %v1039_v56  ;;  %v10324_v46 = vld [vmem:[#allocation76_spill] sm:$0xff]  ;;  %v1752_v45 = vmul.f32 %v10328_v36, %v10327_v57  ;;  %v6257_v56 = vld [vmem:[%s9477_s3 + $0x16] ss:$0 sm:$0xff]  ;;  %v2447_v57 = vmul.f32 %v10240_v17, %v6113_v38  ;;  %v6272_v36 = vld [vmem:[%s9477_s3 + $0x1d] ss:$0 sm:$0xff] }
 0x174   : >> { %v1153_v31 = vmul.f32 %v6241_v7, %v10324_v46  ;;  %v10325_v41 = vld [vmem:[#allocation84_spill] sm:$0xff]  ;;  %v1700_v42 = vadd.f32 %v1684_v24, %v1666_v14  ;;  %v2597_v48 = vadd.f32 %v2581_v44, %v2563_v4  ;;  %10330 = vst [vmem:[#allocation103_spill] sm:$0xff] %v6257_v56  ;;  %v2413_v24 = vmul.f32 %v10234_v25, %v6086_v21  ;;  %v10333_v14 = vld [vmem:[#allocation45_spill] sm:$0xff] }
 0x175   : >> { %v2317_v11 = vmul.f32 %v10325_v41, %v6060_v60  ;;  %v2265_v50 = vadd.f32 %v2249_v58, %v2231_v27  ;;  %v6252_v1 = vld [vmem:[%s5023_s22 + $0x108] sm:$0xff]  ;;  %v1135_v15 = vadd.f32 %v1119_v2, %v1101_v9  ;;  %v10332_v58 = vld [vmem:[#allocation82_spill] sm:$0xff]  ;;  %10335 = vst [vmem:[#allocation22_spill] sm:$0xff] %v6272_v36  ;;  %v2481_v38 = vmul.f32 %v10249_v32, %v6153_v54 }
 0x176   : >> { %10329 = vst [vmem:[#allocation20_spill] sm:$0xff] %v6252_v1  ;;  %v10331_v18 = vld [vmem:[#allocation80_spill] sm:$0xff]  ;;  %v1734_v44 = vadd.f32 %v1718_v19, %v1700_v42  ;;  %v1786_v4 = vmul.f32 %v10333_v14, %v10332_v58  ;;  %v6267_v27 = vadd.f32 %v2615_v63, %v2597_v48  ;;  %v10337_v42 = vld [vmem:[#allocation49_spill] sm:$0xff]  ;;  %v2515_v14 = vmul.f32 %v10260_v51, %v6172_v55 }
 0x177   : >> { %v1187_v46 = vmul.f32 %v6257_v56, %v10331_v18  ;;  %v2299_v2 = vadd.f32 %v2283_v37, %v2265_v50  ;;  %v1169_v9 = vadd.f32 %v1153_v31, %v1135_v15  ;;  %v10336_v18 = vld [vmem:[#allocation85_spill] sm:$0xff]  ;;  %v1820_v58 = vmul.f32 %v10337_v42, %v6252_v1  ;;  %v6286_v37 = vld [vmem:[%s9477_s3 + $0x24] ss:$0 sm:$0xff]  ;;  %v10339_v31 = vld [vmem:[#allocation108_spill] sm:$0xff] }
 0x178   : >> { %10334 = vst [vmem:[#allocation59_spill] sm:$0xff] %v6267_v27  ;;  %v1221_v21 = vmul.f32 %v6272_v36, %v10336_v18  ;;  %v1768_v19 = vadd.f32 %v1752_v45, %v1734_v44  ;;  %v6281_v63 = vld [vmem:[%s5023_s22 + $0x10e] sm:$0xff]  ;;  %v1255_v48 = vmul.f32 %v6286_v37, %v10339_v31  ;;  %v2649_v50 = vsel %vm415_vm2, %v6267_v27, 0.0  ;;  %v4395_v54 = vld [vmem:[%s5023_s22 + $0x65] sm:$0xff] }
 0x179   : >> { %10338 = vst [vmem:[#allocation83_spill] sm:$0xff] %v6286_v37  ;;  %v2333_v15 = vadd.f32 %v2317_v11, %v2299_v2  ;;  %v2695_v45 = vmul.f32 %v6267_v27, %v6267_v27  ;;  %v1203_v44 = vadd.f32 %v1187_v46, %v1169_v9  ;;  %2650 = vadd.xlane.f32.xlu0 %v2649_v50  ;;  %v6304_v46 = vld [vmem:[%s9477_s3 + $0x2b] ss:$0 sm:$0xff]  ;;  %v10366_v1 = vld [vmem:[#allocation95_spill] sm:$0xff] }
 0x17a   : >> { %v2696_v18 = vmul.f32 %v6141_v6, %v6141_v6  ;;  %v1802_v42 = vadd.f32 %v1786_v4, %v1768_v19  ;;  %v820_v28 = vmul.f32 %v4395_v54, %v6108_v61  ;;  %10340 = vst [vmem:[#allocation24_spill] sm:$0xff] %v6304_v46  ;;  %v1289_v9 = vmul.f32 %v6304_v46, %v6281_v63  ;;  %v10341_v4 = vld [vmem:[#allocation58_spill] sm:$0xff]  ;;  %v10344_v6 = vld [vmem:[#allocation92_spill] sm:$0xff] }
 0x17b   : >> { %v2367_v60 = vadd.f32 %v2351_v53, %v2333_v15  ;;  %v2713_v11 = vsel %vm415_vm2, %v2695_v45, 0.0  ;;  %v1237_v2 = vadd.f32 %v1221_v21, %v1203_v44  ;;  %v1916_v19 = vmul.f32 %v10278_v10, %v10341_v4  ;;  %v6312_v53 = vld [vmem:[%s5023_s22 + $0x85] sm:$0xff]  ;;  %v6319_v44 = vld [vmem:[%s9477_s3 + $0x2] ss:$0 sm:$0xff]  ;;  %v10347_v4 = vld [vmem:[#allocation54_spill] sm:$0xff] }
 0x17c   : >> { %2714 = vadd.xlane.f32.xlu1 %v2713_v11  ;;  %v1836_v50 = vadd.f32 %v1820_v58, %v1802_v42  ;;  %v836_v54 = vadd.f32 %v820_v28, %v10297_v59  ;;  %10342 = vst [vmem:[#allocation111_spill] sm:$0xff] %v6312_v53  ;;  %v854_v21 = vmul.f32 %v6312_v53, %v6120_v20  ;;  %v6324_v42 = vld [vmem:[%s5023_s22 + $0xa5] sm:$0xff]  ;;  %v10346_v11 = vld [vmem:[#allocation62_spill] sm:$0xff] }
 0x17d   : >> { %v2429_v15 = vadd.f32 %v2413_v24, %v2367_v60  ;;  %v1271_v45 = vadd.f32 %v1255_v48, %v1237_v2  ;;  %10343 = vst [vmem:[#allocation53_spill] sm:$0xff] %v6319_v44  ;;  %v1351_v58 = vmul.f32 %v6319_v44, %v10344_v6  ;;  %v888_v10 = vmul.f32 %v6324_v42, %v6132_v12  ;;  %v6332_v48 = vld [vmem:[%s5023_s22 + $0xc5] sm:$0xff] }
 0x17e   : >> { %10345 = vst [vmem:[#allocation29_spill] sm:$0xff] %v6324_v42  ;;  %v1898_v28 = vadd.f32 %v6183_v26, %v1836_v50  ;;  %v1950_v60 = vmul.f32 %v10347_v4, %v10346_v11  ;;  %v870_v24 = vadd.f32 %v854_v21, %v836_v54  ;;  %v922_v2 = vmul.f32 %v6332_v48, %v6148_v43  ;;  %v6340_v42 = vld [vmem:[%s9477_s3 + $0x9] ss:$0 sm:$0xff]  ;;  %v10350_v26 = vld [vmem:[#allocation26_spill] sm:$0xff] }
 0x17f   : >> { %10348 = vst [vmem:[#allocation27_spill] sm:$0xff] %v6332_v48  ;;  %v2463_v27 = vadd.f32 %v2447_v57, %v2429_v15  ;;  %v2716_v6 = vsel %vm415_vm2, %v2696_v18, 0.0  ;;  %v1305_v53 = vadd.f32 %v1289_v9, %v1271_v45  ;;  %v1385_v50 = vmul.f32 %v6340_v42, %v10350_v26  ;;  %v10351_v21 = vld [vmem:[#allocation64_spill] sm:$0xff]  ;;  %v6356_v45 = vld [vmem:[%s9477_s3 + $0x10] ss:$0 sm:$0xff] }
 0x180   : >> { %10349 = vst [vmem:[#allocation60_spill] sm:$0xff] %v6340_v42  ;;  %v1932_v54 = vadd.f32 %v1916_v19, %v1898_v28  ;;  %v10352_v11 = vld [vmem:[#allocation56_spill] sm:$0xff]  ;;  %v904_v55 = vadd.f32 %v888_v10, %v870_v24  ;;  %v2549_v9 = vmul.f32 %v10267_v30, %v6190_v3  ;;  %v10355_v19 = vld [vmem:[#allocation93_spill] sm:$0xff] }
 0x181   : >> { %v1984_v4 = vmul.f32 %v10352_v11, %v10351_v21  ;;  %v6347_v48 = vld [vmem:[%s5023_s22 + $0xe5] sm:$0xff]  ;;  %v2497_v18 = vadd.f32 %v2481_v38, %v2463_v27  ;;  %v1367_v15 = vadd.f32 %v1351_v58, %v1305_v53  ;;  %10354 = vst [vmem:[#allocation31_spill] sm:$0xff] %v6356_v45  ;;  %v1419_v28 = vmul.f32 %v6356_v45, %v10355_v19  ;;  %v6364_v24 = vld [vmem:[%s5023_s22 + $0xf3] sm:$0xff] }
 0x182   : >> { %10353 = vst [vmem:[#allocation38_spill] sm:$0xff] %v6347_v48  ;;  %v956_v57 = vmul.f32 %v6347_v48, %v6158_v29  ;;  %v6361_v10 = vld [vmem:[%s5023_s22 + $0x125] sm:$0xff]  ;;  %2717 = vadd.xlane.f32.xlu0 %v2716_v6  ;;  %v1966_v26 = vadd.f32 %v1950_v60, %v1932_v54  ;;  %v10358_v21 = vld [vmem:[#allocation66_spill] sm:$0xff]  ;;  %v938_v27 = vadd.f32 %v922_v2, %v904_v55  ;;  %v6378_v6 = vld [vmem:[%s9477_s3 + $0x17] ss:$0 sm:$0xff] }
 0x183   : >> { %10356 = vst [vmem:[#allocation28_spill] sm:$0xff] %v6361_v10  ;;  %v2018_v38 = vmul.f32 %v10285_v47, %v10358_v21  ;;  %v10359_v11 = vld [vmem:[#allocation75_spill] sm:$0xff]  ;;  %v2531_v58 = vadd.f32 %v2515_v14, %v2497_v18  ;;  %v2583_v48 = vmul.f32 %v10274_v34, %v6206_v5  ;;  %v6373_v3 = vld [vmem:[%s5023_s22 + $0x109] sm:$0xff]  ;;  %v1401_v19 = vadd.f32 %v1385_v50, %v1367_v15  ;;  %v10362_v60 = vld [vmem:[#allocation94_spill] sm:$0xff] }
 0x184   : >> { %10357 = vst [vmem:[#allocation46_spill] sm:$0xff] %v6364_v24  ;;  %v990_v53 = vmul.f32 %v6177_v39, %v10359_v11  ;;  %v1453_v47 = vmul.f32 %v6378_v6, %v10362_v60  ;;  %v2000_v55 = vadd.f32 %v1984_v4, %v1966_v26  ;;  %v10363_v2 = vld [vmem:[#allocation107_spill] sm:$0xff]  ;;  %v972_v18 = vadd.f32 %v956_v57, %v938_v27  ;;  %v6391_v5 = vld [vmem:[%s9477_s3 + $0x1e] ss:$0 sm:$0xff]  ;;  %v6398_v57 = vld [vmem:[%s9477_s3 + $0x2e] ss:$0 sm:$0xff] }
 0x185   : >> { %10360 = vst [vmem:[#allocation33_spill] sm:$0xff] %v6373_v3  ;;  %v10364_v54 = vld [vmem:[#allocation63_spill] sm:$0xff]  ;;  %v1024_v21 = vmul.f32 %v6195_v40, %v6361_v10  ;;  %v2565_v11 = vadd.f32 %v2549_v9, %v2531_v58  ;;  %v2617_v50 = vmul.f32 %v10276_v16, %v6364_v24  ;;  %v1435_v15 = vadd.f32 %v1419_v28, %v1401_v19  ;;  %v6403_v27 = vld [vmem:[%s5023_s22 + $0x10f] sm:$0xff] }
 0x186   : >> { %10361 = vst [vmem:[#allocation30_spill] sm:$0xff] %v6378_v6  ;;  %v2052_v14 = vmul.f32 %v10364_v54, %v10363_v2  ;;  %v1487_v4 = vmul.f32 %v6391_v5, %v10366_v1  ;;  %v2034_v26 = vadd.f32 %v2018_v38, %v2000_v55  ;;  %v2086_v9 = vmul.f32 %v6398_v57, %v6373_v3  ;;  %v4407_v58 = vld [vmem:[%s5023_s22 + $0x66] sm:$0xff]  ;;  %v6410_v1 = vld [vmem:[%s9477_s3 + $0x25] ss:$0 sm:$0xff]  ;;  %v10371_v54 = vld [vmem:[#allocation74_spill] sm:$0xff] }
 0x187   : >> { %10365 = vst [vmem:[#allocation50_spill] sm:$0xff] %v6391_v5  ;;  %v1006_v28 = vadd.f32 %v990_v53, %v972_v18  ;;  %v1086_v19 = vmul.f32 %v4407_v58, %v6211_v0  ;;  %v2599_v60 = vadd.f32 %v2583_v48, %v2565_v11  ;;  %v1469_v2 = vadd.f32 %v1453_v47, %v1435_v15  ;;  %v10370_v38 = vld [vmem:[#allocation71_spill] sm:$0xff]  ;;  %v6426_v11 = vld [vmem:[%s9477_s3 + $0x2c] ss:$0 sm:$0xff] }
 0x188   : >> { %10367 = vst [vmem:[#allocation34_spill] sm:$0xff] %v6398_v57  ;;  %v1521_v55 = vmul.f32 %v6410_v1, %v10370_v38  ;;  %v2148_v10 = vmul.f32 %v10205_v62, %v10371_v54  ;;  %v2068_v24 = vadd.f32 %v2052_v14, %v2034_v26  ;;  %v6417_v53 = vld [vmem:[%s5023_s22 + $0x86] sm:$0xff]  ;;  %v1555_v15 = vmul.f32 %v6426_v11, %v6403_v27  ;;  %v10374_v14 = vld [vmem:[#allocation77_spill] sm:$0xff] }
 0x189   : >> { %10368 = vst [vmem:[#allocation32_spill] sm:$0xff] %v6403_v27  ;;  %v1040_v3 = vadd.f32 %v1024_v21, %v1006_v28  ;;  %v1120_v48 = vmul.f32 %v6417_v53, %v6228_v35  ;;  %v6421_v18 = vadd.f32 %v2617_v50, %v2599_v60  ;;  %v1503_v47 = vadd.f32 %v1487_v4, %v1469_v2  ;;  %v6433_v28 = vld [vmem:[%s5023_s22 + $0xa6] sm:$0xff] }
 0x18a   : >> { %10369 = vst [vmem:[#allocation52_spill] sm:$0xff] %v6410_v1  ;;  %v2102_v62 = vadd.f32 %v2086_v9, %v2068_v24  ;;  %v2182_v21 = vmul.f32 %v10209_v22, %v10374_v14  ;;  %v1154_v50 = vmul.f32 %v6433_v28, %v6241_v7  ;;  %v6444_v24 = vld [vmem:[%s9477_s3 + $0x3] ss:$0 sm:$0xff]  ;;  %v6451_v14 = vld [vmem:[%s5023_s22 + $0xc6] sm:$0xff] }
 0x18b   : >> { %10372 = vst [vmem:[#allocation67_spill] sm:$0xff] %v6417_v53  ;;  %v1102_v26 = vadd.f32 %v1086_v19, %v1040_v3  ;;  %v2655_v4 = vsel %vm415_vm2, %v6421_v18, 0.0  ;;  %v2697_v58 = vmul.f32 %v6421_v18, %v6421_v18  ;;  %v1537_v60 = vadd.f32 %v1521_v55, %v1503_v47  ;;  %v10377_v22 = vld [vmem:[#allocation99_spill] sm:$0xff]  ;;  %v10378_v19 = vld [vmem:[#allocation81_spill] sm:$0xff]  ;;  %v10380_v47 = vld [vmem:[#allocation98_spill] sm:$0xff] }
 0x18c   : >> { %10373 = vst [vmem:[#allocation57_spill] sm:$0xff] %v6421_v18  ;;  %v1617_v3 = vmul.f32 %v6444_v24, %v10377_v22  ;;  %2656 = vadd.xlane.f32.xlu2 %v2655_v4  ;;  %v2164_v9 = vadd.f32 %v2148_v10, %v2102_v62  ;;  %v2216_v2 = vmul.f32 %v10212_v52, %v10378_v19  ;;  %v6466_v52 = vld [vmem:[%s9477_s3 + $0xa] ss:$0 sm:$0xff]  ;;  %v10383_v10 = vld [vmem:[#allocation101_spill] sm:$0xff] }
 0x18d   : >> { %10375 = vst [vmem:[#allocation61_spill] sm:$0xff] %v6433_v28  ;;  %v1136_v54 = vadd.f32 %v1120_v48, %v1102_v26  ;;  %v1188_v55 = vmul.f32 %v6451_v14, %v6257_v56  ;;  %v6457_v18 = vmul.f32 %v10234_v25, %v10380_v47  ;;  %v6460_v28 = vld [vmem:[%s5023_s22 + $0x10a] sm:$0xff]  ;;  %v2719_v4 = vsel %vm415_vm2, %v2697_v58, 0.0  ;;  %v10384_v26 = vld [vmem:[#allocation86_spill] sm:$0xff] }
 0x18e   : >> { %10376 = vst [vmem:[#allocation91_spill] sm:$0xff] %v6444_v24  ;;  %v1571_v22 = vadd.f32 %v1555_v15, %v1537_v60  ;;  %v1651_v48 = vmul.f32 %v6466_v52, %v10383_v10  ;;  %v2198_v62 = vadd.f32 %v2182_v21, %v2164_v9  ;;  %v2250_v19 = vmul.f32 %v10216_v49, %v10384_v26  ;;  %v6473_v47 = vld [vmem:[%s5023_s22 + $0xe6] sm:$0xff]  ;;  %v6484_v49 = vld [vmem:[%s9477_s3 + $0x11] ss:$0 sm:$0xff] }
 0x18f   : >> { %10379 = vst [vmem:[#allocation55_spill] sm:$0xff] %v6451_v14  ;;  %2720 = vadd.xlane.f32.xlu1 %v2719_v4  ;;  %v1170_v25 = vadd.f32 %v1154_v50, %v1136_v54  ;;  %v1222_v15 = vmul.f32 %v6473_v47, %v6272_v36  ;;  %v10386_v58 = vld [vmem:[#allocation88_spill] sm:$0xff]  ;;  %v10387_v14 = vld [vmem:[#allocation51_spill] sm:$0xff]  ;;  %v2352_v4 = vmul.f32 %v10326_v33, %v6460_v28 }
 0x190   : >> { %10381 = vst [vmem:[#allocation39_spill] sm:$0xff] %v6460_v28  ;;  %v2284_v60 = vmul.f32 %v10220_v13, %v10386_v58  ;;  %v2318_v53 = vmul.f32 %v10325_v41, %v10387_v14  ;;  %v1633_v10 = vadd.f32 %v1617_v3, %v1571_v22  ;;  %v10389_v21 = vld [vmem:[#allocation104_spill] sm:$0xff]  ;;  %v2232_v54 = vadd.f32 %v2216_v2, %v2198_v62  ;;  %v10391_v26 = vld [vmem:[#allocation11_spill] sm:$0xff]  ;;  %v6498_v14 = vld [vmem:[%s9477_s3 + $0x18] ss:$0 sm:$0xff] }
 0x191   : >> { %10382 = vst [vmem:[#allocation69_spill] sm:$0xff] %v6466_v52  ;;  %v1685_v50 = vmul.f32 %v6484_v49, %v10389_v21  ;;  %v6489_v9 = vld [vmem:[%s5023_s22 + $0x126] sm:$0xff]  ;;  %v1204_v13 = vadd.f32 %v1188_v55, %v1170_v25  ;;  %v1256_v41 = vmul.f32 %v6286_v37, %v10391_v26  ;;  %v10393_v22 = vld [vmem:[#allocation106_spill] sm:$0xff] }
 0x192   : >> { %10385 = vst [vmem:[#allocation48_spill] sm:$0xff] %v6473_v47  ;;  %v1667_v3 = vadd.f32 %v1651_v48, %v1633_v10  ;;  %v1719_v58 = vmul.f32 %v6498_v14, %v10393_v22  ;;  %v4418_v21 = vld [vmem:[%s5023_s22 + $0x6d] sm:$0xff]  ;;  %v2266_v55 = vadd.f32 %v2250_v19, %v2232_v54  ;;  %v6515_v25 = vld [vmem:[%s9477_s3 + $0x1f] ss:$0 sm:$0xff]  ;;  %v6524_v19 = vld [vmem:[%s9477_s3 + $0x26] ss:$0 sm:$0xff] }
 0x193   : >> { %10388 = vst [vmem:[#allocation41_spill] sm:$0xff] %v6484_v49  ;;  %v821_v2 = vmul.f32 %v4418_v21, %v6108_v61  ;;  %v6505_v62 = vld [vmem:[%s5023_s22 + $0x8d] sm:$0xff]  ;;  %v10397_v10 = vld [vmem:[#allocation110_spill] sm:$0xff]  ;;  %v1238_v22 = vadd.f32 %v1222_v15, %v1204_v13  ;;  %v1290_v21 = vmul.f32 %v6304_v46, %v6489_v9  ;;  %v10399_v54 = vld [vmem:[#allocation15_spill] sm:$0xff] }
 0x194   : >> { %10390 = vst [vmem:[#allocation72_spill] sm:$0xff] %v6489_v9  ;;  %v855_v33 = vmul.f32 %v6505_v62, %v6120_v20  ;;  %v6510_v48 = vld [vmem:[%s5023_s22 + $0x110] sm:$0xff]  ;;  %v1753_v26 = vmul.f32 %v6515_v25, %v10397_v10  ;;  %v1701_v47 = vadd.f32 %v1685_v50, %v1667_v3  ;;  %v1787_v28 = vmul.f32 %v6524_v19, %v10399_v54  ;;  %v10401_v10 = vld [vmem:[#allocation102_spill] sm:$0xff]  ;;  %v4423_v9 = vld [vmem:[%s5023_s22 + $0x67] sm:$0xff] }
 0x195   : >> { %10392 = vst [vmem:[#allocation44_spill] sm:$0xff] %v6498_v14  ;;  %v837_v27 = vadd.f32 %v821_v2, %v10297_v59  ;;  %v6530_v38 = vld [vmem:[%s5023_s22 + $0xad] sm:$0xff]  ;;  %v2300_v13 = vadd.f32 %v2284_v60, %v2266_v55  ;;  %v2448_v50 = vmul.f32 %v10240_v17, %v10401_v10  ;;  %v1272_v3 = vadd.f32 %v1256_v41, %v1238_v22 }
 0x196   : >> { %10394 = vst [vmem:[#allocation76_spill] sm:$0xff] %v6505_v62  ;;  %v889_v15 = vmul.f32 %v6530_v38, %v6132_v12  ;;  %v1352_v20 = vmul.f32 %v4423_v9, %v6319_v44  ;;  %v1735_v62 = vadd.f32 %v1719_v58, %v1701_v47  ;;  %v6541_v54 = vld [vmem:[%s9477_s3 + $0x2d] ss:$0 sm:$0xff]  ;;  %v6553_v47 = vld [vmem:[%s9477_s3 + $0x4] ss:$0 sm:$0xff]  ;;  %v10405_v9 = vld [vmem:[#allocation65_spill] sm:$0xff] }
 0x197   : >> { %10395 = vst [vmem:[#allocation84_spill] sm:$0xff] %v6510_v48  ;;  %v1821_v2 = vmul.f32 %v6541_v54, %v6510_v48  ;;  %v871_v59 = vadd.f32 %v855_v33, %v837_v27  ;;  %v6546_v12 = vld [vmem:[%s5023_s22 + $0xcd] sm:$0xff]  ;;  %v2334_v60 = vadd.f32 %v2318_v53, %v2300_v13  ;;  %v1883_v41 = vmul.f32 %v6553_v47, %v10405_v9  ;;  %v6569_v9 = vld [vmem:[%s9477_s3 + $0xb] ss:$0 sm:$0xff] }
 0x198   : >> { %10396 = vst [vmem:[#allocation87_spill] sm:$0xff] %v6515_v25  ;;  %v923_v17 = vmul.f32 %v6546_v12, %v6148_v43  ;;  %v1306_v58 = vadd.f32 %v1290_v21, %v1272_v3  ;;  %v6558_v55 = vld [vmem:[%s5023_s22 + $0x87] sm:$0xff]  ;;  %v10407_v33 = vld [vmem:[#allocation105_spill] sm:$0xff]  ;;  %v1769_v10 = vadd.f32 %v1753_v26, %v1735_v62  ;;  %v957_v13 = vmul.f32 %v6158_v29, %v10312_v8  ;;  %v10408_v21 = vld [vmem:[#allocation90_spill] sm:$0xff] }
 0x199   : >> { %10398 = vst [vmem:[#allocation47_spill] sm:$0xff] %v6524_v19  ;;  %v1386_v27 = vmul.f32 %v6558_v55, %v6340_v42  ;;  %v2482_v22 = vmul.f32 %v10249_v32, %v10407_v33  ;;  %v905_v53 = vadd.f32 %v889_v15, %v871_v59  ;;  %v2368_v48 = vadd.f32 %v2352_v4, %v2334_v60  ;;  %v6579_v59 = vld [vmem:[%s5023_s22 + $0x12d] sm:$0xff] }
 0x19a   : >> { %10400 = vst [vmem:[#allocation43_spill] sm:$0xff] %v6530_v38  ;;  %v1917_v3 = vmul.f32 %v6569_v9, %v10408_v21  ;;  %v1368_v43 = vadd.f32 %v1352_v20, %v1306_v58  ;;  %v10411_v8 = vld [vmem:[#allocation109_spill] sm:$0xff]  ;;  %v1803_v62 = vadd.f32 %v1787_v28, %v1769_v10  ;;  %v991_v15 = vmul.f32 %v6177_v39, %v6169_v23  ;;  %v10415_v28 = vld [vmem:[#allocation112_spill] sm:$0xff] }
 0x19b   : >> { %10402 = vst [vmem:[#allocation80_spill] sm:$0xff] %v6541_v54  ;;  %v2516_v4 = vmul.f32 %v10260_v51, %v10411_v8  ;;  %v939_v26 = vadd.f32 %v923_v17, %v905_v53  ;;  %v2430_v60 = vadd.f32 %v6457_v18, %v2368_v48  ;;  %v6589_v20 = vld [vmem:[%s9477_s3 + $0x12] ss:$0 sm:$0xff]  ;;  %v2550_v17 = vmul.f32 %v10267_v30, %v10415_v28  ;;  %v6613_v39 = vld [vmem:[%s5023_s22 + $0xe7] sm:$0xff] }
 0x19c   : >> { %10403 = vst [vmem:[#allocation82_spill] sm:$0xff] %v6546_v12  ;;  %v10413_v58 = vld [vmem:[#allocation73_spill] sm:$0xff]  ;;  %v1402_v21 = vadd.f32 %v1386_v27, %v1368_v43  ;;  %v1837_v18 = vadd.f32 %v1821_v2, %v1803_v62  ;;  %v1025_v10 = vmul.f32 %v6195_v40, %v6579_v59  ;;  %v6608_v43 = vld [vmem:[%s9477_s3 + $0x19] ss:$0 sm:$0xff]  ;;  %v10418_v27 = vld [vmem:[#allocation68_spill] sm:$0xff]  ;;  %v1488_v30 = vmul.f32 %v6613_v39, %v6391_v5 }
 0x19d   : >> { %10404 = vst [vmem:[#allocation45_spill] sm:$0xff] %v6553_v47  ;;  %v1951_v33 = vmul.f32 %v6589_v20, %v10413_v58  ;;  %v973_v48 = vadd.f32 %v957_v13, %v939_v26  ;;  %v6603_v53 = vld [vmem:[%s5023_s22 + $0x10b] sm:$0xff]  ;;  %v2464_v8 = vadd.f32 %v2448_v50, %v2430_v60  ;;  %v1985_v58 = vmul.f32 %v6608_v43, %v10418_v27  ;;  %v10420_v2 = vld [vmem:[#allocation35_spill] sm:$0xff] }
 0x19e   : >> { %10406 = vst [vmem:[#allocation85_spill] sm:$0xff] %v6558_v55  ;;  %v6574_v55 = vld [vmem:[%s5023_s22 + $0xa7] sm:$0xff]  ;;  %v2584_v13 = vmul.f32 %v10274_v34, %v10420_v2  ;;  %v1899_v62 = vadd.f32 %v1883_v41, %v1837_v18 }
 0x19f   : >> { %10409 = vst [vmem:[#allocation49_spill] sm:$0xff] %v6574_v55  ;;  %v1420_v32 = vmul.f32 %v6574_v55, %v6356_v45  ;;  %v6594_v55 = vld [vmem:[%s5023_s22 + $0xc7] sm:$0xff]  ;;  %v1007_v26 = vadd.f32 %v991_v15, %v973_v48  ;;  %v2498_v40 = vadd.f32 %v2482_v22, %v2464_v8  ;;  %v2618_v15 = vmul.f32 %v10276_v16, %v6603_v53 }
 0x1a0   : >> { %10410 = vst [vmem:[#allocation108_spill] sm:$0xff] %v6579_v59  ;;  %v1454_v51 = vmul.f32 %v6594_v55, %v6378_v6  ;;  %v6620_v50 = vld [vmem:[%s5023_s22 + $0x127] sm:$0xff]  ;;  %v6625_v59 = vld [vmem:[%s5023_s22 + $0x111] sm:$0xff]  ;;  %v1933_v48 = vadd.f32 %v1917_v3, %v1899_v62 }
 0x1a1   : >> { %10412 = vst [vmem:[#allocation58_spill] sm:$0xff] %v6589_v20  ;;  %v4434_v60 = vld [vmem:[%s5023_s22 + $0x6e] sm:$0xff]  ;;  %v1041_v22 = vadd.f32 %v1025_v10, %v1007_v26  ;;  %v1556_v16 = vmul.f32 %v6426_v11, %v6620_v50  ;;  %v2087_v10 = vmul.f32 %v6398_v57, %v6625_v59 }
 0x1a2   : >> { %10414 = vst [vmem:[#allocation92_spill] sm:$0xff] %v6594_v55  ;;  %v1436_v55 = vadd.f32 %v1420_v32, %v1402_v21  ;;  %v1087_v28 = vmul.f32 %v4434_v60, %v6211_v0  ;;  %v6630_v32 = vld [vmem:[%s9477_s3 + $0x20] ss:$0 sm:$0xff]  ;;  %v10423_v21 = vld [vmem:[#allocation70_spill] sm:$0xff]  ;;  %v10424_v41 = vld [vmem:[#allocation36_spill] sm:$0xff]  ;;  %v2532_v60 = vadd.f32 %v2516_v4, %v2498_v40  ;;  %v1967_v3 = vadd.f32 %v1951_v33, %v1933_v48 }
 0x1a3   : >> { %10416 = vst [vmem:[#allocation62_spill] sm:$0xff] %v6603_v53  ;;  %v2019_v27 = vmul.f32 %v6630_v32, %v10423_v21  ;;  %v1522_v18 = vmul.f32 %v6410_v1, %v10424_v41  ;;  %v6639_v8 = vld [vmem:[%s5023_s22 + $0x8e] sm:$0xff]  ;;  %v6646_v21 = vld [vmem:[%s9477_s3 + $0x27] ss:$0 sm:$0xff] }
 0x1a4   : >> { %10417 = vst [vmem:[#allocation54_spill] sm:$0xff] %v6608_v43  ;;  %v1470_v34 = vadd.f32 %v1454_v51, %v1436_v55  ;;  %v1121_v2 = vmul.f32 %v6639_v8, %v6228_v35  ;;  %v10425_v55 = vld [vmem:[#allocation14_spill] sm:$0xff]  ;;  %v1103_v62 = vadd.f32 %v1087_v28, %v1041_v22  ;;  %v6655_v26 = vld [vmem:[%s5023_s22 + $0xae] sm:$0xff]  ;;  %v2566_v4 = vadd.f32 %v2550_v17, %v2532_v60 }
 0x1a5   : >> { %10419 = vst [vmem:[#allocation26_spill] sm:$0xff] %v6613_v39  ;;  %v2053_v51 = vmul.f32 %v6646_v21, %v10425_v55  ;;  %v1155_v40 = vmul.f32 %v6655_v26, %v6241_v7  ;;  %v4440_v48 = vld [vmem:[%s5023_s22 + $0x68] sm:$0xff]  ;;  %v2001_v22 = vadd.f32 %v1985_v58, %v1967_v3  ;;  %v10430_v17 = vld [vmem:[#allocation10_spill] sm:$0xff]  ;;  %v6683_v58 = vld [vmem:[%s9477_s3 + $0x13] ss:$0 sm:$0xff] }
 0x1a6   : >> { %10421 = vst [vmem:[#allocation64_spill] sm:$0xff] %v6620_v50  ;;  %v1504_v41 = vadd.f32 %v1488_v30, %v1470_v34  ;;  %v6662_v30 = vld [vmem:[%s9477_s3 + $0x5] ss:$0 sm:$0xff]  ;;  %v10428_v34 = vld [vmem:[#allocation13_spill] sm:$0xff]  ;;  %v1618_v28 = vmul.f32 %v4440_v48, %v6444_v24  ;;  %v6671_v39 = vld [vmem:[%s9477_s3 + $0xc] ss:$0 sm:$0xff]  ;;  %v1137_v53 = vadd.f32 %v1121_v2, %v1103_v62 }
 0x1a7   : >> { %10422 = vst [vmem:[#allocation56_spill] sm:$0xff] %v6625_v59  ;;  %v2149_v50 = vmul.f32 %v6662_v30, %v10428_v34  ;;  %v2183_v60 = vmul.f32 %v6671_v39, %v10430_v17  ;;  %v6676_v59 = vld [vmem:[%s5023_s22 + $0xce] sm:$0xff]  ;;  %v10433_v3 = vld [vmem:[#allocation78_spill] sm:$0xff]  ;;  %v2035_v62 = vadd.f32 %v2019_v27, %v2001_v22 }
 0x1a8   : >> { %10426 = vst [vmem:[#allocation93_spill] sm:$0xff] %v6655_v26  ;;  %v1538_v33 = vadd.f32 %v1522_v18, %v1504_v41  ;;  %v1189_v18 = vmul.f32 %v6676_v59, %v6257_v56  ;;  %v2600_v41 = vadd.f32 %v2584_v13, %v2566_v4  ;;  %v2217_v34 = vmul.f32 %v6683_v58, %v10433_v3  ;;  %v6688_v17 = vld [vmem:[%s5023_s22 + $0x88] sm:$0xff] }
 0x1a9   : >> { %10427 = vst [vmem:[#allocation66_spill] sm:$0xff] %v6662_v30  ;;  %v1652_v2 = vmul.f32 %v6688_v17, %v6466_v52  ;;  %v6693_v55 = vld [vmem:[%s5023_s22 + $0xa8] sm:$0xff]  ;;  %v1171_v4 = vadd.f32 %v1155_v40, %v1137_v53  ;;  %v1223_v56 = vmul.f32 %v6272_v36, %v10339_v31  ;;  %v2069_v31 = vadd.f32 %v2053_v51, %v2035_v62 }
 0x1aa   : >> { %10429 = vst [vmem:[#allocation75_spill] sm:$0xff] %v6671_v39  ;;  %v1572_v48 = vadd.f32 %v1556_v16, %v1538_v33  ;;  %v1686_v13 = vmul.f32 %v6693_v55, %v6484_v49  ;;  %v6699_v39 = vadd.f32 %v2618_v15, %v2600_v41  ;;  %v6704_v16 = vld [vmem:[%s9477_s3 + $0x1a] ss:$0 sm:$0xff]  ;;  %v10438_v33 = vld [vmem:[#allocation89_spill] sm:$0xff]  ;;  %v6709_v27 = vld [vmem:[%s5023_s22 + $0x128] sm:$0xff] }
 0x1ab   : >> { %10431 = vst [vmem:[#allocation94_spill] sm:$0xff] %v6676_v59  ;;  %v2251_v3 = vmul.f32 %v6704_v16, %v10438_v33  ;;  %v6717_v40 = vld [vmem:[%s5023_s22 + $0x12e] sm:$0xff]  ;;  %v1257_v33 = vmul.f32 %v6286_v37, %v6281_v63  ;;  %v2103_v62 = vadd.f32 %v2087_v10, %v2069_v31  ;;  %v6739_v37 = vld [vmem:[%s9477_s3 + $0x21] ss:$0 sm:$0xff] }
 0x1ac   : >> { %10432 = vst [vmem:[#allocation107_spill] sm:$0xff] %v6683_v58  ;;  %v1634_v22 = vadd.f32 %v1618_v28, %v1572_v48  ;;  %v6720_v15 = vld [vmem:[%s5023_s22 + $0xe8] sm:$0xff]  ;;  %v2658_v28 = vsel %vm415_vm2, %v6699_v39, 0.0  ;;  %v2698_v48 = vmul.f32 %v6699_v39, %v6699_v39 }
 0x1ad   : >> { %10434 = vst [vmem:[#allocation63_spill] sm:$0xff] %v6688_v17  ;;  %v6712_v17 = vld [vmem:[%s5023_s22 + $0xc8] sm:$0xff]  ;;  %v1754_v41 = vmul.f32 %v6720_v15, %v6515_v25  ;;  %2659 = vadd.xlane.f32.xlu2 %v2658_v28  ;;  %v6747_v28 = vld [vmem:[%s5023_s22 + $0x112] sm:$0xff] }
 0x1ae   : >> { %10435 = vst [vmem:[#allocation95_spill] sm:$0xff] %v6693_v55  ;;  %v1720_v53 = vmul.f32 %v6712_v17, %v6498_v14  ;;  %v1205_v55 = vadd.f32 %v1189_v18, %v1171_v4  ;;  %v10443_v36 = vld [vmem:[#allocation20_spill] sm:$0xff]  ;;  %v1822_v18 = vmul.f32 %v6541_v54, %v6709_v27 }
 0x1af   : >> { %10436 = vst [vmem:[#allocation74_spill] sm:$0xff] %v6699_v39  ;;  %v1788_v51 = vmul.f32 %v6524_v19, %v10443_v36  ;;  %v10445_v39 = vld [vmem:[#allocation12_spill] sm:$0xff]  ;;  %v2722_v36 = vsel %vm415_vm2, %v2698_v48, 0.0 }
 0x1b0   : >> { %10437 = vst [vmem:[#allocation77_spill] sm:$0xff] %v6704_v16  ;;  %v1239_v4 = vadd.f32 %v1223_v56, %v1205_v55  ;;  %v4450_v10 = vld [vmem:[%s5023_s22 + $0x69] sm:$0xff]  ;;  %v2165_v56 = vadd.f32 %v2149_v50, %v2103_v62  ;;  %2723 = vadd.xlane.f32.xlu1 %v2722_v36 }
 0x1b1   : >> { %10439 = vst [vmem:[#allocation99_spill] sm:$0xff] %v6709_v27  ;;  %v1884_v31 = vmul.f32 %v4450_v10, %v6553_v47  ;;  %v4451_v27 = vld [vmem:[%s5023_s22 + $0x6f] sm:$0xff] }
 0x1b2   : >> { %10440 = vst [vmem:[#allocation81_spill] sm:$0xff] %v6712_v17  ;;  %v1668_v17 = vadd.f32 %v1652_v2, %v1634_v22  ;;  %v2285_v2 = vmul.f32 %v6739_v37, %v10445_v39  ;;  %v1273_v55 = vadd.f32 %v1257_v33, %v1239_v4  ;;  %v10447_v54 = vld [vmem:[#allocation76_spill] sm:$0xff]  ;;  %v10450_v62 = vld [vmem:[#allocation37_spill] sm:$0xff] }
 0x1b3   : >> { %10441 = vst [vmem:[#allocation98_spill] sm:$0xff] %v6717_v40  ;;  %v6756_v39 = vld [vmem:[%s9477_s3 + $0x28] ss:$0 sm:$0xff]  ;;  %v6761_v50 = vld [vmem:[%s5023_s22 + $0x8f] sm:$0xff] }
 0x1b4   : >> { %10442 = vst [vmem:[#allocation101_spill] sm:$0xff] %v6720_v15  ;;  %v1291_v15 = vmul.f32 %v6304_v46, %v6717_v40  ;;  %v1702_v22 = vadd.f32 %v1686_v13, %v1668_v17  ;;  %v1353_v46 = vmul.f32 %v4451_v27, %v6319_v44  ;;  %v823_v40 = vmul.f32 %v10447_v54, %v6108_v61  ;;  %v10449_v17 = vld [vmem:[#allocation25_spill] sm:$0xff]  ;;  %v10452_v44 = vld [vmem:[#allocation40_spill] sm:$0xff] }
 0x1b5   : >> { %10444 = vst [vmem:[#allocation86_spill] sm:$0xff] %v6739_v37  ;;  %v2319_v13 = vmul.f32 %v6756_v39, %v10449_v17  ;;  %v1387_v33 = vmul.f32 %v6761_v50, %v6340_v42  ;;  %v857_v27 = vmul.f32 %v6530_v38, %v10450_v62  ;;  %v2199_v54 = vadd.f32 %v2183_v60, %v2165_v56  ;;  %v10451_v36 = vld [vmem:[#allocation9_spill] sm:$0xff] }
 0x1b6   : >> { %10446 = vst [vmem:[#allocation88_spill] sm:$0xff] %v6747_v28  ;;  %v1736_v48 = vadd.f32 %v1720_v53, %v1702_v22  ;;  %v1307_v4 = vadd.f32 %v1291_v15, %v1273_v55  ;;  %v839_v10 = vadd.f32 %v823_v40, %v10451_v36  ;;  %v891_v47 = vmul.f32 %v6546_v12, %v10452_v44  ;;  %v6773_v53 = vld [vmem:[%s9477_s3 + $0x2f] ss:$0 sm:$0xff] }
 0x1b7   : >> { %10448 = vst [vmem:[#allocation51_spill] sm:$0xff] %v6756_v39  ;;  %v2353_v22 = vmul.f32 %v6773_v53, %v6747_v28  ;;  %v6778_v42 = vld [vmem:[%s5023_s22 + $0x89] sm:$0xff]  ;;  %v2233_v56 = vadd.f32 %v2217_v34, %v2199_v54 }
 0x1b8   : >> { %10453 = vst [vmem:[#allocation104_spill] sm:$0xff] %v6773_v53  ;;  %v1770_v17 = vadd.f32 %v1754_v41, %v1736_v48  ;;  %v1918_v60 = vmul.f32 %v6778_v42, %v6569_v9  ;;  %v6783_v40 = vld [vmem:[%s5023_s22 + $0xaf] sm:$0xff]  ;;  %v1369_v55 = vadd.f32 %v1353_v46, %v1307_v4  ;;  %v873_v12 = vadd.f32 %v857_v27, %v839_v10  ;;  %v6795_v41 = vld [vmem:[%s9477_s3 + $0x6] ss:$0 sm:$0xff] }
 0x1b9   : >> { %10454 = vst [vmem:[#allocation11_spill] sm:$0xff] %v6778_v42  ;;  %v1421_v15 = vmul.f32 %v6783_v40, %v6356_v45  ;;  %v6788_v38 = vld [vmem:[%s5023_s22 + $0xed] sm:$0xff]  ;;  %v2267_v54 = vadd.f32 %v2251_v3, %v2233_v56 }
 0x1ba   : >> { %10455 = vst [vmem:[#allocation106_spill] sm:$0xff] %v6783_v40  ;;  %v10457_v44 = vld [vmem:[#allocation16_spill] sm:$0xff]  ;;  %v1804_v53 = vadd.f32 %v1788_v51, %v1770_v17  ;;  %v1403_v4 = vadd.f32 %v1387_v33, %v1369_v55  ;;  %v907_v10 = vadd.f32 %v891_v47, %v873_v12  ;;  %v10463_v17 = vld [vmem:[#allocation97_spill] sm:$0xff]  ;;  %v10465_v12 = vld [vmem:[#allocation71_spill] sm:$0xff] }
 0x1bb   : >> { %10456 = vst [vmem:[#allocation110_spill] sm:$0xff] %v6788_v38  ;;  %v925_v28 = vmul.f32 %v6788_v38, %v10457_v44  ;;  %v10459_v48 = vld [vmem:[#allocation96_spill] sm:$0xff]  ;;  %v959_v38 = vmul.f32 %v6158_v29, %v6169_v23  ;;  %v1489_v47 = vmul.f32 %v6391_v5, %v10465_v12  ;;  %v2301_v33 = vadd.f32 %v2285_v2, %v2267_v54  ;;  %v10474_v5 = vld [vmem:[#allocation18_spill] sm:$0xff] }
 0x1bc   : >> { %10458 = vst [vmem:[#allocation102_spill] sm:$0xff] %v6795_v41  ;;  %v2415_v42 = vmul.f32 %v6795_v41, %v10459_v48  ;;  %v6800_v45 = vld [vmem:[%s5023_s22 + $0xa9] sm:$0xff]  ;;  %v1437_v55 = vadd.f32 %v1421_v15, %v1403_v4 }
 0x1bd   : >> { %10460 = vst [vmem:[#allocation65_spill] sm:$0xff] %v6800_v45  ;;  %v1952_v46 = vmul.f32 %v6800_v45, %v6589_v20  ;;  %v6805_v34 = vld [vmem:[%s5023_s22 + $0xcf] sm:$0xff]  ;;  %v6814_v51 = vld [vmem:[%s9477_s3 + $0xd] ss:$0 sm:$0xff]  ;;  %v1838_v45 = vadd.f32 %v1822_v18, %v1804_v53  ;;  %v2335_v15 = vadd.f32 %v2319_v13, %v2301_v33 }
 0x1be   : >> { %10461 = vst [vmem:[#allocation105_spill] sm:$0xff] %v6805_v34  ;;  %v1455_v27 = vmul.f32 %v6805_v34, %v6378_v6  ;;  %v2449_v48 = vmul.f32 %v6814_v51, %v10463_v17  ;;  %v6819_v41 = vld [vmem:[%s5023_s22 + $0xc9] sm:$0xff]  ;;  %v941_v6 = vadd.f32 %v925_v28, %v907_v10  ;;  %v6836_v18 = vld [vmem:[%s9477_s3 + $0x14] ss:$0 sm:$0xff] }
 0x1bf   : >> { %10462 = vst [vmem:[#allocation90_spill] sm:$0xff] %v6814_v51  ;;  %v1986_v3 = vmul.f32 %v6819_v41, %v6608_v43  ;;  %v6826_v23 = vld [vmem:[%s5023_s22 + $0x14d] sm:$0xff]  ;;  %v1900_v51 = vadd.f32 %v1884_v31, %v1838_v45  ;;  %v6855_v45 = vld [vmem:[%s9477_s3 + $0x1b] ss:$0 sm:$0xff]  ;;  %v10476_v31 = vld [vmem:[#allocation23_spill] sm:$0xff] }
 0x1c0   : >> { %10464 = vst [vmem:[#allocation109_spill] sm:$0xff] %v6819_v41  ;;  %v6829_v56 = vld [vmem:[%s5023_s22 + $0x12f] sm:$0xff]  ;;  %v1471_v10 = vadd.f32 %v1455_v27, %v1437_v55  ;;  %v1027_v43 = vmul.f32 %v10474_v5, %v6826_v23  ;;  %v1089_v55 = vmul.f32 %v6639_v8, %v6211_v0 }
 0x1c1   : >> { %10466 = vst [vmem:[#allocation73_spill] sm:$0xff] %v6826_v23  ;;  %v10468_v29 = vld [vmem:[#allocation108_spill] sm:$0xff]  ;;  %v10469_v34 = vld [vmem:[#allocation17_spill] sm:$0xff]  ;;  %v1557_v27 = vmul.f32 %v6426_v11, %v6829_v56  ;;  %v6868_v23 = vld [vmem:[%s9477_s3 + $0x22] ss:$0 sm:$0xff] }
 0x1c2   : >> { %10467 = vst [vmem:[#allocation112_spill] sm:$0xff] %v6829_v56  ;;  %v993_v17 = vmul.f32 %v10469_v34, %v10468_v29  ;;  %v10470_v53 = vld [vmem:[#allocation21_spill] sm:$0xff]  ;;  %v10472_v54 = vld [vmem:[#allocation32_spill] sm:$0xff]  ;;  %v975_v29 = vadd.f32 %v959_v38, %v941_v6  ;;  %v2369_v6 = vadd.f32 %v2353_v22, %v2335_v15  ;;  %v1505_v38 = vadd.f32 %v1489_v47, %v1471_v10 }
 0x1c3   : >> { %v2483_v41 = vmul.f32 %v6836_v18, %v10470_v53  ;;  %v6841_v12 = vld [vmem:[%s5023_s22 + $0xe9] sm:$0xff]  ;;  %v1523_v28 = vmul.f32 %v6410_v1, %v10472_v54  ;;  %10475 = vst [vmem:[#allocation70_spill] sm:$0xff] %v6855_v45  ;;  %v2517_v53 = vmul.f32 %v6855_v45, %v10476_v31  ;;  %v6877_v47 = vld [vmem:[%s5023_s22 + $0x113] sm:$0xff]  ;;  %v1123_v10 = vmul.f32 %v6655_v26, %v6228_v35 }
 0x1c4   : >> { %10471 = vst [vmem:[#allocation68_spill] sm:$0xff] %v6841_v12  ;;  %v2020_v2 = vmul.f32 %v6841_v12, %v6630_v32  ;;  %v6848_v4 = vld [vmem:[%s5023_s22 + $0x129] sm:$0xff]  ;;  %v1934_v12 = vadd.f32 %v1918_v60, %v1900_v51  ;;  %v1009_v33 = vadd.f32 %v993_v17, %v975_v29  ;;  %v2431_v17 = vadd.f32 %v2415_v42, %v2369_v6 }
 0x1c5   : >> { %10473 = vst [vmem:[#allocation35_spill] sm:$0xff] %v6848_v4  ;;  %v10477_v1 = vld [vmem:[#allocation33_spill] sm:$0xff]  ;;  %v10479_v31 = vld [vmem:[#allocation100_spill] sm:$0xff]  ;;  %v2088_v51 = vmul.f32 %v6398_v57, %v6848_v4  ;;  %v1539_v8 = vadd.f32 %v1523_v28, %v1505_v38 }
 0x1c6   : >> { %v2054_v13 = vmul.f32 %v6646_v21, %v10477_v1  ;;  %10478 = vst [vmem:[#allocation36_spill] sm:$0xff] %v6868_v23  ;;  %v2551_v60 = vmul.f32 %v6868_v23, %v10479_v31  ;;  %v1968_v1 = vadd.f32 %v1952_v46, %v1934_v12  ;;  %v4467_v22 = vld [vmem:[%s5023_s22 + $0x70] sm:$0xff]  ;;  %v1043_v15 = vadd.f32 %v1027_v43, %v1009_v33  ;;  %v6884_v31 = vld [vmem:[%s9477_s3 + $0x29] ss:$0 sm:$0xff]  ;;  %v10482_v46 = vld [vmem:[#allocation46_spill] sm:$0xff] }
 0x1c7   : >> { %v1619_v29 = vmul.f32 %v4467_v22, %v6444_v24  ;;  %10480 = vst [vmem:[#allocation13_spill] sm:$0xff] %v6877_v47  ;;  %v2585_v12 = vmul.f32 %v6884_v31, %v10482_v46  ;;  %v4469_v22 = vld [vmem:[%s5023_s22 + $0x6a] sm:$0xff]  ;;  %v2465_v28 = vadd.f32 %v2449_v48, %v2431_v17  ;;  %v1573_v6 = vadd.f32 %v1557_v27, %v1539_v8  ;;  %v10485_v48 = vld [vmem:[#allocation75_spill] sm:$0xff] }
 0x1c8   : >> { %10481 = vst [vmem:[#allocation10_spill] sm:$0xff] %v6884_v31  ;;  %v2002_v4 = vadd.f32 %v1986_v3, %v1968_v1  ;;  %v2150_v24 = vmul.f32 %v4469_v22, %v6662_v30  ;;  %v6891_v42 = vld [vmem:[%s5023_s22 + $0x90] sm:$0xff]  ;;  %v1105_v38 = vadd.f32 %v1089_v55, %v1043_v15  ;;  %v1157_v33 = vmul.f32 %v6676_v59, %v6241_v7 }
 0x1c9   : >> { %v1653_v43 = vmul.f32 %v6891_v42, %v6466_v52  ;;  %v6900_v3 = vld [vmem:[%s9477_s3 + $0x30] ss:$0 sm:$0xff]  ;;  %v2499_v8 = vadd.f32 %v2483_v41, %v2465_v28  ;;  %v1635_v15 = vadd.f32 %v1619_v29, %v1573_v6 }
 0x1ca   : >> { %10483 = vst [vmem:[#allocation78_spill] sm:$0xff] %v6900_v3  ;;  %v2619_v1 = vmul.f32 %v6900_v3, %v6877_v47  ;;  %v2036_v22 = vadd.f32 %v2020_v2, %v2002_v4  ;;  %v6905_v26 = vld [vmem:[%s5023_s22 + $0x8a] sm:$0xff]  ;;  %v1139_v59 = vadd.f32 %v1123_v10, %v1105_v38  ;;  %v10488_v47 = vld [vmem:[#allocation103_spill] sm:$0xff] }
 0x1cb   : >> { %10484 = vst [vmem:[#allocation89_spill] sm:$0xff] %v6905_v26  ;;  %v2184_v27 = vmul.f32 %v6905_v26, %v10485_v48  ;;  %v6910_v55 = vld [vmem:[%s5023_s22 + $0xb0] sm:$0xff]  ;;  %v2533_v28 = vadd.f32 %v2517_v53, %v2499_v8 }
 0x1cc   : >> { %10486 = vst [vmem:[#allocation20_spill] sm:$0xff] %v6910_v55  ;;  %v1687_v17 = vmul.f32 %v6910_v55, %v6484_v49  ;;  %v6915_v46 = vld [vmem:[%s5023_s22 + $0xee] sm:$0xff]  ;;  %v2070_v4 = vadd.f32 %v2054_v13, %v2036_v22  ;;  %v1669_v13 = vadd.f32 %v1653_v43, %v1635_v15  ;;  %v1173_v38 = vadd.f32 %v1157_v33, %v1139_v59  ;;  %v10493_v22 = vld [vmem:[#allocation22_spill] sm:$0xff] }
 0x1cd   : >> { %10487 = vst [vmem:[#allocation12_spill] sm:$0xff] %v6915_v46  ;;  %v1191_v2 = vmul.f32 %v6915_v46, %v10488_v47  ;;  %v6920_v3 = vld [vmem:[%s5023_s22 + $0xaa] sm:$0xff]  ;;  %v1225_v46 = vmul.f32 %v10493_v22, %v6281_v63  ;;  %v2567_v8 = vadd.f32 %v2551_v60, %v2533_v28  ;;  %v10498_v63 = vld [vmem:[#allocation98_spill] sm:$0xff] }
 0x1ce   : >> { %10489 = vst [vmem:[#allocation76_spill] sm:$0xff] %v6920_v3  ;;  %v2218_v26 = vmul.f32 %v6920_v3, %v6683_v58  ;;  %v6925_v52 = vld [vmem:[%s5023_s22 + $0xca] sm:$0xff]  ;;  %v2104_v3 = vadd.f32 %v2088_v51, %v2070_v4  ;;  %v1703_v43 = vadd.f32 %v1687_v17, %v1669_v13  ;;  %v10499_v51 = vld [vmem:[#allocation83_spill] sm:$0xff] }
 0x1cf   : >> { %10490 = vst [vmem:[#allocation37_spill] sm:$0xff] %v6925_v52  ;;  %v2252_v41 = vmul.f32 %v6925_v52, %v6704_v16  ;;  %v6930_v29 = vld [vmem:[%s5023_s22 + $0xd0] sm:$0xff]  ;;  %v10495_v16 = vld [vmem:[#allocation15_spill] sm:$0xff]  ;;  %v10496_v55 = vld [vmem:[#allocation84_spill] sm:$0xff]  ;;  %v1207_v33 = vadd.f32 %v1191_v2, %v1173_v38  ;;  %v1259_v15 = vmul.f32 %v10499_v51, %v10498_v63 }
 0x1d0   : >> { %10491 = vst [vmem:[#allocation9_spill] sm:$0xff] %v6930_v29  ;;  %v1721_v10 = vmul.f32 %v6930_v29, %v6498_v14  ;;  %v6935_v6 = vld [vmem:[%s5023_s22 + $0x130] sm:$0xff]  ;;  %v1755_v58 = vmul.f32 %v6515_v25, %v10495_v16  ;;  %v1789_v53 = vmul.f32 %v6524_v19, %v10496_v55  ;;  %v2166_v4 = vadd.f32 %v2150_v24, %v2104_v3  ;;  %v10500_v14 = vld [vmem:[#allocation39_spill] sm:$0xff]  ;;  %v10505_v24 = vld [vmem:[#allocation24_spill] sm:$0xff] }
 0x1d1   : >> { %10492 = vst [vmem:[#allocation16_spill] sm:$0xff] %v6935_v6  ;;  %v6940_v49 = vld [vmem:[%s5023_s22 + $0xea] sm:$0xff]  ;;  %v10502_v25 = vld [vmem:[#allocation111_spill] sm:$0xff]  ;;  %v2601_v19 = vadd.f32 %v2585_v12, %v2567_v8  ;;  %v1241_v2 = vadd.f32 %v1225_v46, %v1207_v33 }
 0x1d2   : >> { %10494 = vst [vmem:[#allocation96_spill] sm:$0xff] %v6940_v49  ;;  %v2286_v52 = vmul.f32 %v6940_v49, %v6739_v37  ;;  %v6949_v59 = vld [vmem:[%s5023_s22 + $0x14e] sm:$0xff]  ;;  %v2320_v49 = vmul.f32 %v6756_v39, %v10500_v14  ;;  %v822_v29 = vmul.f32 %v10502_v25, %v6108_v61  ;;  %v1737_v60 = vadd.f32 %v1721_v10, %v1703_v43 }
 0x1d3   : >> { %10497 = vst [vmem:[#allocation97_spill] sm:$0xff] %v6949_v59  ;;  %v10501_v37 = vld [vmem:[#allocation80_spill] sm:$0xff]  ;;  %v4479_v17 = vld [vmem:[%s5023_s22 + $0x71] sm:$0xff]  ;;  %v2200_v63 = vadd.f32 %v2184_v27, %v2166_v4  ;;  %v1293_v3 = vmul.f32 %v10505_v24, %v6949_v59  ;;  %v1275_v46 = vadd.f32 %v1259_v15, %v1241_v2 }
 0x1d4   : >> { %v1823_v16 = vmul.f32 %v10501_v37, %v6935_v6  ;;  %v10503_v28 = vld [vmem:[#allocation45_spill] sm:$0xff]  ;;  %v838_v14 = vadd.f32 %v822_v29, %v10451_v36  ;;  %v6969_v6 = vadd.f32 %v2619_v1, %v2601_v19  ;;  %v1771_v61 = vadd.f32 %v1755_v58, %v1737_v60  ;;  %v10509_v33 = vld [vmem:[#allocation40_spill] sm:$0xff]  ;;  %v10510_v29 = vld [vmem:[#allocation27_spill] sm:$0xff] }
 0x1d5   : >> { %v1885_v13 = vmul.f32 %v4479_v17, %v10503_v28  ;;  %v6962_v38 = vld [vmem:[%s5023_s22 + $0x12a] sm:$0xff]  ;;  %v2234_v10 = vadd.f32 %v2218_v26, %v2200_v63  ;;  %v890_v4 = vmul.f32 %v10510_v29, %v10509_v33 }
 0x1d6   : >> { %10504 = vst [vmem:[#allocation71_spill] sm:$0xff] %v6962_v38  ;;  %v10506_v39 = vld [vmem:[#allocation29_spill] sm:$0xff]  ;;  %v2661_v19 = vsel %vm415_vm2, %v6969_v6, 0.0  ;;  %v2699_v58 = vmul.f32 %v6969_v6, %v6969_v6  ;;  %v1805_v15 = vadd.f32 %v1789_v53, %v1771_v61  ;;  %v10514_v53 = vld [vmem:[#allocation38_spill] sm:$0xff] }
 0x1d7   : >> { %v856_v37 = vmul.f32 %v10506_v39, %v10450_v62  ;;  %10507 = vst [vmem:[#allocation17_spill] sm:$0xff] %v6969_v6  ;;  %v6972_v25 = vld [vmem:[%s5023_s22 + $0x91] sm:$0xff]  ;;  %v10511_v62 = vld [vmem:[#allocation104_spill] sm:$0xff]  ;;  %2662 = vadd.xlane.f32.xlu0 %v2661_v19  ;;  %v2268_v26 = vadd.f32 %v2252_v41, %v2234_v10  ;;  %v924_v61 = vmul.f32 %v10514_v53, %v10457_v44 }
 0x1d8   : >> { %v1919_v12 = vmul.f32 %v6972_v25, %v6569_v9  ;;  %v10508_v27 = vld [vmem:[#allocation53_spill] sm:$0xff]  ;;  %v2354_v1 = vmul.f32 %v10511_v62, %v6962_v38  ;;  %v2725_v17 = vsel %vm415_vm2, %v2699_v58, 0.0  ;;  %v1839_v2 = vadd.f32 %v1823_v16, %v1805_v15  ;;  %v7002_v16 = vld [vmem:[%s5023_s22 + $0x105] sm:$0xff]  ;;  %v10519_v19 = vld [vmem:[#allocation42_spill] sm:$0xff] }
 0x1d9   : >> { %v1355_v8 = vmul.f32 %v6761_v50, %v10508_v27  ;;  %v872_v43 = vadd.f32 %v856_v37, %v838_v14  ;;  %v1309_v50 = vadd.f32 %v1293_v3, %v1275_v46  ;;  %v10512_v37 = vld [vmem:[#allocation60_spill] sm:$0xff]  ;;  %v6990_v14 = vld [vmem:[%s5023_s22 + $0xb1] sm:$0xff]  ;;  %2726 = vadd.xlane.f32.xlu2 %v2725_v17  ;;  %v2302_v41 = vadd.f32 %v2286_v52, %v2268_v26  ;;  %v10515_v46 = vld [vmem:[#allocation31_spill] sm:$0xff] }
 0x1da   : >> { %v1389_v63 = vmul.f32 %v6783_v40, %v10512_v37  ;;  %10513 = vst [vmem:[#allocation21_spill] sm:$0xff] %v6990_v14  ;;  %v1953_v33 = vmul.f32 %v6990_v14, %v6589_v20  ;;  %v10516_v10 = vld [vmem:[#allocation105_spill] sm:$0xff]  ;;  %v958_v58 = vmul.f32 %v7002_v16, %v10519_v19  ;;  %v10520_v6 = vld [vmem:[#allocation102_spill] sm:$0xff]  ;;  %v1901_v59 = vadd.f32 %v1885_v13, %v1839_v2  ;;  %v10521_v17 = vld [vmem:[#allocation28_spill] sm:$0xff] }
 0x1db   : >> { %v906_v60 = vadd.f32 %v890_v4, %v872_v43  ;;  %v1371_v3 = vadd.f32 %v1355_v8, %v1309_v50  ;;  %v1423_v43 = vmul.f32 %v10516_v10, %v10515_v46  ;;  %v6999_v4 = vld [vmem:[%s5023_s22 + $0x145] sm:$0xff]  ;;  %10518 = vst [vmem:[#allocation18_spill] sm:$0xff] %v7002_v16  ;;  %v992_v52 = vmul.f32 %v10469_v34, %v10521_v17  ;;  %v7011_v26 = vld [vmem:[%s5023_s22 + $0xd1] sm:$0xff] }
 0x1dc   : >> { %10517 = vst [vmem:[#allocation32_spill] sm:$0xff] %v6999_v4  ;;  %v4483_v15 = vld [vmem:[%s5023_s22 + $0x6b] sm:$0xff]  ;;  %v2336_v8 = vadd.f32 %v2320_v49, %v2302_v41  ;;  %v10523_v50 = vld [vmem:[#allocation54_spill] sm:$0xff]  ;;  %v1935_v2 = vadd.f32 %v1919_v12, %v1901_v59 }
 0x1dd   : >> { %v2416_v40 = vmul.f32 %v4483_v15, %v10520_v6  ;;  %v940_v44 = vadd.f32 %v924_v61, %v906_v60  ;;  %10522 = vst [vmem:[#allocation23_spill] sm:$0xff] %v7011_v26  ;;  %v1987_v10 = vmul.f32 %v7011_v26, %v10523_v50  ;;  %v1405_v38 = vadd.f32 %v1389_v63, %v1371_v3  ;;  %v7016_v20 = vld [vmem:[%s5023_s22 + $0xef] sm:$0xff]  ;;  %v10525_v19 = vld [vmem:[#allocation30_spill] sm:$0xff] }
 0x1de   : >> { %10524 = vst [vmem:[#allocation33_spill] sm:$0xff] %v7016_v20  ;;  %v1457_v15 = vmul.f32 %v7016_v20, %v10525_v19  ;;  %v7021_v13 = vld [vmem:[%s5023_s22 + $0x8b] sm:$0xff]  ;;  %v10527_v60 = vld [vmem:[#allocation90_spill] sm:$0xff]  ;;  %v1026_v61 = vmul.f32 %v10474_v5, %v6999_v4  ;;  %v2370_v41 = vadd.f32 %v2354_v1, %v2336_v8  ;;  %v1969_v59 = vadd.f32 %v1953_v33, %v1935_v2  ;;  %v10533_v1 = vld [vmem:[#allocation67_spill] sm:$0xff] }
 0x1df   : >> { %10526 = vst [vmem:[#allocation100_spill] sm:$0xff] %v7021_v13  ;;  %v2450_v34 = vmul.f32 %v7021_v13, %v10527_v60  ;;  %v974_v49 = vadd.f32 %v958_v58, %v940_v44  ;;  %v10528_v50 = vld [vmem:[#allocation14_spill] sm:$0xff]  ;;  %v1439_v3 = vadd.f32 %v1423_v43, %v1405_v38  ;;  %v7032_v20 = vld [vmem:[%s5023_s22 + $0xab] sm:$0xff]  ;;  %v1088_v58 = vmul.f32 %v10533_v1, %v6211_v0 }
 0x1e0   : >> { %v2021_v63 = vmul.f32 %v6630_v32, %v10528_v50  ;;  %v10529_v26 = vld [vmem:[#allocation50_spill] sm:$0xff]  ;;  %10530 = vst [vmem:[#allocation103_spill] sm:$0xff] %v7032_v20  ;;  %v2484_v14 = vmul.f32 %v7032_v20, %v6836_v18  ;;  %v7040_v12 = vld [vmem:[%s5023_s22 + $0x14f] sm:$0xff]  ;;  %v2432_v44 = vadd.f32 %v2416_v40, %v2370_v41  ;;  %v2003_v2 = vadd.f32 %v1987_v10, %v1969_v59 }
 0x1e1   : >> { %v1491_v17 = vmul.f32 %v10529_v26, %v10472_v54  ;;  %v7037_v13 = vld [vmem:[%s5023_s22 + $0x131] sm:$0xff]  ;;  %10532 = vst [vmem:[#allocation15_spill] sm:$0xff] %v7040_v12  ;;  %v1008_v5 = vadd.f32 %v992_v52, %v974_v49  ;;  %v10534_v38 = vld [vmem:[#allocation56_spill] sm:$0xff]  ;;  %v1473_v54 = vadd.f32 %v1457_v15, %v1439_v3  ;;  %v1559_v3 = vmul.f32 %v6426_v11, %v7040_v12 }
 0x1e2   : >> { %10531 = vst [vmem:[#allocation22_spill] sm:$0xff] %v7037_v13  ;;  %v2055_v43 = vmul.f32 %v6646_v21, %v10534_v38  ;;  %v10535_v8 = vld [vmem:[#allocation52_spill] sm:$0xff]  ;;  %v10537_v49 = vld [vmem:[#allocation61_spill] sm:$0xff]  ;;  %v2466_v40 = vadd.f32 %v2450_v34, %v2432_v44  ;;  %v2089_v41 = vmul.f32 %v6398_v57, %v7037_v13  ;;  %v10542_v57 = vld [vmem:[#allocation62_spill] sm:$0xff] }
 0x1e3   : >> { %v1525_v50 = vmul.f32 %v10535_v8, %v6829_v56  ;;  %v7049_v20 = vld [vmem:[%s5023_s22 + $0xcb] sm:$0xff]  ;;  %v1042_v52 = vadd.f32 %v1026_v61, %v1008_v5  ;;  %v1122_v0 = vmul.f32 %v10537_v49, %v6228_v35  ;;  %v1507_v15 = vadd.f32 %v1491_v17, %v1473_v54  ;;  %v10539_v61 = vld [vmem:[#allocation55_spill] sm:$0xff] }
 0x1e4   : >> { %10536 = vst [vmem:[#allocation84_spill] sm:$0xff] %v7049_v20  ;;  %v2518_v33 = vmul.f32 %v7049_v20, %v6855_v45  ;;  %v7060_v1 = vld [vmem:[%s5023_s22 + $0xeb] sm:$0xff]  ;;  %v2037_v20 = vadd.f32 %v2021_v63, %v2003_v2  ;;  %v1156_v59 = vmul.f32 %v10539_v61, %v6241_v7  ;;  %v2500_v34 = vadd.f32 %v2484_v14, %v2466_v40  ;;  %v10541_v54 = vld [vmem:[#allocation91_spill] sm:$0xff] }
 0x1e5   : >> { %10538 = vst [vmem:[#allocation83_spill] sm:$0xff] %v7060_v1  ;;  %v2552_v56 = vmul.f32 %v7060_v1, %v6868_v23  ;;  %v1104_v10 = vadd.f32 %v1088_v58, %v1042_v52  ;;  %v7067_v35 = vld [vmem:[%s5023_s22 + $0x12b] sm:$0xff]  ;;  %v1541_v44 = vadd.f32 %v1525_v50, %v1507_v15  ;;  %v1621_v12 = vmul.f32 %v6891_v42, %v10541_v54 }
 0x1e6   : >> { %10540 = vst [vmem:[#allocation39_spill] sm:$0xff] %v7067_v35  ;;  %v4490_v5 = vld [vmem:[%s5023_s22 + $0x72] sm:$0xff]  ;;  %v2586_v1 = vmul.f32 %v6884_v31, %v10542_v57  ;;  %v2071_v63 = vadd.f32 %v2055_v43, %v2037_v20  ;;  %v10543_v2 = vld [vmem:[#allocation48_spill] sm:$0xff]  ;;  %v2534_v52 = vadd.f32 %v2518_v33, %v2500_v34  ;;  %v10550_v34 = vld [vmem:[#allocation107_spill] sm:$0xff] }
 0x1e7   : >> { %v2151_v17 = vmul.f32 %v4490_v5, %v6662_v30  ;;  %v1138_v58 = vadd.f32 %v1122_v0, %v1104_v10  ;;  %v1190_v7 = vmul.f32 %v10543_v2, %v10488_v47  ;;  %v7078_v14 = vld [vmem:[%s5023_s22 + $0x92] sm:$0xff]  ;;  %v1575_v40 = vadd.f32 %v1559_v3, %v1541_v44  ;;  %v10546_v42 = vld [vmem:[#allocation20_spill] sm:$0xff] }
 0x1e8   : >> { %10544 = vst [vmem:[#allocation111_spill] sm:$0xff] %v7078_v14  ;;  %v2185_v50 = vmul.f32 %v7078_v14, %v10485_v48  ;;  %v10545_v15 = vld [vmem:[#allocation69_spill] sm:$0xff]  ;;  %v10547_v30 = vld [vmem:[#allocation78_spill] sm:$0xff]  ;;  %v2105_v20 = vadd.f32 %v2089_v41, %v2071_v63  ;;  %v7087_v0 = vld [vmem:[%s5023_s22 + $0x106] sm:$0xff]  ;;  %v2568_v33 = vadd.f32 %v2552_v56, %v2534_v52 }
 0x1e9   : >> { %v1655_v5 = vmul.f32 %v10546_v42, %v10545_v15  ;;  %v2620_v57 = vmul.f32 %v10547_v30, %v7067_v35  ;;  %v1172_v43 = vadd.f32 %v1156_v59, %v1138_v58  ;;  %10548 = vst [vmem:[#allocation45_spill] sm:$0xff] %v7087_v0  ;;  %v1224_v47 = vmul.f32 %v7087_v0, %v10493_v22  ;;  %v7092_v10 = vld [vmem:[%s5023_s22 + $0xb2] sm:$0xff]  ;;  %v7099_v41 = vld [vmem:[%s5023_s22 + $0x146] sm:$0xff] }
 0x1ea   : >> { %10549 = vst [vmem:[#allocation24_spill] sm:$0xff] %v7092_v10  ;;  %v2219_v3 = vmul.f32 %v7092_v10, %v10550_v34  ;;  %v1637_v44 = vadd.f32 %v1621_v12, %v1575_v40  ;;  %v10551_v42 = vld [vmem:[#allocation41_spill] sm:$0xff]  ;;  %v2167_v59 = vadd.f32 %v2151_v17, %v2105_v20  ;;  %v10556_v56 = vld [vmem:[#allocation72_spill] sm:$0xff]  ;;  %v2602_v14 = vadd.f32 %v2586_v1, %v2568_v33  ;;  %v10558_v30 = vld [vmem:[#allocation86_spill] sm:$0xff] }
 0x1eb   : >> { %v10552_v48 = vld [vmem:[#allocation9_spill] sm:$0xff]  ;;  %10553 = vst [vmem:[#allocation29_spill] sm:$0xff] %v7099_v41  ;;  %v1206_v0 = vadd.f32 %v1190_v7, %v1172_v43  ;;  %v1258_v52 = vmul.f32 %v10499_v51, %v10556_v56  ;;  %v10561_v10 = vld [vmem:[#allocation44_spill] sm:$0xff]  ;;  %v10563_v7 = vld [vmem:[#allocation87_spill] sm:$0xff]  ;;  %v1292_v51 = vmul.f32 %v10505_v24, %v7099_v41 }
 0x1ec   : >> { %v1689_v35 = vmul.f32 %v10552_v48, %v10551_v42  ;;  %v7102_v63 = vld [vmem:[%s5023_s22 + $0xd2] sm:$0xff]  ;;  %v1671_v40 = vadd.f32 %v1655_v5, %v1637_v44  ;;  %v2201_v42 = vadd.f32 %v2185_v50, %v2167_v59  ;;  %v1757_v43 = vmul.f32 %v10563_v7, %v10496_v55  ;;  %v10566_v33 = vld [vmem:[#allocation51_spill] sm:$0xff]  ;;  %v10567_v56 = vld [vmem:[#allocation16_spill] sm:$0xff] }
 0x1ed   : >> { %10554 = vst [vmem:[#allocation53_spill] sm:$0xff] %v7102_v63  ;;  %v10555_v58 = vld [vmem:[#allocation77_spill] sm:$0xff]  ;;  %v7125_v1 = vadd.f32 %v2620_v57, %v2602_v14 }
 0x1ee   : >> { %v2253_v22 = vmul.f32 %v7102_v63, %v10555_v58  ;;  %v10557_v2 = vld [vmem:[#allocation25_spill] sm:$0xff]  ;;  %v1240_v58 = vadd.f32 %v1224_v47, %v1206_v0  ;;  %v1705_v44 = vadd.f32 %v1689_v35, %v1671_v40 }
 0x1ef   : >> { %v2287_v34 = vmul.f32 %v10558_v30, %v10557_v2  ;;  %v7111_v12 = vld [vmem:[%s5023_s22 + $0x150] sm:$0xff]  ;;  %10564 = vst [vmem:[#allocation60_spill] sm:$0xff] %v7125_v1  ;;  %v10565_v2 = vld [vmem:[#allocation88_spill] sm:$0xff]  ;;  %v10568_v30 = vld [vmem:[#allocation47_spill] sm:$0xff]  ;;  %v2664_v24 = vsel %vm415_vm2, %v7125_v1, 0.0  ;;  %v2700_v14 = vmul.f32 %v7125_v1, %v7125_v1 }
 0x1f0   : >> { %10559 = vst [vmem:[#allocation40_spill] sm:$0xff] %v7111_v12  ;;  %v7114_v48 = vld [vmem:[%s5023_s22 + $0xf0] sm:$0xff]  ;;  %v2321_v5 = vmul.f32 %v10566_v33, %v10565_v2  ;;  %v1791_v63 = vmul.f32 %v10568_v30, %v10567_v56  ;;  %v1274_v59 = vadd.f32 %v1258_v52, %v1240_v58  ;;  %2665 = vadd.xlane.f32.xlu0 %v2664_v24 }
 0x1f1   : >> { %10560 = vst [vmem:[#allocation27_spill] sm:$0xff] %v7114_v48  ;;  %v1723_v17 = vmul.f32 %v7114_v48, %v10561_v10  ;;  %v7119_v20 = vld [vmem:[%s5023_s22 + $0x132] sm:$0xff]  ;;  %v2235_v48 = vadd.f32 %v2219_v3, %v2201_v42  ;;  %v10569_v10 = vld [vmem:[#allocation80_spill] sm:$0xff]  ;;  %v2728_v40 = vsel %vm415_vm2, %v2700_v14, 0.0 }
 0x1f2   : >> { %10562 = vst [vmem:[#allocation104_spill] sm:$0xff] %v7119_v20  ;;  %v1825_v50 = vmul.f32 %v10569_v10, %v7111_v12  ;;  %v10570_v55 = vld [vmem:[#allocation85_spill] sm:$0xff]  ;;  %v2355_v35 = vmul.f32 %v10511_v62, %v7119_v20  ;;  %v1308_v47 = vadd.f32 %v1292_v51, %v1274_v59  ;;  %2729 = vadd.xlane.f32.xlu2 %v2728_v40  ;;  %v10573_v14 = vld [vmem:[#allocation26_spill] sm:$0xff] }
 0x1f3   : >> { %v1354_v0 = vmul.f32 %v10570_v55, %v10508_v27  ;;  %v1739_v57 = vadd.f32 %v1723_v17, %v1705_v44  ;;  %v2269_v42 = vadd.f32 %v2253_v22, %v2235_v48  ;;  %v10571_v3 = vld [vmem:[#allocation49_spill] sm:$0xff]  ;;  %v7146_v27 = vld [vmem:[%s9477_s3] ss:$0 sm:$0xff]  ;;  %v1887_v17 = vmul.f32 %v6972_v25, %v10503_v28  ;;  %v7156_v48 = vld [vmem:[%s9477_s3 + $0x7] ss:$0 sm:$0xff] }
 0x1f4   : >> { %v1388_v58 = vmul.f32 %v10571_v3, %v10512_v37  ;;  %v824_v52 = vmul.f32 %v7146_v27, %v10506_v39  ;;  %v858_v37 = vmul.f32 %v7156_v48, %v10510_v29  ;;  %v10572_v39 = vld [vmem:[#allocation92_spill] sm:$0xff]  ;;  %v4498_v59 = vld [vmem:[%s5023_s22 + $0x73] sm:$0xff] }
 0x1f5   : >> { %v1773_v55 = vadd.f32 %v1757_v43, %v1739_v57  ;;  %v2303_v22 = vadd.f32 %v2287_v34, %v2269_v42  ;;  %v1370_v51 = vadd.f32 %v1354_v0, %v1308_v47  ;;  %v1422_v44 = vmul.f32 %v10572_v39, %v10515_v46  ;;  %v7170_v29 = vld [vmem:[%s9477_s3 + $0xe] ss:$0 sm:$0xff]  ;;  %v7182_v47 = vld [vmem:[%s5023_s22 + $0x93] sm:$0xff] }
 0x1f6   : >> { %v840_v43 = vadd.f32 %v824_v52, %v10451_v36  ;;  %v2417_v25 = vmul.f32 %v4498_v59, %v10520_v6  ;;  %v1456_v57 = vmul.f32 %v10573_v14, %v10525_v19  ;;  %v892_v34 = vmul.f32 %v7170_v29, %v10514_v53  ;;  %v10574_v53 = vld [vmem:[#allocation21_spill] sm:$0xff]  ;;  %v7199_v59 = vld [vmem:[%s9477_s3 + $0x1c] ss:$0 sm:$0xff] }
 0x1f7   : >> { %v1807_v24 = vadd.f32 %v1791_v63, %v1773_v55  ;;  %v2337_v46 = vadd.f32 %v2321_v5, %v2303_v22  ;;  %v1404_v0 = vadd.f32 %v1388_v58, %v1370_v51  ;;  %v7177_v63 = vld [vmem:[%s9477_s3 + $0x15] ss:$0 sm:$0xff]  ;;  %v2451_v52 = vmul.f32 %v7182_v47, %v10527_v60  ;;  %v7189_v58 = vld [vmem:[%s5023_s22 + $0x107] sm:$0xff] }
 0x1f8   : >> { %v874_v42 = vadd.f32 %v858_v37, %v840_v43  ;;  %v926_v19 = vmul.f32 %v7177_v63, %v7002_v16  ;;  %v1921_v5 = vmul.f32 %v10574_v53, %v6569_v9  ;;  %10575 = vst [vmem:[#allocation38_spill] sm:$0xff] %v7189_v58  ;;  %v1490_v55 = vmul.f32 %v7189_v58, %v10529_v26  ;;  %v7194_v22 = vld [vmem:[%s5023_s22 + $0x147] sm:$0xff]  ;;  %v7204_v1 = vld [vmem:[%s5023_s22 + $0xb3] sm:$0xff] }
 0x1f9   : >> { %v1841_v40 = vadd.f32 %v1825_v50, %v1807_v24  ;;  %v2371_v37 = vadd.f32 %v2355_v35, %v2337_v46  ;;  %10576 = vst [vmem:[#allocation31_spill] sm:$0xff] %v7194_v22  ;;  %v1438_v51 = vadd.f32 %v1422_v44, %v1404_v0  ;;  %v10577_v50 = vld [vmem:[#allocation28_spill] sm:$0xff]  ;;  %v2485_v26 = vmul.f32 %v7204_v1, %v6836_v18  ;;  %v10579_v46 = vld [vmem:[#allocation58_spill] sm:$0xff]  ;;  %v10580_v53 = vld [vmem:[#allocation23_spill] sm:$0xff] }
 0x1fa   : >> { %v908_v43 = vadd.f32 %v892_v34, %v874_v42  ;;  %v960_v24 = vmul.f32 %v7199_v59, %v10577_v50  ;;  %10578 = vst [vmem:[#allocation42_spill] sm:$0xff] %v7204_v1  ;;  %v1955_v12 = vmul.f32 %v10580_v53, %v10579_v46  ;;  %v10581_v44 = vld [vmem:[#allocation64_spill] sm:$0xff]  ;;  %v7218_v50 = vld [vmem:[%s9477_s3 + $0x23] ss:$0 sm:$0xff]  ;;  %v7228_v53 = vld [vmem:[%s5023_s22 + $0xf1] sm:$0xff] }
 0x1fb   : >> { %v1903_v35 = vadd.f32 %v1887_v17, %v1841_v40  ;;  %v1524_v34 = vmul.f32 %v10535_v8, %v10581_v44  ;;  %v7213_v0 = vld [vmem:[%s5023_s22 + $0x165] sm:$0xff]  ;;  %v2433_v42 = vadd.f32 %v2417_v25, %v2371_v37  ;;  %v1472_v56 = vadd.f32 %v1456_v57, %v1438_v51  ;;  %10583 = vst [vmem:[#allocation30_spill] sm:$0xff] %v7218_v50  ;;  %v7223_v17 = vld [vmem:[%s5023_s22 + $0xd3] sm:$0xff] }
 0x1fc   : >> { %10582 = vst [vmem:[#allocation102_spill] sm:$0xff] %v7213_v0  ;;  %v942_v16 = vadd.f32 %v926_v19, %v908_v43  ;;  %v994_v58 = vmul.f32 %v7218_v50, %v6999_v4  ;;  %v2519_v40 = vmul.f32 %v7223_v17, %v6855_v45  ;;  %v10586_v25 = vld [vmem:[#allocation54_spill] sm:$0xff]  ;;  %v1558_v19 = vmul.f32 %v6426_v11, %v7194_v22  ;;  %v7237_v4 = vld [vmem:[%s9477_s3 + $0x2a] ss:$0 sm:$0xff]  ;;  %v10589_v11 = vld [vmem:[#allocation63_spill] sm:$0xff] }
 0x1fd   : >> { %10584 = vst [vmem:[#allocation90_spill] sm:$0xff] %v7223_v17  ;;  %v1937_v8 = vadd.f32 %v1921_v5, %v1903_v35  ;;  %v1989_v57 = vmul.f32 %v7228_v53, %v10586_v25  ;;  %v2467_v37 = vadd.f32 %v2451_v52, %v2433_v42  ;;  %v1506_v51 = vadd.f32 %v1490_v55, %v1472_v56  ;;  %v10588_v5 = vld [vmem:[#allocation46_spill] sm:$0xff]  ;;  %v10598_v22 = vld [vmem:[#allocation41_spill] sm:$0xff] }
 0x1fe   : >> { %10585 = vst [vmem:[#allocation14_spill] sm:$0xff] %v7228_v53  ;;  %v976_v43 = vadd.f32 %v960_v24, %v942_v16  ;;  %v1028_v44 = vmul.f32 %v7237_v4, %v7213_v0  ;;  %v2553_v35 = vmul.f32 %v6868_v23, %v10588_v5  ;;  %v2023_v53 = vmul.f32 %v6630_v32, %v10534_v38  ;;  %v7248_v56 = vld [vmem:[%s5023_s22 + $0x133] sm:$0xff]  ;;  %v7256_v0 = vld [vmem:[%s9477_s3 + $0x1] ss:$0 sm:$0xff] }
 0x1ff   : >> { %10587 = vst [vmem:[#allocation50_spill] sm:$0xff] %v7237_v4  ;;  %v1971_v45 = vadd.f32 %v1955_v12, %v1937_v8  ;;  %v1620_v52 = vmul.f32 %v10589_v11, %v10541_v54  ;;  %v2501_v16 = vadd.f32 %v2485_v26, %v2467_v37  ;;  %v7251_v55 = vld [vmem:[%s5023_s22 + $0x151] sm:$0xff]  ;;  %v1540_v24 = vadd.f32 %v1524_v34, %v1506_v51  ;;  %v10594_v26 = vld [vmem:[#allocation95_spill] sm:$0xff] }
 0x200   : >> { %10590 = vst [vmem:[#allocation67_spill] sm:$0xff] %v7248_v56  ;;  %v1010_v42 = vadd.f32 %v994_v58, %v976_v43  ;;  %v1090_v12 = vmul.f32 %v7256_v0, %v10537_v49  ;;  %v10593_v8 = vld [vmem:[#allocation13_spill] sm:$0xff]  ;;  %v2057_v54 = vmul.f32 %v6646_v21, %v7037_v13  ;;  %v1654_v37 = vmul.f32 %v10594_v26, %v10545_v15  ;;  %v7269_v43 = vld [vmem:[%s9477_s3 + $0x8] ss:$0 sm:$0xff]  ;;  %v10596_v11 = vld [vmem:[#allocation78_spill] sm:$0xff] }
 0x201   : >> { %10591 = vst [vmem:[#allocation56_spill] sm:$0xff] %v7251_v55  ;;  %v2587_v38 = vmul.f32 %v6884_v31, %v10593_v8  ;;  %v2005_v5 = vadd.f32 %v1989_v57, %v1971_v45  ;;  %v2535_v34 = vadd.f32 %v2519_v40, %v2501_v16  ;;  %v1574_v58 = vadd.f32 %v1558_v19, %v1540_v24  ;;  %v10597_v13 = vld [vmem:[#allocation34_spill] sm:$0xff]  ;;  %v10599_v15 = vld [vmem:[#allocation81_spill] sm:$0xff]  ;;  %v7282_v24 = vld [vmem:[%s9477_s3 + $0xf] ss:$0 sm:$0xff] }
 0x202   : >> { %10592 = vst [vmem:[#allocation52_spill] sm:$0xff] %v7256_v0  ;;  %v1044_v51 = vadd.f32 %v1028_v44, %v1010_v42  ;;  %v1124_v49 = vmul.f32 %v7269_v43, %v10539_v61  ;;  %v2621_v45 = vmul.f32 %v10596_v11, %v7248_v56  ;;  %v2091_v31 = vmul.f32 %v10597_v13, %v7251_v55  ;;  %v10601_v61 = vld [vmem:[#allocation48_spill] sm:$0xff]  ;;  %v10603_v26 = vld [vmem:[#allocation111_spill] sm:$0xff]  ;;  %v7295_v23 = vld [vmem:[%s5023_s22 + $0xf2] sm:$0xff] }
 0x203   : >> { %10595 = vst [vmem:[#allocation61_spill] sm:$0xff] %v7269_v43  ;;  %v2039_v57 = vadd.f32 %v2023_v53, %v2005_v5  ;;  %v1688_v40 = vmul.f32 %v10599_v15, %v10598_v22  ;;  %v2569_v44 = vadd.f32 %v2553_v35, %v2535_v34  ;;  %v1636_v19 = vadd.f32 %v1620_v52, %v1574_v58  ;;  %v10602_v5 = vld [vmem:[#allocation66_spill] sm:$0xff]  ;;  %v10604_v55 = vld [vmem:[#allocation75_spill] sm:$0xff]  ;;  %v10605_v11 = vld [vmem:[#allocation24_spill] sm:$0xff] }
 0x204   : >> { %v1106_v16 = vadd.f32 %v1090_v12, %v1044_v51  ;;  %10600 = vst [vmem:[#allocation55_spill] sm:$0xff] %v7282_v24  ;;  %v1158_v42 = vmul.f32 %v7282_v24, %v10601_v61  ;;  %v2153_v13 = vmul.f32 %v10603_v26, %v10602_v5  ;;  %v2187_v22 = vmul.f32 %v10605_v11, %v10604_v55  ;;  %v10606_v35 = vld [vmem:[#allocation107_spill] sm:$0xff]  ;;  %v10607_v52 = vld [vmem:[#allocation53_spill] sm:$0xff]  ;;  %v10608_v51 = vld [vmem:[#allocation44_spill] sm:$0xff] }
 0x205   : >> { %v2073_v53 = vadd.f32 %v2057_v54, %v2039_v57  ;;  %v2221_v34 = vmul.f32 %v10607_v52, %v10606_v35  ;;  %v2603_v12 = vadd.f32 %v2587_v38, %v2569_v44  ;;  %v1670_v58 = vadd.f32 %v1654_v37, %v1636_v19  ;;  %v10609_v15 = vld [vmem:[#allocation101_spill] sm:$0xff]  ;;  %10610 = vst [vmem:[#allocation91_spill] sm:$0xff] %v7295_v23  ;;  %v10612_v26 = vld [vmem:[#allocation86_spill] sm:$0xff]  ;;  %v7302_v24 = vld [vmem:[%s5023_s22 + $0x148] sm:$0xff] }
 0x206   : >> { %v1722_v43 = vmul.f32 %v10609_v15, %v10608_v51  ;;  %v1140_v56 = vadd.f32 %v1124_v49, %v1106_v16  ;;  %v10611_v54 = vld [vmem:[#allocation77_spill] sm:$0xff]  ;;  %v2289_v61 = vmul.f32 %v10612_v26, %v10565_v2  ;;  %10613 = vst [vmem:[#allocation62_spill] sm:$0xff] %v7302_v24  ;;  %v7314_v19 = vld [vmem:[%s5023_s22 + $0x108] sm:$0xff]  ;;  %v2323_v51 = vmul.f32 %v10566_v33, %v7119_v20  ;;  %v10621_v20 = vld [vmem:[#allocation11_spill] sm:$0xff] }
 0x207   : >> { %v2107_v0 = vadd.f32 %v2091_v31, %v2073_v53  ;;  %v2255_v57 = vmul.f32 %v7295_v23, %v10611_v54  ;;  %v7307_v38 = vld [vmem:[%s9477_s3 + $0x16] ss:$0 sm:$0xff]  ;;  %v7311_v31 = vadd.f32 %v2621_v45, %v2603_v12  ;;  %v1704_v44 = vadd.f32 %v1688_v40, %v1670_v58  ;;  %10616 = vst [vmem:[#allocation25_spill] sm:$0xff] %v7314_v19  ;;  %v10617_v23 = vld [vmem:[#allocation99_spill] sm:$0xff]  ;;  %v7325_v45 = vld [vmem:[%s9477_s3 + $0x1d] ss:$0 sm:$0xff] }
 0x208   : >> { %v10614_v37 = vld [vmem:[#allocation45_spill] sm:$0xff]  ;;  %v1756_v2 = vmul.f32 %v7314_v19, %v10563_v7  ;;  %v1174_v16 = vadd.f32 %v1158_v42, %v1140_v56  ;;  %v1790_v52 = vmul.f32 %v10568_v30, %v10617_v23  ;;  %v10618_v12 = vld [vmem:[#allocation72_spill] sm:$0xff]  ;;  %v1824_v56 = vmul.f32 %v10569_v10, %v7302_v24  ;;  %v10624_v24 = vld [vmem:[#allocation43_spill] sm:$0xff] }
 0x209   : >> { %v1192_v49 = vmul.f32 %v7307_v38, %v10614_v37  ;;  %10615 = vst [vmem:[#allocation69_spill] sm:$0xff] %v7311_v31  ;;  %v2169_v53 = vadd.f32 %v2153_v13, %v2107_v0  ;;  %v1226_v40 = vmul.f32 %v7325_v45, %v10618_v12  ;;  %v2667_v58 = vsel %vm415_vm2, %v7311_v31, 0.0  ;;  %v7336_v42 = vld [vmem:[%s5023_s22 + $0x166] sm:$0xff]  ;;  %v7339_v30 = vld [vmem:[%s5023_s22 + $0x152] sm:$0xff]  ;;  %v7346_v37 = vld [vmem:[%s9477_s3 + $0x24] ss:$0 sm:$0xff] }
 0x20a   : >> { %v2701_v7 = vmul.f32 %v7311_v31, %v7311_v31  ;;  %v1738_v0 = vadd.f32 %v1722_v43, %v1704_v44  ;;  %10619 = vst [vmem:[#allocation87_spill] sm:$0xff] %v7336_v42  ;;  %2668 = vadd.xlane.f32.xlu1 %v2667_v58  ;;  %v1886_v11 = vmul.f32 %v10621_v20, %v10503_v28  ;;  %v10623_v58 = vld [vmem:[#allocation65_spill] sm:$0xff] }
 0x20b   : >> { %10620 = vst [vmem:[#allocation88_spill] sm:$0xff] %v7339_v30  ;;  %v2203_v13 = vadd.f32 %v2187_v22, %v2169_v53  ;;  %v1208_v12 = vadd.f32 %v1192_v49, %v1174_v16  ;;  %v1260_v43 = vmul.f32 %v7346_v37, %v7099_v41  ;;  %v1920_v31 = vmul.f32 %v10623_v58, %v6569_v9  ;;  %v7358_v49 = vld [vmem:[%s9477_s3 + $0x2b] ss:$0 sm:$0xff]  ;;  %v10625_v53 = vld [vmem:[#allocation82_spill] sm:$0xff] }
 0x20c   : >> { %10622 = vst [vmem:[#allocation51_spill] sm:$0xff] %v7346_v37  ;;  %v2731_v10 = vsel %vm415_vm2, %v2701_v7, 0.0  ;;  %v1772_v44 = vadd.f32 %v1756_v2, %v1738_v0  ;;  %v825_v22 = vmul.f32 %v7146_v27, %v10624_v24  ;;  %v1294_v16 = vmul.f32 %v7358_v49, %v7336_v42  ;;  %v7374_v42 = vld [vmem:[%s9477_s3 + $0x2] ss:$0 sm:$0xff]  ;;  %v7430_v41 = vld [vmem:[%s5023_s22 + $0xf3] sm:$0xff] }
 0x20d   : >> { %2732 = vadd.xlane.f32.xlu0 %v2731_v10  ;;  %v2237_v28 = vadd.f32 %v2221_v34, %v2203_v13  ;;  %v1242_v20 = vadd.f32 %v1226_v40, %v1208_v12  ;;  %v859_v2 = vmul.f32 %v7156_v48, %v10625_v53  ;;  %v2357_v9 = vmul.f32 %v10511_v62, %v7339_v30  ;;  %v10626_v34 = vld [vmem:[#allocation110_spill] sm:$0xff]  ;;  %v10627_v13 = vld [vmem:[#allocation109_spill] sm:$0xff] }
 0x20e   : >> { %v1806_v7 = vadd.f32 %v1790_v52, %v1772_v44  ;;  %v841_v24 = vadd.f32 %v825_v22, %v10451_v36  ;;  %v893_v40 = vmul.f32 %v7170_v29, %v10626_v34  ;;  %v1954_v12 = vmul.f32 %v10627_v13, %v10579_v46  ;;  %v7381_v34 = vld [vmem:[%s5023_s22 + $0x10d] sm:$0xff]  ;;  %10640 = vst [vmem:[#allocation58_spill] sm:$0xff] %v7430_v41 }
 0x20f   : >> { %v2271_v0 = vadd.f32 %v2255_v57, %v2237_v28  ;;  %v1276_v10 = vadd.f32 %v1260_v43, %v1242_v20  ;;  %v1356_v53 = vmul.f32 %v7374_v42, %v10571_v3  ;;  %v2419_v52 = vmul.f32 %v7182_v47, %v10520_v6  ;;  %10628 = vst [vmem:[#allocation47_spill] sm:$0xff] %v7381_v34  ;;  %v10629_v43 = vld [vmem:[#allocation68_spill] sm:$0xff] }
 0x210   : >> { %v1840_v44 = vadd.f32 %v1824_v56, %v1806_v7  ;;  %v875_v22 = vadd.f32 %v859_v2, %v841_v24  ;;  %v927_v46 = vmul.f32 %v7381_v34, %v7177_v63  ;;  %v1988_v28 = vmul.f32 %v10629_v43, %v10586_v25  ;;  %v7390_v3 = vld [vmem:[%s9477_s3 + $0x9] ss:$0 sm:$0xff]  ;;  %v10639_v34 = vld [vmem:[#allocation38_spill] sm:$0xff] }
 0x211   : >> { %v2305_v57 = vadd.f32 %v2289_v61, %v2271_v0  ;;  %v1310_v20 = vadd.f32 %v1294_v16, %v1276_v10  ;;  %10630 = vst [vmem:[#allocation80_spill] sm:$0xff] %v7390_v3  ;;  %v1390_v47 = vmul.f32 %v7390_v3, %v10572_v39  ;;  %v2453_v56 = vmul.f32 %v7204_v1, %v10527_v60  ;;  %v10631_v24 = vld [vmem:[#allocation108_spill] sm:$0xff]  ;;  %v7406_v39 = vld [vmem:[%s9477_s3 + $0x10] ss:$0 sm:$0xff] }
 0x212   : >> { %v1902_v2 = vadd.f32 %v1886_v11, %v1840_v44  ;;  %v909_v7 = vadd.f32 %v893_v40, %v875_v22  ;;  %v961_v61 = vmul.f32 %v7199_v59, %v10631_v24  ;;  %v7399_v25 = vld [vmem:[%s5023_s22 + $0x109] sm:$0xff]  ;;  %10633 = vst [vmem:[#allocation49_spill] sm:$0xff] %v7406_v39  ;;  %v1424_v11 = vmul.f32 %v7406_v39, %v10573_v14  ;;  %v7425_v14 = vld [vmem:[%s9477_s3 + $0x17] ss:$0 sm:$0xff] }
 0x213   : >> { %v2339_v0 = vadd.f32 %v2323_v51, %v2305_v57  ;;  %10632 = vst [vmem:[#allocation85_spill] sm:$0xff] %v7399_v25  ;;  %v2022_v16 = vmul.f32 %v7399_v25, %v6630_v32  ;;  %v1372_v10 = vadd.f32 %v1356_v53, %v1310_v20  ;;  %v7411_v40 = vld [vmem:[%s5023_s22 + $0x16d] sm:$0xff]  ;;  %v2487_v51 = vmul.f32 %v7223_v17, %v6836_v18  ;;  %v10637_v20 = vld [vmem:[#allocation35_spill] sm:$0xff] }
 0x214   : >> { %10634 = vst [vmem:[#allocation92_spill] sm:$0xff] %v7411_v40  ;;  %v7416_v44 = vld [vmem:[%s5023_s22 + $0x149] sm:$0xff]  ;;  %v1936_v22 = vadd.f32 %v1920_v31, %v1902_v2  ;;  %v943_v57 = vadd.f32 %v927_v46, %v909_v7  ;;  %v2056_v1 = vmul.f32 %v6646_v21, %v10637_v20  ;;  %v1458_v17 = vmul.f32 %v7425_v14, %v10639_v34  ;;  %v10641_v31 = vld [vmem:[#allocation70_spill] sm:$0xff] }
 0x215   : >> { %10635 = vst [vmem:[#allocation26_spill] sm:$0xff] %v7416_v44  ;;  %v10636_v24 = vld [vmem:[#allocation73_spill] sm:$0xff]  ;;  %v2373_v53 = vadd.f32 %v2357_v9, %v2339_v0  ;;  %v1406_v30 = vadd.f32 %v1390_v47, %v1372_v10  ;;  %v2521_v46 = vmul.f32 %v7430_v41, %v10641_v31  ;;  %v1029_v21 = vmul.f32 %v7237_v4, %v7411_v40  ;;  %v7439_v7 = vld [vmem:[%s9477_s3 + $0x2e] ss:$0 sm:$0xff] }
 0x216   : >> { %v995_v32 = vmul.f32 %v7218_v50, %v10636_v24  ;;  %10638 = vst [vmem:[#allocation28_spill] sm:$0xff] %v7425_v14  ;;  %v1970_v9 = vadd.f32 %v1954_v12, %v1936_v22  ;;  %v977_v2 = vadd.f32 %v961_v61, %v943_v57  ;;  %v2090_v0 = vmul.f32 %v7439_v7, %v7416_v44  ;;  %v7446_v24 = vld [vmem:[%s9477_s3 + $0x1e] ss:$0 sm:$0xff]  ;;  %v10644_v12 = vld [vmem:[#allocation64_spill] sm:$0xff]  ;;  %v10647_v40 = vld [vmem:[#allocation93_spill] sm:$0xff] }
 0x217   : >> { %v2435_v47 = vadd.f32 %v2419_v52, %v2373_v53  ;;  %10642 = vst [vmem:[#allocation54_spill] sm:$0xff] %v7439_v7  ;;  %v1440_v10 = vadd.f32 %v1424_v11, %v1406_v30  ;;  %v1492_v61 = vmul.f32 %v7446_v24, %v10644_v12  ;;  %v10645_v22 = vld [vmem:[#allocation36_spill] sm:$0xff]  ;;  %v7458_v7 = vld [vmem:[%s5023_s22 + $0x153] sm:$0xff]  ;;  %v7465_v12 = vld [vmem:[%s9477_s3 + $0x25] ss:$0 sm:$0xff] }
 0x218   : >> { %10643 = vst [vmem:[#allocation46_spill] sm:$0xff] %v7446_v24  ;;  %v2555_v52 = vmul.f32 %v10645_v22, %v10593_v8  ;;  %v2004_v57 = vadd.f32 %v1988_v28, %v1970_v9  ;;  %v7453_v53 = vld [vmem:[%s5023_s22 + $0x167] sm:$0xff]  ;;  %v1011_v41 = vadd.f32 %v995_v32, %v977_v2  ;;  %v10650_v11 = vld [vmem:[#allocation89_spill] sm:$0xff]  ;;  %v10654_v32 = vld [vmem:[#allocation10_spill] sm:$0xff] }
 0x219   : >> { %10646 = vst [vmem:[#allocation63_spill] sm:$0xff] %v7453_v53  ;;  %v10648_v34 = vld [vmem:[#allocation52_spill] sm:$0xff]  ;;  %v2469_v30 = vadd.f32 %v2453_v56, %v2435_v47  ;;  %v2152_v44 = vmul.f32 %v10650_v11, %v10602_v5  ;;  %v1474_v25 = vadd.f32 %v1458_v17, %v1440_v10  ;;  %v10652_v8 = vld [vmem:[#allocation31_spill] sm:$0xff]  ;;  %v10656_v24 = vld [vmem:[#allocation61_spill] sm:$0xff] }
 0x21a   : >> { %v1091_v20 = vmul.f32 %v10648_v34, %v10647_v40  ;;  %10649 = vst [vmem:[#allocation13_spill] sm:$0xff] %v7458_v7  ;;  %v1526_v28 = vmul.f32 %v7465_v12, %v10652_v8  ;;  %v10653_v9 = vld [vmem:[#allocation67_spill] sm:$0xff]  ;;  %v2038_v22 = vadd.f32 %v2022_v16, %v2004_v57  ;;  %v1045_v40 = vadd.f32 %v1029_v21, %v1011_v41  ;;  %v10655_v34 = vld [vmem:[#allocation94_spill] sm:$0xff]  ;;  %v10657_v5 = vld [vmem:[#allocation76_spill] sm:$0xff] }
 0x21b   : >> { %10651 = vst [vmem:[#allocation34_spill] sm:$0xff] %v7465_v12  ;;  %v2589_v2 = vmul.f32 %v10654_v32, %v10653_v9  ;;  %v1125_v56 = vmul.f32 %v10656_v24, %v10655_v34  ;;  %v2503_v47 = vadd.f32 %v2487_v51, %v2469_v30  ;;  %v2186_v17 = vmul.f32 %v10657_v5, %v10604_v55  ;;  %v7478_v11 = vld [vmem:[%s9477_s3 + $0x2c] ss:$0 sm:$0xff]  ;;  %v10659_v16 = vld [vmem:[#allocation78_spill] sm:$0xff]  ;;  %v10661_v57 = vld [vmem:[#allocation55_spill] sm:$0xff] }
 0x21c   : >> { %v1508_v10 = vadd.f32 %v1492_v61, %v1474_v25  ;;  %10658 = vst [vmem:[#allocation41_spill] sm:$0xff] %v7478_v11  ;;  %v1560_v8 = vmul.f32 %v7478_v11, %v7453_v53  ;;  %v2623_v41 = vmul.f32 %v10659_v16, %v7458_v7  ;;  %v2072_v21 = vadd.f32 %v2056_v1, %v2038_v22  ;;  %v10660_v51 = vld [vmem:[#allocation12_spill] sm:$0xff]  ;;  %v10662_v25 = vld [vmem:[#allocation37_spill] sm:$0xff]  ;;  %v7491_v5 = vld [vmem:[%s9477_s3 + $0x3] ss:$0 sm:$0xff] }
 0x21d   : >> { %v1107_v34 = vadd.f32 %v1091_v20, %v1045_v40  ;;  %v1159_v30 = vmul.f32 %v10661_v57, %v10660_v51  ;;  %v2537_v55 = vadd.f32 %v2521_v46, %v2503_v47  ;;  %v2220_v61 = vmul.f32 %v10662_v25, %v10606_v35  ;;  %10663 = vst [vmem:[#allocation48_spill] sm:$0xff] %v7491_v5  ;;  %v10664_v53 = vld [vmem:[#allocation95_spill] sm:$0xff]  ;;  %v10665_v1 = vld [vmem:[#allocation96_spill] sm:$0xff] }
 0x21e   : >> { %v1542_v9 = vadd.f32 %v1526_v28, %v1508_v10  ;;  %v1622_v11 = vmul.f32 %v7491_v5, %v10664_v53  ;;  %v2106_v7 = vadd.f32 %v2090_v0, %v2072_v21  ;;  %v2254_v20 = vmul.f32 %v10665_v1, %v10611_v54  ;;  %v7498_v40 = vld [vmem:[%s5023_s22 + $0x10e] sm:$0xff]  ;;  %v7510_v0 = vld [vmem:[%s9477_s3 + $0xa] ss:$0 sm:$0xff] }
 0x21f   : >> { %v1141_v22 = vadd.f32 %v1125_v56, %v1107_v34  ;;  %10666 = vst [vmem:[#allocation66_spill] sm:$0xff] %v7498_v40  ;;  %v1193_v46 = vmul.f32 %v7498_v40, %v7307_v38  ;;  %v2571_v35 = vadd.f32 %v2555_v52, %v2537_v55  ;;  %v7503_v28 = vld [vmem:[%s5023_s22 + $0x10a] sm:$0xff]  ;;  %v10671_v34 = vld [vmem:[#allocation71_spill] sm:$0xff]  ;;  %v10672_v55 = vld [vmem:[#allocation98_spill] sm:$0xff] }
 0x220   : >> { %10667 = vst [vmem:[#allocation111_spill] sm:$0xff] %v7503_v28  ;;  %v2288_v47 = vmul.f32 %v7503_v28, %v10612_v26  ;;  %v1576_v10 = vadd.f32 %v1560_v8, %v1542_v9  ;;  %v10669_v54 = vld [vmem:[#allocation81_spill] sm:$0xff]  ;;  %v2168_v21 = vadd.f32 %v2152_v44, %v2106_v7  ;;  %v2322_v52 = vmul.f32 %v10566_v33, %v10671_v34  ;;  %v7531_v33 = vld [vmem:[%s9477_s3 + $0x18] ss:$0 sm:$0xff]  ;;  %v4536_v34 = vld [vmem:[%s5023_s22 + $0xc5] sm:$0xff] }
 0x221   : >> { %10668 = vst [vmem:[#allocation75_spill] sm:$0xff] %v7510_v0  ;;  %v1656_v53 = vmul.f32 %v7510_v0, %v10669_v54  ;;  %v7515_v56 = vld [vmem:[%s5023_s22 + $0x14a] sm:$0xff]  ;;  %v1175_v51 = vadd.f32 %v1159_v30, %v1141_v22  ;;  %v1227_v40 = vmul.f32 %v7325_v45, %v10672_v55  ;;  %v2605_v26 = vadd.f32 %v2589_v2, %v2571_v35 }
 0x222   : >> { %10670 = vst [vmem:[#allocation107_spill] sm:$0xff] %v7515_v56  ;;  %v1638_v8 = vadd.f32 %v1622_v11, %v1576_v10  ;;  %v7524_v9 = vld [vmem:[%s9477_s3 + $0x11] ss:$0 sm:$0xff]  ;;  %v1724_v44 = vmul.f32 %v7531_v33, %v7314_v19  ;;  %v2202_v2 = vadd.f32 %v2186_v17, %v2168_v21  ;;  %v7541_v11 = vld [vmem:[%s9477_s3 + $0x1f] ss:$0 sm:$0xff]  ;;  %v2356_v55 = vmul.f32 %v10511_v62, %v7515_v56  ;;  %v7554_v28 = vld [vmem:[%s5023_s22 + $0x168] sm:$0xff] }
 0x223   : >> { %10673 = vst [vmem:[#allocation44_spill] sm:$0xff] %v7524_v9  ;;  %v1690_v54 = vmul.f32 %v7524_v9, %v10609_v15  ;;  %v7536_v7 = vld [vmem:[%s5023_s22 + $0x16e] sm:$0xff]  ;;  %v1758_v15 = vmul.f32 %v7541_v11, %v10617_v23  ;;  %v1209_v30 = vadd.f32 %v1193_v46, %v1175_v51  ;;  %v7547_v10 = vadd.f32 %v2623_v41, %v2605_v26  ;;  %v7559_v46 = vld [vmem:[%s5023_s22 + $0xe5] sm:$0xff] }
 0x224   : >> { %10674 = vst [vmem:[#allocation101_spill] sm:$0xff] %v7531_v33  ;;  %v10676_v22 = vld [vmem:[#allocation97_spill] sm:$0xff]  ;;  %v1672_v19 = vadd.f32 %v1656_v53, %v1638_v8  ;;  %v826_v17 = vmul.f32 %v4536_v34, %v7146_v27  ;;  %v2236_v21 = vadd.f32 %v2220_v61, %v2202_v2  ;;  %v1295_v23 = vmul.f32 %v7358_v49, %v7536_v7  ;;  %v7568_v61 = vld [vmem:[%s9477_s3 + $0x26] ss:$0 sm:$0xff]  ;;  %v10681_v34 = vld [vmem:[#allocation62_spill] sm:$0xff] }
 0x225   : >> { %10675 = vst [vmem:[#allocation77_spill] sm:$0xff] %v7536_v7  ;;  %v1261_v35 = vmul.f32 %v7346_v37, %v10676_v22  ;;  %v1243_v33 = vadd.f32 %v1227_v40, %v1209_v30  ;;  %v860_v41 = vmul.f32 %v7559_v46, %v7156_v48  ;;  %v2673_v62 = vsel %vm415_vm2, %v7547_v10, 0.0  ;;  %v10682_v2 = vld [vmem:[#allocation106_spill] sm:$0xff] }
 0x226   : >> { %10677 = vst [vmem:[#allocation86_spill] sm:$0xff] %v7547_v10  ;;  %v1706_v53 = vadd.f32 %v1690_v54, %v1672_v19  ;;  %v1792_v40 = vmul.f32 %v7568_v61, %v10681_v34  ;;  %v842_v51 = vadd.f32 %v826_v17, %v10451_v36  ;;  %2674 = vadd.xlane.f32.xlu2 %v2673_v62  ;;  %v10683_v22 = vld [vmem:[#allocation18_spill] sm:$0xff]  ;;  %v7580_v54 = vld [vmem:[%s9477_s3 + $0x2d] ss:$0 sm:$0xff]  ;;  %v7585_v17 = vld [vmem:[%s5023_s22 + $0x125] sm:$0xff] }
 0x227   : >> { %10678 = vst [vmem:[#allocation99_spill] sm:$0xff] %v7554_v28  ;;  %v2270_v26 = vadd.f32 %v2254_v20, %v2236_v21  ;;  %v1277_v8 = vadd.f32 %v1261_v35, %v1243_v33  ;;  %v1357_v30 = vmul.f32 %v7374_v42, %v10682_v2  ;;  %v1826_v7 = vmul.f32 %v7580_v54, %v7554_v28  ;;  %v10685_v35 = vld [vmem:[#allocation100_spill] sm:$0xff]  ;;  %v10686_v62 = vld [vmem:[#allocation105_spill] sm:$0xff]  ;;  %v7641_v28 = vld [vmem:[%s9477_s3 + $0x19] ss:$0 sm:$0xff] }
 0x228   : >> { %10679 = vst [vmem:[#allocation72_spill] sm:$0xff] %v7559_v46  ;;  %v894_v46 = vmul.f32 %v7170_v29, %v10683_v22  ;;  %v1740_v19 = vadd.f32 %v1724_v44, %v1706_v53  ;;  %v876_v34 = vadd.f32 %v860_v41, %v842_v51  ;;  %v928_v20 = vmul.f32 %v7585_v17, %v7177_v63  ;;  %v7596_v22 = vld [vmem:[%s9477_s3 + $0x4] ss:$0 sm:$0xff] }
 0x229   : >> { %10680 = vst [vmem:[#allocation11_spill] sm:$0xff] %v7568_v61  ;;  %v2304_v33 = vadd.f32 %v2288_v47, %v2270_v26  ;;  %v2418_v21 = vmul.f32 %v10685_v35, %v10520_v6  ;;  %v1311_v44 = vadd.f32 %v1295_v23, %v1277_v8  ;;  %v1391_v53 = vmul.f32 %v7390_v3, %v10686_v62  ;;  %v10688_v6 = vld [vmem:[#allocation103_spill] sm:$0xff]  ;;  %v10689_v35 = vld [vmem:[#allocation33_spill] sm:$0xff] }
 0x22a   : >> { %10684 = vst [vmem:[#allocation65_spill] sm:$0xff] %v7585_v17  ;;  %v1774_v2 = vadd.f32 %v1758_v15, %v1740_v19  ;;  %v1888_v41 = vmul.f32 %v7596_v22, %v10623_v58  ;;  %v910_v51 = vadd.f32 %v894_v46, %v876_v34  ;;  %v10687_v17 = vld [vmem:[#allocation32_spill] sm:$0xff]  ;;  %v2452_v23 = vmul.f32 %v10688_v6, %v10527_v60 }
 0x22b   : >> { %v962_v47 = vmul.f32 %v7199_v59, %v10687_v17  ;;  %v2338_v26 = vadd.f32 %v2322_v52, %v2304_v33  ;;  %v1373_v8 = vadd.f32 %v1357_v30, %v1311_v44  ;;  %v1425_v15 = vmul.f32 %v7406_v39, %v10689_v35  ;;  %v7607_v19 = vld [vmem:[%s5023_s22 + $0x185] sm:$0xff]  ;;  %v10691_v52 = vld [vmem:[#allocation102_spill] sm:$0xff]  ;;  %v7621_v35 = vld [vmem:[%s5023_s22 + $0x10f] sm:$0xff]  ;;  %10698 = vst [vmem:[#allocation109_spill] sm:$0xff] %v7641_v28 }
 0x22c   : >> { %10690 = vst [vmem:[#allocation43_spill] sm:$0xff] %v7607_v19  ;;  %v1808_v62 = vadd.f32 %v1792_v40, %v1774_v2  ;;  %v7612_v58 = vld [vmem:[%s9477_s3 + $0xb] ss:$0 sm:$0xff]  ;;  %v944_v34 = vadd.f32 %v928_v20, %v910_v51  ;;  %v996_v17 = vmul.f32 %v7218_v50, %v10691_v52  ;;  %v1459_v40 = vmul.f32 %v7621_v35, %v7425_v14  ;;  %v10695_v51 = vld [vmem:[#allocation83_spill] sm:$0xff] }
 0x22d   : >> { %v1922_v46 = vmul.f32 %v7612_v58, %v10627_v13  ;;  %v2372_v60 = vadd.f32 %v2356_v55, %v2338_v26  ;;  %v10692_v30 = vld [vmem:[#allocation84_spill] sm:$0xff]  ;;  %v1407_v44 = vadd.f32 %v1391_v53, %v1373_v8  ;;  %10693 = vst [vmem:[#allocation82_spill] sm:$0xff] %v7621_v35  ;;  %v7628_v13 = vld [vmem:[%s9477_s3 + $0x12] ss:$0 sm:$0xff]  ;;  %v2520_v26 = vmul.f32 %v10695_v51, %v10641_v31 }
 0x22e   : >> { %v2486_v33 = vmul.f32 %v10692_v30, %v6836_v18  ;;  %v1842_v2 = vadd.f32 %v1826_v7, %v1808_v62  ;;  %10694 = vst [vmem:[#allocation110_spill] sm:$0xff] %v7628_v13  ;;  %v1956_v55 = vmul.f32 %v7628_v13, %v10629_v43  ;;  %v978_v20 = vadd.f32 %v962_v47, %v944_v34  ;;  %v10696_v7 = vld [vmem:[#allocation112_spill] sm:$0xff]  ;;  %v10697_v62 = vld [vmem:[#allocation46_spill] sm:$0xff]  ;;  %v10699_v43 = vld [vmem:[#allocation85_spill] sm:$0xff] }
 0x22f   : >> { %v1030_v18 = vmul.f32 %v7237_v4, %v7607_v19  ;;  %v2434_v53 = vadd.f32 %v2418_v21, %v2372_v60  ;;  %v1441_v8 = vadd.f32 %v1425_v15, %v1407_v44  ;;  %v1493_v52 = vmul.f32 %v10697_v62, %v10696_v7  ;;  %v7646_v34 = vld [vmem:[%s5023_s22 + $0x16f] sm:$0xff]  ;;  %v4546_v60 = vld [vmem:[%s5023_s22 + $0xc6] sm:$0xff] }
 0x230   : >> { %v1904_v35 = vadd.f32 %v1888_v41, %v1842_v2  ;;  %v1990_v47 = vmul.f32 %v7641_v28, %v10699_v43  ;;  %10700 = vst [vmem:[#allocation68_spill] sm:$0xff] %v7646_v34  ;;  %v1012_v21 = vadd.f32 %v996_v17, %v978_v20  ;;  %v10701_v19 = vld [vmem:[#allocation52_spill] sm:$0xff]  ;;  %v10704_v4 = vld [vmem:[#allocation15_spill] sm:$0xff] }
 0x231   : >> { %v1092_v31 = vmul.f32 %v4546_v60, %v10701_v19  ;;  %v2468_v15 = vadd.f32 %v2452_v23, %v2434_v53  ;;  %v7651_v44 = vld [vmem:[%s5023_s22 + $0x10b] sm:$0xff]  ;;  %v1475_v7 = vadd.f32 %v1459_v40, %v1441_v8  ;;  %v1527_v50 = vmul.f32 %v7465_v12, %v10704_v4  ;;  %v7663_v17 = vld [vmem:[%s9477_s3 + $0x20] ss:$0 sm:$0xff] }
 0x232   : >> { %10702 = vst [vmem:[#allocation108_spill] sm:$0xff] %v7651_v44  ;;  %v10703_v41 = vld [vmem:[#allocation36_spill] sm:$0xff]  ;;  %v1938_v43 = vadd.f32 %v1922_v46, %v1904_v35  ;;  %v10707_v20 = vld [vmem:[#allocation35_spill] sm:$0xff]  ;;  %v1046_v53 = vadd.f32 %v1030_v18, %v1012_v21  ;;  %v10711_v19 = vld [vmem:[#allocation41_spill] sm:$0xff] }
 0x233   : >> { %v2554_v2 = vmul.f32 %v7651_v44, %v10703_v41  ;;  %v7658_v51 = vld [vmem:[%s5023_s22 + $0x14b] sm:$0xff]  ;;  %10706 = vst [vmem:[#allocation70_spill] sm:$0xff] %v7663_v17  ;;  %v2024_v23 = vmul.f32 %v7663_v17, %v10707_v20  ;;  %v2502_v8 = vadd.f32 %v2486_v33, %v2468_v15  ;;  %v10709_v41 = vld [vmem:[#allocation39_spill] sm:$0xff]  ;;  %v1509_v35 = vadd.f32 %v1493_v52, %v1475_v7  ;;  %v10712_v21 = vld [vmem:[#allocation26_spill] sm:$0xff] }
 0x234   : >> { %10705 = vst [vmem:[#allocation73_spill] sm:$0xff] %v7658_v51  ;;  %v7668_v60 = vld [vmem:[%s5023_s22 + $0xe6] sm:$0xff]  ;;  %v2588_v4 = vmul.f32 %v10654_v32, %v10709_v41  ;;  %v1561_v44 = vmul.f32 %v10711_v19, %v7646_v34  ;;  %v1972_v12 = vadd.f32 %v1956_v55, %v1938_v43  ;;  %v1108_v33 = vadd.f32 %v1092_v31, %v1046_v53  ;;  %v10713_v15 = vld [vmem:[#allocation45_spill] sm:$0xff]  ;;  %v10715_v34 = vld [vmem:[#allocation54_spill] sm:$0xff] }
 0x235   : >> { %10708 = vst [vmem:[#allocation64_spill] sm:$0xff] %v7668_v60  ;;  %v1126_v40 = vmul.f32 %v7668_v60, %v10656_v24  ;;  %v7675_v46 = vld [vmem:[%s5023_s22 + $0x169] sm:$0xff]  ;;  %v7682_v18 = vld [vmem:[%s9477_s3 + $0x27] ss:$0 sm:$0xff]  ;;  %v1160_v32 = vmul.f32 %v10661_v57, %v10713_v15  ;;  %v2536_v60 = vadd.f32 %v2520_v26, %v2502_v8  ;;  %v2622_v52 = vmul.f32 %v10659_v16, %v7658_v51  ;;  %v7702_v16 = vld [vmem:[%s9477_s3 + $0x5] ss:$0 sm:$0xff] }
 0x236   : >> { %10710 = vst [vmem:[#allocation93_spill] sm:$0xff] %v7675_v46  ;;  %v2058_v20 = vmul.f32 %v7682_v18, %v10712_v21  ;;  %v1543_v7 = vadd.f32 %v1527_v50, %v1509_v35  ;;  %v10714_v24 = vld [vmem:[#allocation20_spill] sm:$0xff]  ;;  %v2006_v43 = vadd.f32 %v1990_v47, %v1972_v12  ;;  %v2092_v41 = vmul.f32 %v10715_v34, %v7675_v46  ;;  %v10718_v26 = vld [vmem:[#allocation9_spill] sm:$0xff] }
 0x237   : >> { %v1623_v55 = vmul.f32 %v7491_v5, %v10714_v24  ;;  %v1142_v19 = vadd.f32 %v1126_v40, %v1108_v33  ;;  %v7695_v17 = vld [vmem:[%s5023_s22 + $0x126] sm:$0xff]  ;;  %v2570_v53 = vadd.f32 %v2554_v2, %v2536_v60  ;;  %v1657_v47 = vmul.f32 %v7510_v0, %v10718_v26  ;;  %v10720_v35 = vld [vmem:[#allocation29_spill] sm:$0xff] }
 0x238   : >> { %10716 = vst [vmem:[#allocation89_spill] sm:$0xff] %v7695_v17  ;;  %v1194_v31 = vmul.f32 %v7695_v17, %v7307_v38  ;;  %v10717_v50 = vld [vmem:[#allocation76_spill] sm:$0xff]  ;;  %v1577_v12 = vadd.f32 %v1561_v44, %v1543_v7  ;;  %v2040_v40 = vadd.f32 %v2024_v23, %v2006_v43  ;;  %v1228_v33 = vmul.f32 %v7325_v45, %v10720_v35  ;;  %v7720_v44 = vld [vmem:[%s9477_s3 + $0x13] ss:$0 sm:$0xff]  ;;  %v10721_v43 = vld [vmem:[#allocation27_spill] sm:$0xff] }
 0x239   : >> { %v2154_v24 = vmul.f32 %v7702_v16, %v10717_v50  ;;  %v7711_v8 = vld [vmem:[%s9477_s3 + $0xc] ss:$0 sm:$0xff]  ;;  %v1176_v60 = vadd.f32 %v1160_v32, %v1142_v19  ;;  %v2604_v15 = vadd.f32 %v2588_v4, %v2570_v53  ;;  %v2222_v23 = vmul.f32 %v7720_v44, %v10665_v1  ;;  %v7730_v19 = vld [vmem:[%s5023_s22 + $0x170] sm:$0xff]  ;;  %v10726_v17 = vld [vmem:[#allocation87_spill] sm:$0xff] }
 0x23a   : >> { %10719 = vst [vmem:[#allocation10_spill] sm:$0xff] %v7711_v8  ;;  %v2188_v2 = vmul.f32 %v7711_v8, %v10662_v25  ;;  %v1639_v7 = vadd.f32 %v1623_v55, %v1577_v12  ;;  %v1691_v50 = vmul.f32 %v7524_v9, %v10721_v43  ;;  %v7727_v26 = vld [vmem:[%s5023_s22 + $0x186] sm:$0xff]  ;;  %v2074_v25 = vadd.f32 %v2058_v20, %v2040_v40  ;;  %v7733_v32 = vld [vmem:[%s5023_s22 + $0x110] sm:$0xff]  ;;  %v7744_v55 = vld [vmem:[%s9477_s3 + $0x1a] ss:$0 sm:$0xff] }
 0x23b   : >> { %10722 = vst [vmem:[#allocation94_spill] sm:$0xff] %v7727_v26  ;;  %v10725_v4 = vld [vmem:[#allocation101_spill] sm:$0xff]  ;;  %v1210_v35 = vadd.f32 %v1194_v31, %v1176_v60  ;;  %v1262_v46 = vmul.f32 %v7346_v37, %v10726_v17  ;;  %v7739_v1 = vadd.f32 %v2622_v52, %v2604_v15  ;;  %v10728_v20 = vld [vmem:[#allocation111_spill] sm:$0xff]  ;;  %v10729_v43 = vld [vmem:[#allocation16_spill] sm:$0xff]  ;;  %v1296_v52 = vmul.f32 %v7358_v49, %v7727_v26 }
 0x23c   : >> { %10723 = vst [vmem:[#allocation78_spill] sm:$0xff] %v7730_v19  ;;  %v1725_v53 = vmul.f32 %v7733_v32, %v10725_v4  ;;  %v2256_v12 = vmul.f32 %v7744_v55, %v10728_v20  ;;  %v1673_v40 = vadd.f32 %v1657_v47, %v1639_v7  ;;  %v2108_v31 = vadd.f32 %v2092_v41, %v2074_v25  ;;  %v10730_v60 = vld [vmem:[#allocation40_spill] sm:$0xff]  ;;  %v10732_v25 = vld [vmem:[#allocation71_spill] sm:$0xff]  ;;  %v10736_v26 = vld [vmem:[#allocation38_spill] sm:$0xff] }
 0x23d   : >> { %10724 = vst [vmem:[#allocation12_spill] sm:$0xff] %v7733_v32  ;;  %v1759_v32 = vmul.f32 %v7541_v11, %v10729_v43  ;;  %v1793_v21 = vmul.f32 %v7568_v61, %v10730_v60  ;;  %v1244_v17 = vadd.f32 %v1228_v33, %v1210_v35  ;;  %v2670_v15 = vsel %vm415_vm2, %v7739_v1, 0.0  ;;  %v7761_v7 = vld [vmem:[%s5023_s22 + $0x16a] sm:$0xff]  ;;  %v7766_v33 = vld [vmem:[%s9477_s3 + $0x21] ss:$0 sm:$0xff] }
 0x23e   : >> { %10727 = vst [vmem:[#allocation55_spill] sm:$0xff] %v7739_v1  ;;  %v2702_v37 = vmul.f32 %v7739_v1, %v7739_v1  ;;  %v1707_v20 = vadd.f32 %v1691_v50, %v1673_v40  ;;  %v1827_v47 = vmul.f32 %v7580_v54, %v7730_v19  ;;  %2671 = vadd.xlane.f32.xlu1 %v2670_v15  ;;  %v4558_v60 = vld [vmem:[%s5023_s22 + $0xc7] sm:$0xff] }
 0x23f   : >> { %10731 = vst [vmem:[#allocation37_spill] sm:$0xff] %v7761_v7  ;;  %v2170_v41 = vadd.f32 %v2154_v24, %v2108_v31  ;;  %v2290_v35 = vmul.f32 %v7766_v33, %v10732_v25  ;;  %v1278_v43 = vadd.f32 %v1262_v46, %v1244_v17  ;;  %v1358_v50 = vmul.f32 %v4558_v60, %v7374_v42  ;;  %v10733_v24 = vld [vmem:[#allocation21_spill] sm:$0xff]  ;;  %v7780_v17 = vld [vmem:[%s9477_s3 + $0x28] ss:$0 sm:$0xff]  ;;  %v10735_v60 = vld [vmem:[#allocation23_spill] sm:$0xff] }
 0x240   : >> { %v2734_v40 = vsel %vm415_vm2, %v2702_v37, 0.0  ;;  %v2703_v15 = vmul.f32 %v7547_v10, %v7547_v10  ;;  %v1741_v1 = vadd.f32 %v1725_v53, %v1707_v20  ;;  %v1889_v31 = vmul.f32 %v7596_v22, %v10733_v24  ;;  %v7785_v37 = vld [vmem:[%s5023_s22 + $0xe7] sm:$0xff]  ;;  %v7792_v20 = vld [vmem:[%s9477_s3 + $0x2f] ss:$0 sm:$0xff] }
 0x241   : >> { %2735 = vadd.xlane.f32.xlu0 %v2734_v40  ;;  %v2204_v19 = vadd.f32 %v2188_v2, %v2170_v41  ;;  %v2324_v46 = vmul.f32 %v7780_v17, %v7515_v56  ;;  %v1312_v25 = vadd.f32 %v1296_v52, %v1278_v43  ;;  %10734 = vst [vmem:[#allocation95_spill] sm:$0xff] %v7785_v37  ;;  %v4562_v24 = vld [vmem:[%s5023_s22 + $0xcd] sm:$0xff] }
 0x242   : >> { %v1392_v53 = vmul.f32 %v7785_v37, %v7390_v3  ;;  %v2358_v2 = vmul.f32 %v7792_v20, %v7761_v7  ;;  %v1775_v41 = vadd.f32 %v1759_v32, %v1741_v1  ;;  %v1923_v40 = vmul.f32 %v7612_v58, %v10735_v60  ;;  %v7803_v56 = vld [vmem:[%s5023_s22 + $0xed] sm:$0xff]  ;;  %v10738_v7 = vld [vmem:[#allocation47_spill] sm:$0xff] }
 0x243   : >> { %v827_v52 = vmul.f32 %v4562_v24, %v7146_v27  ;;  %v2238_v43 = vadd.f32 %v2222_v23, %v2204_v19  ;;  %v1374_v10 = vadd.f32 %v1358_v50, %v1312_v25  ;;  %v1426_v37 = vmul.f32 %v7406_v39, %v10736_v26  ;;  %10737 = vst [vmem:[#allocation96_spill] sm:$0xff] %v7803_v56  ;;  %v10739_v19 = vld [vmem:[#allocation14_spill] sm:$0xff]  ;;  %v7814_v25 = vld [vmem:[%s5023_s22 + $0x127] sm:$0xff] }
 0x244   : >> { %v861_v3 = vmul.f32 %v7803_v56, %v7156_v48  ;;  %v2737_v32 = vsel %vm415_vm2, %v2703_v15, 0.0  ;;  %v1809_v1 = vadd.f32 %v1793_v21, %v1775_v41  ;;  %v895_v24 = vmul.f32 %v10738_v7, %v7170_v29  ;;  %10740 = vst [vmem:[#allocation81_spill] sm:$0xff] %v7814_v25  ;;  %v7821_v21 = vld [vmem:[%s9477_s3 + $0x6] ss:$0 sm:$0xff] }
 0x245   : >> { %v843_v60 = vadd.f32 %v827_v52, %v10451_v36  ;;  %v2272_v23 = vadd.f32 %v2256_v12, %v2238_v43  ;;  %v1957_v50 = vmul.f32 %v7628_v13, %v10739_v19  ;;  %v1408_v26 = vadd.f32 %v1392_v53, %v1374_v10  ;;  %v7826_v52 = vld [vmem:[%s5023_s22 + $0x12d] sm:$0xff]  ;;  %v10743_v7 = vld [vmem:[#allocation31_spill] sm:$0xff] }
 0x246   : >> { %v1460_v39 = vmul.f32 %v7814_v25, %v7425_v14  ;;  %v2420_v15 = vmul.f32 %v7821_v21, %v10688_v6  ;;  %v1843_v12 = vadd.f32 %v1827_v47, %v1809_v1  ;;  %10741 = vst [vmem:[#allocation98_spill] sm:$0xff] %v7826_v52  ;;  %v929_v10 = vmul.f32 %v7826_v52, %v7177_v63  ;;  %v7831_v43 = vld [vmem:[%s5023_s22 + $0x111] sm:$0xff]  ;;  %v10749_v56 = vld [vmem:[#allocation63_spill] sm:$0xff] }
 0x247   : >> { %v877_v41 = vadd.f32 %v861_v3, %v843_v60  ;;  %v2306_v53 = vadd.f32 %v2290_v35, %v2272_v23  ;;  %2738 = vadd.xlane.f32.xlu1 %v2737_v32  ;;  %10742 = vst [vmem:[#allocation97_spill] sm:$0xff] %v7831_v43  ;;  %v1991_v19 = vmul.f32 %v7831_v43, %v7641_v28  ;;  %v7840_v3 = vld [vmem:[%s9477_s3 + $0xd] ss:$0 sm:$0xff] }
 0x248   : >> { %v1442_v25 = vadd.f32 %v1426_v37, %v1408_v26  ;;  %v1494_v6 = vmul.f32 %v10697_v62, %v10743_v7  ;;  %10744 = vst [vmem:[#allocation106_spill] sm:$0xff] %v7840_v3  ;;  %v2454_v47 = vmul.f32 %v7840_v3, %v10692_v30  ;;  %v1905_v35 = vadd.f32 %v1889_v31, %v1843_v12  ;;  %v7845_v32 = vld [vmem:[%s5023_s22 + $0x187] sm:$0xff]  ;;  %v10747_v26 = vld [vmem:[#allocation22_spill] sm:$0xff]  ;;  %v7862_v30 = vld [vmem:[%s9477_s3 + $0x14] ss:$0 sm:$0xff] }
 0x249   : >> { %10745 = vst [vmem:[#allocation18_spill] sm:$0xff] %v7845_v32  ;;  %v911_v1 = vadd.f32 %v895_v24, %v877_v41  ;;  %v7848_v60 = vld [vmem:[%s5023_s22 + $0x14d] sm:$0xff]  ;;  %v2340_v23 = vadd.f32 %v2324_v46, %v2306_v53  ;;  %v10748_v7 = vld [vmem:[#allocation70_spill] sm:$0xff]  ;;  %v10753_v31 = vld [vmem:[#allocation83_spill] sm:$0xff] }
 0x24a   : >> { %10746 = vst [vmem:[#allocation100_spill] sm:$0xff] %v7848_v60  ;;  %v963_v37 = vmul.f32 %v7848_v60, %v7199_v59  ;;  %v2025_v43 = vmul.f32 %v10748_v7, %v10747_v26  ;;  %v1476_v52 = vadd.f32 %v1460_v39, %v1442_v25  ;;  %v10750_v62 = vld [vmem:[#allocation34_spill] sm:$0xff]  ;;  %v7857_v28 = vld [vmem:[%s5023_s22 + $0x18d] sm:$0xff]  ;;  %v2488_v24 = vmul.f32 %v7862_v30, %v10753_v31 }
 0x24b   : >> { %v1528_v14 = vmul.f32 %v10750_v62, %v10749_v56  ;;  %10751 = vst [vmem:[#allocation105_spill] sm:$0xff] %v7857_v28  ;;  %v7867_v12 = vld [vmem:[%s5023_s22 + $0x171] sm:$0xff]  ;;  %v1939_v46 = vadd.f32 %v1923_v40, %v1905_v35  ;;  %v945_v41 = vadd.f32 %v929_v10, %v911_v1  ;;  %v10755_v53 = vld [vmem:[#allocation92_spill] sm:$0xff]  ;;  %v2374_v26 = vadd.f32 %v2358_v2, %v2340_v23  ;;  %v7878_v31 = vld [vmem:[%s9477_s3 + $0x1b] ss:$0 sm:$0xff] }
 0x24c   : >> { %10752 = vst [vmem:[#allocation32_spill] sm:$0xff] %v7862_v30  ;;  %v10756_v39 = vld [vmem:[#allocation30_spill] sm:$0xff]  ;;  %v10757_v56 = vld [vmem:[#allocation56_spill] sm:$0xff]  ;;  %v1510_v62 = vadd.f32 %v1494_v6, %v1476_v52  ;;  %v10758_v7 = vld [vmem:[#allocation41_spill] sm:$0xff]  ;;  %v2093_v52 = vmul.f32 %v10715_v34, %v7867_v12 }
 0x24d   : >> { %10754 = vst [vmem:[#allocation103_spill] sm:$0xff] %v7867_v12  ;;  %v997_v25 = vmul.f32 %v10756_v39, %v10755_v53  ;;  %v2059_v60 = vmul.f32 %v7682_v18, %v10757_v56  ;;  %v1562_v3 = vmul.f32 %v10758_v7, %v7845_v32  ;;  %v10759_v30 = vld [vmem:[#allocation108_spill] sm:$0xff]  ;;  %v1973_v10 = vadd.f32 %v1957_v50, %v1939_v46  ;;  %v10760_v2 = vld [vmem:[#allocation50_spill] sm:$0xff]  ;;  %v7891_v53 = vld [vmem:[%s9477_s3 + $0x22] ss:$0 sm:$0xff] }
 0x24e   : >> { %v2522_v40 = vmul.f32 %v7878_v31, %v10759_v30  ;;  %v979_v35 = vadd.f32 %v963_v37, %v945_v41  ;;  %v1031_v1 = vmul.f32 %v10760_v2, %v7857_v28  ;;  %v2436_v56 = vadd.f32 %v2420_v15, %v2374_v26  ;;  %v4572_v23 = vld [vmem:[%s5023_s22 + $0xc8] sm:$0xff]  ;;  %v10761_v30 = vld [vmem:[#allocation39_spill] sm:$0xff] }
 0x24f   : >> { %v1544_v6 = vadd.f32 %v1528_v14, %v1510_v62  ;;  %v1624_v32 = vmul.f32 %v4572_v23, %v7491_v5  ;;  %v2556_v50 = vmul.f32 %v7891_v53, %v10761_v30  ;;  %v2007_v37 = vadd.f32 %v1991_v19, %v1973_v10  ;;  %v4574_v41 = vld [vmem:[%s5023_s22 + $0xce] sm:$0xff]  ;;  %v7910_v19 = vld [vmem:[%s9477_s3 + $0x29] ss:$0 sm:$0xff] }
 0x250   : >> { %v1013_v46 = vadd.f32 %v997_v25, %v979_v35  ;;  %v10762_v15 = vld [vmem:[#allocation52_spill] sm:$0xff]  ;;  %v2470_v14 = vadd.f32 %v2454_v47, %v2436_v56  ;;  %v2590_v30 = vmul.f32 %v7910_v19, %v7658_v51  ;;  %v10767_v35 = vld [vmem:[#allocation61_spill] sm:$0xff] }
 0x251   : >> { %v1093_v26 = vmul.f32 %v4574_v41, %v10762_v15  ;;  %v7898_v28 = vld [vmem:[%s5023_s22 + $0x16b] sm:$0xff]  ;;  %v1578_v12 = vadd.f32 %v1562_v3, %v1544_v6  ;;  %v2041_v25 = vadd.f32 %v2025_v43, %v2007_v37 }
 0x252   : >> { %10763 = vst [vmem:[#allocation33_spill] sm:$0xff] %v7898_v28  ;;  %v10764_v62 = vld [vmem:[#allocation24_spill] sm:$0xff]  ;;  %v1047_v47 = vadd.f32 %v1031_v1, %v1013_v46  ;;  %v2504_v56 = vadd.f32 %v2488_v24, %v2470_v14  ;;  %v10768_v6 = vld [vmem:[#allocation53_spill] sm:$0xff]  ;;  %v10770_v24 = vld [vmem:[#allocation66_spill] sm:$0xff] }
 0x253   : >> { %v2155_v23 = vmul.f32 %v7702_v16, %v10764_v62  ;;  %v7903_v5 = vld [vmem:[%s5023_s22 + $0xe8] sm:$0xff]  ;;  %v2189_v41 = vmul.f32 %v7711_v8, %v10768_v6  ;;  %v1640_v62 = vadd.f32 %v1624_v32, %v1578_v12  ;;  %v7926_v43 = vld [vmem:[%s9477_s3 + $0x30] ss:$0 sm:$0xff]  ;;  %v2075_v37 = vadd.f32 %v2059_v60, %v2041_v25  ;;  %v10771_v32 = vld [vmem:[#allocation91_spill] sm:$0xff] }
 0x254   : >> { %10765 = vst [vmem:[#allocation84_spill] sm:$0xff] %v7903_v5  ;;  %v1658_v7 = vmul.f32 %v7903_v5, %v7510_v0  ;;  %v7915_v10 = vld [vmem:[%s5023_s22 + $0xee] sm:$0xff]  ;;  %v2624_v1 = vmul.f32 %v7926_v43, %v7898_v28  ;;  %v1109_v46 = vadd.f32 %v1093_v26, %v1047_v47  ;;  %v1161_v14 = vmul.f32 %v10770_v24, %v10661_v57 }
 0x255   : >> { %10766 = vst [vmem:[#allocation112_spill] sm:$0xff] %v7915_v10  ;;  %v1127_v3 = vmul.f32 %v7915_v10, %v10767_v35  ;;  %v10769_v5 = vld [vmem:[#allocation25_spill] sm:$0xff]  ;;  %v2538_v6 = vadd.f32 %v2522_v40, %v2504_v56  ;;  %v2223_v12 = vmul.f32 %v7720_v44, %v10771_v32  ;;  %v7935_v51 = vld [vmem:[%s5023_s22 + $0x128] sm:$0xff] }
 0x256   : >> { %v1692_v0 = vmul.f32 %v7524_v9, %v10769_v5  ;;  %v1674_v5 = vadd.f32 %v1658_v7, %v1640_v62  ;;  %10772 = vst [vmem:[#allocation36_spill] sm:$0xff] %v7935_v51  ;;  %v1726_v10 = vmul.f32 %v7935_v51, %v10725_v4  ;;  %v2109_v9 = vadd.f32 %v2093_v52, %v2075_v37  ;;  %v7940_v8 = vld [vmem:[%s5023_s22 + $0x172] sm:$0xff]  ;;  %v10776_v56 = vld [vmem:[#allocation104_spill] sm:$0xff] }
 0x257   : >> { %10773 = vst [vmem:[#allocation15_spill] sm:$0xff] %v7940_v8  ;;  %v7943_v60 = vld [vmem:[%s5023_s22 + $0x112] sm:$0xff]  ;;  %v1143_v25 = vadd.f32 %v1127_v3, %v1109_v46  ;;  %v2572_v47 = vadd.f32 %v2556_v50, %v2538_v6  ;;  %v2291_v62 = vmul.f32 %v7766_v33, %v10776_v56  ;;  %v7955_v32 = vld [vmem:[%s5023_s22 + $0x188] sm:$0xff]  ;;  %v2359_v56 = vmul.f32 %v7792_v20, %v7940_v8 }
 0x258   : >> { %10774 = vst [vmem:[#allocation35_spill] sm:$0xff] %v7943_v60  ;;  %v2257_v26 = vmul.f32 %v7943_v60, %v7744_v55  ;;  %v7948_v40 = vld [vmem:[%s5023_s22 + $0x12e] sm:$0xff]  ;;  %v1708_v52 = vadd.f32 %v1692_v0, %v1674_v5  ;;  %v10778_v37 = vld [vmem:[#allocation62_spill] sm:$0xff]  ;;  %v2171_v28 = vadd.f32 %v2155_v23, %v2109_v9  ;;  %v10781_v5 = vld [vmem:[#allocation99_spill] sm:$0xff] }
 0x259   : >> { %10775 = vst [vmem:[#allocation45_spill] sm:$0xff] %v7948_v40  ;;  %v1195_v7 = vmul.f32 %v7948_v40, %v7307_v38  ;;  %v1760_v51 = vmul.f32 %v7541_v11, %v10778_v37  ;;  %v10779_v24 = vld [vmem:[#allocation88_spill] sm:$0xff]  ;;  %v1177_v46 = vadd.f32 %v1161_v14, %v1143_v25  ;;  %v2606_v6 = vadd.f32 %v2590_v30, %v2572_v47  ;;  %v10783_v25 = vld [vmem:[#allocation77_spill] sm:$0xff]  ;;  %v10784_v40 = vld [vmem:[#allocation51_spill] sm:$0xff] }
 0x25a   : >> { %10777 = vst [vmem:[#allocation20_spill] sm:$0xff] %v7955_v32  ;;  %v2325_v3 = vmul.f32 %v7780_v17, %v10779_v24  ;;  %v7962_v60 = vld [vmem:[%s5023_s22 + $0x14e] sm:$0xff]  ;;  %v1742_v0 = vadd.f32 %v1726_v10, %v1708_v52  ;;  %v1794_v37 = vmul.f32 %v7568_v61, %v10781_v5  ;;  %v2205_v23 = vadd.f32 %v2189_v41, %v2171_v28 }
 0x25b   : >> { %10780 = vst [vmem:[#allocation54_spill] sm:$0xff] %v7962_v60  ;;  %v1229_v50 = vmul.f32 %v7962_v60, %v7325_v45  ;;  %v7971_v9 = vld [vmem:[%s5023_s22 + $0x18e] sm:$0xff]  ;;  %v1828_v24 = vmul.f32 %v7580_v54, %v7955_v32  ;;  %v1211_v14 = vadd.f32 %v1195_v7, %v1177_v46  ;;  %v1263_v60 = vmul.f32 %v10784_v40, %v10783_v25  ;;  %v4584_v32 = vld [vmem:[%s5023_s22 + $0x105] sm:$0xff] }
 0x25c   : >> { %10782 = vst [vmem:[#allocation76_spill] sm:$0xff] %v7971_v9  ;;  %v7977_v30 = vadd.f32 %v2624_v1, %v2606_v6  ;;  %v1776_v47 = vadd.f32 %v1760_v51, %v1742_v0  ;;  %v4583_v8 = vld [vmem:[%s5023_s22 + $0xc9] sm:$0xff]  ;;  %v2239_v61 = vadd.f32 %v2223_v12, %v2205_v23  ;;  %v1297_v41 = vmul.f32 %v7358_v49, %v7971_v9  ;;  %v10788_v0 = vld [vmem:[#allocation42_spill] sm:$0xff] }
 0x25d   : >> { %v1890_v10 = vmul.f32 %v4583_v8, %v7596_v22  ;;  %v10786_v52 = vld [vmem:[#allocation72_spill] sm:$0xff]  ;;  %v1245_v28 = vadd.f32 %v1229_v50, %v1211_v14  ;;  %v862_v7 = vmul.f32 %v4584_v32, %v7156_v48  ;;  %v2421_v23 = vmul.f32 %v7821_v21, %v10788_v0  ;;  %v10806_v9 = vld [vmem:[#allocation70_spill] sm:$0xff] }
 0x25e   : >> { %10785 = vst [vmem:[#allocation9_spill] sm:$0xff] %v7977_v30  ;;  %v828_v5 = vmul.f32 %v10786_v52, %v7146_v27  ;;  %v2676_v1 = vsel %vm415_vm2, %v7977_v30, 0.0  ;;  %v2704_v51 = vmul.f32 %v7977_v30, %v7977_v30  ;;  %v1810_v46 = vadd.f32 %v1794_v37, %v1776_v47  ;;  %v7992_v8 = vld [vmem:[%s5023_s22 + $0xe9] sm:$0xff] }
 0x25f   : >> { %10787 = vst [vmem:[#allocation29_spill] sm:$0xff] %v7992_v8  ;;  %v1924_v27 = vmul.f32 %v7992_v8, %v7612_v58  ;;  %2677 = vadd.xlane.f32.xlu2 %v2676_v1  ;;  %v2273_v12 = vadd.f32 %v2257_v26, %v2239_v61  ;;  %v1279_v50 = vadd.f32 %v1263_v60, %v1245_v28  ;;  %v4586_v6 = vld [vmem:[%s5023_s22 + $0xcf] sm:$0xff]  ;;  %v10796_v8 = vld [vmem:[#allocation90_spill] sm:$0xff] }
 0x260   : >> { %v1359_v48 = vmul.f32 %v4586_v6, %v7374_v42  ;;  %v844_v32 = vadd.f32 %v828_v5, %v10451_v36  ;;  %v2740_v37 = vsel %vm415_vm2, %v2704_v51, 0.0  ;;  %v1844_v14 = vadd.f32 %v1828_v24, %v1810_v46  ;;  %v10789_v47 = vld [vmem:[#allocation65_spill] sm:$0xff]  ;;  %v10791_v26 = vld [vmem:[#allocation80_spill] sm:$0xff]  ;;  %v10794_v46 = vld [vmem:[#allocation82_spill] sm:$0xff] }
 0x261   : >> { %v896_v52 = vmul.f32 %v10789_v47, %v7170_v29  ;;  %v2307_v30 = vadd.f32 %v2291_v62, %v2273_v12  ;;  %2741 = vadd.xlane.f32.xlu1 %v2740_v37  ;;  %v1313_v61 = vadd.f32 %v1297_v41, %v1279_v50  ;;  %v8005_v60 = vld [vmem:[%s5023_s22 + $0xef] sm:$0xff]  ;;  %v4588_v29 = vld [vmem:[%s5023_s22 + $0x145] sm:$0xff]  ;;  %v10795_v37 = vld [vmem:[#allocation102_spill] sm:$0xff] }
 0x262   : >> { %10790 = vst [vmem:[#allocation27_spill] sm:$0xff] %v8005_v60  ;;  %v1393_v28 = vmul.f32 %v8005_v60, %v10791_v26  ;;  %v878_v5 = vadd.f32 %v862_v7, %v844_v32  ;;  %v1906_v1 = vadd.f32 %v1890_v10, %v1844_v14  ;;  %v10792_v6 = vld [vmem:[#allocation85_spill] sm:$0xff]  ;;  %v930_v62 = vmul.f32 %v4588_v29, %v7177_v63  ;;  %v10797_v7 = vld [vmem:[#allocation106_spill] sm:$0xff]  ;;  %v10801_v63 = vld [vmem:[#allocation28_spill] sm:$0xff] }
 0x263   : >> { %v1958_v51 = vmul.f32 %v7628_v13, %v10792_v6  ;;  %v10793_v24 = vld [vmem:[#allocation49_spill] sm:$0xff]  ;;  %v2341_v12 = vadd.f32 %v2325_v3, %v2307_v30  ;;  %v1375_v41 = vadd.f32 %v1359_v48, %v1313_v61  ;;  %v964_v47 = vmul.f32 %v7199_v59, %v10795_v37  ;;  %v810_v30 = vld [vmem:[%s5023_s22 + $0x1a5] sm:$0xff]  ;;  %v10805_v37 = vld [vmem:[#allocation26_spill] sm:$0xff] }
 0x264   : >> { %v1427_v0 = vmul.f32 %v10794_v46, %v10793_v24  ;;  %v912_v50 = vadd.f32 %v896_v52, %v878_v5  ;;  %v2455_v32 = vmul.f32 %v10797_v7, %v10796_v8  ;;  %v1940_v10 = vadd.f32 %v1924_v27, %v1906_v1  ;;  %v8020_v14 = vld [vmem:[%s5023_s22 + $0x129] sm:$0xff]  ;;  %v10802_v61 = vld [vmem:[#allocation43_spill] sm:$0xff]  ;;  %v10803_v27 = vld [vmem:[#allocation58_spill] sm:$0xff] }
 0x265   : >> { %10798 = vst [vmem:[#allocation101_spill] sm:$0xff] %v8020_v14  ;;  %v10799_v6 = vld [vmem:[#allocation109_spill] sm:$0xff]  ;;  %v2375_v48 = vadd.f32 %v2359_v56, %v2341_v12  ;;  %v1409_v59 = vadd.f32 %v1393_v28, %v1375_v41  ;;  %v998_v8 = vmul.f32 %v10756_v39, %v10802_v61  ;;  %v10804_v5 = vld [vmem:[#allocation32_spill] sm:$0xff] }
 0x266   : >> { %v1992_v46 = vmul.f32 %v8020_v14, %v10799_v6  ;;  %v8025_v60 = vld [vmem:[%s5023_s22 + $0x12f] sm:$0xff]  ;;  %v946_v52 = vadd.f32 %v930_v62, %v912_v50  ;;  %v2489_v1 = vmul.f32 %v10804_v5, %v10803_v27  ;;  %v1974_v29 = vadd.f32 %v1958_v51, %v1940_v10  ;;  %v10807_v6 = vld [vmem:[#allocation46_spill] sm:$0xff] }
 0x267   : >> { %10800 = vst [vmem:[#allocation16_spill] sm:$0xff] %v8025_v60  ;;  %v1461_v3 = vmul.f32 %v8025_v60, %v10801_v63  ;;  %v2026_v14 = vmul.f32 %v10806_v9, %v10805_v37  ;;  %v8037_v25 = vld [vmem:[%s5023_s22 + $0x14f] sm:$0xff]  ;;  %v2437_v13 = vadd.f32 %v2421_v23, %v2375_v48  ;;  %v1443_v28 = vadd.f32 %v1427_v0, %v1409_v59  ;;  %v10813_v48 = vld [vmem:[#allocation34_spill] sm:$0xff] }
 0x268   : >> { %v1495_v60 = vmul.f32 %v8037_v25, %v10807_v6  ;;  %v8042_v63 = vld [vmem:[%s5023_s22 + $0x189] sm:$0xff]  ;;  %v980_v39 = vadd.f32 %v964_v47, %v946_v52  ;;  %v1032_v62 = vmul.f32 %v10760_v2, %v810_v30  ;;  %v8049_v12 = vld [vmem:[%s5023_s22 + $0x113] sm:$0xff]  ;;  %v2008_v41 = vadd.f32 %v1992_v46, %v1974_v29  ;;  %v10815_v30 = vld [vmem:[#allocation67_spill] sm:$0xff] }
 0x269   : >> { %10808 = vst [vmem:[#allocation40_spill] sm:$0xff] %v8042_v63  ;;  %v8045_v56 = vld [vmem:[%s5023_s22 + $0x18f] sm:$0xff]  ;;  %v2523_v51 = vmul.f32 %v8049_v12, %v7878_v31  ;;  %v2471_v27 = vadd.f32 %v2455_v32, %v2437_v13  ;;  %v1477_v0 = vadd.f32 %v1461_v3, %v1443_v28  ;;  %v2557_v52 = vmul.f32 %v7891_v53, %v10815_v30 }
 0x26a   : >> { %10809 = vst [vmem:[#allocation71_spill] sm:$0xff] %v8045_v56  ;;  %v10811_v50 = vld [vmem:[#allocation93_spill] sm:$0xff]  ;;  %v10812_v23 = vld [vmem:[#allocation68_spill] sm:$0xff]  ;;  %v1014_v59 = vadd.f32 %v998_v8, %v980_v39  ;;  %v2042_v37 = vadd.f32 %v2026_v14, %v2008_v41  ;;  %v2094_v46 = vmul.f32 %v10715_v34, %v8042_v63 }
 0x26b   : >> { %10810 = vst [vmem:[#allocation21_spill] sm:$0xff] %v8049_v12  ;;  %v2060_v10 = vmul.f32 %v7682_v18, %v10811_v50  ;;  %v1529_v61 = vmul.f32 %v10813_v48, %v10812_v23  ;;  %v10814_v47 = vld [vmem:[#allocation64_spill] sm:$0xff]  ;;  %v10816_v29 = vld [vmem:[#allocation41_spill] sm:$0xff]  ;;  %v2505_v13 = vadd.f32 %v2489_v1, %v2471_v27  ;;  %v1511_v32 = vadd.f32 %v1495_v60, %v1477_v0 }
 0x26c   : >> { %v1094_v2 = vmul.f32 %v10814_v47, %v10762_v15  ;;  %v1563_v50 = vmul.f32 %v10816_v29, %v8045_v56  ;;  %v8066_v12 = vld [vmem:[%s5023_s22 + $0x173] sm:$0xff]  ;;  %v1048_v3 = vadd.f32 %v1032_v62, %v1014_v59  ;;  %v4593_v8 = vld [vmem:[%s5023_s22 + $0x106] sm:$0xff] }
 0x26d   : >> { %10817 = vst [vmem:[#allocation23_spill] sm:$0xff] %v8066_v12  ;;  %v1128_v15 = vmul.f32 %v4593_v8, %v10767_v35  ;;  %v10818_v28 = vld [vmem:[#allocation13_spill] sm:$0xff]  ;;  %v2076_v14 = vadd.f32 %v2060_v10, %v2042_v37  ;;  %v10819_v63 = vld [vmem:[#allocation48_spill] sm:$0xff]  ;;  %v2539_v23 = vadd.f32 %v2523_v51, %v2505_v13  ;;  %v1545_v1 = vadd.f32 %v1529_v61, %v1511_v32  ;;  %v10822_v59 = vld [vmem:[#allocation10_spill] sm:$0xff] }
 0x26e   : >> { %v2591_v39 = vmul.f32 %v7910_v19, %v10818_v28  ;;  %v4594_v41 = vld [vmem:[%s5023_s22 + $0xca] sm:$0xff]  ;;  %v1110_v60 = vadd.f32 %v1094_v2, %v1048_v3  ;;  %v2625_v35 = vmul.f32 %v7926_v43, %v8066_v12  ;;  %v10823_v28 = vld [vmem:[#allocation75_spill] sm:$0xff] }
 0x26f   : >> { %v2156_v47 = vmul.f32 %v4594_v41, %v7702_v16  ;;  %v4595_v30 = vld [vmem:[%s5023_s22 + $0xd0] sm:$0xff]  ;;  %v2110_v0 = vadd.f32 %v2094_v46, %v2076_v14  ;;  %v2573_v61 = vadd.f32 %v2557_v52, %v2539_v23  ;;  %v1579_v2 = vadd.f32 %v1563_v50, %v1545_v1  ;;  %v4598_v32 = vld [vmem:[%s5023_s22 + $0x146] sm:$0xff] }
 0x270   : >> { %v1625_v56 = vmul.f32 %v4595_v30, %v10819_v63  ;;  %v10820_v62 = vld [vmem:[#allocation89_spill] sm:$0xff]  ;;  %v1144_v13 = vadd.f32 %v1128_v15, %v1110_v60  ;;  %v10824_v41 = vld [vmem:[#allocation111_spill] sm:$0xff]  ;;  %v10827_v50 = vld [vmem:[#allocation44_spill] sm:$0xff] }
 0x271   : >> { %v1162_v27 = vmul.f32 %v10820_v62, %v10661_v57  ;;  %v8081_v10 = vld [vmem:[%s5023_s22 + $0xea] sm:$0xff]  ;;  %v1196_v57 = vmul.f32 %v4598_v32, %v7307_v38  ;;  %v2172_v3 = vadd.f32 %v2156_v47, %v2110_v0  ;;  %v2224_v46 = vmul.f32 %v7720_v44, %v10824_v41  ;;  %v10829_v60 = vld [vmem:[#allocation107_spill] sm:$0xff] }
 0x272   : >> { %10821 = vst [vmem:[#allocation38_spill] sm:$0xff] %v8081_v10  ;;  %v2190_v37 = vmul.f32 %v8081_v10, %v10822_v59  ;;  %v8086_v8 = vld [vmem:[%s5023_s22 + $0xf0] sm:$0xff]  ;;  %v2607_v62 = vadd.f32 %v2591_v39, %v2573_v61  ;;  %v1641_v23 = vadd.f32 %v1625_v56, %v1579_v2  ;;  %v10828_v52 = vld [vmem:[#allocation12_spill] sm:$0xff]  ;;  %v2292_v47 = vmul.f32 %v7766_v33, %v10829_v60  ;;  %v10831_v41 = vld [vmem:[#allocation87_spill] sm:$0xff] }
 0x273   : >> { %v1659_v51 = vmul.f32 %v8086_v8, %v10823_v28  ;;  %v8095_v14 = vld [vmem:[%s5023_s22 + $0x12a] sm:$0xff]  ;;  %v1693_v15 = vmul.f32 %v10828_v52, %v10827_v50  ;;  %v1178_v1 = vadd.f32 %v1162_v27, %v1144_v13  ;;  %v1230_v12 = vmul.f32 %v7325_v45, %v10831_v41  ;;  %v4601_v45 = vld [vmem:[%s9477_s3] ss:$0 sm:$0xff] }
 0x274   : >> { %10825 = vst [vmem:[#allocation14_spill] sm:$0xff] %v8095_v14  ;;  %v2258_v30 = vmul.f32 %v8095_v14, %v7744_v55  ;;  %v8100_v10 = vld [vmem:[%s5023_s22 + $0x18a] sm:$0xff]  ;;  %v2206_v38 = vadd.f32 %v2190_v37, %v2172_v3  ;;  %v8110_v14 = vadd.f32 %v2625_v35, %v2607_v62  ;;  %v10833_v3 = vld [vmem:[#allocation94_spill] sm:$0xff] }
 0x275   : >> { %10826 = vst [vmem:[#allocation31_spill] sm:$0xff] %v8100_v10  ;;  %v10830_v0 = vld [vmem:[#allocation37_spill] sm:$0xff]  ;;  %v1675_v39 = vadd.f32 %v1659_v51, %v1641_v23  ;;  %v1076_v27 = vld [vmem:[%s5023_s22 + $0x1a6] sm:$0xff]  ;;  %v1212_v37 = vadd.f32 %v1196_v57, %v1178_v1  ;;  %v2360_v13 = vmul.f32 %v7792_v20, %v8100_v10  ;;  %v1264_v60 = vmul.f32 %v10784_v40, %v10833_v3 }
 0x276   : >> { %v2326_v32 = vmul.f32 %v7780_v17, %v10830_v0  ;;  %10832 = vst [vmem:[#allocation22_spill] sm:$0xff] %v8110_v14  ;;  %v8113_v61 = vld [vmem:[%s5023_s22 + $0x130] sm:$0xff]  ;;  %v2240_v2 = vadd.f32 %v2224_v46, %v2206_v38  ;;  %v10834_v35 = vld [vmem:[#allocation96_spill] sm:$0xff]  ;;  %v2679_v62 = vsel %vm415_vm2, %v8110_v14, 0.0  ;;  %v2705_v23 = vmul.f32 %v8110_v14, %v8110_v14  ;;  %v10835_v0 = vld [vmem:[#allocation78_spill] sm:$0xff] }
 0x277   : >> { %v1727_v56 = vmul.f32 %v8113_v61, %v10725_v4  ;;  %v829_v51 = vmul.f32 %v4601_v45, %v10834_v35  ;;  %v1709_v57 = vadd.f32 %v1693_v15, %v1675_v39  ;;  %v8131_v46 = vld [vmem:[%s5023_s22 + $0x150] sm:$0xff]  ;;  %2680 = vadd.xlane.f32.xlu0 %v2679_v62  ;;  %v1246_v41 = vadd.f32 %v1230_v12, %v1212_v37  ;;  %v10836_v14 = vld [vmem:[#allocation11_spill] sm:$0xff] }
 0x278   : >> { %v1761_v1 = vmul.f32 %v8131_v46, %v7541_v11  ;;  %v2274_v40 = vadd.f32 %v2258_v30, %v2240_v2  ;;  %v8136_v38 = vld [vmem:[%s5023_s22 + $0x190] sm:$0xff]  ;;  %v1298_v3 = vmul.f32 %v7358_v49, %v1076_v27  ;;  %v2743_v35 = vsel %vm415_vm2, %v2705_v23, 0.0  ;;  %v4603_v39 = vld [vmem:[%s9477_s3 + $0x7] ss:$0 sm:$0xff]  ;;  %v10839_v27 = vld [vmem:[#allocation98_spill] sm:$0xff] }
 0x279   : >> { %v845_v45 = vadd.f32 %v829_v51, %v10451_v36  ;;  %v1743_v10 = vadd.f32 %v1727_v56, %v1709_v57  ;;  %v1795_v15 = vmul.f32 %v10836_v14, %v10835_v0  ;;  %v10837_v62 = vld [vmem:[#allocation47_spill] sm:$0xff]  ;;  %2744 = vadd.xlane.f32.xlu2 %v2743_v35  ;;  %v1280_v37 = vadd.f32 %v1264_v60, %v1246_v41  ;;  %v4604_v56 = vld [vmem:[%s9477_s3 + $0xe] ss:$0 sm:$0xff] }
 0x27a   : >> { %v863_v30 = vmul.f32 %v4603_v39, %v10837_v62  ;;  %v2308_v12 = vadd.f32 %v2292_v47, %v2274_v40  ;;  %v10838_v49 = vld [vmem:[#allocation95_spill] sm:$0xff]  ;;  %v897_v2 = vmul.f32 %v4604_v56, %v10839_v27  ;;  %v1829_v23 = vmul.f32 %v7580_v54, %v8136_v38  ;;  %v4605_v47 = vld [vmem:[%s9477_s3 + $0x15] ss:$0 sm:$0xff]  ;;  %v10840_v60 = vld [vmem:[#allocation100_spill] sm:$0xff] }
 0x27b   : >> { %v1360_v36 = vmul.f32 %v10838_v49, %v7374_v42  ;;  %v1777_v51 = vadd.f32 %v1761_v1, %v1743_v10  ;;  %v931_v40 = vmul.f32 %v4605_v47, %v10840_v60  ;;  %v4606_v42 = vld [vmem:[%s5023_s22 + $0xcb] sm:$0xff]  ;;  %v1314_v39 = vadd.f32 %v1298_v3, %v1280_v37  ;;  %v4609_v56 = vld [vmem:[%s9477_s3 + $0x1c] ss:$0 sm:$0xff] }
 0x27c   : >> { %v879_v57 = vadd.f32 %v863_v30, %v845_v45  ;;  %v2342_v41 = vadd.f32 %v2326_v32, %v2308_v12  ;;  %v2422_v35 = vmul.f32 %v4606_v42, %v7821_v21  ;;  %v4607_v62 = vld [vmem:[%s5023_s22 + $0x107] sm:$0xff]  ;;  %v4608_v49 = vld [vmem:[%s5023_s22 + $0xd1] sm:$0xff] }
 0x27d   : >> { %v1394_v10 = vmul.f32 %v4607_v62, %v10791_v26  ;;  %v1811_v1 = vadd.f32 %v1795_v15, %v1777_v51  ;;  %v1891_v45 = vmul.f32 %v4608_v49, %v7596_v22  ;;  %v10841_v27 = vld [vmem:[#allocation92_spill] sm:$0xff]  ;;  %v1376_v37 = vadd.f32 %v1360_v36, %v1314_v39  ;;  %v10843_v26 = vld [vmem:[#allocation81_spill] sm:$0xff] }
 0x27e   : >> { %v913_v30 = vadd.f32 %v897_v2, %v879_v57  ;;  %v965_v32 = vmul.f32 %v4609_v56, %v10841_v27  ;;  %v2376_v12 = vadd.f32 %v2360_v13, %v2342_v41  ;;  %v8170_v47 = vld [vmem:[%s5023_s22 + $0xeb] sm:$0xff]  ;;  %v1428_v15 = vmul.f32 %v10843_v26, %v10793_v24  ;;  %v4612_v13 = vld [vmem:[%s9477_s3 + $0x23] ss:$0 sm:$0xff]  ;;  %v10848_v26 = vld [vmem:[#allocation110_spill] sm:$0xff] }
 0x27f   : >> { %10842 = vst [vmem:[#allocation83_spill] sm:$0xff] %v8170_v47  ;;  %v2456_v3 = vmul.f32 %v8170_v47, %v10797_v7  ;;  %v811_v51 = vld [vmem:[%s5023_s22 + $0x1ad] sm:$0xff]  ;;  %v1845_v60 = vadd.f32 %v1829_v23, %v1811_v1  ;;  %v1410_v39 = vadd.f32 %v1394_v10, %v1376_v37 }
 0x280   : >> { %v8178_v2 = vld [vmem:[%s5023_s22 + $0xf1] sm:$0xff]  ;;  %v947_v42 = vadd.f32 %v931_v40, %v913_v30  ;;  %v2438_v49 = vadd.f32 %v2422_v35, %v2376_v12  ;;  %v10846_v36 = vld [vmem:[#allocation108_spill] sm:$0xff] }
 0x281   : >> { %10844 = vst [vmem:[#allocation30_spill] sm:$0xff] %v8178_v2  ;;  %v1925_v57 = vmul.f32 %v8178_v2, %v7612_v58  ;;  %v10845_v41 = vld [vmem:[#allocation105_spill] sm:$0xff]  ;;  %v2490_v24 = vmul.f32 %v10804_v5, %v10846_v36  ;;  %v4613_v23 = vld [vmem:[%s5023_s22 + $0x147] sm:$0xff]  ;;  %v1907_v27 = vadd.f32 %v1891_v45, %v1845_v60  ;;  %v1444_v37 = vadd.f32 %v1428_v15, %v1410_v39 }
 0x282   : >> { %v999_v62 = vmul.f32 %v4612_v13, %v10845_v41  ;;  %v10847_v1 = vld [vmem:[#allocation28_spill] sm:$0xff]  ;;  %v10849_v47 = vld [vmem:[#allocation97_spill] sm:$0xff]  ;;  %v981_v30 = vadd.f32 %v965_v32, %v947_v42  ;;  %v2472_v35 = vadd.f32 %v2456_v3, %v2438_v49  ;;  %v10851_v41 = vld [vmem:[#allocation63_spill] sm:$0xff] }
 0x283   : >> { %v1462_v56 = vmul.f32 %v4613_v23, %v10847_v1  ;;  %v1959_v40 = vmul.f32 %v10849_v47, %v10848_v26  ;;  %v4614_v2 = vld [vmem:[%s9477_s3 + $0x2a] ss:$0 sm:$0xff]  ;;  %v8196_v12 = vld [vmem:[%s5023_s22 + $0x12b] sm:$0xff]  ;;  %v1496_v45 = vmul.f32 %v10807_v6, %v10851_v41  ;;  %v1941_v60 = vadd.f32 %v1925_v57, %v1907_v27  ;;  %v4617_v3 = vld [vmem:[%s9477_s3 + $0x1] ss:$0 sm:$0xff] }
 0x284   : >> { %v1033_v13 = vmul.f32 %v4614_v2, %v811_v51  ;;  %10850 = vst [vmem:[#allocation56_spill] sm:$0xff] %v8196_v12  ;;  %v2524_v10 = vmul.f32 %v8196_v12, %v7878_v31  ;;  %v8203_v23 = vld [vmem:[%s5023_s22 + $0x131] sm:$0xff]  ;;  %v1342_v1 = vld [vmem:[%s5023_s22 + $0x1a7] sm:$0xff]  ;;  %v1015_v51 = vadd.f32 %v999_v62, %v981_v30  ;;  %v2506_v12 = vadd.f32 %v2490_v24, %v2472_v35 }
 0x285   : >> { %10852 = vst [vmem:[#allocation50_spill] sm:$0xff] %v8203_v23  ;;  %v10853_v32 = vld [vmem:[#allocation109_spill] sm:$0xff]  ;;  %v10854_v2 = vld [vmem:[#allocation112_spill] sm:$0xff]  ;;  %v1478_v6 = vadd.f32 %v1462_v56, %v1444_v37  ;;  %v10856_v57 = vld [vmem:[#allocation18_spill] sm:$0xff]  ;;  %v1975_v36 = vadd.f32 %v1959_v40, %v1941_v60  ;;  %v1564_v40 = vmul.f32 %v10816_v29, %v1342_v1 }
 0x286   : >> { %v1993_v42 = vmul.f32 %v8203_v23, %v10853_v32  ;;  %v1095_v49 = vmul.f32 %v4617_v3, %v10854_v2  ;;  %v10855_v15 = vld [vmem:[#allocation73_spill] sm:$0xff]  ;;  %v1530_v27 = vmul.f32 %v10813_v48, %v10856_v57  ;;  %v1049_v30 = vadd.f32 %v1033_v13, %v1015_v51  ;;  %v4619_v24 = vld [vmem:[%s9477_s3 + $0x8] ss:$0 sm:$0xff]  ;;  %v10858_v35 = vld [vmem:[#allocation66_spill] sm:$0xff] }
 0x287   : >> { %v2558_v39 = vmul.f32 %v7891_v53, %v10855_v15  ;;  %v8217_v41 = vld [vmem:[%s5023_s22 + $0x18b] sm:$0xff]  ;;  %v1129_v3 = vmul.f32 %v4619_v24, %v10858_v35  ;;  %v2540_v2 = vadd.f32 %v2524_v10, %v2506_v12  ;;  %v1512_v57 = vadd.f32 %v1496_v45, %v1478_v6  ;;  %v10860_v15 = vld [vmem:[#allocation103_spill] sm:$0xff]  ;;  %v4621_v6 = vld [vmem:[%s9477_s3 + $0x16] ss:$0 sm:$0xff] }
 0x288   : >> { %v8220_v23 = vld [vmem:[%s5023_s22 + $0x151] sm:$0xff]  ;;  %v2009_v60 = vadd.f32 %v1993_v42, %v1975_v36  ;;  %v2061_v13 = vmul.f32 %v7682_v18, %v10860_v15  ;;  %v1111_v51 = vadd.f32 %v1095_v49, %v1049_v30  ;;  %v2626_v35 = vmul.f32 %v7926_v43, %v8217_v41  ;;  %v10862_v29 = vld [vmem:[#allocation84_spill] sm:$0xff] }
 0x289   : >> { %10857 = vst [vmem:[#allocation39_spill] sm:$0xff] %v8220_v23  ;;  %v2027_v62 = vmul.f32 %v8220_v23, %v10806_v9  ;;  %v10859_v56 = vld [vmem:[#allocation33_spill] sm:$0xff]  ;;  %v4620_v23 = vld [vmem:[%s9477_s3 + $0xf] ss:$0 sm:$0xff]  ;;  %v2574_v10 = vadd.f32 %v2558_v39, %v2540_v2  ;;  %v1546_v45 = vadd.f32 %v1530_v27, %v1512_v57  ;;  %v1626_v36 = vmul.f32 %v10862_v29, %v10819_v63  ;;  %v10863_v30 = vld [vmem:[#allocation54_spill] sm:$0xff] }
 0x28a   : >> { %v2592_v37 = vmul.f32 %v7910_v19, %v10859_v56  ;;  %v8231_v48 = vld [vmem:[%s5023_s22 + $0x191] sm:$0xff]  ;;  %v1145_v49 = vadd.f32 %v1129_v3, %v1111_v51 }
 0x28b   : >> { %v10861_v24 = vld [vmem:[#allocation45_spill] sm:$0xff]  ;;  %v2043_v42 = vadd.f32 %v2027_v62, %v2009_v60  ;;  %v2095_v1 = vmul.f32 %v10715_v34, %v8231_v48  ;;  %v1580_v2 = vadd.f32 %v1564_v40, %v1546_v45  ;;  %v4624_v34 = vld [vmem:[%s9477_s3 + $0x1d] ss:$0 sm:$0xff] }
 0x28c   : >> { %v1163_v12 = vmul.f32 %v4620_v23, %v10861_v24  ;;  %v1197_v23 = vmul.f32 %v4621_v6, %v10863_v30  ;;  %v2608_v39 = vadd.f32 %v2592_v37, %v2574_v10  ;;  %v4622_v24 = vld [vmem:[%s5023_s22 + $0x108] sm:$0xff]  ;;  %v4623_v63 = vld [vmem:[%s5023_s22 + $0xd2] sm:$0xff] }
 0x28d   : >> { %v1660_v27 = vmul.f32 %v4622_v24, %v10823_v28  ;;  %v2077_v57 = vadd.f32 %v2061_v13, %v2043_v42  ;;  %v2157_v62 = vmul.f32 %v4623_v63, %v7702_v16  ;;  %v10864_v3 = vld [vmem:[#allocation77_spill] sm:$0xff]  ;;  %v1642_v6 = vadd.f32 %v1626_v36, %v1580_v2  ;;  %v10865_v37 = vld [vmem:[#allocation36_spill] sm:$0xff]  ;;  %v4626_v42 = vld [vmem:[%s9477_s3 + $0x24] ss:$0 sm:$0xff] }
 0x28e   : >> { %v1179_v60 = vadd.f32 %v1163_v12, %v1145_v49  ;;  %v1231_v51 = vmul.f32 %v4624_v34, %v10864_v3  ;;  %v8258_v29 = vadd.f32 %v2626_v35, %v2608_v39  ;;  %v1694_v40 = vmul.f32 %v10865_v37, %v10827_v50  ;;  %v1077_v10 = vld [vmem:[%s5023_s22 + $0x1ae] sm:$0xff]  ;;  %v10867_v2 = vld [vmem:[#allocation35_spill] sm:$0xff]  ;;  %v4628_v63 = vld [vmem:[%s9477_s3 + $0x2b] ss:$0 sm:$0xff] }
 0x28f   : >> { %v2111_v28 = vadd.f32 %v2095_v1, %v2077_v57  ;;  %v8264_v13 = vld [vmem:[%s5023_s22 + $0xf2] sm:$0xff]  ;;  %v10866_v49 = vld [vmem:[#allocation76_spill] sm:$0xff]  ;;  %v1676_v36 = vadd.f32 %v1660_v27, %v1642_v6  ;;  %v2225_v24 = vmul.f32 %v10867_v2, %v7720_v44  ;;  %v10868_v27 = vld [vmem:[#allocation99_spill] sm:$0xff] }
 0x290   : >> { %v2191_v12 = vmul.f32 %v8264_v13, %v10822_v59  ;;  %v1213_v45 = vadd.f32 %v1197_v23, %v1179_v60  ;;  %v1265_v30 = vmul.f32 %v4626_v42, %v10866_v49  ;;  %v2682_v35 = vsel %vm415_vm2, %v8258_v29, 0.0  ;;  %v4627_v1 = vld [vmem:[%s5023_s22 + $0x148] sm:$0xff] }
 0x291   : >> { %v2706_v50 = vmul.f32 %v8258_v29, %v8258_v29  ;;  %v1728_v39 = vmul.f32 %v4627_v1, %v10725_v4  ;;  %2683 = vadd.xlane.f32.xlu0 %v2682_v35  ;;  %v2173_v23 = vadd.f32 %v2157_v62, %v2111_v28  ;;  %v1299_v60 = vmul.f32 %v4628_v63, %v1077_v10  ;;  %v8287_v62 = vld [vmem:[%s5023_s22 + $0x132] sm:$0xff]  ;;  %v1608_v37 = vld [vmem:[%s5023_s22 + $0x1a8] sm:$0xff]  ;;  %v4630_v10 = vld [vmem:[%s9477_s3 + $0x2] ss:$0 sm:$0xff] }
 0x292   : >> { %v1247_v57 = vadd.f32 %v1231_v51, %v1213_v45  ;;  %v1710_v3 = vadd.f32 %v1694_v40, %v1676_v36  ;;  %v1762_v6 = vmul.f32 %v7541_v11, %v10868_v27  ;;  %v2259_v51 = vmul.f32 %v8287_v62, %v7744_v55  ;;  %v10869_v45 = vld [vmem:[#allocation27_spill] sm:$0xff]  ;;  %v10870_v49 = vld [vmem:[#allocation20_spill] sm:$0xff]  ;;  %v10871_v1 = vld [vmem:[#allocation82_spill] sm:$0xff] }
 0x293   : >> { %v2746_v34 = vsel %vm415_vm2, %v2706_v50, 0.0  ;;  %v2207_v4 = vadd.f32 %v2191_v12, %v2173_v23  ;;  %v1361_v42 = vmul.f32 %v4630_v10, %v10869_v45  ;;  %v1796_v11 = vmul.f32 %v10836_v14, %v10870_v49  ;;  %v8299_v50 = vld [vmem:[%s5023_s22 + $0x152] sm:$0xff]  ;;  %v10873_v27 = vld [vmem:[#allocation16_spill] sm:$0xff] }
 0x294   : >> { %2747 = vadd.xlane.f32.xlu2 %v2746_v34  ;;  %v1281_v28 = vadd.f32 %v1265_v30, %v1247_v57  ;;  %v1744_v40 = vadd.f32 %v1728_v39, %v1710_v3  ;;  %v2293_v12 = vmul.f32 %v8299_v50, %v7766_v33  ;;  %v4632_v30 = vld [vmem:[%s9477_s3 + $0x9] ss:$0 sm:$0xff]  ;;  %v8308_v57 = vld [vmem:[%s5023_s22 + $0x192] sm:$0xff]  ;;  %v1830_v63 = vmul.f32 %v7580_v54, %v1608_v37 }
 0x295   : >> { %v2241_v35 = vadd.f32 %v2225_v24, %v2207_v4  ;;  %v1395_v23 = vmul.f32 %v4632_v30, %v10871_v1  ;;  %v10872_v24 = vld [vmem:[#allocation15_spill] sm:$0xff]  ;;  %v10874_v10 = vld [vmem:[#allocation29_spill] sm:$0xff] }
 0x296   : >> { %v1315_v36 = vadd.f32 %v1299_v60, %v1281_v28  ;;  %v1778_v39 = vadd.f32 %v1762_v6, %v1744_v40  ;;  %v2327_v34 = vmul.f32 %v7780_v17, %v10872_v24  ;;  %v4633_v60 = vld [vmem:[%s9477_s3 + $0x10] ss:$0 sm:$0xff]  ;;  %v1892_v45 = vmul.f32 %v10874_v10, %v7596_v22  ;;  %v4634_v37 = vld [vmem:[%s9477_s3 + $0x17] ss:$0 sm:$0xff] }
 0x297   : >> { %v2275_v14 = vadd.f32 %v2259_v51, %v2241_v35  ;;  %v1429_v4 = vmul.f32 %v4633_v60, %v10873_v27  ;;  %v2361_v6 = vmul.f32 %v7792_v20, %v8308_v57  ;;  %v4635_v35 = vld [vmem:[%s5023_s22 + $0x109] sm:$0xff]  ;;  %v4636_v30 = vld [vmem:[%s5023_s22 + $0xd3] sm:$0xff] }
 0x298   : >> { %v1377_v3 = vadd.f32 %v1361_v42, %v1315_v36  ;;  %v1812_v28 = vadd.f32 %v1796_v11, %v1778_v39  ;;  %v1463_v42 = vmul.f32 %v4634_v37, %v8037_v25  ;;  %v1926_v11 = vmul.f32 %v4635_v35, %v7612_v58  ;;  %v10875_v39 = vld [vmem:[#allocation68_spill] sm:$0xff]  ;;  %v10876_v60 = vld [vmem:[#allocation101_spill] sm:$0xff] }
 0x299   : >> { %v2309_v49 = vadd.f32 %v2293_v12, %v2275_v14  ;;  %v2423_v12 = vmul.f32 %v4636_v30, %v7821_v21  ;;  %v1960_v25 = vmul.f32 %v10876_v60, %v10848_v26  ;;  %v4640_v37 = vld [vmem:[%s5023_s22 + $0x149] sm:$0xff] }
 0x29a   : >> { %v1411_v51 = vadd.f32 %v1395_v23, %v1377_v3  ;;  %v1846_v40 = vadd.f32 %v1830_v63, %v1812_v28  ;;  %v4637_v23 = vld [vmem:[%s9477_s3 + $0x1e] ss:$0 sm:$0xff]  ;;  %v1343_v63 = vld [vmem:[%s5023_s22 + $0x1af] sm:$0xff] }
 0x29b   : >> { %v2343_v36 = vadd.f32 %v2327_v34, %v2309_v49  ;;  %v1497_v14 = vmul.f32 %v4637_v23, %v10875_v39  ;;  %v8337_v28 = vld [vmem:[%s5023_s22 + $0xf3] sm:$0xff]  ;;  %v10877_v49 = vld [vmem:[#allocation71_spill] sm:$0xff] }
 0x29c   : >> { %v1445_v1 = vadd.f32 %v1429_v4, %v1411_v51  ;;  %v1908_v3 = vadd.f32 %v1892_v45, %v1846_v40  ;;  %v2457_v34 = vmul.f32 %v8337_v28, %v10797_v7  ;;  %v4639_v4 = vld [vmem:[%s9477_s3 + $0x25] ss:$0 sm:$0xff]  ;;  %v1994_v40 = vmul.f32 %v4640_v37, %v10853_v32  ;;  %v10879_v39 = vld [vmem:[#allocation93_spill] sm:$0xff] }
 0x29d   : >> { %v2377_v27 = vadd.f32 %v2361_v6, %v2343_v36  ;;  %v1531_v51 = vmul.f32 %v4639_v4, %v10877_v49  ;;  %v10878_v6 = vld [vmem:[#allocation21_spill] sm:$0xff]  ;;  %v2028_v60 = vmul.f32 %v10806_v9, %v10879_v39  ;;  %v10881_v39 = vld [vmem:[#allocation23_spill] sm:$0xff] }
 0x29e   : >> { %v1479_v10 = vadd.f32 %v1463_v42, %v1445_v1  ;;  %v1942_v45 = vadd.f32 %v1926_v11, %v1908_v3  ;;  %v2491_v36 = vmul.f32 %v10878_v6, %v10804_v5  ;;  %v4641_v42 = vld [vmem:[%s9477_s3 + $0x2c] ss:$0 sm:$0xff]  ;;  %v8355_v3 = vld [vmem:[%s5023_s22 + $0x133] sm:$0xff] }
 0x29f   : >> { %v2439_v35 = vadd.f32 %v2423_v12, %v2377_v27  ;;  %v1565_v1 = vmul.f32 %v4641_v42, %v1343_v63  ;;  %v2525_v12 = vmul.f32 %v8355_v3, %v7878_v31  ;;  %v1874_v27 = vld [vmem:[%s5023_s22 + $0x1a9] sm:$0xff]  ;;  %v8367_v37 = vld [vmem:[%s5023_s22 + $0x153] sm:$0xff] }
 0x2a0   : >> { %v1513_v30 = vadd.f32 %v1497_v14, %v1479_v10  ;;  %v1976_v23 = vadd.f32 %v1960_v25, %v1942_v45  ;;  %v4643_v14 = vld [vmem:[%s9477_s3 + $0x3] ss:$0 sm:$0xff]  ;;  %v10880_v25 = vld [vmem:[#allocation40_spill] sm:$0xff]  ;;  %v8376_v42 = vld [vmem:[%s5023_s22 + $0x193] sm:$0xff] }
 0x2a1   : >> { %v2473_v11 = vadd.f32 %v2457_v34, %v2439_v35  ;;  %v1627_v10 = vmul.f32 %v4643_v14, %v8086_v8  ;;  %v2062_v49 = vmul.f32 %v7682_v18, %v10880_v25  ;;  %v2559_v34 = vmul.f32 %v8367_v37, %v7891_v53  ;;  %v10882_v14 = vld [vmem:[#allocation38_spill] sm:$0xff] }
 0x2a2   : >> { %v1547_v4 = vadd.f32 %v1531_v51, %v1513_v30  ;;  %v2010_v63 = vadd.f32 %v1994_v40, %v1976_v23  ;;  %v4645_v51 = vld [vmem:[%s9477_s3 + $0xa] ss:$0 sm:$0xff]  ;;  %v8381_v40 = vld [vmem:[%s9477_s3 + $0x2e] ss:$0 sm:$0xff] }
 0x2a3   : >> { %v2507_v45 = vadd.f32 %v2491_v36, %v2473_v11  ;;  %v1661_v30 = vmul.f32 %v4645_v51, %v10828_v52  ;;  %v2096_v36 = vmul.f32 %v8381_v40, %v1874_v27  ;;  %v4647_v52 = vld [vmem:[%s9477_s3 + $0x11] ss:$0 sm:$0xff]  ;;  %v2627_v27 = vmul.f32 %v7926_v43, %v8376_v42 }
 0x2a4   : >> { %v1581_v35 = vadd.f32 %v1565_v1, %v1547_v4  ;;  %v2044_v8 = vadd.f32 %v2028_v60, %v2010_v63  ;;  %v2593_v1 = vmul.f32 %v7910_v19, %v10881_v39  ;;  %v1695_v4 = vmul.f32 %v4647_v52, %v8113_v61  ;;  %v4649_v51 = vld [vmem:[%s5023_s22 + $0x10a] sm:$0xff] }
 0x2a5   : >> { %v2541_v23 = vadd.f32 %v2525_v12, %v2507_v45  ;;  %v2158_v63 = vmul.f32 %v10882_v14, %v7702_v16  ;;  %v2192_v61 = vmul.f32 %v4649_v51, %v10822_v59  ;;  %v1609_v14 = vld [vmem:[%s5023_s22 + $0x1b0] sm:$0xff] }
 0x2a6   : >> { %v1643_v11 = vadd.f32 %v1627_v10, %v1581_v35  ;;  %v2078_v60 = vadd.f32 %v2062_v49, %v2044_v8  ;;  %v4648_v10 = vld [vmem:[%s9477_s3 + $0x18] ss:$0 sm:$0xff] }
 0x2a7   : >> { %v2575_v25 = vadd.f32 %v2559_v34, %v2541_v23  ;;  %v1729_v45 = vmul.f32 %v4648_v10, %v8131_v46  ;;  %v4650_v34 = vld [vmem:[%s9477_s3 + $0x1f] ss:$0 sm:$0xff] }
 0x2a8   : >> { %v1677_v12 = vadd.f32 %v1661_v30, %v1643_v11  ;;  %v2112_v35 = vadd.f32 %v2096_v36, %v2078_v60  ;;  %v1763_v23 = vmul.f32 %v4650_v34, %v10835_v0  ;;  %v10883_v11 = vld [vmem:[#allocation14_spill] sm:$0xff] }
 0x2a9   : >> { %v2609_v49 = vadd.f32 %v2593_v1, %v2575_v25  ;;  %v2226_v52 = vmul.f32 %v10883_v11, %v7720_v44  ;;  %v4651_v1 = vld [vmem:[%s9477_s3 + $0x26] ss:$0 sm:$0xff]  ;;  %v4652_v25 = vld [vmem:[%s5023_s22 + $0x14a] sm:$0xff] }
 0x2aa   : >> { %v1711_v8 = vadd.f32 %v1695_v4, %v1677_v12  ;;  %v2174_v30 = vadd.f32 %v2158_v63, %v2112_v35  ;;  %v1797_v4 = vmul.f32 %v4651_v1, %v8136_v38  ;;  %v2260_v12 = vmul.f32 %v4652_v25, %v7744_v55  ;;  %v10884_v35 = vld [vmem:[#allocation37_spill] sm:$0xff]  ;;  %v10886_v11 = vld [vmem:[#allocation31_spill] sm:$0xff] }
 0x2ab   : >> { %v8407_v46 = vadd.f32 %v2627_v27, %v2609_v49  ;;  %v1831_v27 = vmul.f32 %v7580_v54, %v1609_v14  ;;  %v2294_v51 = vmul.f32 %v7766_v33, %v10884_v35  ;;  %v2328_v1 = vmul.f32 %v7780_v17, %v10886_v11 }
 0x2ac   : >> { %v1745_v36 = vadd.f32 %v1729_v45, %v1711_v8  ;;  %v2208_v60 = vadd.f32 %v2192_v61, %v2174_v30  ;;  %v2140_v61 = vld [vmem:[%s5023_s22 + $0x1aa] sm:$0xff]  ;;  %v10885_v8 = vld [vmem:[#allocation30_spill] sm:$0xff]  ;;  %v1927_v54 = vmul.f32 %v10849_v47, %v7612_v58  ;;  %v2029_v35 = vmul.f32 %v10806_v9, %v10860_v15 }
 0x2ad   : >> { %v2685_v0 = vsel %vm415_vm2, %v8407_v46, 0.0  ;;  %v2707_v63 = vmul.f32 %v8407_v46, %v8407_v46  ;;  %v1893_v34 = vmul.f32 %v10885_v8, %v7596_v22  ;;  %v2362_v14 = vmul.f32 %v7792_v20, %v2140_v61  ;;  %v10888_v22 = vld [vmem:[#allocation83_spill] sm:$0xff]  ;;  %v1875_v61 = vld [vmem:[%s5023_s22 + $0x1b1] sm:$0xff] }
 0x2ae   : >> { %v1779_v10 = vadd.f32 %v1763_v23, %v1745_v36  ;;  %2686 = vadd.xlane.f32.xlu1 %v2685_v0  ;;  %v2242_v45 = vadd.f32 %v2226_v52, %v2208_v60  ;;  %v10887_v60 = vld [vmem:[#allocation50_spill] sm:$0xff]  ;;  %v2424_v0 = vmul.f32 %v10888_v22, %v7821_v21  ;;  %v2063_v8 = vmul.f32 %v7682_v18, %v8231_v48  ;;  %v2406_v15 = vld [vmem:[%s5023_s22 + $0x1ab] sm:$0xff] }
 0x2af   : >> { %v2749_v38 = vsel %vm415_vm2, %v2707_v63, 0.0  ;;  %v10889_v63 = vld [vmem:[#allocation39_spill] sm:$0xff]  ;;  %v2560_v9 = vmul.f32 %v7891_v53, %v10859_v56  ;;  %v2594_v18 = vmul.f32 %v7910_v19, %v8217_v41  ;;  %v2227_v22 = vmul.f32 %v8287_v62, %v7720_v44  ;;  %v2141_v62 = vld [vmem:[%s5023_s22 + $0x1b2] sm:$0xff] }
 0x2b0   : >> { %v1813_v49 = vadd.f32 %v1797_v4, %v1779_v10  ;;  %2750 = vadd.xlane.f32.xlu0 %v2749_v38  ;;  %v2276_v30 = vadd.f32 %v2260_v12, %v2242_v45  ;;  %v1961_v4 = vmul.f32 %v10887_v60, %v10848_v26  ;;  %v1995_v10 = vmul.f32 %v10889_v63, %v10853_v32  ;;  %v10890_v45 = vld [vmem:[#allocation108_spill] sm:$0xff]  ;;  %v10892_v32 = vld [vmem:[#allocation73_spill] sm:$0xff] }
 0x2b1   : >> { %v2458_v58 = vmul.f32 %v10797_v7, %v10890_v45  ;;  %v10891_v26 = vld [vmem:[#allocation56_spill] sm:$0xff]  ;;  %v2261_v63 = vmul.f32 %v8299_v50, %v7744_v55  ;;  %v2329_v55 = vmul.f32 %v7780_v17, %v8308_v57 }
 0x2b2   : >> { %v1847_v23 = vadd.f32 %v1831_v27, %v1813_v49  ;;  %v2310_v52 = vadd.f32 %v2294_v51, %v2276_v30  ;;  %v2492_v38 = vmul.f32 %v10891_v26, %v10804_v5  ;;  %v2526_v30 = vmul.f32 %v7878_v31, %v10892_v32 }
 0x2b4   : >> { %v1909_v36 = vadd.f32 %v1893_v34, %v1847_v23  ;;  %v2344_v25 = vadd.f32 %v2328_v1, %v2310_v52  ;;  %v2097_v1 = vmul.f32 %v8381_v40, %v1875_v61  ;;  %v2159_v52 = vmul.f32 %v8264_v13, %v7702_v16  ;;  %v2712_v16 = vpop.xlane.xlu1 %2711 }
 0x2b5   : >> { %v2628_v40 = vmul.f32 %v7926_v43, %v2406_v15 }
 0x2b6   : >> { %v1943_v12 = vadd.f32 %v1927_v54, %v1909_v36  ;;  %v2378_v27 = vadd.f32 %v2362_v14, %v2344_v25  ;;  %v2193_v36 = vmul.f32 %v10867_v2, %v10822_v59  ;;  %v2654_v25 = vpop.xlane.xlu2 %2653 }
 0x2b7   : >> { %v8486_v17 = vmul.f32 0.125, %v2654_v25  ;;  %v2407_v25 = vld [vmem:[%s5023_s22 + $0x1b3] sm:$0xff] }
 0x2b8   : >> { %v1977_v47 = vadd.f32 %v1961_v4, %v1943_v12  ;;  %v2440_v51 = vadd.f32 %v2424_v0, %v2378_v27  ;;  %v2648_v4 = vpop.xlane.xlu0 %2647  ;;  %v2774_v12 = vmul.f32 0.125, %v2712_v16  ;;  %v2295_v27 = vmul.f32 %v7766_v33, %v10872_v24 }
 0x2b9   : >> { %v8461_v0 = vmul.f32 0.125, %v2648_v4  ;;  %v2363_v33 = vmul.f32 %v7792_v20, %v2141_v62 }
 0x2ba   : >> { %v2011_v49 = vadd.f32 %v1995_v10, %v1977_v47  ;;  %v2474_v34 = vadd.f32 %v2458_v58, %v2440_v51 }
 0x2bb   : >> { %v2790_v59 = vmul.f32 %v8461_v0, %v8461_v0 }
 0x2bc   : >> { %v2045_v11 = vadd.f32 %v2029_v35, %v2011_v49  ;;  %v2508_v23 = vadd.f32 %v2492_v38, %v2474_v34  ;;  %v2715_v49 = vpop.xlane.xlu1 %2714 }
 0x2bd   : >> { %v2806_v45 = vsub.f32 %v2774_v12, %v2790_v59  ;;  %v2775_v34 = vmul.f32 0.125, %v2715_v49 }
 0x2be   : >> { %v2079_v54 = vadd.f32 %v2063_v8, %v2045_v11  ;;  %v2542_v14 = vadd.f32 %v2526_v30, %v2508_v23  ;;  %v2657_v26 = vpop.xlane.xlu2 %2656  ;;  %v2425_v8 = vmul.f32 %v8337_v28, %v7821_v21  ;;  %v2459_v11 = vmul.f32 %v10878_v6, %v10797_v7 }
 0x2bf   : >> { %v2822_v50 = vmax.f32 %v2806_v45, 0.0  ;;  %v8491_v30 = vmul.f32 0.125, %v2657_v26  ;;  %v2493_v21 = vmul.f32 %v8355_v3, %v10804_v5  ;;  %v2792_v28 = vmul.f32 %v8486_v17, %v8486_v17 }
 0x2c0   : >> { %v2113_v48 = vadd.f32 %v2097_v1, %v2079_v54  ;;  %v2576_v60 = vadd.f32 %v2560_v9, %v2542_v14  ;;  %v2651_v51 = vpop.xlane.xlu0 %2650  ;;  %v2527_v7 = vmul.f32 %v8367_v37, %v7878_v31  ;;  %v2595_v31 = vmul.f32 %v7910_v19, %v8376_v42 }
 0x2c1   : >> { %v8480_v24 = vadd.f32 1e-06, %v2822_v50  ;;  %v8482_v61 = vmul.f32 0.125, %v2651_v51  ;;  %v2793_v15 = vmul.f32 %v8491_v30, %v8491_v30 }
 0x2c2   : >> { %v2175_v56 = vadd.f32 %v2159_v52, %v2113_v48  ;;  %v2610_v13 = vadd.f32 %v2594_v18, %v2576_v60 }
 0x2c3   : >> { %4286 = vrsqrt.f32 %v8480_v24  ;;  %v2791_v57 = vmul.f32 %v8482_v61, %v8482_v61  ;;  %vm2876_vm5 = vweird.f32 %v8480_v24 }
 0x2c4   : >> { %v2209_v41 = vadd.f32 %v2193_v36, %v2175_v56  ;;  %v8467_v2 = vadd.f32 %v2628_v40, %v2610_v13  ;;  %v2721_v5 = vpop.xlane.xlu1 %2720  ;;  %v2561_v40 = vmul.f32 %v7891_v53, %v10881_v39 }
 0x2c5   : >> { %v2807_v1 = vsub.f32 %v2775_v34, %v2791_v57  ;;  %v2777_v36 = vmul.f32 0.125, %v2721_v5  ;;  %v10893_v34 = vld [vmem:[#allocation79_spill] sm:$0xff] }
 0x2c6   : >> { %v2243_v10 = vadd.f32 %v2227_v22, %v2209_v41  ;;  %v2688_v44 = vsel %vm415_vm2, %v8467_v2, 0.0  ;;  %v2708_v58 = vmul.f32 %v8467_v2, %v8467_v2  ;;  %v2660_v52 = vpop.xlane.xlu2 %2659  ;;  %v2629_v41 = vmul.f32 %v7926_v43, %v2407_v25  ;;  %v3092_v57 = vld [vmem:[%s9481_s7] sm:$0xf] }
 0x2c7   : >> { %2689 = vadd.xlane.f32.xlu1 %v2688_v44  ;;  %v2823_v9 = vmax.f32 %v2807_v1, 0.0  ;;  %v2809_v56 = vsub.f32 %v2777_v36, %v2793_v15 }
 0x2c8   : >> { %v2277_v47 = vadd.f32 %v2261_v63, %v2243_v10  ;;  %v2752_v35 = vsel %vm415_vm2, %v2708_v58, 0.0  ;;  %v2718_v54 = vpop.xlane.xlu0 %2717 }
 0x2c9   : >> { %2753 = vadd.xlane.f32.xlu0 %v2752_v35  ;;  %v8501_v14 = vpop.eup %4286  ;;  %v8505_v6 = vadd.f32 1e-06, %v2823_v9  ;;  %v2776_v48 = vmul.f32 0.125, %v2718_v54  ;;  %v2825_v13 = vmax.f32 %v2809_v56, 0.0  ;;  %v3122_v9 = vsel %vm3120_vm4, %v3092_v57, 0  ;;  %v10896_v56 = vld [vmem:[#allocation4_spill] sm:$0xff] }
 0x2ca   : >> { %v2311_v38 = vadd.f32 %v2295_v27, %v2277_v47  ;;  %v2871_v3 = vmul.f32 %v8501_v14, %v8480_v24  ;;  %vm2877_vm3 = vweird.f32 %v8501_v14  ;;  %3131 = vmatpush.bf16.msra.mxu0 %v3122_v9  ;;  %4216 = vmatpush.bf16.msra.mxu3 %v3122_v9 }
 0x2cb   : >> { %4288 = vrsqrt.f32 %v8505_v6  ;;  %v2808_v4 = vsub.f32 %v2776_v48, %v2792_v28  ;;  %v8519_v59 = vadd.f32 1e-06, %v2825_v13  ;;  %vm2878_vm7 = vmor %vm2876_vm5, %vm2877_vm3  ;;  %vm2886_vm8 = vweird.f32 %v8505_v6 }
 0x2cc   : >> { %v2345_v32 = vadd.f32 %v2329_v55, %v2311_v38  ;;  %v2872_v16 = vmul.f32 %v8501_v14, %v2871_v3  ;;  %v2724_v42 = vpop.xlane.xlu1 %2723  ;;  %v8535_v38 = vmul.f32 0.125, %v2660_v52  ;;  %v10894_v52 = vld [vmem:[#allocation59_spill] sm:$0xff] }
 0x2cd   : >> { %v2824_v37 = vmax.f32 %v2808_v4, 0.0  ;;  %v2778_v28 = vmul.f32 0.125, %v2724_v42  ;;  %vm2906_vm11 = vweird.f32 %v8519_v59 }
 0x2ce   : >> { %v2379_v20 = vadd.f32 %v2363_v33, %v2345_v32  ;;  %v2873_v27 = vmul.f32 0.5, %v2872_v16  ;;  %v2727_v19 = vpop.xlane.xlu2 %2726  ;;  %v2838_v32 = vsub.f32 %v10893_v34, %v8461_v0  ;;  %v2794_v0 = vmul.f32 %v8535_v38, %v8535_v38 }
 0x2cf   : >> { %v8517_v63 = vadd.f32 1e-06, %v2824_v37  ;;  %v2779_v24 = vmul.f32 0.125, %v2727_v19 }
 0x2d0   : >> { %v2441_v23 = vadd.f32 %v2425_v8, %v2379_v20  ;;  %v2663_v53 = vpop.xlane.xlu0 %2662  ;;  %v2874_v47 = vsub.f32 1.5, %v2873_v27 }
 0x2d1   : >> { %v4289_v39 = vpop.eup %4288  ;;  %4290 = vrsqrt.f32 %v8517_v63  ;;  %v8537_v33 = vmul.f32 0.125, %v2663_v53  ;;  %vm2896_vm13 = vweird.f32 %v8517_v63 }
 0x2d2   : >> { %v2475_v18 = vadd.f32 %v2459_v11, %v2441_v23  ;;  %v2881_v45 = vmul.f32 %v4289_v39, %v8505_v6  ;;  %4292 = vrsqrt.f32 %v8519_v59  ;;  %v2875_v8 = vmul.f32 %v8501_v14, %v2874_v47  ;;  %v10895_v6 = vld [vmem:[#allocation3_spill] sm:$0xff] }
 0x2d3   : >> { %vm2887_vm6 = vweird.f32 %v4289_v39  ;;  %v8561_v48 = vperm.slane %v10895_v6, 0 }
 0x2d4   : >> { %v2509_v60 = vadd.f32 %v2493_v21, %v2475_v18  ;;  %v2882_v62 = vmul.f32 %v4289_v39, %v2881_v45  ;;  %v2669_v23 = vpop.xlane.xlu1 %2668  ;;  %v2795_v21 = vmul.f32 %v8537_v33, %v8537_v33  ;;  %v2879_v15 = vsel %vm2878_vm7, %v8501_v14, %v2875_v8  ;;  %vm2888_vm9 = vmor %vm2886_vm8, %vm2887_vm6 }
 0x2d5   : >> { %v2839_v18 = vsub.f32 %v10894_v52, %v8482_v61 }
 0x2d6   : >> { %v2543_v22 = vadd.f32 %v2527_v7, %v2509_v60  ;;  %v2883_v55 = vmul.f32 0.5, %v2882_v62  ;;  %v2730_v1 = vpop.xlane.xlu2 %2729  ;;  %v3030_v7 = vmul.f32 %v2879_v15, %v2838_v32  ;;  %v2810_v60 = vsub.f32 %v2778_v28, %v2794_v0 }
 0x2d7   : >> { %v8531_v35 = vpop.eup %4290  ;;  %v2811_v14 = vsub.f32 %v2779_v24, %v2795_v21  ;;  %v8576_v62 = vmul.f32 0.125, %v2669_v23 }
 0x2d8   : >> { %v2577_v12 = vadd.f32 %v2561_v40, %v2543_v22  ;;  %v2666_v51 = vpop.xlane.xlu0 %2665  ;;  %v8533_v26 = vpop.eup %4292  ;;  %v2884_v49 = vsub.f32 1.5, %v2883_v55  ;;  %v2891_v20 = vmul.f32 %v8531_v35, %v8517_v63  ;;  %v3049_v61 = vmul.f32 %v8561_v48, %v3030_v7  ;;  %v10898_v63 = vld [vmem:[#allocation57_spill] sm:$0xff] }
 0x2d9   : >> { %v2901_v11 = vmul.f32 %v8533_v26, %v8519_v59  ;;  %v8565_v25 = vmul.f32 0.125, %v2666_v51  ;;  %v8569_v22 = vperm.slane %v10896_v56, 0  ;;  %v2826_v16 = vmax.f32 %v2810_v60, 0.0  ;;  %v10897_v59 = vld [vmem:[#allocation19_spill] sm:$0xff] }
 0x2da   : >> { %v2611_v10 = vadd.f32 %v2595_v31, %v2577_v12  ;;  %v2885_v54 = vmul.f32 %v4289_v39, %v2884_v49  ;;  %v2892_v5 = vmul.f32 %v8531_v35, %v2891_v20  ;;  %v2827_v12 = vmax.f32 %v2811_v14, 0.0 }
 0x2db   : >> { %v2902_v3 = vmul.f32 %v8533_v26, %v2901_v11  ;;  %v3068_v27 = vadd.f32 %v8569_v22, %v3049_v61  ;;  %vm2897_vm10 = vweird.f32 %v8531_v35  ;;  %vm2907_vm12 = vweird.f32 %v8533_v26 }
 0x2dc   : >> { %v8523_v44 = vadd.f32 %v2629_v41, %v2611_v10  ;;  %v2889_v36 = vsel %vm2888_vm9, %v4289_v39, %v2885_v54  ;;  %v2893_v31 = vmul.f32 0.5, %v2892_v5  ;;  %v2672_v53 = vpop.xlane.xlu1 %2671  ;;  %v2796_v39 = vmul.f32 %v8565_v25, %v8565_v25  ;;  %vm2898_vm14 = vmor %vm2896_vm13, %vm2897_vm10 }
 0x2dd   : >> { %v3031_v40 = vmul.f32 %v2889_v36, %v2839_v18  ;;  %v2903_v37 = vmul.f32 0.5, %v2902_v3  ;;  %v2780_v10 = vmul.f32 0.125, %v2730_v1  ;;  %v8584_v47 = vadd.f32 1e-06, %v2827_v12  ;;  %vm2908_vm15 = vmor %vm2906_vm11, %vm2907_vm12 }
 0x2de   : >> { %v2691_v43 = vsel %vm415_vm2, %v8523_v44, 0.0  ;;  %v2709_v58 = vmul.f32 %v8523_v44, %v8523_v44  ;;  %v2675_v41 = vpop.xlane.xlu2 %2674  ;;  %v2894_v19 = vsub.f32 1.5, %v2893_v31  ;;  %v2840_v32 = vsub.f32 %v10897_v59, %v8486_v17 }
 0x2df   : >> { %2692 = vadd.xlane.f32.xlu2 %v2691_v43  ;;  %v3050_v13 = vmul.f32 %v8561_v48, %v3031_v40  ;;  %v2904_v42 = vsub.f32 1.5, %v2903_v37  ;;  %v8579_v43 = vadd.f32 1e-06, %v2826_v16  ;;  %v2812_v55 = vsub.f32 %v2780_v10, %v2796_v39 }
 0x2e0   : >> { %v2755_v50 = vsel %vm415_vm2, %v2709_v58, 0.0  ;;  %v2733_v4 = vpop.xlane.xlu0 %2732  ;;  %v2895_v8 = vmul.f32 %v8531_v35, %v2894_v19  ;;  %v2841_v57 = vsub.f32 %v10898_v63, %v8491_v30  ;;  %v8599_v9 = vmul.f32 0.125, %v2675_v41 }
 0x2e1   : >> { %2756 = vadd.xlane.f32.xlu1 %v2755_v50  ;;  %v3069_v45 = vadd.f32 %v8569_v22, %v3050_v13  ;;  %v2797_v50 = vmul.f32 %v8576_v62, %v8576_v62  ;;  %v2781_v51 = vmul.f32 0.125, %v2733_v4  ;;  %v2905_v34 = vmul.f32 %v8533_v26, %v2904_v42 }
 0x2e2   : >> { %4294 = vrsqrt.f32 %v8579_v43  ;;  %v2899_v20 = vsel %vm2898_vm14, %v8531_v35, %v2895_v8  ;;  %v2828_v1 = vmax.f32 %v2812_v55, 0.0  ;;  %v8605_v15 = vmul.f32 0.125, %v2672_v53 }
 0x2e3   : >> { %v3084_v58 = vpack.c.bf16 %v3069_v45, %v3068_v27  ;;  %v2909_v11 = vsel %vm2908_vm15, %v8533_v26, %v2905_v34  ;;  %4296 = vrsqrt.f32 %v8584_v47  ;;  %v3032_v23 = vmul.f32 %v2899_v20, %v2840_v32 }
 0x2e4   : >> { %v3033_v0 = vmul.f32 %v2909_v11, %v2841_v57  ;;  %v2813_v21 = vsub.f32 %v2781_v51, %v2797_v50  ;;  %v2739_v24 = vpop.xlane.xlu1 %2738  ;;  %v8603_v30 = vadd.f32 1e-06, %v2828_v1  ;;  %v2799_v18 = vmul.f32 %v8599_v9, %v8599_v9 }
 0x2e5   : >> { %4145 = vmatmul.msk.bf16.vlgmr.msra.gmra.mxu0 %vm415_vm2, %v3084_v58  ;;  %v3051_v35 = vmul.f32 %v8561_v48, %v3032_v23  ;;  %v2783_v7 = vmul.f32 0.125, %v2739_v24  ;;  %v2798_v36 = vmul.f32 %v8605_v15, %v8605_v15  ;;  %vm2926_vm0 = vweird.f32 %v8584_v47 }
 0x2e6   : >> { %v2678_v28 = vpop.xlane.xlu2 %2677  ;;  %v3052_v26 = vmul.f32 %v8561_v48, %v3033_v0  ;;  %v2829_v54 = vmax.f32 %v2813_v21, 0.0  ;;  %4298 = vrsqrt.f32 %v8603_v30  ;;  %vm2916_vm1 = vweird.f32 %v8579_v43 }
 0x2e7   : >> { %v3070_v40 = vadd.f32 %v8569_v22, %v3051_v35  ;;  %v8624_v61 = vmul.f32 0.125, %v2678_v28  ;;  %v2815_v56 = vsub.f32 %v2783_v7, %v2799_v18  ;;  %v10901_v35 = vld [vmem:[#allocation74_spill] sm:$0xff]  ;;  %vm2936_vm7 = vweird.f32 %v8603_v30 }
 0x2e8   : >> { %v2736_v49 = vpop.xlane.xlu0 %2735  ;;  %v8601_v17 = vpop.eup %4294  ;;  %v3071_v6 = vadd.f32 %v8569_v22, %v3052_v26  ;;  %v8622_v4 = vadd.f32 1e-06, %v2829_v54  ;;  %v2842_v26 = vsub.f32 %v10901_v35, %v8535_v38  ;;  %v10902_v54 = vld [vmem:[#allocation17_spill] sm:$0xff] }
 0x2e9   : >> { %v8609_v52 = vpop.eup %4296  ;;  %v2911_v5 = vmul.f32 %v8601_v17, %v8579_v43  ;;  %v2782_v60 = vmul.f32 0.125, %v2736_v49  ;;  %v2800_v39 = vmul.f32 %v8624_v61, %v8624_v61  ;;  %v2831_v27 = vmax.f32 %v2815_v56, 0.0 }
 0x2ea   : >> { %v2921_v14 = vmul.f32 %v8609_v52, %v8584_v47  ;;  %v3085_v37 = vpack.c.bf16 %v3071_v6, %v3070_v40  ;;  %4300 = vrsqrt.f32 %v8622_v4  ;;  %vm2927_vm3 = vweird.f32 %v8609_v52 }
 0x2eb   : >> { %v2912_v12 = vmul.f32 %v8601_v17, %v2911_v5  ;;  %v2814_v41 = vsub.f32 %v2782_v60, %v2798_v36  ;;  %v8640_v49 = vadd.f32 1e-06, %v2831_v27  ;;  %vm2917_vm4 = vweird.f32 %v8601_v17  ;;  %vm8656_vm5 = vmor %vm2926_vm0, %vm2927_vm3 }
 0x2ec   : >> { %v2742_v13 = vpop.xlane.xlu1 %2741  ;;  %v2922_v53 = vmul.f32 %v8609_v52, %v2921_v14  ;;  %v8634_v10 = vpop.eup %4298  ;;  %v2843_v18 = vsub.f32 %v10902_v54, %v8537_v33  ;;  %vm2918_vm6 = vmor %vm2916_vm1, %vm2917_vm4  ;;  %vm2946_vm10 = vweird.f32 %v8622_v4 }
 0x2ed   : >> { %v2784_v42 = vmul.f32 0.125, %v2742_v13  ;;  %v2913_v58 = vmul.f32 0.5, %v2912_v12  ;;  %v2830_v55 = vmax.f32 %v2814_v41, 0.0  ;;  %v2931_v51 = vmul.f32 %v8634_v10, %v8603_v30 }
 0x2ee   : >> { %v2745_v16 = vpop.xlane.xlu2 %2744  ;;  %v2923_v50 = vmul.f32 0.5, %v2922_v53  ;;  %4302 = vrsqrt.f32 %v8640_v49  ;;  %vm2937_vm8 = vweird.f32 %v8634_v10  ;;  %vm2966_vm13 = vweird.f32 %v8640_v49 }
 0x2ef   : >> { %v2785_v19 = vmul.f32 0.125, %v2745_v16  ;;  %v2816_v34 = vsub.f32 %v2784_v42, %v2800_v39  ;;  %v2914_v32 = vsub.f32 1.5, %v2913_v58  ;;  %v8646_v63 = vadd.f32 1e-06, %v2830_v55  ;;  %vm8697_vm9 = vmor %vm2936_vm7, %vm2937_vm8 }
 0x2f0   : >> { %v2681_v3 = vpop.xlane.xlu0 %2680  ;;  %v8642_v59 = vpop.eup %4300  ;;  %v2924_v57 = vsub.f32 1.5, %v2923_v50  ;;  %v2932_v20 = vmul.f32 %v8634_v10, %v2931_v51 }
 0x2f1   : >> { %v8626_v31 = vmul.f32 0.125, %v2681_v3  ;;  %v2941_v11 = vmul.f32 %v8642_v59, %v8622_v4  ;;  %v2832_v23 = vmax.f32 %v2816_v34, 0.0  ;;  %4304 = vrsqrt.f32 %v8646_v63  ;;  %v10905_v4 = vld [vmem:[#allocation60_spill] sm:$0xff] }
 0x2f2   : >> { %v2915_v24 = vmul.f32 %v8601_v17, %v2914_v32  ;;  %v2933_v7 = vmul.f32 0.5, %v2932_v20  ;;  %v2925_v6 = vmul.f32 %v8609_v52, %v2924_v57  ;;  %vm2947_vm11 = vweird.f32 %v8642_v59  ;;  %v10906_v20 = vld [vmem:[#allocation69_spill] sm:$0xff] }
 0x2f3   : >> { %v2801_v45 = vmul.f32 %v8626_v31, %v8626_v31  ;;  %v2942_v5 = vmul.f32 %v8642_v59, %v2941_v11  ;;  %v8672_v36 = vadd.f32 1e-06, %v2832_v23  ;;  %vm2948_vm12 = vmor %vm2946_vm10, %vm2947_vm11  ;;  %v2844_v32 = vsub.f32 %v10905_v4, %v8565_v25 }
 0x2f4   : >> { %v2919_v60 = vsel %vm2918_vm6, %v8601_v17, %v2915_v24  ;;  %v2929_v33 = vsel %vm8656_vm5, %v8609_v52, %v2925_v6  ;;  %v8680_v14 = vpop.eup %4302  ;;  %v2845_v11 = vsub.f32 %v10906_v20, %v8576_v62  ;;  %vm2956_vm15 = vweird.f32 %v8646_v63 }
 0x2f5   : >> { %4146 = vmatmul.msk.bf16.gmra.mxu0 %vm415_vm2, %v3085_v37  ;;  %v2817_v8 = vsub.f32 %v2785_v19, %v2801_v45  ;;  %v3034_v43 = vmul.f32 %v2919_v60, %v2842_v26  ;;  %v3035_v56 = vmul.f32 %v2929_v33, %v2843_v18  ;;  %v2934_v37 = vsub.f32 1.5, %v2933_v7 }
 0x2f6   : >> { %v2943_v17 = vmul.f32 0.5, %v2942_v5  ;;  %4306 = vrsqrt.f32 %v8672_v36  ;;  %v2961_v52 = vmul.f32 %v8680_v14, %v8640_v49  ;;  %vm2967_vm14 = vweird.f32 %v8680_v14 }
 0x2f7   : >> { %v2833_v1 = vmax.f32 %v2817_v8, 0.0  ;;  %v3053_v16 = vmul.f32 %v8561_v48, %v3034_v43  ;;  %v8684_v13 = vpop.eup %4304  ;;  %v3054_v12 = vmul.f32 %v8561_v48, %v3035_v56  ;;  %v2935_v27 = vmul.f32 %v8634_v10, %v2934_v37  ;;  %vm8741_vm1 = vmor %vm2966_vm13, %vm2967_vm14 }
 0x2f8   : >> { %v2951_v39 = vmul.f32 %v8684_v13, %v8646_v63  ;;  %v2944_v19 = vsub.f32 1.5, %v2943_v17  ;;  %v2962_v58 = vmul.f32 %v8680_v14, %v2961_v52  ;;  %vm2957_vm0 = vweird.f32 %v8684_v13 }
 0x2f9   : >> { %v8670_v3 = vadd.f32 1e-06, %v2833_v1  ;;  %v3072_v53 = vadd.f32 %v8569_v22, %v3053_v16  ;;  %v3073_v30 = vadd.f32 %v8569_v22, %v3054_v12  ;;  %v2939_v34 = vsel %vm8697_vm9, %v8634_v10, %v2935_v27  ;;  %vm8752_vm3 = vmor %vm2956_vm15, %vm2957_vm0 }
 0x2fa   : >> { %v2952_v8 = vmul.f32 %v8684_v13, %v2951_v39  ;;  %v2945_v57 = vmul.f32 %v8642_v59, %v2944_v19  ;;  %v2963_v1 = vmul.f32 0.5, %v2962_v58  ;;  %v3036_v10 = vmul.f32 %v2939_v34, %v2844_v32 }
 0x2fb   : >> { %4308 = vrsqrt.f32 %v8670_v3  ;;  %v3086_v42 = vpack.c.bf16 %v3073_v30, %v3072_v53  ;;  %vm2976_vm4 = vweird.f32 %v8672_v36  ;;  %vm2986_vm5 = vweird.f32 %v8670_v3 }
 0x2fc   : >> { %v8704_v50 = vpop.eup %4306  ;;  %v2953_v24 = vmul.f32 0.5, %v2952_v8  ;;  %v2964_v54 = vsub.f32 1.5, %v2963_v1 }
 0x2fd   : >> { %v2971_v21 = vmul.f32 %v8704_v50, %v8672_v36  ;;  %vm2977_vm6 = vweird.f32 %v8704_v50 }
 0x2fe   : >> { %v2954_v5 = vsub.f32 1.5, %v2953_v24  ;;  %v2965_v17 = vmul.f32 %v8680_v14, %v2964_v54  ;;  %vm2978_vm8 = vmor %vm2976_vm4, %vm2977_vm6 }
 0x2ff   : >> { %v2972_v7 = vmul.f32 %v8704_v50, %v2971_v21 }
 0x300   : >> { %v2955_v63 = vmul.f32 %v8684_v13, %v2954_v5  ;;  %v2969_v27 = vsel %vm8741_vm1, %v8680_v14, %v2965_v17  ;;  %v10913_v14 = vld [vmem:[#allocation22_spill] sm:$0xff] }
 0x301   : >> { %v8707_v51 = vpop.eup %4308  ;;  %v2973_v37 = vmul.f32 0.5, %v2972_v7  ;;  %v2849_v8 = vsub.f32 %v10913_v14, %v8626_v31 }
 0x302   : >> { %vm2987_vm7 = vweird.f32 %v8707_v51  ;;  %v2959_v36 = vsel %vm8752_vm3, %v8684_v13, %v2955_v63  ;;  %v10914_v13 = vld [vmem:[#allocation9_spill] sm:$0xff] }
 0x303   : >> { %vm2988_vm9 = vmor %vm2986_vm5, %vm2987_vm7  ;;  %v2848_v20 = vsub.f32 %v10914_v13, %v8624_v61 }
 0x304   : >> { %v2684_v47 = vpop.xlane.xlu0 %2683 }
 0x305   : >> { %v8654_v0 = vmul.f32 0.125, %v2684_v47  ;;  %4147 = vmatmul.msk.bf16.gmra.mxu0 %vm415_vm2, %v3086_v42  ;;  %v2981_v47 = vmul.f32 %v8707_v51, %v8670_v3  ;;  %v10912_v42 = vld [vmem:[#allocation55_spill] sm:$0xff] }
 0x306   : >> { %v2846_v58 = vsub.f32 %v10912_v42, %v8605_v15 }
 0x307   : >> { %v2748_v28 = vpop.xlane.xlu2 %2747  ;;  %v2802_v38 = vmul.f32 %v8654_v0, %v8654_v0  ;;  %v2982_v18 = vmul.f32 %v8707_v51, %v2981_v47 }
 0x308   : >> { %v2786_v40 = vmul.f32 0.125, %v2748_v28  ;;  %v2949_v28 = vsel %vm2948_vm12, %v8642_v59, %v2945_v57  ;;  %v3055_v59 = vmul.f32 %v8561_v48, %v3036_v10  ;;  %v3038_v57 = vmul.f32 %v2959_v36, %v2846_v58 }
 0x309   : >> { %v3037_v35 = vmul.f32 %v2949_v28, %v2845_v11  ;;  %v2983_v56 = vmul.f32 0.5, %v2982_v18 }
 0x30a   : >> { %v2818_v41 = vsub.f32 %v2786_v40, %v2802_v38  ;;  %v3074_v16 = vadd.f32 %v8569_v22, %v3055_v59  ;;  %v3057_v10 = vmul.f32 %v8561_v48, %v3038_v57  ;;  %v2850_v59 = vsub.f32 %v8258_v29, %v8654_v0 }
 0x30b   : >> { %v3056_v26 = vmul.f32 %v8561_v48, %v3037_v35  ;;  %v2984_v45 = vsub.f32 1.5, %v2983_v56 }
 0x30c   : >> { %v2834_v55 = vmax.f32 %v2818_v41, 0.0  ;;  %v10909_v41 = vld [vmem:[#allocation86_spill] sm:$0xff]  ;;  %v3076_v18 = vadd.f32 %v8569_v22, %v3057_v10 }
 0x30d   : >> { %v3075_v40 = vadd.f32 %v8569_v22, %v3056_v26  ;;  %v2847_v53 = vsub.f32 %v10909_v41, %v8599_v9  ;;  %v2974_v9 = vsub.f32 1.5, %v2973_v37  ;;  %v2985_v32 = vmul.f32 %v8707_v51, %v2984_v45 }
 0x30e   : >> { %v8718_v23 = vadd.f32 1e-06, %v2834_v55 }
 0x30f   : >> { %v3087_v30 = vpack.c.bf16 %v3075_v40, %v3074_v16  ;;  %v3039_v55 = vmul.f32 %v2969_v27, %v2847_v53  ;;  %v2975_v4 = vmul.f32 %v8704_v50, %v2974_v9  ;;  %v2989_v11 = vsel %vm2988_vm9, %v8707_v51, %v2985_v32 }
 0x310   : >> { %4310 = vrsqrt.f32 %v8718_v23  ;;  %v3041_v3 = vmul.f32 %v2989_v11, %v2849_v8  ;;  %vm2996_vm10 = vweird.f32 %v8718_v23 }
 0x311   : >> { %v2979_v15 = vsel %vm2978_vm8, %v8704_v50, %v2975_v4  ;;  %v3058_v1 = vmul.f32 %v8561_v48, %v3039_v55 }
 0x312   : >> { %v3040_v47 = vmul.f32 %v2979_v15, %v2848_v20  ;;  %v3060_v35 = vmul.f32 %v8561_v48, %v3041_v3 }
 0x313   : >> { %v3077_v61 = vadd.f32 %v8569_v22, %v3058_v1 }
 0x314   : >> { %v3059_v24 = vmul.f32 %v8561_v48, %v3040_v47  ;;  %v3079_v51 = vadd.f32 %v8569_v22, %v3060_v35 }
 0x315   : >> { %4148 = vmatmul.msk.bf16.gmra.mxu0 %vm415_vm2, %v3087_v30 }
 0x316   : >> { %v8747_v12 = vpop.eup %4310  ;;  %v3078_v50 = vadd.f32 %v8569_v22, %v3059_v24  ;;  %v10917_v24 = vld [vmem:[#allocation5_spill] sm:$0xff] }
 0x317   : >> { %v2991_v19 = vmul.f32 %v8747_v12, %v8718_v23  ;;  %vm2997_vm11 = vweird.f32 %v8747_v12  ;;  %v8815_v35 = vperm.slane %v10917_v24, 0 }
 0x318   : >> { %v3089_v7 = vpack.c.bf16 %v3079_v51, %v3078_v50  ;;  %vm8794_vm12 = vmor %vm2996_vm10, %vm2997_vm11 }
 0x319   : >> { %v2992_v34 = vmul.f32 %v8747_v12, %v2991_v19 }
 0x31a   : >> { %4150 = vmatmul.msk.bf16.vlgmr.msra.gmra.mxu3 %vm415_vm2, %v3089_v7 }
 0x31b   : >> { %v2993_v21 = vmul.f32 0.5, %v2992_v34 }
 0x31d   : >> { %v2994_v26 = vsub.f32 1.5, %v2993_v21 }
 0x31f   : >> { %v2995_v40 = vmul.f32 %v8747_v12, %v2994_v26 }
 0x321   : >> { %v2687_v25 = vpop.xlane.xlu1 %2686  ;;  %v2999_v56 = vsel %vm8794_vm12, %v8747_v12, %v2995_v40 }
 0x322   : >> { %v8727_v62 = vmul.f32 0.125, %v2687_v25  ;;  %v3042_v16 = vmul.f32 %v2999_v56, %v2850_v59 }
 0x323   : >> { %v2751_v6 = vpop.xlane.xlu0 %2750 }
 0x324   : >> { %v2803_v60 = vmul.f32 %v8727_v62, %v8727_v62  ;;  %v2787_v38 = vmul.f32 0.125, %v2751_v6  ;;  %v3088_v6 = vpack.c.bf16 %v3077_v61, %v3076_v18  ;;  %v2851_v43 = vsub.f32 %v8407_v46, %v8727_v62 }
 0x325   : >> { %v3061_v53 = vmul.f32 %v8561_v48, %v3042_v16 }
 0x326   : >> { %v2819_v33 = vsub.f32 %v2787_v38, %v2803_v60  ;;  %4149 = vmatmul.msk.bf16.gmra.mxu0 %vm415_vm2, %v3088_v6 }
 0x327   : >> { %v3080_v62 = vadd.f32 %v8569_v22, %v3061_v53 }
 0x328   : >> { %v2835_v52 = vmax.f32 %v2819_v33, 0.0 }
 0x32a   : >> { %v2867_v39 = vadd.f32 1e-06, %v2835_v52 }
 0x32c   : >> { %4312 = vrsqrt.f32 %v2867_v39  ;;  %vm3006_vm13 = vweird.f32 %v2867_v39 }
 0x332   : >> { %v4313_v31 = vpop.eup %4312 }
 0x333   : >> { %v3001_v28 = vmul.f32 %v4313_v31, %v2867_v39  ;;  %vm3007_vm14 = vweird.f32 %v4313_v31 }
 0x334   : >> { %vm3008_vm15 = vmor %vm3006_vm13, %vm3007_vm14 }
 0x335   : >> { %v3002_v25 = vmul.f32 %v4313_v31, %v3001_v28 }
 0x337   : >> { %v3003_v54 = vmul.f32 0.5, %v3002_v25 }
 0x339   : >> { %v3004_v23 = vsub.f32 1.5, %v3003_v54 }
 0x33a   : >> { %v2690_v60 = vpop.xlane.xlu1 %2689 }
 0x33b   : >> { %v2772_v38 = vmul.f32 0.125, %v2690_v60  ;;  %v3005_v37 = vmul.f32 %v4313_v31, %v3004_v23 }
 0x33c   : >> { %v2754_v33 = vpop.xlane.xlu0 %2753 }
 0x33d   : >> { %v2804_v29 = vmul.f32 %v2772_v38, %v2772_v38  ;;  %v2788_v0 = vmul.f32 0.125, %v2754_v33  ;;  %v3009_v52 = vsel %vm3008_vm15, %v4313_v31, %v3005_v37  ;;  %v2852_v20 = vsub.f32 %v8467_v2, %v2772_v38 }
 0x33e   : >> { %v3043_v41 = vmul.f32 %v3009_v52, %v2851_v43 }
 0x33f   : >> { %v2820_v17 = vsub.f32 %v2788_v0, %v2804_v29 }
 0x340   : >> { %v3062_v49 = vmul.f32 %v8561_v48, %v3043_v41 }
 0x341   : >> { %v2836_v63 = vmax.f32 %v2820_v17, 0.0 }
 0x342   : >> { %v3081_v46 = vadd.f32 %v8569_v22, %v3062_v49 }
 0x343   : >> { %v2868_v30 = vadd.f32 1e-06, %v2836_v63 }
 0x344   : >> { %v3090_v39 = vpack.c.bf16 %v3081_v46, %v3080_v62 }
 0x345   : >> { %4314 = vrsqrt.f32 %v2868_v30  ;;  %vm3016_vm0 = vweird.f32 %v2868_v30 }
 0x346   : >> { %4151 = vmatmul.msk.bf16.gmra.mxu3 %vm415_vm2, %v3090_v39 }
 0x34b   : >> { %v4315_v12 = vpop.eup %4314 }
 0x34c   : >> { %v3011_v45 = vmul.f32 %v4315_v12, %v2868_v30  ;;  %vm3017_vm1 = vweird.f32 %v4315_v12 }
 0x34d   : >> { %vm3018_vm3 = vmor %vm3016_vm0, %vm3017_vm1 }
 0x34e   : >> { %v3012_v58 = vmul.f32 %v4315_v12, %v3011_v45 }
 0x350   : >> { %v3013_v8 = vmul.f32 0.5, %v3012_v58 }
 0x352   : >> { %v2693_v27 = vpop.xlane.xlu2 %2692  ;;  %v3014_v4 = vsub.f32 1.5, %v3013_v8 }
 0x353   : >> { %v2773_v9 = vmul.f32 0.125, %v2693_v27 }
 0x354   : >> { %v2757_v19 = vpop.xlane.xlu1 %2756  ;;  %v3015_v32 = vmul.f32 %v4315_v12, %v3014_v4 }
 0x355   : >> { %v2805_v36 = vmul.f32 %v2773_v9, %v2773_v9  ;;  %v2789_v42 = vmul.f32 0.125, %v2757_v19  ;;  %v2853_v3 = vsub.f32 %v8523_v44, %v2773_v9 }
 0x356   : >> { %v3019_v11 = vsel %vm3018_vm3, %v4315_v12, %v3015_v32 }
 0x357   : >> { %v2821_v55 = vsub.f32 %v2789_v42, %v2805_v36  ;;  %v3044_v31 = vmul.f32 %v3019_v11, %v2852_v20 }
 0x359   : >> { %v2837_v14 = vmax.f32 %v2821_v55, 0.0  ;;  %v3063_v28 = vmul.f32 %v8561_v48, %v3044_v31 }
 0x35b   : >> { %v2869_v34 = vadd.f32 1e-06, %v2837_v14  ;;  %v3082_v61 = vadd.f32 %v8569_v22, %v3063_v28 }
 0x35d   : >> { %4316 = vrsqrt.f32 %v2869_v34  ;;  %vm3026_vm4 = vweird.f32 %v2869_v34 }
 0x362   : >> { %v3133_v50 = vpop.f32.mrf.mxu0 }
 0x363   : >> { %v4317_v57 = vpop.eup %4316  ;;  %v8820_v51 = vadd.f32 %v3133_v50, %v8815_v35 }
 0x364   : >> { %v3021_v13 = vmul.f32 %v4317_v57, %v2869_v34  ;;  %vm3027_vm5 = vweird.f32 %v4317_v57 }
 0x365   : >> { %vm3028_vm6 = vmor %vm3026_vm4, %vm3027_vm5  ;;  %v8824_v44 = vmul.f32 0.70710677, %v8820_v51 }
 0x366   : >> { %v3022_v15 = vmul.f32 %v4317_v57, %v3021_v13 }
 0x367   : >> { %v8827_v18 = vand.u32 2147483647, %v8824_v44 }
 0x368   : >> { %v3023_v1 = vmul.f32 0.5, %v3022_v15 }
 0x369   : >> { %v3221_v7 = vmul.f32 0.3275911, %v8827_v18 }
 0x36a   : >> { %v3024_v47 = vsub.f32 1.5, %v3023_v1  ;;  %v3135_v59 = vpop.f32.mrf.mxu0 }
 0x36b   : >> { %v8832_v5 = vadd.f32 %v3135_v59, %v8815_v35 }
 0x36c   : >> { %v3025_v21 = vmul.f32 %v4317_v57, %v3024_v47 }
 0x36e   : >> { %v3029_v10 = vsel %vm3028_vm6, %v4317_v57, %v3025_v21 }
 0x36f   : >> { %v3045_v25 = vmul.f32 %v3029_v10, %v2853_v3 }
 0x371   : >> { %v3064_v2 = vmul.f32 %v8561_v48, %v3045_v25  ;;  %v3237_v48 = vadd.f32 1.0, %v3221_v7 }
 0x372   : >> { %v3138_v56 = vpop.f32.mrf.mxu0 }
 0x373   : >> { %v3083_v26 = vadd.f32 %v8569_v22, %v3064_v2  ;;  %4318 = vrcp.f32 %v3237_v48  ;;  %v8835_v22 = vmul.f32 0.70710677, %v8832_v5  ;;  %v3264_v0 = vand.u32 2147483648, %v3237_v48 }
 0x374   : >> { %vm3258_vm8 = vweird.f32 %v3237_v48  ;;  %v3262_v16 = vand.u32 2147483647, %v3237_v48  ;;  %v8842_v17 = vadd.f32 %v3138_v56, %v8815_v35 }
 0x375   : >> { %v3091_v54 = vpack.c.bf16 %v3083_v26, %v3082_v61  ;;  %v8838_v60 = vand.u32 2147483647, %v8835_v22  ;;  %v3265_v53 = vor.u32 1.1754944e-38, %v3264_v0  ;;  %v3637_v26 = vsub.f32 0.0, %v8827_v18 }
 0x376   : >> { %v8845_v41 = vmul.f32 0.70710677, %v8842_v17  ;;  %vm3263_vm10 = vcmp.eq.f32.partialorder %v3262_v16, 8.507059e+37 }
 0x377   : >> { %4152 = vmatmul.msk.bf16.gmra.mxu3 %vm415_vm2, %v3091_v54  ;;  %v3222_v40 = vmul.f32 0.3275911, %v8838_v60  ;;  %v3653_v0 = vmul.f32 %v3637_v26, %v8827_v18 }
 0x378   : >> { %v8848_v46 = vand.u32 2147483647, %v8845_v41 }
 0x379   : >> { %v4319_v6 = vpop.eup %4318  ;;  %v3238_v33 = vadd.f32 1.0, %v3222_v40 }
 0x37a   : >> { %v3254_v23 = vmul.f32 %v4319_v6, %v3237_v48  ;;  %vm3259_vm7 = vweird.f32 %v4319_v6  ;;  %v3223_v27 = vmul.f32 0.3275911, %v8848_v46  ;;  %v3140_v9 = vpop.f32.mrf.mxu0 }
 0x37b   : >> { %4320 = vrcp.f32 %v3238_v33  ;;  %vm3260_vm9 = vmor %vm3258_vm8, %vm3259_vm7  ;;  %v3279_v30 = vand.u32 2147483648, %v3238_v33  ;;  %v3277_v12 = vand.u32 2147483647, %v3238_v33  ;;  %vm3273_vm12 = vweird.f32 %v3238_v33 }
 0x37c   : >> { %v3255_v38 = vsub.f32 1.0, %v3254_v23  ;;  %v3239_v42 = vadd.f32 1.0, %v3223_v27  ;;  %v8855_v58 = vadd.f32 %v3140_v9, %v8815_v35 }
 0x37d   : >> { %v3280_v36 = vor.u32 1.1754944e-38, %v3279_v30  ;;  %vm3278_vm14 = vcmp.eq.f32.partialorder %v3277_v12, 8.507059e+37  ;;  %v3638_v30 = vsub.f32 0.0, %v8838_v60 }
 0x37e   : >> { %v3256_v43 = vmul.f32 %v4319_v6, %v3255_v38  ;;  %4322 = vrcp.f32 %v3239_v42  ;;  %v8860_v34 = vmul.f32 0.70710677, %v8855_v58  ;;  %v3294_v23 = vand.u32 2147483648, %v3239_v42 }
 0x37f   : >> { %vm3288_vm0 = vweird.f32 %v3239_v42  ;;  %v3292_v40 = vand.u32 2147483647, %v3239_v42 }
 0x380   : >> { %v3257_v29 = vadd.f32 %v4319_v6, %v3256_v43  ;;  %v8864_v32 = vand.u32 2147483647, %v8860_v34 }
 0x381   : >> { %v4321_v37 = vpop.eup %4320  ;;  %vm3293_vm3 = vcmp.eq.f32.partialorder %v3292_v40, 8.507059e+37 }
 0x382   : >> { %v3269_v52 = vmul.f32 %v4321_v37, %v3238_v33  ;;  %v3261_v63 = vsel %vm3260_vm9, %v4319_v6, %v3257_v29  ;;  %vm3274_vm11 = vweird.f32 %v4321_v37  ;;  %v3143_v57 = vpop.f32.mrf.mxu0  ;;  %v3224_v15 = vmul.f32 0.3275911, %v8864_v32 }
 0x383   : >> { %v8850_v62 = vsel %vm3263_vm10, %v3265_v53, %v3261_v63  ;;  %vm3275_vm13 = vmor %vm3273_vm12, %vm3274_vm11  ;;  %v8869_v11 = vadd.f32 %v3143_v57, %v8815_v35 }
 0x384   : >> { %v3270_v49 = vsub.f32 1.0, %v3269_v52  ;;  %v3493_v19 = vmul.f32 1.0614054, %v8850_v62  ;;  %v4323_v13 = vpop.eup %4322  ;;  %v3240_v47 = vadd.f32 1.0, %v3224_v15  ;;  %v3295_v52 = vor.u32 1.1754944e-38, %v3294_v23 }
 0x385   : >> { %v3284_v31 = vmul.f32 %v4323_v13, %v3239_v42  ;;  %v8872_v3 = vmul.f32 0.70710677, %v8869_v11  ;;  %vm3289_vm15 = vweird.f32 %v4323_v13 }
 0x386   : >> { %v3271_v39 = vmul.f32 %v4321_v37, %v3270_v49  ;;  %v3509_v8 = vadd.f32 -1.4531521, %v3493_v19  ;;  %4324 = vrcp.f32 %v3240_v47  ;;  %vm8889_vm1 = vmor %vm3288_vm0, %vm3289_vm15  ;;  %v3307_v63 = vand.u32 2147483647, %v3240_v47 }
 0x387   : >> { %v3285_v21 = vsub.f32 1.0, %v3284_v31  ;;  %v8876_v25 = vand.u32 2147483647, %v8872_v3  ;;  %v3309_v53 = vand.u32 2147483648, %v3240_v47  ;;  %vm3303_vm5 = vweird.f32 %v3240_v47 }
 0x388   : >> { %v3272_v45 = vadd.f32 %v4321_v37, %v3271_v39  ;;  %v3525_v20 = vmul.f32 %v3509_v8, %v8850_v62  ;;  %vm3308_vm7 = vcmp.eq.f32.partialorder %v3307_v63, 8.507059e+37  ;;  %v3654_v31 = vmul.f32 %v3638_v30, %v8838_v60 }
 0x389   : >> { %v3286_v24 = vmul.f32 %v4323_v13, %v3285_v21  ;;  %v3225_v2 = vmul.f32 0.3275911, %v8876_v25  ;;  %v3310_v8 = vor.u32 1.1754944e-38, %v3309_v53  ;;  %vm3733_vm0 = vcmp.ge.f32.partialorder %v8824_v44, 0.0 }
 0x38a   : >> { %v3276_v55 = vsel %vm3275_vm13, %v4321_v37, %v3272_v45  ;;  %v3541_v28 = vadd.f32 1.4214138, %v3525_v20  ;;  %v3145_v61 = vpop.f32.mrf.mxu0 }
 0x38b   : >> { %v8857_v14 = vsel %vm3278_vm14, %v3280_v36, %v3276_v55  ;;  %v8882_v54 = vadd.f32 %v3145_v61, %v8815_v35  ;;  %v3287_v48 = vadd.f32 %v4323_v13, %v3286_v24  ;;  %v8884_v6 = vadd.f32 1.0, %v3225_v2 }
 0x38c   : >> { %v3494_v4 = vmul.f32 1.0614054, %v8857_v14  ;;  %v3557_v50 = vmul.f32 %v3541_v28, %v8850_v62  ;;  %v4325_v59 = vpop.eup %4324  ;;  %v3669_v55 = vmul.f32 1.442695, %v3653_v0 }
 0x38d   : >> { %v8887_v38 = vmul.f32 0.70710677, %v8882_v54  ;;  %v3299_v33 = vmul.f32 %v4325_v59, %v3240_v47  ;;  %4326 = vrcp.f32 %v8884_v6  ;;  %v3291_v37 = vsel %vm8889_vm1, %v4323_v13, %v3287_v48 }
 0x38e   : >> { %v3510_v1 = vadd.f32 -1.4531521, %v3494_v4  ;;  %v3573_v43 = vadd.f32 -0.28449672, %v3557_v50  ;;  %vm3304_vm4 = vweird.f32 %v4325_v59  ;;  %v8903_v27 = vsel %vm3293_vm3, %v3295_v52, %v3291_v37 }
 0x38f   : >> { %v3300_v16 = vsub.f32 1.0, %v3299_v33  ;;  %v8899_v49 = vand.u32 2147483647, %v8887_v38  ;;  %vm3305_vm6 = vmor %vm3303_vm5, %vm3304_vm4  ;;  %v3495_v57 = vmul.f32 1.0614054, %v8903_v27  ;;  %v3324_v2 = vand.u32 2147483648, %v8884_v6 }
 0x390   : >> { %v3526_v10 = vmul.f32 %v3510_v1, %v8857_v14  ;;  %v3589_v18 = vmul.f32 %v3573_v43, %v8850_v62  ;;  %v3322_v24 = vand.u32 2147483647, %v8884_v6  ;;  %vm3318_vm9 = vweird.f32 %v8884_v6  ;;  %v4210_v33 = vld [vmem:[%s9483_s9 + $0x8] sm:$0xff] }
 0x391   : >> { %v3301_v39 = vmul.f32 %v4325_v59, %v3300_v16  ;;  %v3226_v45 = vmul.f32 0.3275911, %v8899_v49  ;;  %v3511_v61 = vadd.f32 -1.4531521, %v3495_v57  ;;  %v3325_v29 = vor.u32 1.1754944e-38, %v3324_v2  ;;  %3871 = vmatpush.bf16.msra.mxu1 %v4210_v33  ;;  %4217 = vmatpush.bf16.msra.mxu2 %v4210_v33 }
 0x392   : >> { %v3542_v7 = vadd.f32 1.4214138, %v3526_v10  ;;  %v3148_v12 = vpop.f32.mrf.mxu0  ;;  %v3605_v1 = vadd.f32 0.2548296, %v3589_v18  ;;  %vm3323_vm11 = vcmp.eq.f32.partialorder %v3322_v24, 8.507059e+37  ;;  %v4209_v18 = vld [vmem:[%s9483_s9] sm:$0xff] }
 0x393   : >> { %v8907_v9 = vadd.f32 %v3148_v12, %v8815_v35  ;;  %v3302_v36 = vadd.f32 %v4325_v59, %v3301_v39  ;;  %v4327_v42 = vpop.eup %4326  ;;  %v8909_v4 = vadd.f32 1.0, %v3226_v45  ;;  %v3527_v0 = vmul.f32 %v3511_v61, %v8903_v27 }
 0x394   : >> { %v3558_v56 = vmul.f32 %v3542_v7, %v8857_v14  ;;  %v3314_v20 = vmul.f32 %v4327_v42, %v8884_v6  ;;  %vm3319_vm8 = vweird.f32 %v4327_v42  ;;  %v3621_v60 = vmul.f32 %v3605_v1, %v8850_v62 }
 0x395   : >> { %v3306_v13 = vsel %vm3305_vm6, %v4325_v59, %v3302_v36  ;;  %v8914_v15 = vmul.f32 0.70710677, %v8907_v9  ;;  %4328 = vrcp.f32 %v8909_v4  ;;  %v3671_v7 = vmul.f32 1.442695, %v3654_v31  ;;  %vm3320_vm10 = vmor %vm3318_vm9, %vm3319_vm8  ;;  %3872 = vmatpush.bf16.msra.mxu1 %v4209_v18  ;;  %4218 = vmatpush.bf16.msra.mxu2 %v4209_v18 }
 0x396   : >> { %v3574_v19 = vadd.f32 -0.28449672, %v3558_v56  ;;  %v8917_v21 = vsel %vm3308_vm7, %v3310_v8, %v3306_v13  ;;  %v3315_v10 = vsub.f32 1.0, %v3314_v20  ;;  %4330 = vpow2.f32 %v3669_v55 }
 0x397   : >> { %v3496_v28 = vmul.f32 1.0614054, %v8917_v21  ;;  %v8925_v26 = vand.u32 2147483647, %v8914_v15  ;;  %4332 = vpow2.f32 %v3671_v7  ;;  %v3639_v13 = vsub.f32 0.0, %v8848_v46 }
 0x398   : >> { %v3590_v47 = vmul.f32 %v3574_v19, %v8857_v14  ;;  %v3316_v50 = vmul.f32 %v4327_v42, %v3315_v10  ;;  %v3339_v19 = vand.u32 2147483648, %v8909_v4  ;;  %vm3333_vm13 = vweird.f32 %v8909_v4 }
 0x399   : >> { %v3512_v48 = vadd.f32 -1.4531521, %v3496_v28  ;;  %v3227_v40 = vmul.f32 0.3275911, %v8925_v26  ;;  %v3655_v33 = vmul.f32 %v3639_v13, %v8848_v46  ;;  %vm3734_vm1 = vcmp.ge.f32.partialorder %v8835_v22, 0.0 }
 0x39a   : >> { %v3606_v59 = vadd.f32 0.2548296, %v3590_v47  ;;  %v3317_v23 = vadd.f32 %v4327_v42, %v3316_v50  ;;  %v3150_v12 = vpop.f32.mrf.mxu0  ;;  %v3340_v28 = vor.u32 1.1754944e-38, %v3339_v19  ;;  %vm3735_vm7 = vcmp.ge.f32.partialorder %v8845_v41, 0.0 }
 0x39b   : >> { %v4329_v43 = vpop.eup %4328  ;;  %v3528_v6 = vmul.f32 %v3512_v48, %v8917_v21  ;;  %v8938_v63 = vadd.f32 1.0, %v3227_v40  ;;  %v8954_v57 = vadd.f32 %v3150_v12, %v8815_v35  ;;  %v3673_v12 = vmul.f32 1.442695, %v3655_v33 }
 0x39c   : >> { %v3321_v56 = vsel %vm3320_vm10, %v4327_v42, %v3317_v23  ;;  %v3329_v62 = vmul.f32 %v4329_v43, %v8909_v4  ;;  %v4331_v16 = vpop.eup %4330  ;;  %v3622_v30 = vmul.f32 %v3606_v59, %v8857_v14  ;;  %v3543_v42 = vadd.f32 1.4214138, %v3527_v0 }
 0x39d   : >> { %v3158_v37 = vpop.f32.mrf.mxu3  ;;  %v8936_v52 = vsel %vm3323_vm11, %v3325_v29, %v3321_v56  ;;  %v8940_v53 = vmul.f32 %v4331_v16, %v3621_v60  ;;  %4334 = vrcp.f32 %v8938_v63  ;;  %vm3334_vm12 = vweird.f32 %v4329_v43  ;;  %v4333_v1 = vpop.eup %4332 }
 0x39e   : >> { %v3330_v39 = vsub.f32 1.0, %v3329_v62  ;;  %v3497_v45 = vmul.f32 1.0614054, %v8936_v52  ;;  %v8950_v36 = vadd.f32 %v3158_v37, %v8815_v35  ;;  %v3337_v14 = vand.u32 2147483647, %v8909_v4  ;;  %vm3335_vm14 = vmor %vm3333_vm13, %vm3334_vm12 }
 0x39f   : >> { %v3544_v8 = vadd.f32 1.4214138, %v3528_v6  ;;  %v3717_v31 = vsub.f32 1.0, %v8940_v53  ;;  %v3702_v24 = vmul.f32 %v4333_v1, %v3622_v30  ;;  %v3559_v2 = vmul.f32 %v3543_v42, %v8903_v27 }
 0x3a0   : >> { %v3331_v55 = vmul.f32 %v4329_v43, %v3330_v39  ;;  %v3513_v47 = vadd.f32 -1.4531521, %v3497_v45  ;;  %v8960_v10 = vmul.f32 0.70710677, %v8950_v36  ;;  %vm3338_vm15 = vcmp.eq.f32.partialorder %v3337_v14, 8.507059e+37 }
 0x3a1   : >> { %v3560_v60 = vmul.f32 %v3544_v8, %v8917_v21  ;;  %v8970_v48 = vmul.f32 0.70710677, %v8954_v57  ;;  %v3640_v59 = vsub.f32 0.0, %v8864_v32  ;;  %v3718_v0 = vsub.f32 1.0, %v3702_v24 }
 0x3a2   : >> { %v3332_v20 = vadd.f32 %v4329_v43, %v3331_v55  ;;  %v8967_v4 = vand.u32 2147483647, %v8960_v10  ;;  %v3575_v56 = vadd.f32 -0.28449672, %v3559_v2  ;;  %v3749_v37 = vsub.f32 0.0, %v3717_v31 }
 0x3a3   : >> { %v4335_v50 = vpop.eup %4334  ;;  %v3576_v16 = vadd.f32 -0.28449672, %v3560_v60  ;;  %v8983_v53 = vand.u32 2147483647, %v8970_v48  ;;  %v3656_v30 = vmul.f32 %v3640_v59, %v8864_v32  ;;  %v3641_v45 = vsub.f32 0.0, %v8876_v25 }
 0x3a4   : >> { %v3336_v61 = vsel %vm3335_vm14, %v4329_v43, %v3332_v20  ;;  %v3344_v40 = vmul.f32 %v4335_v50, %v8938_v63  ;;  %v3529_v43 = vmul.f32 %v3513_v47, %v8936_v52  ;;  %v3231_v29 = vmul.f32 0.3275911, %v8967_v4 }
 0x3a5   : >> { %v8964_v7 = vsel %vm3338_vm15, %v3340_v28, %v3336_v61  ;;  %vm3349_vm3 = vweird.f32 %v4335_v50  ;;  %v3354_v19 = vand.u32 2147483648, %v8938_v63  ;;  %v3750_v42 = vsub.f32 0.0, %v3718_v0 }
 0x3a6   : >> { %v3498_v23 = vmul.f32 1.0614054, %v8964_v7  ;;  %v3345_v62 = vsub.f32 1.0, %v3344_v40  ;;  %v8980_v6 = vadd.f32 1.0, %v3231_v29  ;;  %v3545_v18 = vadd.f32 1.4214138, %v3529_v43 }
 0x3a7   : >> { %vm3348_vm4 = vweird.f32 %v8938_v63  ;;  %v3352_v14 = vand.u32 2147483647, %v8938_v63  ;;  %v3591_v8 = vmul.f32 %v3575_v56, %v8903_v27  ;;  %v3592_v13 = vmul.f32 %v3576_v16, %v8917_v21 }
 0x3a8   : >> { %v3514_v39 = vadd.f32 -1.4531521, %v3498_v23  ;;  %v3346_v46 = vmul.f32 %v4335_v50, %v3345_v62  ;;  %vm8992_vm5 = vmor %vm3348_vm4, %vm3349_vm3  ;;  %4336 = vrcp.f32 %v8980_v6  ;;  %v3228_v20 = vmul.f32 0.3275911, %v8983_v53 }
 0x3a9   : >> { %v3675_v1 = vmul.f32 1.442695, %v3656_v30  ;;  %v3642_v28 = vsub.f32 0.0, %v8899_v49  ;;  %v3765_v24 = vsel %vm3733_vm0, %v3717_v31, %v3749_v37  ;;  %v3561_v2 = vmul.f32 %v3545_v18, %v8936_v52 }
 0x3aa   : >> { %v3347_v55 = vadd.f32 %v4335_v50, %v3346_v46  ;;  %v3530_v47 = vmul.f32 %v3514_v39, %v8964_v7  ;;  %v3355_v61 = vor.u32 1.1754944e-38, %v3354_v19  ;;  %v9005_v60 = vadd.f32 1.0, %v3228_v20 }
 0x3ab   : >> { %v3766_v59 = vsel %vm3734_vm1, %v3718_v0, %v3750_v42  ;;  %4338 = vpow2.f32 %v3673_v12  ;;  %v3657_v23 = vmul.f32 %v3641_v45, %v8876_v25  ;;  %vm3353_vm6 = vcmp.eq.f32.partialorder %v3352_v14, 8.507059e+37 }
 0x3ac   : >> { %v3351_v63 = vsel %vm8992_vm5, %v4335_v50, %v3347_v55  ;;  %v3607_v40 = vadd.f32 0.2548296, %v3591_v8  ;;  %v3608_v33 = vadd.f32 0.2548296, %v3592_v13  ;;  %4340 = vrcp.f32 %v9005_v60  ;;  %v3160_v50 = vpop.f32.mrf.mxu3  ;;  %v3153_v13 = vpop.f32.mrf.mxu0 }
 0x3ad   : >> { %v9010_v43 = vsel %vm3353_vm6, %v3355_v61, %v3351_v63  ;;  %4342 = vpow2.f32 %v3675_v1  ;;  %v3546_v44 = vadd.f32 1.4214138, %v3530_v47  ;;  %v3658_v31 = vmul.f32 %v3642_v28, %v8899_v49 }
 0x3ae   : >> { %v9014_v29 = vpop.eup %4336  ;;  %v3781_v56 = vadd.f32 1.0, %v3765_v24  ;;  %v3577_v22 = vadd.f32 -0.28449672, %v3561_v2  ;;  %v3173_v0 = vmul.f32 0.5, %v8820_v51  ;;  %v3782_v62 = vadd.f32 1.0, %v3766_v59 }
 0x3af   : >> { %v3677_v25 = vmul.f32 1.442695, %v3657_v23  ;;  %v3499_v37 = vmul.f32 1.0614054, %v9010_v43  ;;  %v3174_v16 = vmul.f32 0.5, %v8832_v5  ;;  %v3623_v30 = vmul.f32 %v3607_v40, %v8903_v27 }
 0x3b0   : >> { %v3624_v39 = vmul.f32 %v3608_v33, %v8917_v21  ;;  %v9022_v46 = vadd.f32 %v3160_v50, %v8815_v35  ;;  %v9025_v12 = vmul.f32 0.5, %v8842_v17  ;;  %v3562_v18 = vmul.f32 %v3546_v44, %v8964_v7 }
 0x3b1   : >> { %v4339_v49 = vpop.eup %4338  ;;  %v3679_v51 = vmul.f32 1.442695, %v3658_v31  ;;  %v3404_v45 = vmul.f32 %v9014_v29, %v8980_v6  ;;  %v9030_v42 = vmul.f32 %v3781_v56, %v3173_v0  ;;  %v9033_v5 = vmul.f32 0.5, %v8855_v58 }
 0x3b2   : >> { %v4341_v19 = vpop.eup %4340  ;;  %v3593_v27 = vmul.f32 %v3577_v22, %v8936_v52  ;;  %v9037_v21 = vmul.f32 0.70710677, %v9022_v46  ;;  %v3798_v17 = vmul.f32 %v3782_v62, %v3174_v16  ;;  %4344 = vpow2.f32 %v3677_v25 }
 0x3b3   : >> { %v4343_v55 = vpop.eup %4342  ;;  %v3515_v14 = vadd.f32 -1.4531521, %v3499_v37  ;;  %v3359_v8 = vmul.f32 %v4341_v19, %v9005_v60  ;;  %v3703_v32 = vmul.f32 %v4339_v49, %v3623_v30  ;;  %v3643_v1 = vsub.f32 0.0, %v8925_v26 }
 0x3b4   : >> { %v9040_v20 = vmul.f32 %v4343_v55, %v3624_v39  ;;  %v9044_v58 = vand.u32 2147483647, %v9037_v21  ;;  %v3578_v47 = vadd.f32 -0.28449672, %v3562_v18  ;;  %4346 = vpow2.f32 %v3679_v51 }
 0x3b5   : >> { %v3405_v28 = vsub.f32 1.0, %v3404_v45  ;;  %v3360_v63 = vsub.f32 1.0, %v3359_v8  ;;  %v3609_v24 = vadd.f32 0.2548296, %v3593_v27  ;;  %v3369_v2 = vand.u32 2147483648, %v9005_v60 }
 0x3b6   : >> { %v3232_v61 = vmul.f32 0.3275911, %v9044_v58  ;;  %v9049_v59 = vadd.f32 %v3153_v13, %v8815_v35  ;;  %v3531_v23 = vmul.f32 %v3515_v14, %v9010_v43  ;;  %vm3364_vm8 = vweird.f32 %v4341_v19 }
 0x3b7   : >> { %v3361_v40 = vmul.f32 %v4341_v19, %v3360_v63  ;;  %v3367_v33 = vand.u32 2147483647, %v9005_v60  ;;  %v3719_v44 = vsub.f32 1.0, %v3703_v32  ;;  %v3720_v31 = vsub.f32 1.0, %v9040_v20 }
 0x3b8   : >> { %v3659_v50 = vmul.f32 %v3643_v1, %v8925_v26  ;;  %v9056_v56 = vadd.f32 1.0, %v3232_v61  ;;  %v4345_v22 = vpop.eup %4344  ;;  %v3594_v0 = vmul.f32 %v3578_v47, %v8964_v7  ;;  %v3406_v62 = vmul.f32 %v9014_v29, %v3405_v28 }
 0x3b9   : >> { %v3362_v25 = vadd.f32 %v4341_v19, %v3361_v40  ;;  %vm3363_vm9 = vweird.f32 %v9005_v60  ;;  %v3625_v37 = vmul.f32 %v3609_v24, %v8936_v52  ;;  %v3370_v16 = vor.u32 1.1754944e-38, %v3369_v2 }
 0x3ba   : >> { %vm3365_vm10 = vmor %vm3363_vm9, %vm3364_vm8  ;;  %4348 = vrcp.f32 %v9056_v56  ;;  %v9064_v30 = vmul.f32 0.70710677, %v9049_v59  ;;  %v4347_v26 = vpop.eup %4346  ;;  %v3547_v39 = vadd.f32 1.4214138, %v3531_v23  ;;  %vm3368_vm11 = vcmp.eq.f32.partialorder %v3367_v33, 8.507059e+37 }
 0x3bb   : >> { %v3366_v49 = vsel %vm3365_vm10, %v4341_v19, %v3362_v25  ;;  %v3813_v18 = vpack.c.bf16 %v3798_v17, %v9030_v42  ;;  %v3751_v51 = vsub.f32 0.0, %v3719_v44  ;;  %vm3408_vm12 = vweird.f32 %v8980_v6 }
 0x3bc   : >> { %v3414_v60 = vand.u32 2147483648, %v8980_v6  ;;  %v9069_v45 = vsel %vm3368_vm11, %v3370_v16, %v3366_v49  ;;  %v3610_v52 = vadd.f32 0.2548296, %v3594_v0  ;;  %v3407_v27 = vadd.f32 %v9014_v29, %v3406_v62 }
 0x3bd   : >> { %vm3409_vm13 = vweird.f32 %v9014_v29  ;;  %v3500_v55 = vmul.f32 1.0614054, %v9069_v45  ;;  %v3705_v14 = vmul.f32 %v4345_v22, %v3625_v37  ;;  %v3644_v19 = vsub.f32 0.0, %v8983_v53 }
 0x3be   : >> { %v9076_v8 = vand.u32 2147483647, %v9064_v30  ;;  %vm3840_vm14 = vcmask 261120   ;;  %v3752_v42 = vsub.f32 0.0, %v3720_v31  ;;  %v3563_v17 = vmul.f32 %v3547_v39, %v9010_v43  ;;  %vm9090_vm0 = vmor %vm3408_vm12, %vm3409_vm13 }
 0x3bf   : >> { %v3412_v13 = vand.u32 2147483647, %v8980_v6  ;;  %v3516_v32 = vadd.f32 -1.4531521, %v3500_v55  ;;  %4161 = vmatmul.msk.bf16.vlgmr.msra.gmra.mxu1 %vm3840_vm14, %v3813_v18  ;;  %v3767_v47 = vsel %vm3735_vm7, %v3719_v44, %v3751_v51  ;;  %vm3736_vm15 = vcmp.ge.f32.partialorder %v8860_v34, 0.0  ;;  %v3155_v44 = vpop.f32.mrf.mxu0 }
 0x3c0   : >> { %v9081_v1 = vpop.eup %4348  ;;  %v3415_v63 = vor.u32 1.1754944e-38, %v3414_v60  ;;  %v3229_v24 = vmul.f32 0.3275911, %v9076_v8  ;;  %v3626_v2 = vmul.f32 %v3610_v52, %v8964_v7  ;;  %v3411_v41 = vsel %vm9090_vm0, %v9014_v29, %v3407_v27 }
 0x3c1   : >> { %v3532_v61 = vmul.f32 %v3516_v32, %v9069_v45  ;;  %v3419_v34 = vmul.f32 %v9081_v1, %v9056_v56  ;;  %v3721_v23 = vsub.f32 1.0, %v3705_v14  ;;  %v3660_v6 = vmul.f32 %v3644_v19, %v8983_v53 }
 0x3c2   : >> { %v9103_v40 = vadd.f32 1.0, %v3229_v24  ;;  %v3768_v22 = vsel %vm3736_vm15, %v3720_v31, %v3752_v42  ;;  %v3579_v7 = vadd.f32 -0.28449672, %v3563_v17  ;;  %v3681_v0 = vmul.f32 1.442695, %v3659_v50 }
 0x3c3   : >> { %vm3413_vm1 = vcmp.eq.f32.partialorder %v3412_v13, 8.507059e+37  ;;  %v3783_v62 = vadd.f32 1.0, %v3767_v47  ;;  %v3420_v25 = vsub.f32 1.0, %v3419_v34  ;;  %v9112_v37 = vmul.f32 0.5, %v8869_v11 }
 0x3c4   : >> { %v9108_v29 = vsel %vm3413_vm1, %v3415_v63, %v3411_v41  ;;  %4350 = vrcp.f32 %v9103_v40  ;;  %v3706_v53 = vmul.f32 %v4347_v26, %v3626_v2  ;;  %v3548_v16 = vadd.f32 1.4214138, %v3532_v61 }
 0x3c5   : >> { %v9115_v39 = vadd.f32 %v3155_v44, %v8815_v35  ;;  %v3784_v49 = vadd.f32 1.0, %v3768_v22  ;;  %v3753_v18 = vsub.f32 0.0, %v3721_v23  ;;  %v3683_v31 = vmul.f32 1.442695, %v3660_v6 }
 0x3c6   : >> { %vm3737_vm3 = vcmp.ge.f32.partialorder %v8872_v3, 0.0  ;;  %v9122_v51 = vmul.f32 0.5, %v8882_v54  ;;  %v3595_v60 = vmul.f32 %v3579_v7, %v9010_v43  ;;  %v3503_v11 = vmul.f32 1.0614054, %v9108_v29 }
 0x3c7   : >> { %v9127_v26 = vmul.f32 %v3783_v62, %v9025_v12  ;;  %4352 = vpow2.f32 %v3681_v0  ;;  %v3421_v52 = vmul.f32 %v9081_v1, %v3420_v25  ;;  %v3722_v55 = vsub.f32 1.0, %v3706_v53 }
 0x3c8   : >> { %vm3738_vm4 = vcmp.ge.f32.partialorder %v8887_v38, 0.0  ;;  %v3647_v3 = vsub.f32 0.0, %v8967_v4  ;;  %v3564_v54 = vmul.f32 %v3548_v16, %v9069_v45  ;;  %v9137_v14 = vmul.f32 0.70710677, %v9115_v39 }
 0x3c9   : >> { %v3163_v20 = vpop.f32.mrf.mxu3  ;;  %v3800_v12 = vmul.f32 %v3784_v49, %v9033_v5  ;;  %v3769_v42 = vsel %vm3737_vm3, %v3721_v23, %v3753_v18  ;;  %4354 = vpow2.f32 %v3683_v31  ;;  %v3611_v13 = vadd.f32 0.2548296, %v3595_v60 }
 0x3ca   : >> { %v9106_v33 = vadd.f32 %v3163_v20, %v8815_v35  ;;  %v4351_v19 = vpop.eup %4350  ;;  %v3519_v32 = vadd.f32 -1.4531521, %v3503_v11  ;;  %v3648_v20 = vsub.f32 0.0, %v9044_v58  ;;  %v3422_v28 = vadd.f32 %v9081_v1, %v3421_v52 }
 0x3cb   : >> { %v3374_v47 = vmul.f32 %v4351_v19, %v9103_v40  ;;  %vm3424_vm5 = vweird.f32 %v9081_v1  ;;  %v3429_v63 = vand.u32 2147483648, %v9056_v56  ;;  %v3754_v2 = vsub.f32 0.0, %v3722_v55 }
 0x3cc   : >> { %v9118_v50 = vmul.f32 0.70710677, %v9106_v33  ;;  %v3580_v5 = vadd.f32 -0.28449672, %v3564_v54  ;;  %v9149_v61 = vand.u32 2147483647, %v9137_v14  ;;  %vm3423_vm6 = vweird.f32 %v9056_v56 }
 0x3cd   : >> { %v3375_v41 = vsub.f32 1.0, %v3374_v47  ;;  %v4353_v23 = vpop.eup %4352  ;;  %v3427_v6 = vand.u32 2147483647, %v9056_v56  ;;  %v3384_v44 = vand.u32 2147483648, %v9103_v40  ;;  %v3627_v22 = vmul.f32 %v3611_v13, %v9010_v43  ;;  %vm9156_vm7 = vmor %vm3423_vm6, %vm3424_vm5 }
 0x3ce   : >> { %v9131_v27 = vand.u32 2147483647, %v9118_v50  ;;  %vm3379_vm8 = vweird.f32 %v4351_v19  ;;  %v3382_v62 = vand.u32 2147483647, %v9103_v40  ;;  %v3535_v53 = vmul.f32 %v3519_v32, %v9108_v29 }
 0x3cf   : >> { %v3376_v0 = vmul.f32 %v4351_v19, %v3375_v41  ;;  %v4355_v25 = vpop.eup %4354  ;;  %v3426_v56 = vsel %vm9156_vm7, %v9081_v1, %v3422_v28  ;;  %v3430_v16 = vor.u32 1.1754944e-38, %v3429_v63  ;;  %v3596_v43 = vmul.f32 %v3580_v5, %v9069_v45 }
 0x3d0   : >> { %v3233_v17 = vmul.f32 0.3275911, %v9131_v27  ;;  %vm3378_vm9 = vweird.f32 %v9103_v40  ;;  %v3230_v31 = vmul.f32 0.3275911, %v9149_v61  ;;  %v3770_v60 = vsel %vm3738_vm4, %v3722_v55, %v3754_v2 }
 0x3d1   : >> { %v3165_v34 = vpop.f32.mrf.mxu3  ;;  %v3377_v18 = vadd.f32 %v4351_v19, %v3376_v0  ;;  %vm3428_vm10 = vcmp.eq.f32.partialorder %v3427_v6, 8.507059e+37  ;;  %vm3380_vm11 = vmor %vm3378_vm9, %vm3379_vm8  ;;  %v3385_v11 = vor.u32 1.1754944e-38, %v3384_v44  ;;  %v3645_v52 = vsub.f32 0.0, %v9076_v8 }
 0x3d2   : >> { %v9146_v24 = vadd.f32 1.0, %v3233_v17  ;;  %v9166_v49 = vadd.f32 %v3165_v34, %v8815_v35  ;;  %v9174_v1 = vsel %vm3428_vm10, %v3430_v16, %v3426_v56  ;;  %vm3383_vm12 = vcmp.eq.f32.partialorder %v3382_v62, 8.507059e+37 }
 0x3d3   : >> { %v3381_v54 = vsel %vm3380_vm11, %v4351_v19, %v3377_v18  ;;  %v9176_v17 = vadd.f32 1.0, %v3230_v31  ;;  %v9180_v32 = vmul.f32 %v4353_v23, %v3627_v22  ;;  %v3814_v55 = vpack.c.bf16 %v3800_v12, %v9127_v26 }
 0x3d4   : >> { %4356 = vrcp.f32 %v9146_v24  ;;  %v9182_v40 = vsel %vm3383_vm12, %v3385_v11, %v3381_v54  ;;  %v9185_v38 = vmul.f32 0.70710677, %v9166_v49  ;;  %v3551_v47 = vadd.f32 1.4214138, %v3535_v53 }
 0x3d5   : >> { %v3612_v28 = vadd.f32 0.2548296, %v3596_v43  ;;  %v3501_v63 = vmul.f32 1.0614054, %v9182_v40  ;;  %v9192_v2 = vmul.f32 0.5, %v8907_v9  ;;  %v3663_v5 = vmul.f32 %v3647_v3, %v8967_v4  ;;  %4162 = vmatmul.msk.bf16.gmra.mxu1 %vm3840_vm14, %v3814_v55 }
 0x3d6   : >> { %v3504_v41 = vmul.f32 1.0614054, %v9174_v1  ;;  %4358 = vrcp.f32 %v9176_v17  ;;  %v3785_v34 = vadd.f32 1.0, %v3769_v42  ;;  %v3786_v26 = vadd.f32 1.0, %v3770_v60 }
 0x3d7   : >> { %v3517_v12 = vadd.f32 -1.4531521, %v3501_v63  ;;  %v3661_v23 = vmul.f32 %v3645_v52, %v9076_v8  ;;  %v3723_v44 = vsub.f32 1.0, %v9180_v32  ;;  %v3664_v22 = vmul.f32 %v3648_v20, %v9044_v58 }
 0x3d8   : >> { %v9202_v7 = vand.u32 2147483647, %v9185_v38  ;;  %v3567_v4 = vmul.f32 %v3551_v47, %v9108_v29  ;;  %v9206_v3 = vmul.f32 0.5, %v8954_v57  ;;  %v3628_v42 = vmul.f32 %v3612_v28, %v9069_v45 }
 0x3d9   : >> { %v3533_v0 = vmul.f32 %v3517_v12, %v9182_v40  ;;  %v9210_v62 = vmul.f32 1.442695, %v3663_v5  ;;  %v3520_v8 = vadd.f32 -1.4531521, %v3504_v41  ;;  %v9214_v58 = vmul.f32 %v3785_v34, %v9112_v37 }
 0x3da   : >> { %v9178_v13 = vpop.eup %4356  ;;  %v3234_v53 = vmul.f32 0.3275911, %v9202_v7  ;;  %v9217_v20 = vmul.f32 %v3786_v26, %v9122_v51  ;;  %v3685_v16 = vmul.f32 1.442695, %v3661_v23  ;;  %v9221_v57 = vsub.f32 0.0, %v3723_v44 }
 0x3db   : >> { %v3434_v19 = vmul.f32 %v9178_v13, %v9146_v24  ;;  %v3549_v56 = vadd.f32 1.4214138, %v3533_v0  ;;  %v9223_v45 = vmul.f32 1.442695, %v3664_v22  ;;  %v9228_v60 = vadd.f32 -0.28449672, %v3567_v4 }
 0x3dc   : >> { %v4359_v43 = vpop.eup %4358  ;;  %v9226_v31 = vadd.f32 1.0, %v3234_v53  ;;  %v3708_v37 = vmul.f32 %v4355_v25, %v3628_v42  ;;  %v3536_v52 = vmul.f32 %v3520_v8, %v9174_v1  ;;  %v3442_v54 = vand.u32 2147483647, %v9146_v24 }
 0x3dd   : >> { %v3435_v9 = vsub.f32 1.0, %v3434_v19  ;;  %v3565_v11 = vmul.f32 %v3549_v56, %v9182_v40  ;;  %v3389_v51 = vmul.f32 %v4359_v43, %v9176_v17  ;;  %v3444_v28 = vand.u32 2147483648, %v9146_v24 }
 0x3de   : >> { %4360 = vrcp.f32 %v9226_v31  ;;  %vm3438_vm13 = vweird.f32 %v9146_v24  ;;  %vm3439_vm15 = vweird.f32 %v9178_v13  ;;  %v3399_v19 = vand.u32 2147483648, %v9176_v17 }
 0x3df   : >> { %v3436_v18 = vmul.f32 %v9178_v13, %v3435_v9  ;;  %v3581_v47 = vadd.f32 -0.28449672, %v3565_v11  ;;  %4362 = vpow2.f32 %v3685_v16  ;;  %v3390_v63 = vsub.f32 1.0, %v3389_v51  ;;  %vm9257_vm5 = vmor %vm3438_vm13, %vm3439_vm15 }
 0x3e0   : >> { %vm3739_vm0 = vcmp.ge.f32.partialorder %v8914_v15, 0.0  ;;  %v3724_v5 = vsub.f32 1.0, %v3708_v37  ;;  %vm3740_vm1 = vcmp.ge.f32.partialorder %v8970_v48, 0.0  ;;  %vm3394_vm3 = vweird.f32 %v4359_v43 }
 0x3e1   : >> { %v3437_v25 = vadd.f32 %v9178_v13, %v3436_v18  ;;  %v3391_v41 = vmul.f32 %v4359_v43, %v3390_v63  ;;  %v3397_v34 = vand.u32 2147483647, %v9176_v17  ;;  %v3552_v12 = vadd.f32 1.4214138, %v3536_v52 }
 0x3e2   : >> { %vm9246_vm4 = vcmp.eq.f32.partialorder %v3442_v54, 8.507059e+37  ;;  %v3597_v9 = vmul.f32 %v3581_v47, %v9182_v40  ;;  %v3445_v42 = vor.u32 1.1754944e-38, %v3444_v28  ;;  %vm3393_vm6 = vweird.f32 %v9176_v17 }
 0x3e3   : >> { %v3392_v0 = vadd.f32 %v4359_v43, %v3391_v41  ;;  %v3441_v53 = vsel %vm9257_vm5, %v9178_v13, %v3437_v25  ;;  %vm3395_vm7 = vmor %vm3393_vm6, %vm3394_vm3  ;;  %v3400_v56 = vor.u32 1.1754944e-38, %v3399_v19  ;;  %v3756_v37 = vsub.f32 0.0, %v3724_v5 }
 0x3e4   : >> { %v4361_v8 = vpop.eup %4360  ;;  %vm3398_vm8 = vcmp.eq.f32.partialorder %v3397_v34, 8.507059e+37  ;;  %v3568_v17 = vmul.f32 %v3552_v12, %v9174_v1  ;;  %v3613_v47 = vadd.f32 0.2548296, %v3597_v9  ;;  %v9279_v28 = vsel %vm9246_vm4, %v3445_v42, %v3441_v53 }
 0x3e5   : >> { %v4363_v18 = vpop.eup %4362  ;;  %v3396_v11 = vsel %vm3395_vm7, %v4359_v43, %v3392_v0  ;;  %v3449_v51 = vmul.f32 %v4361_v8, %v9226_v31  ;;  %v3459_v43 = vand.u32 2147483648, %v9226_v31  ;;  %vm3454_vm9 = vweird.f32 %v4361_v8 }
 0x3e6   : >> { %v9273_v52 = vsel %vm3398_vm8, %v3400_v56, %v3396_v11  ;;  %v3771_v12 = vsel %vm3739_vm0, %v3723_v44, %v9221_v57  ;;  %v3772_v23 = vsel %vm3740_vm1, %v3724_v5, %v3756_v37  ;;  %vm3453_vm10 = vweird.f32 %v9226_v31 }
 0x3e7   : >> { %v3450_v63 = vsub.f32 1.0, %v3449_v51  ;;  %v3599_v15 = vmul.f32 %v9228_v60, %v9108_v29  ;;  %v3584_v32 = vadd.f32 -0.28449672, %v3568_v17  ;;  %vm3455_vm11 = vmor %vm3453_vm10, %vm3454_vm9  ;;  %v3460_v48 = vor.u32 1.1754944e-38, %v3459_v43 }
 0x3e8   : >> { %v3788_v42 = vadd.f32 1.0, %v3772_v23  ;;  %v3787_v11 = vadd.f32 1.0, %v3771_v12  ;;  %vm3741_vm0 = vcmp.ge.f32.partialorder %v9064_v30, 0.0  ;;  %vm3742_vm5 = vcmp.ge.f32.partialorder %v9137_v14, 0.0 }
 0x3e9   : >> { %v3451_v34 = vmul.f32 %v4361_v8, %v3450_v63  ;;  %v3600_v51 = vmul.f32 %v3584_v32, %v9174_v1  ;;  %vm3744_vm9 = vcmp.ge.f32.partialorder %v9037_v21, 0.0  ;;  %vm3743_vm10 = vcmp.ge.f32.partialorder %v8960_v10, 0.0 }
 0x3eb   : >> { %v3452_v9 = vadd.f32 %v4361_v8, %v3451_v34 }
 0x3ed   : >> { %v3456_v4 = vsel %vm3455_vm11, %v4361_v8, %v3452_v9  ;;  %v3181_v9 = vmul.f32 0.5, %v9049_v59  ;;  %vm3746_vm11 = vcmp.ge.f32.partialorder %v9185_v38, 0.0 }
 0x3fa   : >> { %v3168_v6 = vpop.f32.mrf.mxu3 }
 0x3fb   : >> { %v9236_v55 = vadd.f32 %v3168_v6, %v8815_v35  ;;  %v3646_v6 = vsub.f32 0.0, %v9149_v61 }
 0x3fd   : >> { %v9252_v22 = vmul.f32 0.70710677, %v9236_v55  ;;  %v3662_v13 = vmul.f32 %v3646_v6, %v9149_v61  ;;  %v3815_v61 = vpack.c.bf16 %v9217_v20, %v9214_v58  ;;  %v3505_v6 = vmul.f32 1.0614054, %v9279_v28 }
 0x3fe   : >> { %v3629_v58 = vmul.f32 %v3613_v47, %v9182_v40  ;;  %v3615_v47 = vadd.f32 0.2548296, %v3599_v15 }
 0x3ff   : >> { %v9266_v16 = vand.u32 2147483647, %v9252_v22  ;;  %4163 = vmatmul.msk.bf16.gmra.mxu1 %vm3840_vm14, %v3815_v61  ;;  %v3687_v5 = vmul.f32 1.442695, %v3662_v13  ;;  %v3521_v40 = vadd.f32 -1.4531521, %v3505_v6  ;;  %v3803_v61 = vmul.f32 %v3787_v11, %v9192_v2 }
 0x401   : >> { %v3235_v54 = vmul.f32 0.3275911, %v9266_v16 }
 0x402   : >> { %v3170_v26 = vpop.f32.mrf.mxu3 }
 0x403   : >> { %v9269_v24 = vadd.f32 %v3170_v26, %v8815_v35  ;;  %v3502_v35 = vmul.f32 1.0614054, %v9273_v52  ;;  %v9283_v25 = vadd.f32 1.0, %v3235_v54  ;;  %v3457_v26 = vand.u32 2147483647, %v9226_v31 }
 0x404   : >> { %v3709_v31 = vmul.f32 %v4363_v18, %v3629_v58  ;;  %v3537_v18 = vmul.f32 %v3521_v40, %v9279_v28 }
 0x405   : >> { %v9286_v19 = vmul.f32 0.70710677, %v9269_v24  ;;  %v3518_v41 = vadd.f32 -1.4531521, %v3502_v35  ;;  %4364 = vrcp.f32 %v9283_v25  ;;  %vm3458_vm12 = vcmp.eq.f32.partialorder %v3457_v26, 8.507059e+37 }
 0x406   : >> { %v9309_v0 = vsel %vm3458_vm12, %v3460_v48, %v3456_v4  ;;  %4366 = vpow2.f32 %v9210_v62  ;;  %v3804_v62 = vmul.f32 %v3788_v42, %v9206_v3  ;;  %v3725_v35 = vsub.f32 1.0, %v3709_v31 }
 0x407   : >> { %v3534_v20 = vmul.f32 %v3518_v41, %v9273_v52  ;;  %v9307_v44 = vand.u32 2147483647, %v9286_v19  ;;  %v3506_v56 = vmul.f32 1.0614054, %v9309_v0  ;;  %4368 = vpow2.f32 %v9223_v45 }
 0x408   : >> { %4370 = vpow2.f32 %v3687_v5  ;;  %v3616_v41 = vadd.f32 0.2548296, %v3600_v51  ;;  %v3472_v34 = vand.u32 2147483647, %v9283_v25  ;;  %v3474_v26 = vand.u32 2147483648, %v9283_v25 }
 0x409   : >> { %v3550_v57 = vadd.f32 1.4214138, %v3534_v20  ;;  %v3236_v53 = vmul.f32 0.3275911, %v9307_v44  ;;  %v3522_v13 = vadd.f32 -1.4531521, %v3506_v56  ;;  %v3631_v20 = vmul.f32 %v3615_v47, %v9108_v29 }
 0x40a   : >> { %v3553_v15 = vadd.f32 1.4214138, %v3537_v18  ;;  %v3816_v32 = vpack.c.bf16 %v3804_v62, %v3803_v61  ;;  %vm3468_vm15 = vweird.f32 %v9283_v25  ;;  %v3632_v42 = vmul.f32 %v3616_v41, %v9174_v1 }
 0x40b   : >> { %v3566_v60 = vmul.f32 %v3550_v57, %v9273_v52  ;;  %v4365_v37 = vpop.eup %4364  ;;  %v9317_v8 = vadd.f32 1.0, %v3236_v53  ;;  %v3538_v43 = vmul.f32 %v3522_v13, %v9309_v0  ;;  %v3757_v57 = vsub.f32 0.0, %v3725_v35 }
 0x40c   : >> { %v3464_v54 = vmul.f32 %v4365_v37, %v9283_v25  ;;  %v4367_v12 = vpop.eup %4366  ;;  %vm3469_vm13 = vweird.f32 %v4365_v37  ;;  %vm3473_vm3 = vcmp.eq.f32.partialorder %v3472_v34, 8.507059e+37  ;;  %v3475_v40 = vor.u32 1.1754944e-38, %v3474_v26 }
 0x40d   : >> { %v3582_v17 = vadd.f32 -0.28449672, %v3566_v60  ;;  %4372 = vrcp.f32 %v9317_v8  ;;  %v3554_v3 = vadd.f32 1.4214138, %v3538_v43  ;;  %v4369_v58 = vpop.eup %4368  ;;  %vm3470_vm1 = vmor %vm3468_vm15, %vm3469_vm13  ;;  %v3711_v60 = vmul.f32 %v4367_v12, %v3631_v20 }
 0x40e   : >> { %v3465_v45 = vsub.f32 1.0, %v3464_v54  ;;  %v4371_v48 = vpop.eup %4370  ;;  %v3650_v56 = vsub.f32 0.0, %v9202_v7  ;;  %v3773_v1 = vsel %vm3741_vm0, %v3725_v35, %v3757_v57  ;;  %v3649_v13 = vsub.f32 0.0, %v9131_v27 }
 0x40f   : >> { %v3598_v63 = vmul.f32 %v3582_v17, %v9273_v52  ;;  %v3570_v59 = vmul.f32 %v3554_v3, %v9309_v0  ;;  %4164 = vmatmul.msk.bf16.gmra.mxu1 %vm3840_vm14, %v3816_v32  ;;  %v3712_v17 = vmul.f32 %v4369_v58, %v3632_v42  ;;  %v3489_v54 = vand.u32 2147483648, %v9317_v8 }
 0x410   : >> { %v3466_v6 = vmul.f32 %v4365_v37, %v3465_v45  ;;  %v3666_v35 = vmul.f32 %v3650_v56, %v9202_v7  ;;  %vm3483_vm6 = vweird.f32 %v9317_v8  ;;  %v3665_v34 = vmul.f32 %v3649_v13, %v9131_v27 }
 0x411   : >> { %v3614_v23 = vadd.f32 0.2548296, %v3598_v63  ;;  %v3586_v62 = vadd.f32 -0.28449672, %v3570_v59  ;;  %v3789_v63 = vadd.f32 1.0, %v3773_v1  ;;  %v3182_v26 = vmul.f32 0.5, %v9115_v39 }
 0x412   : >> { %v3467_v5 = vadd.f32 %v4365_v37, %v3466_v6  ;;  %v3728_v3 = vsub.f32 1.0, %v3712_v17  ;;  %v3695_v7 = vmul.f32 1.442695, %v3666_v35  ;;  %v3727_v32 = vsub.f32 1.0, %v3711_v60 }
 0x413   : >> { %v3630_v2 = vmul.f32 %v3614_v23, %v9273_v52  ;;  %v4373_v4 = vpop.eup %4372  ;;  %v3569_v52 = vmul.f32 %v3553_v15, %v9279_v28  ;;  %v3490_v23 = vor.u32 1.1754944e-38, %v3489_v54  ;;  %v3602_v6 = vmul.f32 %v3586_v62, %v9309_v0 }
 0x414   : >> { %v3471_v53 = vsel %vm3470_vm1, %v4365_v37, %v3467_v5  ;;  %v3479_v31 = vmul.f32 %v4373_v4, %v9317_v8  ;;  %v3487_v37 = vand.u32 2147483647, %v9317_v8  ;;  %vm3484_vm4 = vweird.f32 %v4373_v4 }
 0x415   : >> { %v3710_v29 = vmul.f32 %v4371_v48, %v3630_v2  ;;  %v9338_v25 = vsel %vm3473_vm3, %v3475_v40, %v3471_v53  ;;  %v3585_v43 = vadd.f32 -0.28449672, %v3569_v52  ;;  %vm3485_vm7 = vmor %vm3483_vm6, %vm3484_vm4  ;;  %v3805_v14 = vmul.f32 %v3789_v63, %v3181_v9 }
 0x416   : >> { %v3507_v11 = vmul.f32 1.0614054, %v9338_v25  ;;  %v3480_v51 = vsub.f32 1.0, %v3479_v31  ;;  %vm3488_vm8 = vcmp.eq.f32.partialorder %v3487_v37, 8.507059e+37  ;;  %v3693_v57 = vmul.f32 1.442695, %v3665_v34 }
 0x417   : >> { %v3726_v30 = vsub.f32 1.0, %v3710_v29  ;;  %v3601_v48 = vmul.f32 %v3585_v43, %v9279_v28  ;;  %v3760_v2 = vsub.f32 0.0, %v3728_v3  ;;  %v3618_v5 = vadd.f32 0.2548296, %v3602_v6 }
 0x418   : >> { %v3481_v18 = vmul.f32 %v4373_v4, %v3480_v51  ;;  %v3523_v61 = vadd.f32 -1.4531521, %v3507_v11  ;;  %4374 = vpow2.f32 %v3695_v7  ;;  %v3652_v60 = vsub.f32 0.0, %v9307_v44 }
 0x419   : >> { %v3758_v47 = vsub.f32 0.0, %v3726_v30  ;;  %v3617_v40 = vadd.f32 0.2548296, %v3601_v48  ;;  %4376 = vpow2.f32 %v3693_v57  ;;  %v3776_v59 = vsel %vm3744_vm9, %v3728_v3, %v3760_v2 }
 0x41a   : >> { %v3482_v41 = vadd.f32 %v4373_v4, %v3481_v18  ;;  %v3539_v8 = vmul.f32 %v3523_v61, %v9338_v25  ;;  %v3634_v53 = vmul.f32 %v3618_v5, %v9309_v0  ;;  %v3792_v51 = vadd.f32 1.0, %v3776_v59 }
 0x41b   : >> { %v3774_v45 = vsel %vm3742_vm5, %v3726_v30, %v3758_v47  ;;  %v3633_v56 = vmul.f32 %v3617_v40, %v9279_v28  ;;  %v3651_v17 = vsub.f32 0.0, %v9266_v16  ;;  %v3184_v0 = vmul.f32 0.5, %v9022_v46 }
 0x41c   : >> { %v3790_v12 = vadd.f32 1.0, %v3774_v45  ;;  %v3486_v58 = vsel %vm3485_vm7, %v4373_v4, %v3482_v41  ;;  %v3759_v4 = vsub.f32 0.0, %v3727_v32  ;;  %v3555_v9 = vadd.f32 1.4214138, %v3539_v8 }
 0x41d   : >> { %v3491_v15 = vsel %vm3488_vm8, %v3490_v23, %v3486_v58  ;;  %v3668_v10 = vmul.f32 %v3652_v60, %v9307_v44  ;;  %v3183_v18 = vmul.f32 0.5, %v8950_v36  ;;  %v3808_v28 = vmul.f32 %v3792_v51, %v3184_v0  ;;  %v10931_v60 = vld [vmem:[#allocation7_spill] sm:$0xff]  ;;  %v4172_v51 = vld [vmem:[%s5023_s22 + $0x70] sm:$0xff] }
 0x41e   : >> { %v3806_v20 = vmul.f32 %v3790_v12, %v3182_v26  ;;  %v3508_v27 = vmul.f32 1.0614054, %v3491_v15  ;;  %v3775_v52 = vsel %vm3743_vm10, %v3727_v32, %v3759_v4  ;;  %v3571_v1 = vmul.f32 %v3555_v9, %v9338_v25  ;;  %v4375_v11 = vpop.eup %4374 }
 0x41f   : >> { %v3714_v21 = vmul.f32 %v4375_v11, %v3634_v53  ;;  %v4377_v37 = vpop.eup %4376  ;;  %v3791_v54 = vadd.f32 1.0, %v3775_v52  ;;  %v3667_v63 = vmul.f32 %v3651_v17, %v9266_v16  ;;  %v3699_v61 = vmul.f32 1.442695, %v3668_v10 }
 0x420   : >> { %v3817_v39 = vpack.c.bf16 %v3806_v20, %v3805_v14  ;;  %v3524_v42 = vadd.f32 -1.4531521, %v3508_v27  ;;  %v3713_v47 = vmul.f32 %v4377_v37, %v3633_v56  ;;  %v3587_v62 = vadd.f32 -0.28449672, %v3571_v1 }
 0x421   : >> { %v3730_v43 = vsub.f32 1.0, %v3714_v21  ;;  %v3807_v45 = vmul.f32 %v3791_v54, %v3183_v18  ;;  %v3697_v26 = vmul.f32 1.442695, %v3667_v63  ;;  %4378 = vpow2.f32 %v3699_v61  ;;  %v4173_v54 = vld [vmem:[%s5023_s22 + $0x88] sm:$0xff]  ;;  %v4174_v18 = vld [vmem:[%s5023_s22 + $0x90] sm:$0xff] }
 0x422   : >> { %4165 = vmatmul.msk.bf16.vlgmr.msra.gmra.mxu2 %vm3840_vm14, %v3817_v39  ;;  %v3540_v29 = vmul.f32 %v3524_v42, %v3491_v15  ;;  %v3729_v41 = vsub.f32 1.0, %v3713_v47  ;;  %v3603_v34 = vmul.f32 %v3587_v62, %v9338_v25  ;;  %vm3745_vm12 = vcmp.ge.f32.partialorder %v9118_v50, 0.0 }
 0x423   : >> { %v3818_v12 = vpack.c.bf16 %v3808_v28, %v3807_v45  ;;  %v3762_v23 = vsub.f32 0.0, %v3730_v43  ;;  %4380 = vpow2.f32 %v3697_v26  ;;  %v3186_v8 = vmul.f32 0.5, %v9166_v49  ;;  %v4175_v45 = vld [vmem:[%s5023_s22 + $0xa8] sm:$0xff] }
 0x424   : >> { %v3556_v31 = vadd.f32 1.4214138, %v3540_v29  ;;  %v3761_v44 = vsub.f32 0.0, %v3729_v41  ;;  %v3619_v3 = vadd.f32 0.2548296, %v3603_v34  ;;  %v3185_v57 = vmul.f32 0.5, %v9106_v33 }
 0x425   : >> { %v3778_v36 = vsel %vm3746_vm11, %v3730_v43, %v3762_v23  ;;  %vm3748_vm13 = vcmp.ge.f32.partialorder %v9286_v19, 0.0  ;;  %vm3747_vm15 = vcmp.ge.f32.partialorder %v9252_v22, 0.0  ;;  %v3188_v40 = vmul.f32 0.5, %v9269_v24  ;;  %v10930_v19 = vld [vmem:[#allocation6_spill] sm:$0xff]  ;;  %v4171_v24 = vld [vmem:[%s5023_s22 + $0x68] sm:$0xff] }
 0x426   : >> { %v3572_v30 = vmul.f32 %v3556_v31, %v3491_v15  ;;  %v3777_v6 = vsel %vm3745_vm12, %v3729_v41, %v3761_v44  ;;  %v3635_v58 = vmul.f32 %v3619_v3, %v9338_v25  ;;  %v3794_v20 = vadd.f32 1.0, %v3778_v36  ;;  %v4177_v36 = vld [vmem:[%s5023_s22 + $0xc8] sm:$0xff] }
 0x427   : >> { %v4379_v14 = vpop.eup %4378  ;;  %v3793_v48 = vadd.f32 1.0, %v3777_v6  ;;  %v3187_v9 = vmul.f32 0.5, %v9236_v55  ;;  %v9379_v31 = vperm.slane %v10930_v19, 0  ;;  %v9382_v52 = vperm.slane %v10931_v60, 0 }
 0x428   : >> { %v3588_v13 = vadd.f32 -0.28449672, %v3572_v30  ;;  %v3810_v39 = vmul.f32 %v3794_v20, %v3186_v8  ;;  %v4178_v20 = vld [vmem:[%s5023_s22 + $0xd0] sm:$0xff] }
 0x429   : >> { %v4381_v32 = vpop.eup %4380  ;;  %v3809_v2 = vmul.f32 %v3793_v48, %v3185_v57 }
 0x42a   : >> { %v3604_v35 = vmul.f32 %v3588_v13, %v3491_v15  ;;  %v3715_v27 = vmul.f32 %v4381_v32, %v3635_v58 }
 0x42c   : >> { %v3620_v46 = vadd.f32 0.2548296, %v3604_v35  ;;  %v3731_v5 = vsub.f32 1.0, %v3715_v27  ;;  %v4179_v27 = vld [vmem:[%s5023_s22 + $0xe8] sm:$0xff] }
 0x42e   : >> { %v3636_v16 = vmul.f32 %v3620_v46, %v3491_v15  ;;  %v3819_v15 = vpack.c.bf16 %v3810_v39, %v3809_v2  ;;  %v3763_v50 = vsub.f32 0.0, %v3731_v5 }
 0x430   : >> { %v3716_v7 = vmul.f32 %v4379_v14, %v3636_v16  ;;  %v3779_v49 = vsel %vm3747_vm15, %v3731_v5, %v3763_v50  ;;  %v4180_v5 = vld [vmem:[%s5023_s22 + $0xf0] sm:$0xff] }
 0x431   : >> { %v3795_v33 = vadd.f32 1.0, %v3779_v49  ;;  %v4181_v49 = vld [vmem:[%s5023_s22 + $0x108] sm:$0xff] }
 0x432   : >> { %4166 = vmatmul.msk.bf16.gmra.mxu2 %vm3840_vm14, %v3818_v12  ;;  %v3732_v38 = vsub.f32 1.0, %v3716_v7  ;;  %v4176_v12 = vld [vmem:[%s5023_s22 + $0xb0] sm:$0xff] }
 0x433   : >> { %v3811_v59 = vmul.f32 %v3795_v33, %v3187_v9 }
 0x434   : >> { %v3764_v42 = vsub.f32 0.0, %v3732_v38 }
 0x436   : >> { %v3780_v25 = vsel %vm3748_vm13, %v3732_v38, %v3764_v42 }
 0x437   : >> { %v3796_v4 = vadd.f32 1.0, %v3780_v25 }
 0x439   : >> { %v3812_v29 = vmul.f32 %v3796_v4, %v3188_v40 }
 0x43b   : >> { %v3820_v53 = vpack.c.bf16 %v3812_v29, %v3811_v59  ;;  %v4182_v29 = vld [vmem:[%s5023_s22 + $0x110] sm:$0xff] }
 0x43c   : >> { %v3874_v22 = vpop.f32.mrf.mxu1 }
 0x43d   : >> { %v3875_v56 = vadd.f32 %v3874_v22, %v9379_v31  ;;  %v4183_v22 = vld [vmem:[%s5023_s22 + $0x128] sm:$0xff] }
 0x43f   : >> { %v3917_v55 = vmul.f32 %v9382_v52, %v3875_v56 }
 0x441   : >> { %v3952_v1 = vadd.f32 %v4171_v24, %v3917_v55 }
 0x442   : >> { %4167 = vmatmul.msk.bf16.gmra.mxu2 %vm3840_vm14, %v3819_v15 }
 0x443   : >> { %3970 = vst.msk [vmem:[%s9389_s24] sm:$0xff] %vm415_vm2, %v3952_v1 }
 0x444   : >> { %v3876_v30 = vpop.f32.mrf.mxu1 }
 0x445   : >> { %v3877_v11 = vadd.f32 %v3876_v30, %v9379_v31  ;;  %v4184_v30 = vld [vmem:[%s5023_s22 + $0x130] sm:$0xff] }
 0x447   : >> { %v3918_v17 = vmul.f32 %v9382_v52, %v3877_v11 }
 0x449   : >> { %v3953_v21 = vadd.f32 %v4172_v51, %v3918_v17 }
 0x44b   : >> { %3971 = vst.msk [vmem:[%s9389_s24 + $0x8] sm:$0xff] %vm415_vm2, %v3953_v21 }
 0x452   : >> { %4168 = vmatmul.msk.bf16.gmra.mxu2 %vm3840_vm14, %v3820_v53  ;;  %v3879_v13 = vpop.f32.mrf.mxu1 }
 0x453   : >> { %v3880_v37 = vadd.f32 %v3879_v13, %v9379_v31  ;;  %v4185_v13 = vld [vmem:[%s5023_s22 + $0x148] sm:$0xff] }
 0x455   : >> { %v3919_v0 = vmul.f32 %v9382_v52, %v3880_v37 }
 0x457   : >> { %v3954_v10 = vadd.f32 %v4173_v54, %v3919_v0 }
 0x459   : >> { %3972 = vst.msk [vmem:[%s9389_s24 + $0x10] sm:$0xff] %vm415_vm2, %v3954_v10 }
 0x45a   : >> { %v3881_v47 = vpop.f32.mrf.mxu1 }
 0x45b   : >> { %v3882_v62 = vadd.f32 %v3881_v47, %v9379_v31  ;;  %v4186_v47 = vld [vmem:[%s5023_s22 + $0x150] sm:$0xff] }
 0x45d   : >> { %v3920_v28 = vmul.f32 %v9382_v52, %v3882_v62 }
 0x45f   : >> { %v3955_v63 = vadd.f32 %v4174_v18, %v3920_v28 }
 0x461   : >> { %3973 = vst.msk [vmem:[%s9389_s24 + $0x18] sm:$0xff] %vm415_vm2, %v3955_v63 }
 0x47c   : >> { %v3884_v43 = vpop.f32.mrf.mxu1 }
 0x47d   : >> { %v3885_v35 = vadd.f32 %v3884_v43, %v9379_v31 }
 0x47f   : >> { %v3921_v61 = vmul.f32 %v9382_v52, %v3885_v35 }
 0x481   : >> { %v3956_v41 = vadd.f32 %v4175_v45, %v3921_v61 }
 0x483   : >> { %3974 = vst.msk [vmem:[%s9389_s24 + $0x20] sm:$0xff] %vm415_vm2, %v3956_v41 }
 0x484   : >> { %v3886_v34 = vpop.f32.mrf.mxu1 }
 0x485   : >> { %v3887_v26 = vadd.f32 %v3886_v34, %v9379_v31 }
 0x487   : >> { %v3922_v23 = vmul.f32 %v9382_v52, %v3887_v26 }
 0x489   : >> { %v3957_v46 = vadd.f32 %v4176_v12, %v3922_v23 }
 0x48b   : >> { %3975 = vst.msk [vmem:[%s9389_s24 + $0x28] sm:$0xff] %vm415_vm2, %v3957_v46 }
 0x48c   : >> { %v3889_v44 = vpop.f32.mrf.mxu1 }
 0x48d   : >> { %v3890_v3 = vadd.f32 %v3889_v44, %v9379_v31 }
 0x48f   : >> { %v3923_v16 = vmul.f32 %v9382_v52, %v3890_v3 }
 0x491   : >> { %v3958_v6 = vadd.f32 %v4177_v36, %v3923_v16 }
 0x493   : >> { %3976 = vst.msk [vmem:[%s9389_s24 + $0x30] sm:$0xff] %vm415_vm2, %v3958_v6 }
 0x494   : >> { %v3891_v58 = vpop.f32.mrf.mxu1 }
 0x495   : >> { %v3892_v14 = vadd.f32 %v3891_v58, %v9379_v31 }
 0x497   : >> { %v3924_v7 = vmul.f32 %v9382_v52, %v3892_v14 }
 0x499   : >> { %v3959_v32 = vadd.f32 %v4178_v20, %v3924_v7 }
 0x49b   : >> { %3977 = vst.msk [vmem:[%s9389_s24 + $0x38] sm:$0xff] %vm415_vm2, %v3959_v32 }
 0x4a5   : >> { %v3894_v48 = vpop.f32.mrf.mxu2 }
 0x4a6   : >> { %v3895_v8 = vadd.f32 %v3894_v48, %v9379_v31 }
 0x4a8   : >> { %v3925_v57 = vmul.f32 %v9382_v52, %v3895_v8 }
 0x4aa   : >> { %v3960_v39 = vadd.f32 %v4179_v27, %v3925_v57 }
 0x4ac   : >> { %3978 = vst.msk [vmem:[%s9389_s24 + $0x40] sm:$0xff] %vm415_vm2, %v3960_v39 }
 0x4ad   : >> { %v3896_v38 = vpop.f32.mrf.mxu2 }
 0x4ae   : >> { %v3897_v2 = vadd.f32 %v3896_v38, %v9379_v31 }
 0x4b0   : >> { %v3926_v15 = vmul.f32 %v9382_v52, %v3897_v2 }
 0x4b2   : >> { %v3961_v42 = vadd.f32 %v4180_v5, %v3926_v15 }
 0x4b4   : >> { %3979 = vst.msk [vmem:[%s9389_s24 + $0x48] sm:$0xff] %vm415_vm2, %v3961_v42 }
 0x4b5   : >> { %v3899_v50 = vpop.f32.mrf.mxu2 }
 0x4b6   : >> { %v3900_v25 = vadd.f32 %v3899_v50, %v9379_v31 }
 0x4b8   : >> { %v3927_v4 = vmul.f32 %v9382_v52, %v3900_v25 }
 0x4ba   : >> { %v3962_v33 = vadd.f32 %v4181_v49, %v3927_v4 }
 0x4bc   : >> { %3980 = vst.msk [vmem:[%s9389_s24 + $0x50] sm:$0xff] %vm415_vm2, %v3962_v33 }
 0x4bd   : >> { %v3901_v40 = vpop.f32.mrf.mxu2 }
 0x4be   : >> { %v3902_v9 = vadd.f32 %v3901_v40, %v9379_v31 }
 0x4c0   : >> { %v3928_v59 = vmul.f32 %v9382_v52, %v3902_v9 }
 0x4c2   : >> { %v3963_v53 = vadd.f32 %v4182_v29, %v3928_v59 }
 0x4c4   : >> { %3981 = vst.msk [vmem:[%s9389_s24 + $0x58] sm:$0xff] %vm415_vm2, %v3963_v53 }
 0x4c5   : >> { %v3904_v19 = vpop.f32.mrf.mxu2 }
 0x4c6   : >> { %v3905_v60 = vadd.f32 %v3904_v19, %v9379_v31 }
 0x4c8   : >> { %v3929_v56 = vmul.f32 %v9382_v52, %v3905_v60 }
 0x4ca   : >> { %v3964_v24 = vadd.f32 %v4183_v22, %v3929_v56 }
 0x4cc   : >> { %3982 = vst.msk [vmem:[%s9389_s24 + $0x60] sm:$0xff] %vm415_vm2, %v3964_v24 }
 0x4cd   : >> { %v3906_v55 = vpop.f32.mrf.mxu2 }
 0x4ce   : >> { %v3907_v1 = vadd.f32 %v3906_v55, %v9379_v31 }
 0x4d0   : >> { %v3930_v11 = vmul.f32 %v9382_v52, %v3907_v1 }
 0x4d2   : >> { %v3965_v51 = vadd.f32 %v4184_v30, %v3930_v11 }
 0x4d4   : >> { %3983 = vst.msk [vmem:[%s9389_s24 + $0x68] sm:$0xff] %vm415_vm2, %v3965_v51 }
 0x4d5   : >> { %v3909_v17 = vpop.f32.mrf.mxu2 }
 0x4d6   : >> { %v3910_v21 = vadd.f32 %v3909_v17, %v9379_v31 }
 0x4d8   : >> { %v3931_v37 = vmul.f32 %v9382_v52, %v3910_v21 }
 0x4da   : >> { %v3966_v54 = vadd.f32 %v4185_v13, %v3931_v37 }
 0x4dc   : >> { %3984 = vst.msk [vmem:[%s9389_s24 + $0x70] sm:$0xff] %vm415_vm2, %v3966_v54 }
 0x4dd   : >> { %v3911_v0 = vpop.f32.mrf.mxu2 }
 0x4de   : >> { %v3912_v10 = vadd.f32 %v3911_v0, %v9379_v31 }
 0x4e0   : >> { %v3932_v62 = vmul.f32 %v9382_v52, %v3912_v10  ;;  %775 = sbr.rel (!%p773_p4) target bundleno = 209 (0xd1), region = 110 }
 0x4e2   : >> { %v3967_v18 = vadd.f32 %v4186_v47, %v3932_v62 }
 0x4e4   : >> { %3985 = vst.msk [vmem:[%s9389_s24 + $0x78] sm:$0xff] %vm415_vm2, %v3967_v18 }
 0x4e5 PF: > { %s22_s21 = sadd.s32 1, %s4663_s21  }
 0x4e6   : > { %p19_p5 = scmp.ge.s32.totalorder %s22_s21, 4  }
 0x4e8   :  { %21 = sbr.rel (!%p19_p5) target bundleno = 1 (0x1), region = 121 }

</bundles_post_ra>
